<compile_context>
chip_gen: v5e
topology: v5e:2x2
jax: 0.10.0
libtpu: 0.0.40
codegen_flags: <defaults>
</compile_context>

<pallas_src>
import functools

import jax
import jax.numpy as jnp
import numpy as np
from jax import lax
from jax.experimental import pallas as pl
from jax.experimental.pallas import tpu as pltpu


# ----------------------------------------------------------------------------- glue
def _im2col3x3(x):
    """x: (B, C, H, W) -> (B, C*9, H*W) patches for a 3x3 / pad=1 / stride=1 conv."""
    B, C, H, W = x.shape
    xp = jnp.pad(x, ((0, 0), (0, 0), (1, 1), (1, 1)))
    cols = [xp[:, :, di:di + H, dj:dj + W] for di in range(3) for dj in range(3)]
    return jnp.stack(cols, axis=2).reshape(B, C * 9, H * W)


def _make_p_base(H, W, ks, stride):
    """p_0 + p_n of the reference module, shape (2N, H*W), float32."""
    N = ks * ks
    dx = jnp.arange(-(ks - 1) // 2, (ks - 1) // 2 + 1, dtype=jnp.float32)
    p_n_x = jnp.repeat(dx, ks)                     # [-1,-1,-1, 0,0,0, 1,1,1]
    p_n_y = jnp.tile(dx, ks)                       # [-1, 0, 1,-1,0,1,-1,0,1]
    i = jnp.arange(1, H * stride + 1, stride, dtype=jnp.float32)
    j = jnp.arange(1, W * stride + 1, stride, dtype=jnp.float32)
    p0x = jnp.broadcast_to(i[:, None], (H, W)).reshape(H * W)
    p0y = jnp.broadcast_to(j[None, :], (H, W)).reshape(H * W)
    return jnp.concatenate(
        [p0x[None, :] + p_n_x[:, None], p0y[None, :] + p_n_y[:, None]], axis=0)


def _vmem_limit_bytes():
    """~75% of physical VMEM (capped at 96 MiB) so double buffering / internal scratch
    keeps headroom; ~48 MiB on v7x (64 MiB parts), 96 MiB on v5e/v6e (128 MiB)."""
    try:
        cap = pltpu.get_tpu_info().vmem_capacity_bytes
        return int(min(96 * 1024 * 1024, (cap * 3) // 4))
    except Exception:
        return 48 * 1024 * 1024


def _pick_tile_width(hw, batch, hwp, vmem_budget):
    """Lane-dense tile width: largest multiple of 128 (<=512) such that the (HWp, tw)
    one-hot intermediates stay well under the VMEM budget and the grid has >=4 steps
    (so a 2-TC megacore part gets >=2 pipelined steps per core)."""
    tw = min(512, ((hw + 127) // 128) * 128)
    while tw > 128 and 8 * hwp * tw * 4 > vmem_budget // 2:
        tw -= 128
    while tw > 128 and batch * ((hw + tw - 1) // tw) < 4:
        tw -= 128
    return tw


# ----------------------------------------------------------------------------- kernel
def _deform_conv_kernel(patches_ref, xpad_ref, wp_ref, pbase_ref, wk_ref, out_ref,
                        *, N, outc, Hp, Wpad):
    tw = out_ref.shape[-1]
    HWp = Hp * Wpad

    patches = patches_ref[0]            # (inc*9, tw)   f32
    xpad = xpad_ref[0]                  # (Cp, HWp)     f32

    # Fold the output conv weight into the padded image: A[n*outc + o, k] =
    # sum_c conv.weight[o, c, n] * x_pad[c, k].  Tiny K (=Cp) matmul in f32, stored as
    # bf16 so the big per-tap gather contraction below runs at native MXU rate.
    a_all = jnp.dot(wk_ref[...], xpad,
                    preferred_element_type=jnp.float32).astype(jnp.bfloat16)

    # p_conv (3x3 conv, im2col'd in glue) as an MXU matmul; bias folded into p_base.
    # Kept in f32 so the floor/clip branch decisions match the f32 PyTorch module.
    p = pbase_ref[...] + jnp.dot(wp_ref[...], patches,
                                 preferred_element_type=jnp.float32)   # (2N, tw)
    px = p[:N, :]
    py = p[N:, :]

    hmax = float(Hp - 1)
    wmax = float(Wpad - 1)
    fx = jnp.floor(px)
    fy = jnp.floor(py)
    q_lt_x = jnp.clip(fx, 0.0, hmax)
    q_lt_y = jnp.clip(fy, 0.0, wmax)
    q_rb_x = jnp.clip(fx + 1.0, 0.0, hmax)
    q_rb_y = jnp.clip(fy + 1.0, 0.0, wmax)
    pxc = jnp.clip(px, 0.0, hmax)
    pyc = jnp.clip(py, 0.0, wmax)

    # bilinear corner weights (identical formulas to the PyTorch module), f32.
    g_lt = (1.0 + (q_lt_x - pxc)) * (1.0 + (q_lt_y - pyc))
    g_rb = (1.0 - (q_rb_x - pxc)) * (1.0 - (q_rb_y - pyc))
    g_lb = (1.0 + (q_lt_x - pxc)) * (1.0 - (q_rb_y - pyc))
    g_rt = (1.0 - (q_rb_x - pxc)) * (1.0 + (q_lt_y - pyc))

    # flat indices into the padded image: int32 multiply-add (exact at any resolution).
    ix_lt = q_lt_x.astype(jnp.int32)
    iy_lt = q_lt_y.astype(jnp.int32)
    ix_rb = q_rb_x.astype(jnp.int32)
    iy_rb = q_rb_y.astype(jnp.int32)
    idx_lt = ix_lt * Wpad + iy_lt                 # (N, tw)
    idx_rb = ix_rb * Wpad + iy_rb
    idx_lb = ix_lt * Wpad + iy_rb
    idx_rt = ix_rb * Wpad + iy_lt

    iota_k = lax.broadcasted_iota(jnp.int32, (HWp, tw), 0)
    zero = jnp.float32(0.0)

    # Deformable sampling fused with the output conv: per kernel tap, build the weighted
    # one-hot sampling matrix in f32, cast once, and contract it with the folded A_n slab
    # on the MXU.  N = ks*ks = 9 is a small static constant (a fori_loop would need
    # dynamic sublane slicing of the per-tap rows).
    # TODO(synk): banded/DMA gather to shrink the HWp compare domain at production sizes.
    acc = jnp.zeros((outc, tw), jnp.float32)
    for n in range(N):
        s_n = (jnp.where(idx_lt[n:n + 1, :] == iota_k, g_lt[n:n + 1, :], zero)
               + jnp.where(idx_rb[n:n + 1, :] == iota_k, g_rb[n:n + 1, :], zero)
               + jnp.where(idx_lb[n:n + 1, :] == iota_k, g_lb[n:n + 1, :], zero)
               + jnp.where(idx_rt[n:n + 1, :] == iota_k, g_rt[n:n + 1, :], zero)
               ).astype(jnp.bfloat16)                               # (HWp, tw)
        acc = acc + jnp.dot(a_all[n * outc:(n + 1) * outc, :], s_n,
                            preferred_element_type=jnp.float32)     # (outc, tw)

    out_ref[0] = acc


# ----------------------------------------------------------------------------- wrapper
def deform_conv2d_forward(x, wp, bp, wc, *, ks=3, padding=1, stride=1):
    assert stride == 1, "demo uses the module defaults (stride=1)"
    B, C, H, W = x.shape
    N = ks * ks
    Hp, Wpad = H + 2 * padding, W + 2 * padding
    HWp = Hp * Wpad
    hw = H * W
    outc = wc.shape[0]

    vmem_limit = _vmem_limit_bytes()
    tw = _pick_tile_width(hw, B, HWp, vmem_limit)
    hw_pad = ((hw + tw - 1) // tw) * tw
    n_t = hw_pad // tw

    # im2col patches for p_conv (f32: the offset path deliberately stays full precision).
    patches = _im2col3x3(x).astype(jnp.float32)                      # (B, C*9, hw)
    patches = jnp.pad(patches, ((0, 0), (0, 0), (0, hw_pad - hw)))

    # zero-padded input, channels padded to the 8-sublane granule for the A matmul.
    Cp = ((C + 7) // 8) * 8
    x_pad = jnp.pad(x, ((0, 0), (0, Cp - C),
                        (padding, padding), (padding, padding)))
    x_pad_flat = x_pad.reshape(B, Cp, HWp).astype(jnp.float32)       # (B, Cp, HWp)

    # p_0 + p_n with the p_conv bias folded in host-side; pad columns get a valid coord.
    p_base = _make_p_base(H, W, ks, stride) + bp.reshape(2 * N, 1)
    p_base = jnp.pad(p_base, ((0, 0), (0, hw_pad - hw)),
                     constant_values=1.0).astype(jnp.float32)        # (2N, hw_pad)

    wp2 = wp.reshape(2 * N, C * 9).astype(jnp.float32)               # p_conv weight

    # wk_stack[n*outc + o, c] = conv.weight[o, c, n]   (rows match A slab order)
    wk_stack = jnp.transpose(wc.reshape(outc, C, N), (2, 0, 1)).reshape(N * outc, C)
    wk_stack = jnp.pad(wk_stack, ((0, 0), (0, Cp - C))).astype(jnp.float32)

    kernel = functools.partial(_deform_conv_kernel, N=N, outc=outc, Hp=Hp, Wpad=Wpad)
    out = pl.pallas_call(
        kernel,
        out_shape=jax.ShapeDtypeStruct((B, outc, hw_pad), jnp.float32),
        grid_spec=pltpu.PrefetchScalarGridSpec(
            num_scalar_prefetch=0,
            grid=(B, n_t),
            in_specs=[
                pl.BlockSpec((1, C * 9, tw), lambda b, t: (b, 0, t)),     # patches
                pl.BlockSpec((1, Cp, HWp), lambda b, t: (b, 0, 0)),       # x_pad
                pl.BlockSpec((2 * N, C * 9), lambda b, t: (0, 0)),        # p_conv weight
                pl.BlockSpec((2 * N, tw), lambda b, t: (0, t)),           # p_base
                pl.BlockSpec((N * outc, Cp), lambda b, t: (0, 0)),        # conv weight
            ],
            out_specs=pl.BlockSpec((1, outc, tw), lambda b, t: (b, 0, t)),
        ),
        compiler_params=pltpu.CompilerParams(
            dimension_semantics=("parallel", "parallel"),
            vmem_limit_bytes=vmem_limit,
        ),
    )(patches, x_pad_flat, wp2, p_base, wk_stack)
    return out[:, :, :hw].reshape(B, outc, H, W)


# ----------------------------------------------------------------------------- pure-JAX reference
def reference_forward(x, wp, bp, wc, *, ks=3, padding=1, stride=1):
    B, C, H, W = x.shape
    N = ks * ks
    Hp, Wpad = H + 2 * padding, W + 2 * padding
    hw = H * W
    outc = wc.shape[0]

    patches = _im2col3x3(x)
    offset = jnp.einsum("ok,bkp->bop", wp.reshape(2 * N, C * 9), patches) \
        + bp.reshape(1, 2 * N, 1)
    p = _make_p_base(H, W, ks, stride)[None] + offset                 # (B, 2N, hw)
    px, py = p[:, :N], p[:, N:]

    qltx = jnp.clip(jnp.floor(px), 0, Hp - 1)
    qlty = jnp.clip(jnp.floor(py), 0, Wpad - 1)
    qrbx = jnp.clip(jnp.floor(px) + 1, 0, Hp - 1)
    qrby = jnp.clip(jnp.floor(py) + 1, 0, Wpad - 1)
    pxc = jnp.clip(px, 0, Hp - 1)
    pyc = jnp.clip(py, 0, Wpad - 1)

    g_lt = (1 + (qltx - pxc)) * (1 + (qlty - pyc))
    g_rb = (1 - (qrbx - pxc)) * (1 - (qrby - pyc))
    g_lb = (1 + (qltx - pxc)) * (1 - (qrby - pyc))
    g_rt = (1 - (qrbx - pxc)) * (1 + (qlty - pyc))

    x_pad = jnp.pad(x, ((0, 0), (0, 0), (padding, padding), (padding, padding)))
    x_flat = x_pad.reshape(B, C, Hp * Wpad)

    def gather(qx, qy):
        idx = (qx * Wpad + qy).astype(jnp.int32)                      # (B, N, hw)
        return jax.vmap(
            lambda xf, ii: xf[:, ii.reshape(-1)].reshape(C, N, hw))(x_flat, idx)

    x_lt, x_rb = gather(qltx, qlty), gather(qrbx, qrby)
    x_lb, x_rt = gather(qltx, qrby), gather(qrbx, qlty)
    x_off = (g_lt[:, None] * x_lt + g_rb[:, None] * x_rb
             + g_lb[:, None] * x_lb + g_rt[:, None] * x_rt)           # (B, C, N, hw)
    out = jnp.einsum("ocn,bcnp->bop", wc.reshape(outc, C, N), x_off)
    return out.reshape(B, outc, H, W)


# ----------------------------------------------------------------------------- main
if __name__ == "__main__":
    B, inc, outc, H, W, ks = 2, 4, 8, 16, 16, 3
    N = ks * ks

    key = jax.random.PRNGKey(0)
    k1, k2, k3, k4 = jax.random.split(key, 4)
    x = jax.random.normal(k1, (B, inc, H, W), jnp.float32)
    # Deterministic synthetic parameters (shapes from DeformConv2d.__init__).
    # p_conv weight gets small nonzero values (instead of the constant-0 init) so the
    # deformable sampling path is actually exercised.
    wp = 0.1 * jax.random.normal(k2, (2 * N, inc, 3, 3), jnp.float32)   # p_conv.weight
    bp = 0.1 * jax.random.normal(k3, (2 * N,), jnp.float32)             # p_conv.bias
    wc = 0.3 * jax.random.normal(k4, (outc, inc, ks, ks), jnp.float32)  # conv.weight

    out = deform_conv2d_forward(x, wp, bp, wc, ks=ks, padding=1, stride=1)
    out = jax.block_until_ready(out)

    ref = reference_forward(x, wp, bp, wc, ks=ks, padding=1, stride=1)
    # tolerance covers the bf16 sampling path (folded A and sampling weights in bf16);
    # the offset / floor / clip path is f32 so border decisions match the reference.
    if not np.allclose(np.asarray(out), np.asarray(ref), atol=2e-2, rtol=2e-2):
        err = float(np.max(np.abs(np.asarray(out) - np.asarray(ref))))
        raise AssertionError(f"Pallas kernel does not match JAX reference (max|err|={err})")
    print("KERNEL_OK")
</pallas_src>

<mosaic_0001>
module attributes {stable_mosaic.version = 11 : i64} {
  func.func @_deform_conv_kernel(%arg0: i32, %arg1: i32, %arg2: memref<1x36x128xf32, #tpu.memory_space<vmem>>, %arg3: memref<1x8x324xf32, #tpu.memory_space<vmem>>, %arg4: memref<18x36xf32, #tpu.memory_space<vmem>>, %arg5: memref<18x128xf32, #tpu.memory_space<vmem>>, %arg6: memref<72x8xf32, #tpu.memory_space<vmem>>, %arg7: memref<1x8x128xf32, #tpu.memory_space<vmem>>) attributes {dimension_semantics = [#tpu.dimension_semantics<parallel>, #tpu.dimension_semantics<parallel>], iteration_bounds = array<i64: 2, 2>, scalar_prefetch = 0 : i64, scratch_operands = 0 : i64, tpu.core_type = #tpu.core_type<tc>, window_params = [{transform_indices = @transform_0, window_bounds = array<i64: 1, 36, 128>}, {transform_indices = @transform_1, window_bounds = array<i64: 1, 8, 324>}, {pipeline_mode = #tpu.pipeline_mode<synchronous>, transform_indices = @transform_2, window_bounds = array<i64: 18, 36>}, {transform_indices = @transform_3, window_bounds = array<i64: 18, 128>}, {pipeline_mode = #tpu.pipeline_mode<synchronous>, transform_indices = @transform_4, window_bounds = array<i64: 72, 8>}, {transform_indices = @transform_5, window_bounds = array<i64: 1, 8, 128>}]} {
    %c0 = arith.constant 0 : index
    %c0_0 = arith.constant 0 : index
    %c0_1 = arith.constant 0 : index
    %0 = vector.load %arg2[%c0, %c0_0, %c0_1] : memref<1x36x128xf32, #tpu.memory_space<vmem>>, vector<1x36x128xf32>
    %1 = vector.shape_cast %0 : vector<1x36x128xf32> to vector<36x128xf32>
    %c0_2 = arith.constant 0 : index
    %c0_3 = arith.constant 0 : index
    %c0_4 = arith.constant 0 : index
    %2 = vector.load %arg3[%c0_2, %c0_3, %c0_4] : memref<1x8x324xf32, #tpu.memory_space<vmem>>, vector<1x8x324xf32>
    %3 = vector.shape_cast %2 : vector<1x8x324xf32> to vector<8x324xf32>
    %c0_5 = arith.constant 0 : index
    %c0_6 = arith.constant 0 : index
    %4 = vector.load %arg6[%c0_5, %c0_6] : memref<72x8xf32, #tpu.memory_space<vmem>>, vector<72x8xf32>
    %cst = arith.constant dense<0.000000e+00> : vector<72x324xf32>
    %5 = tpu.matmul %4, %3, %cst {dimension_numbers = #tpu.dot_dimension_numbers<[1], [0], [0], [1], [0, 0, 1, 1], [], []>} : vector<72x8xf32>, vector<8x324xf32>, vector<72x324xf32> -> vector<72x324xf32>
    %6 = arith.truncf %5 : vector<72x324xf32> to vector<72x324xbf16>
    %c0_7 = arith.constant 0 : index
    %c0_8 = arith.constant 0 : index
    %7 = vector.load %arg5[%c0_7, %c0_8] : memref<18x128xf32, #tpu.memory_space<vmem>>, vector<18x128xf32>
    %c0_9 = arith.constant 0 : index
    %c0_10 = arith.constant 0 : index
    %8 = vector.load %arg4[%c0_9, %c0_10] : memref<18x36xf32, #tpu.memory_space<vmem>>, vector<18x36xf32>
    %cst_11 = arith.constant dense<0.000000e+00> : vector<18x128xf32>
    %9 = tpu.matmul %8, %1, %cst_11 {dimension_numbers = #tpu.dot_dimension_numbers<[1], [0], [0], [1], [0, 0, 1, 1], [], []>} : vector<18x36xf32>, vector<36x128xf32>, vector<18x128xf32> -> vector<18x128xf32>
    %10 = arith.addf %7, %9 : vector<18x128xf32>
    %11 = vector.extract_strided_slice %10 {offsets = [0, 0], sizes = [9, 128], strides = [1, 1]} : vector<18x128xf32> to vector<9x128xf32>
    %12 = vector.extract_strided_slice %10 {offsets = [9, 0], sizes = [9, 128], strides = [1, 1]} : vector<18x128xf32> to vector<9x128xf32>
    %13 = math.floor %11 : vector<9x128xf32>
    %14 = math.floor %12 : vector<9x128xf32>
    %cst_12 = arith.constant 0.000000e+00 : f32
    %cst_13 = arith.constant 1.700000e+01 : f32
    %15 = vector.broadcast %cst_12 : f32 to vector<9x128xf32>
    %16 = arith.maximumf %15, %13 : vector<9x128xf32>
    %17 = vector.broadcast %cst_13 : f32 to vector<9x128xf32>
    %18 = arith.minimumf %17, %16 : vector<9x128xf32>
    %cst_14 = arith.constant 0.000000e+00 : f32
    %cst_15 = arith.constant 1.700000e+01 : f32
    %19 = vector.broadcast %cst_14 : f32 to vector<9x128xf32>
    %20 = arith.maximumf %19, %14 : vector<9x128xf32>
    %21 = vector.broadcast %cst_15 : f32 to vector<9x128xf32>
    %22 = arith.minimumf %21, %20 : vector<9x128xf32>
    %cst_16 = arith.constant 1.000000e+00 : f32
    %23 = vector.broadcast %cst_16 : f32 to vector<9x128xf32>
    %24 = arith.addf %13, %23 : vector<9x128xf32>
    %cst_17 = arith.constant 0.000000e+00 : f32
    %cst_18 = arith.constant 1.700000e+01 : f32
    %25 = vector.broadcast %cst_17 : f32 to vector<9x128xf32>
    %26 = arith.maximumf %25, %24 : vector<9x128xf32>
    %27 = vector.broadcast %cst_18 : f32 to vector<9x128xf32>
    %28 = arith.minimumf %27, %26 : vector<9x128xf32>
    %cst_19 = arith.constant 1.000000e+00 : f32
    %29 = vector.broadcast %cst_19 : f32 to vector<9x128xf32>
    %30 = arith.addf %14, %29 : vector<9x128xf32>
    %cst_20 = arith.constant 0.000000e+00 : f32
    %cst_21 = arith.constant 1.700000e+01 : f32
    %31 = vector.broadcast %cst_20 : f32 to vector<9x128xf32>
    %32 = arith.maximumf %31, %30 : vector<9x128xf32>
    %33 = vector.broadcast %cst_21 : f32 to vector<9x128xf32>
    %34 = arith.minimumf %33, %32 : vector<9x128xf32>
    %cst_22 = arith.constant 0.000000e+00 : f32
    %cst_23 = arith.constant 1.700000e+01 : f32
    %35 = vector.broadcast %cst_22 : f32 to vector<9x128xf32>
    %36 = arith.maximumf %35, %11 : vector<9x128xf32>
    %37 = vector.broadcast %cst_23 : f32 to vector<9x128xf32>
    %38 = arith.minimumf %37, %36 : vector<9x128xf32>
    %cst_24 = arith.constant 0.000000e+00 : f32
    %cst_25 = arith.constant 1.700000e+01 : f32
    %39 = vector.broadcast %cst_24 : f32 to vector<9x128xf32>
    %40 = arith.maximumf %39, %12 : vector<9x128xf32>
    %41 = vector.broadcast %cst_25 : f32 to vector<9x128xf32>
    %42 = arith.minimumf %41, %40 : vector<9x128xf32>
    %43 = arith.subf %18, %38 : vector<9x128xf32>
    %cst_26 = arith.constant 1.000000e+00 : f32
    %44 = vector.broadcast %cst_26 : f32 to vector<9x128xf32>
    %45 = arith.addf %44, %43 : vector<9x128xf32>
    %46 = arith.subf %22, %42 : vector<9x128xf32>
    %cst_27 = arith.constant 1.000000e+00 : f32
    %47 = vector.broadcast %cst_27 : f32 to vector<9x128xf32>
    %48 = arith.addf %47, %46 : vector<9x128xf32>
    %49 = arith.mulf %45, %48 : vector<9x128xf32>
    %50 = arith.subf %28, %38 : vector<9x128xf32>
    %cst_28 = arith.constant 1.000000e+00 : f32
    %51 = vector.broadcast %cst_28 : f32 to vector<9x128xf32>
    %52 = arith.subf %51, %50 : vector<9x128xf32>
    %53 = arith.subf %34, %42 : vector<9x128xf32>
    %cst_29 = arith.constant 1.000000e+00 : f32
    %54 = vector.broadcast %cst_29 : f32 to vector<9x128xf32>
    %55 = arith.subf %54, %53 : vector<9x128xf32>
    %56 = arith.mulf %52, %55 : vector<9x128xf32>
    %57 = arith.subf %18, %38 : vector<9x128xf32>
    %cst_30 = arith.constant 1.000000e+00 : f32
    %58 = vector.broadcast %cst_30 : f32 to vector<9x128xf32>
    %59 = arith.addf %58, %57 : vector<9x128xf32>
    %60 = arith.subf %34, %42 : vector<9x128xf32>
    %cst_31 = arith.constant 1.000000e+00 : f32
    %61 = vector.broadcast %cst_31 : f32 to vector<9x128xf32>
    %62 = arith.subf %61, %60 : vector<9x128xf32>
    %63 = arith.mulf %59, %62 : vector<9x128xf32>
    %64 = arith.subf %28, %38 : vector<9x128xf32>
    %cst_32 = arith.constant 1.000000e+00 : f32
    %65 = vector.broadcast %cst_32 : f32 to vector<9x128xf32>
    %66 = arith.subf %65, %64 : vector<9x128xf32>
    %67 = arith.subf %22, %42 : vector<9x128xf32>
    %cst_33 = arith.constant 1.000000e+00 : f32
    %68 = vector.broadcast %cst_33 : f32 to vector<9x128xf32>
    %69 = arith.addf %68, %67 : vector<9x128xf32>
    %70 = arith.mulf %66, %69 : vector<9x128xf32>
    %71 = arith.fptosi %18 : vector<9x128xf32> to vector<9x128xi32>
    %72 = arith.fptosi %22 : vector<9x128xf32> to vector<9x128xi32>
    %73 = arith.fptosi %28 : vector<9x128xf32> to vector<9x128xi32>
    %74 = arith.fptosi %34 : vector<9x128xf32> to vector<9x128xi32>
    %c18_i32 = arith.constant 18 : i32
    %75 = vector.broadcast %c18_i32 : i32 to vector<9x128xi32>
    %76 = arith.muli %71, %75 : vector<9x128xi32>
    %77 = arith.addi %76, %72 : vector<9x128xi32>
    %c18_i32_34 = arith.constant 18 : i32
    %78 = vector.broadcast %c18_i32_34 : i32 to vector<9x128xi32>
    %79 = arith.muli %73, %78 : vector<9x128xi32>
    %80 = arith.addi %79, %74 : vector<9x128xi32>
    %c18_i32_35 = arith.constant 18 : i32
    %81 = vector.broadcast %c18_i32_35 : i32 to vector<9x128xi32>
    %82 = arith.muli %71, %81 : vector<9x128xi32>
    %83 = arith.addi %82, %74 : vector<9x128xi32>
    %c18_i32_36 = arith.constant 18 : i32
    %84 = vector.broadcast %c18_i32_36 : i32 to vector<9x128xi32>
    %85 = arith.muli %73, %84 : vector<9x128xi32>
    %86 = arith.addi %85, %72 : vector<9x128xi32>
    %87 = tpu.iota {dimensions = array<i32: 0>} : vector<324x128xi32>
    %cst_37 = arith.constant 0.000000e+00 : f32
    %88 = vector.broadcast %cst_37 : f32 to vector<8x128xf32>
    %89 = vector.extract_strided_slice %77 {offsets = [0, 0], sizes = [1, 128], strides = [1, 1]} : vector<9x128xi32> to vector<1x128xi32>
    %90 = vector.broadcast %89 : vector<1x128xi32> to vector<324x128xi32>
    %91 = arith.cmpi eq, %90, %87 : vector<324x128xi32>
    %92 = vector.extract_strided_slice %49 {offsets = [0, 0], sizes = [1, 128], strides = [1, 1]} : vector<9x128xf32> to vector<1x128xf32>
    %cst_38 = arith.constant 0.000000e+00 : f32
    %93 = vector.shape_cast %92 : vector<1x128xf32> to vector<1x128xf32>
    %94 = vector.broadcast %93 : vector<1x128xf32> to vector<324x128xf32>
    %95 = vector.broadcast %cst_38 : f32 to vector<324x128xf32>
    %96 = arith.select %91, %94, %95 : vector<324x128xi1>, vector<324x128xf32>
    %97 = vector.extract_strided_slice %80 {offsets = [0, 0], sizes = [1, 128], strides = [1, 1]} : vector<9x128xi32> to vector<1x128xi32>
    %98 = vector.broadcast %97 : vector<1x128xi32> to vector<324x128xi32>
    %99 = arith.cmpi eq, %98, %87 : vector<324x128xi32>
    %100 = vector.extract_strided_slice %56 {offsets = [0, 0], sizes = [1, 128], strides = [1, 1]} : vector<9x128xf32> to vector<1x128xf32>
    %cst_39 = arith.constant 0.000000e+00 : f32
    %101 = vector.shape_cast %100 : vector<1x128xf32> to vector<1x128xf32>
    %102 = vector.broadcast %101 : vector<1x128xf32> to vector<324x128xf32>
    %103 = vector.broadcast %cst_39 : f32 to vector<324x128xf32>
    %104 = arith.select %99, %102, %103 : vector<324x128xi1>, vector<324x128xf32>
    %105 = arith.addf %96, %104 : vector<324x128xf32>
    %106 = vector.extract_strided_slice %83 {offsets = [0, 0], sizes = [1, 128], strides = [1, 1]} : vector<9x128xi32> to vector<1x128xi32>
    %107 = vector.broadcast %106 : vector<1x128xi32> to vector<324x128xi32>
    %108 = arith.cmpi eq, %107, %87 : vector<324x128xi32>
    %109 = vector.extract_strided_slice %63 {offsets = [0, 0], sizes = [1, 128], strides = [1, 1]} : vector<9x128xf32> to vector<1x128xf32>
    %cst_40 = arith.constant 0.000000e+00 : f32
    %110 = vector.shape_cast %109 : vector<1x128xf32> to vector<1x128xf32>
    %111 = vector.broadcast %110 : vector<1x128xf32> to vector<324x128xf32>
    %112 = vector.broadcast %cst_40 : f32 to vector<324x128xf32>
    %113 = arith.select %108, %111, %112 : vector<324x128xi1>, vector<324x128xf32>
    %114 = arith.addf %105, %113 : vector<324x128xf32>
    %115 = vector.extract_strided_slice %86 {offsets = [0, 0], sizes = [1, 128], strides = [1, 1]} : vector<9x128xi32> to vector<1x128xi32>
    %116 = vector.broadcast %115 : vector<1x128xi32> to vector<324x128xi32>
    %117 = arith.cmpi eq, %116, %87 : vector<324x128xi32>
    %118 = vector.extract_strided_slice %70 {offsets = [0, 0], sizes = [1, 128], strides = [1, 1]} : vector<9x128xf32> to vector<1x128xf32>
    %cst_41 = arith.constant 0.000000e+00 : f32
    %119 = vector.shape_cast %118 : vector<1x128xf32> to vector<1x128xf32>
    %120 = vector.broadcast %119 : vector<1x128xf32> to vector<324x128xf32>
    %121 = vector.broadcast %cst_41 : f32 to vector<324x128xf32>
    %122 = arith.select %117, %120, %121 : vector<324x128xi1>, vector<324x128xf32>
    %123 = arith.addf %114, %122 : vector<324x128xf32>
    %124 = arith.truncf %123 : vector<324x128xf32> to vector<324x128xbf16>
    %125 = vector.extract_strided_slice %6 {offsets = [0, 0], sizes = [8, 324], strides = [1, 1]} : vector<72x324xbf16> to vector<8x324xbf16>
    %cst_42 = arith.constant dense<0.000000e+00> : vector<8x128xf32>
    %126 = tpu.matmul %125, %124, %cst_42 {dimension_numbers = #tpu.dot_dimension_numbers<[1], [0], [0], [1], [0, 0, 1, 1], [], []>} : vector<8x324xbf16>, vector<324x128xbf16>, vector<8x128xf32> -> vector<8x128xf32>
    %127 = arith.addf %88, %126 : vector<8x128xf32>
    %128 = vector.extract_strided_slice %77 {offsets = [1, 0], sizes = [1, 128], strides = [1, 1]} : vector<9x128xi32> to vector<1x128xi32>
    %129 = vector.broadcast %128 : vector<1x128xi32> to vector<324x128xi32>
    %130 = arith.cmpi eq, %129, %87 : vector<324x128xi32>
    %131 = vector.extract_strided_slice %49 {offsets = [1, 0], sizes = [1, 128], strides = [1, 1]} : vector<9x128xf32> to vector<1x128xf32>
    %cst_43 = arith.constant 0.000000e+00 : f32
    %132 = vector.shape_cast %131 : vector<1x128xf32> to vector<1x128xf32>
    %133 = vector.broadcast %132 : vector<1x128xf32> to vector<324x128xf32>
    %134 = vector.broadcast %cst_43 : f32 to vector<324x128xf32>
    %135 = arith.select %130, %133, %134 : vector<324x128xi1>, vector<324x128xf32>
    %136 = vector.extract_strided_slice %80 {offsets = [1, 0], sizes = [1, 128], strides = [1, 1]} : vector<9x128xi32> to vector<1x128xi32>
    %137 = vector.broadcast %136 : vector<1x128xi32> to vector<324x128xi32>
    %138 = arith.cmpi eq, %137, %87 : vector<324x128xi32>
    %139 = vector.extract_strided_slice %56 {offsets = [1, 0], sizes = [1, 128], strides = [1, 1]} : vector<9x128xf32> to vector<1x128xf32>
    %cst_44 = arith.constant 0.000000e+00 : f32
    %140 = vector.shape_cast %139 : vector<1x128xf32> to vector<1x128xf32>
    %141 = vector.broadcast %140 : vector<1x128xf32> to vector<324x128xf32>
    %142 = vector.broadcast %cst_44 : f32 to vector<324x128xf32>
    %143 = arith.select %138, %141, %142 : vector<324x128xi1>, vector<324x128xf32>
    %144 = arith.addf %135, %143 : vector<324x128xf32>
    %145 = vector.extract_strided_slice %83 {offsets = [1, 0], sizes = [1, 128], strides = [1, 1]} : vector<9x128xi32> to vector<1x128xi32>
    %146 = vector.broadcast %145 : vector<1x128xi32> to vector<324x128xi32>
    %147 = arith.cmpi eq, %146, %87 : vector<324x128xi32>
    %148 = vector.extract_strided_slice %63 {offsets = [1, 0], sizes = [1, 128], strides = [1, 1]} : vector<9x128xf32> to vector<1x128xf32>
    %cst_45 = arith.constant 0.000000e+00 : f32
    %149 = vector.shape_cast %148 : vector<1x128xf32> to vector<1x128xf32>
    %150 = vector.broadcast %149 : vector<1x128xf32> to vector<324x128xf32>
    %151 = vector.broadcast %cst_45 : f32 to vector<324x128xf32>
    %152 = arith.select %147, %150, %151 : vector<324x128xi1>, vector<324x128xf32>
    %153 = arith.addf %144, %152 : vector<324x128xf32>
    %154 = vector.extract_strided_slice %86 {offsets = [1, 0], sizes = [1, 128], strides = [1, 1]} : vector<9x128xi32> to vector<1x128xi32>
    %155 = vector.broadcast %154 : vector<1x128xi32> to vector<324x128xi32>
    %156 = arith.cmpi eq, %155, %87 : vector<324x128xi32>
    %157 = vector.extract_strided_slice %70 {offsets = [1, 0], sizes = [1, 128], strides = [1, 1]} : vector<9x128xf32> to vector<1x128xf32>
    %cst_46 = arith.constant 0.000000e+00 : f32
    %158 = vector.shape_cast %157 : vector<1x128xf32> to vector<1x128xf32>
    %159 = vector.broadcast %158 : vector<1x128xf32> to vector<324x128xf32>
    %160 = vector.broadcast %cst_46 : f32 to vector<324x128xf32>
    %161 = arith.select %156, %159, %160 : vector<324x128xi1>, vector<324x128xf32>
    %162 = arith.addf %153, %161 : vector<324x128xf32>
    %163 = arith.truncf %162 : vector<324x128xf32> to vector<324x128xbf16>
    %164 = vector.extract_strided_slice %6 {offsets = [8, 0], sizes = [8, 324], strides = [1, 1]} : vector<72x324xbf16> to vector<8x324xbf16>
    %cst_47 = arith.constant dense<0.000000e+00> : vector<8x128xf32>
    %165 = tpu.matmul %164, %163, %cst_47 {dimension_numbers = #tpu.dot_dimension_numbers<[1], [0], [0], [1], [0, 0, 1, 1], [], []>} : vector<8x324xbf16>, vector<324x128xbf16>, vector<8x128xf32> -> vector<8x128xf32>
    %166 = arith.addf %127, %165 : vector<8x128xf32>
    %167 = vector.extract_strided_slice %77 {offsets = [2, 0], sizes = [1, 128], strides = [1, 1]} : vector<9x128xi32> to vector<1x128xi32>
    %168 = vector.broadcast %167 : vector<1x128xi32> to vector<324x128xi32>
    %169 = arith.cmpi eq, %168, %87 : vector<324x128xi32>
    %170 = vector.extract_strided_slice %49 {offsets = [2, 0], sizes = [1, 128], strides = [1, 1]} : vector<9x128xf32> to vector<1x128xf32>
    %cst_48 = arith.constant 0.000000e+00 : f32
    %171 = vector.shape_cast %170 : vector<1x128xf32> to vector<1x128xf32>
    %172 = vector.broadcast %171 : vector<1x128xf32> to vector<324x128xf32>
    %173 = vector.broadcast %cst_48 : f32 to vector<324x128xf32>
    %174 = arith.select %169, %172, %173 : vector<324x128xi1>, vector<324x128xf32>
    %175 = vector.extract_strided_slice %80 {offsets = [2, 0], sizes = [1, 128], strides = [1, 1]} : vector<9x128xi32> to vector<1x128xi32>
    %176 = vector.broadcast %175 : vector<1x128xi32> to vector<324x128xi32>
    %177 = arith.cmpi eq, %176, %87 : vector<324x128xi32>
    %178 = vector.extract_strided_slice %56 {offsets = [2, 0], sizes = [1, 128], strides = [1, 1]} : vector<9x128xf32> to vector<1x128xf32>
    %cst_49 = arith.constant 0.000000e+00 : f32
    %179 = vector.shape_cast %178 : vector<1x128xf32> to vector<1x128xf32>
    %180 = vector.broadcast %179 : vector<1x128xf32> to vector<324x128xf32>
    %181 = vector.broadcast %cst_49 : f32 to vector<324x128xf32>
    %182 = arith.select %177, %180, %181 : vector<324x128xi1>, vector<324x128xf32>
    %183 = arith.addf %174, %182 : vector<324x128xf32>
    %184 = vector.extract_strided_slice %83 {offsets = [2, 0], sizes = [1, 128], strides = [1, 1]} : vector<9x128xi32> to vector<1x128xi32>
    %185 = vector.broadcast %184 : vector<1x128xi32> to vector<324x128xi32>
    %186 = arith.cmpi eq, %185, %87 : vector<324x128xi32>
    %187 = vector.extract_strided_slice %63 {offsets = [2, 0], sizes = [1, 128], strides = [1, 1]} : vector<9x128xf32> to vector<1x128xf32>
    %cst_50 = arith.constant 0.000000e+00 : f32
    %188 = vector.shape_cast %187 : vector<1x128xf32> to vector<1x128xf32>
    %189 = vector.broadcast %188 : vector<1x128xf32> to vector<324x128xf32>
    %190 = vector.broadcast %cst_50 : f32 to vector<324x128xf32>
    %191 = arith.select %186, %189, %190 : vector<324x128xi1>, vector<324x128xf32>
    %192 = arith.addf %183, %191 : vector<324x128xf32>
    %193 = vector.extract_strided_slice %86 {offsets = [2, 0], sizes = [1, 128], strides = [1, 1]} : vector<9x128xi32> to vector<1x128xi32>
    %194 = vector.broadcast %193 : vector<1x128xi32> to vector<324x128xi32>
    %195 = arith.cmpi eq, %194, %87 : vector<324x128xi32>
    %196 = vector.extract_strided_slice %70 {offsets = [2, 0], sizes = [1, 128], strides = [1, 1]} : vector<9x128xf32> to vector<1x128xf32>
    %cst_51 = arith.constant 0.000000e+00 : f32
    %197 = vector.shape_cast %196 : vector<1x128xf32> to vector<1x128xf32>
    %198 = vector.broadcast %197 : vector<1x128xf32> to vector<324x128xf32>
    %199 = vector.broadcast %cst_51 : f32 to vector<324x128xf32>
    %200 = arith.select %195, %198, %199 : vector<324x128xi1>, vector<324x128xf32>
    %201 = arith.addf %192, %200 : vector<324x128xf32>
    %202 = arith.truncf %201 : vector<324x128xf32> to vector<324x128xbf16>
    %203 = vector.extract_strided_slice %6 {offsets = [16, 0], sizes = [8, 324], strides = [1, 1]} : vector<72x324xbf16> to vector<8x324xbf16>
    %cst_52 = arith.constant dense<0.000000e+00> : vector<8x128xf32>
    %204 = tpu.matmul %203, %202, %cst_52 {dimension_numbers = #tpu.dot_dimension_numbers<[1], [0], [0], [1], [0, 0, 1, 1], [], []>} : vector<8x324xbf16>, vector<324x128xbf16>, vector<8x128xf32> -> vector<8x128xf32>
    %205 = arith.addf %166, %204 : vector<8x128xf32>
    %206 = vector.extract_strided_slice %77 {offsets = [3, 0], sizes = [1, 128], strides = [1, 1]} : vector<9x128xi32> to vector<1x128xi32>
    %207 = vector.broadcast %206 : vector<1x128xi32> to vector<324x128xi32>
    %208 = arith.cmpi eq, %207, %87 : vector<324x128xi32>
    %209 = vector.extract_strided_slice %49 {offsets = [3, 0], sizes = [1, 128], strides = [1, 1]} : vector<9x128xf32> to vector<1x128xf32>
    %cst_53 = arith.constant 0.000000e+00 : f32
    %210 = vector.shape_cast %209 : vector<1x128xf32> to vector<1x128xf32>
    %211 = vector.broadcast %210 : vector<1x128xf32> to vector<324x128xf32>
    %212 = vector.broadcast %cst_53 : f32 to vector<324x128xf32>
    %213 = arith.select %208, %211, %212 : vector<324x128xi1>, vector<324x128xf32>
    %214 = vector.extract_strided_slice %80 {offsets = [3, 0], sizes = [1, 128], strides = [1, 1]} : vector<9x128xi32> to vector<1x128xi32>
    %215 = vector.broadcast %214 : vector<1x128xi32> to vector<324x128xi32>
    %216 = arith.cmpi eq, %215, %87 : vector<324x128xi32>
    %217 = vector.extract_strided_slice %56 {offsets = [3, 0], sizes = [1, 128], strides = [1, 1]} : vector<9x128xf32> to vector<1x128xf32>
    %cst_54 = arith.constant 0.000000e+00 : f32
    %218 = vector.shape_cast %217 : vector<1x128xf32> to vector<1x128xf32>
    %219 = vector.broadcast %218 : vector<1x128xf32> to vector<324x128xf32>
    %220 = vector.broadcast %cst_54 : f32 to vector<324x128xf32>
    %221 = arith.select %216, %219, %220 : vector<324x128xi1>, vector<324x128xf32>
    %222 = arith.addf %213, %221 : vector<324x128xf32>
    %223 = vector.extract_strided_slice %83 {offsets = [3, 0], sizes = [1, 128], strides = [1, 1]} : vector<9x128xi32> to vector<1x128xi32>
    %224 = vector.broadcast %223 : vector<1x128xi32> to vector<324x128xi32>
    %225 = arith.cmpi eq, %224, %87 : vector<324x128xi32>
    %226 = vector.extract_strided_slice %63 {offsets = [3, 0], sizes = [1, 128], strides = [1, 1]} : vector<9x128xf32> to vector<1x128xf32>
    %cst_55 = arith.constant 0.000000e+00 : f32
    %227 = vector.shape_cast %226 : vector<1x128xf32> to vector<1x128xf32>
    %228 = vector.broadcast %227 : vector<1x128xf32> to vector<324x128xf32>
    %229 = vector.broadcast %cst_55 : f32 to vector<324x128xf32>
    %230 = arith.select %225, %228, %229 : vector<324x128xi1>, vector<324x128xf32>
    %231 = arith.addf %222, %230 : vector<324x128xf32>
    %232 = vector.extract_strided_slice %86 {offsets = [3, 0], sizes = [1, 128], strides = [1, 1]} : vector<9x128xi32> to vector<1x128xi32>
    %233 = vector.broadcast %232 : vector<1x128xi32> to vector<324x128xi32>
    %234 = arith.cmpi eq, %233, %87 : vector<324x128xi32>
    %235 = vector.extract_strided_slice %70 {offsets = [3, 0], sizes = [1, 128], strides = [1, 1]} : vector<9x128xf32> to vector<1x128xf32>
    %cst_56 = arith.constant 0.000000e+00 : f32
    %236 = vector.shape_cast %235 : vector<1x128xf32> to vector<1x128xf32>
    %237 = vector.broadcast %236 : vector<1x128xf32> to vector<324x128xf32>
    %238 = vector.broadcast %cst_56 : f32 to vector<324x128xf32>
    %239 = arith.select %234, %237, %238 : vector<324x128xi1>, vector<324x128xf32>
    %240 = arith.addf %231, %239 : vector<324x128xf32>
    %241 = arith.truncf %240 : vector<324x128xf32> to vector<324x128xbf16>
    %242 = vector.extract_strided_slice %6 {offsets = [24, 0], sizes = [8, 324], strides = [1, 1]} : vector<72x324xbf16> to vector<8x324xbf16>
    %cst_57 = arith.constant dense<0.000000e+00> : vector<8x128xf32>
    %243 = tpu.matmul %242, %241, %cst_57 {dimension_numbers = #tpu.dot_dimension_numbers<[1], [0], [0], [1], [0, 0, 1, 1], [], []>} : vector<8x324xbf16>, vector<324x128xbf16>, vector<8x128xf32> -> vector<8x128xf32>
    %244 = arith.addf %205, %243 : vector<8x128xf32>
    %245 = vector.extract_strided_slice %77 {offsets = [4, 0], sizes = [1, 128], strides = [1, 1]} : vector<9x128xi32> to vector<1x128xi32>
    %246 = vector.broadcast %245 : vector<1x128xi32> to vector<324x128xi32>
    %247 = arith.cmpi eq, %246, %87 : vector<324x128xi32>
    %248 = vector.extract_strided_slice %49 {offsets = [4, 0], sizes = [1, 128], strides = [1, 1]} : vector<9x128xf32> to vector<1x128xf32>
    %cst_58 = arith.constant 0.000000e+00 : f32
    %249 = vector.shape_cast %248 : vector<1x128xf32> to vector<1x128xf32>
    %250 = vector.broadcast %249 : vector<1x128xf32> to vector<324x128xf32>
    %251 = vector.broadcast %cst_58 : f32 to vector<324x128xf32>
    %252 = arith.select %247, %250, %251 : vector<324x128xi1>, vector<324x128xf32>
    %253 = vector.extract_strided_slice %80 {offsets = [4, 0], sizes = [1, 128], strides = [1, 1]} : vector<9x128xi32> to vector<1x128xi32>
    %254 = vector.broadcast %253 : vector<1x128xi32> to vector<324x128xi32>
    %255 = arith.cmpi eq, %254, %87 : vector<324x128xi32>
    %256 = vector.extract_strided_slice %56 {offsets = [4, 0], sizes = [1, 128], strides = [1, 1]} : vector<9x128xf32> to vector<1x128xf32>
    %cst_59 = arith.constant 0.000000e+00 : f32
    %257 = vector.shape_cast %256 : vector<1x128xf32> to vector<1x128xf32>
    %258 = vector.broadcast %257 : vector<1x128xf32> to vector<324x128xf32>
    %259 = vector.broadcast %cst_59 : f32 to vector<324x128xf32>
    %260 = arith.select %255, %258, %259 : vector<324x128xi1>, vector<324x128xf32>
    %261 = arith.addf %252, %260 : vector<324x128xf32>
    %262 = vector.extract_strided_slice %83 {offsets = [4, 0], sizes = [1, 128], strides = [1, 1]} : vector<9x128xi32> to vector<1x128xi32>
    %263 = vector.broadcast %262 : vector<1x128xi32> to vector<324x128xi32>
    %264 = arith.cmpi eq, %263, %87 : vector<324x128xi32>
    %265 = vector.extract_strided_slice %63 {offsets = [4, 0], sizes = [1, 128], strides = [1, 1]} : vector<9x128xf32> to vector<1x128xf32>
    %cst_60 = arith.constant 0.000000e+00 : f32
    %266 = vector.shape_cast %265 : vector<1x128xf32> to vector<1x128xf32>
    %267 = vector.broadcast %266 : vector<1x128xf32> to vector<324x128xf32>
    %268 = vector.broadcast %cst_60 : f32 to vector<324x128xf32>
    %269 = arith.select %264, %267, %268 : vector<324x128xi1>, vector<324x128xf32>
    %270 = arith.addf %261, %269 : vector<324x128xf32>
    %271 = vector.extract_strided_slice %86 {offsets = [4, 0], sizes = [1, 128], strides = [1, 1]} : vector<9x128xi32> to vector<1x128xi32>
    %272 = vector.broadcast %271 : vector<1x128xi32> to vector<324x128xi32>
    %273 = arith.cmpi eq, %272, %87 : vector<324x128xi32>
    %274 = vector.extract_strided_slice %70 {offsets = [4, 0], sizes = [1, 128], strides = [1, 1]} : vector<9x128xf32> to vector<1x128xf32>
    %cst_61 = arith.constant 0.000000e+00 : f32
    %275 = vector.shape_cast %274 : vector<1x128xf32> to vector<1x128xf32>
    %276 = vector.broadcast %275 : vector<1x128xf32> to vector<324x128xf32>
    %277 = vector.broadcast %cst_61 : f32 to vector<324x128xf32>
    %278 = arith.select %273, %276, %277 : vector<324x128xi1>, vector<324x128xf32>
    %279 = arith.addf %270, %278 : vector<324x128xf32>
    %280 = arith.truncf %279 : vector<324x128xf32> to vector<324x128xbf16>
    %281 = vector.extract_strided_slice %6 {offsets = [32, 0], sizes = [8, 324], strides = [1, 1]} : vector<72x324xbf16> to vector<8x324xbf16>
    %cst_62 = arith.constant dense<0.000000e+00> : vector<8x128xf32>
    %282 = tpu.matmul %281, %280, %cst_62 {dimension_numbers = #tpu.dot_dimension_numbers<[1], [0], [0], [1], [0, 0, 1, 1], [], []>} : vector<8x324xbf16>, vector<324x128xbf16>, vector<8x128xf32> -> vector<8x128xf32>
    %283 = arith.addf %244, %282 : vector<8x128xf32>
    %284 = vector.extract_strided_slice %77 {offsets = [5, 0], sizes = [1, 128], strides = [1, 1]} : vector<9x128xi32> to vector<1x128xi32>
    %285 = vector.broadcast %284 : vector<1x128xi32> to vector<324x128xi32>
    %286 = arith.cmpi eq, %285, %87 : vector<324x128xi32>
    %287 = vector.extract_strided_slice %49 {offsets = [5, 0], sizes = [1, 128], strides = [1, 1]} : vector<9x128xf32> to vector<1x128xf32>
    %cst_63 = arith.constant 0.000000e+00 : f32
    %288 = vector.shape_cast %287 : vector<1x128xf32> to vector<1x128xf32>
    %289 = vector.broadcast %288 : vector<1x128xf32> to vector<324x128xf32>
    %290 = vector.broadcast %cst_63 : f32 to vector<324x128xf32>
    %291 = arith.select %286, %289, %290 : vector<324x128xi1>, vector<324x128xf32>
    %292 = vector.extract_strided_slice %80 {offsets = [5, 0], sizes = [1, 128], strides = [1, 1]} : vector<9x128xi32> to vector<1x128xi32>
    %293 = vector.broadcast %292 : vector<1x128xi32> to vector<324x128xi32>
    %294 = arith.cmpi eq, %293, %87 : vector<324x128xi32>
    %295 = vector.extract_strided_slice %56 {offsets = [5, 0], sizes = [1, 128], strides = [1, 1]} : vector<9x128xf32> to vector<1x128xf32>
    %cst_64 = arith.constant 0.000000e+00 : f32
    %296 = vector.shape_cast %295 : vector<1x128xf32> to vector<1x128xf32>
    %297 = vector.broadcast %296 : vector<1x128xf32> to vector<324x128xf32>
    %298 = vector.broadcast %cst_64 : f32 to vector<324x128xf32>
    %299 = arith.select %294, %297, %298 : vector<324x128xi1>, vector<324x128xf32>
    %300 = arith.addf %291, %299 : vector<324x128xf32>
    %301 = vector.extract_strided_slice %83 {offsets = [5, 0], sizes = [1, 128], strides = [1, 1]} : vector<9x128xi32> to vector<1x128xi32>
    %302 = vector.broadcast %301 : vector<1x128xi32> to vector<324x128xi32>
    %303 = arith.cmpi eq, %302, %87 : vector<324x128xi32>
    %304 = vector.extract_strided_slice %63 {offsets = [5, 0], sizes = [1, 128], strides = [1, 1]} : vector<9x128xf32> to vector<1x128xf32>
    %cst_65 = arith.constant 0.000000e+00 : f32
    %305 = vector.shape_cast %304 : vector<1x128xf32> to vector<1x128xf32>
    %306 = vector.broadcast %305 : vector<1x128xf32> to vector<324x128xf32>
    %307 = vector.broadcast %cst_65 : f32 to vector<324x128xf32>
    %308 = arith.select %303, %306, %307 : vector<324x128xi1>, vector<324x128xf32>
    %309 = arith.addf %300, %308 : vector<324x128xf32>
    %310 = vector.extract_strided_slice %86 {offsets = [5, 0], sizes = [1, 128], strides = [1, 1]} : vector<9x128xi32> to vector<1x128xi32>
    %311 = vector.broadcast %310 : vector<1x128xi32> to vector<324x128xi32>
    %312 = arith.cmpi eq, %311, %87 : vector<324x128xi32>
    %313 = vector.extract_strided_slice %70 {offsets = [5, 0], sizes = [1, 128], strides = [1, 1]} : vector<9x128xf32> to vector<1x128xf32>
    %cst_66 = arith.constant 0.000000e+00 : f32
    %314 = vector.shape_cast %313 : vector<1x128xf32> to vector<1x128xf32>
    %315 = vector.broadcast %314 : vector<1x128xf32> to vector<324x128xf32>
    %316 = vector.broadcast %cst_66 : f32 to vector<324x128xf32>
    %317 = arith.select %312, %315, %316 : vector<324x128xi1>, vector<324x128xf32>
    %318 = arith.addf %309, %317 : vector<324x128xf32>
    %319 = arith.truncf %318 : vector<324x128xf32> to vector<324x128xbf16>
    %320 = vector.extract_strided_slice %6 {offsets = [40, 0], sizes = [8, 324], strides = [1, 1]} : vector<72x324xbf16> to vector<8x324xbf16>
    %cst_67 = arith.constant dense<0.000000e+00> : vector<8x128xf32>
    %321 = tpu.matmul %320, %319, %cst_67 {dimension_numbers = #tpu.dot_dimension_numbers<[1], [0], [0], [1], [0, 0, 1, 1], [], []>} : vector<8x324xbf16>, vector<324x128xbf16>, vector<8x128xf32> -> vector<8x128xf32>
    %322 = arith.addf %283, %321 : vector<8x128xf32>
    %323 = vector.extract_strided_slice %77 {offsets = [6, 0], sizes = [1, 128], strides = [1, 1]} : vector<9x128xi32> to vector<1x128xi32>
    %324 = vector.broadcast %323 : vector<1x128xi32> to vector<324x128xi32>
    %325 = arith.cmpi eq, %324, %87 : vector<324x128xi32>
    %326 = vector.extract_strided_slice %49 {offsets = [6, 0], sizes = [1, 128], strides = [1, 1]} : vector<9x128xf32> to vector<1x128xf32>
    %cst_68 = arith.constant 0.000000e+00 : f32
    %327 = vector.shape_cast %326 : vector<1x128xf32> to vector<1x128xf32>
    %328 = vector.broadcast %327 : vector<1x128xf32> to vector<324x128xf32>
    %329 = vector.broadcast %cst_68 : f32 to vector<324x128xf32>
    %330 = arith.select %325, %328, %329 : vector<324x128xi1>, vector<324x128xf32>
    %331 = vector.extract_strided_slice %80 {offsets = [6, 0], sizes = [1, 128], strides = [1, 1]} : vector<9x128xi32> to vector<1x128xi32>
    %332 = vector.broadcast %331 : vector<1x128xi32> to vector<324x128xi32>
    %333 = arith.cmpi eq, %332, %87 : vector<324x128xi32>
    %334 = vector.extract_strided_slice %56 {offsets = [6, 0], sizes = [1, 128], strides = [1, 1]} : vector<9x128xf32> to vector<1x128xf32>
    %cst_69 = arith.constant 0.000000e+00 : f32
    %335 = vector.shape_cast %334 : vector<1x128xf32> to vector<1x128xf32>
    %336 = vector.broadcast %335 : vector<1x128xf32> to vector<324x128xf32>
    %337 = vector.broadcast %cst_69 : f32 to vector<324x128xf32>
    %338 = arith.select %333, %336, %337 : vector<324x128xi1>, vector<324x128xf32>
    %339 = arith.addf %330, %338 : vector<324x128xf32>
    %340 = vector.extract_strided_slice %83 {offsets = [6, 0], sizes = [1, 128], strides = [1, 1]} : vector<9x128xi32> to vector<1x128xi32>
    %341 = vector.broadcast %340 : vector<1x128xi32> to vector<324x128xi32>
    %342 = arith.cmpi eq, %341, %87 : vector<324x128xi32>
    %343 = vector.extract_strided_slice %63 {offsets = [6, 0], sizes = [1, 128], strides = [1, 1]} : vector<9x128xf32> to vector<1x128xf32>
    %cst_70 = arith.constant 0.000000e+00 : f32
    %344 = vector.shape_cast %343 : vector<1x128xf32> to vector<1x128xf32>
    %345 = vector.broadcast %344 : vector<1x128xf32> to vector<324x128xf32>
    %346 = vector.broadcast %cst_70 : f32 to vector<324x128xf32>
    %347 = arith.select %342, %345, %346 : vector<324x128xi1>, vector<324x128xf32>
    %348 = arith.addf %339, %347 : vector<324x128xf32>
    %349 = vector.extract_strided_slice %86 {offsets = [6, 0], sizes = [1, 128], strides = [1, 1]} : vector<9x128xi32> to vector<1x128xi32>
    %350 = vector.broadcast %349 : vector<1x128xi32> to vector<324x128xi32>
    %351 = arith.cmpi eq, %350, %87 : vector<324x128xi32>
    %352 = vector.extract_strided_slice %70 {offsets = [6, 0], sizes = [1, 128], strides = [1, 1]} : vector<9x128xf32> to vector<1x128xf32>
    %cst_71 = arith.constant 0.000000e+00 : f32
    %353 = vector.shape_cast %352 : vector<1x128xf32> to vector<1x128xf32>
    %354 = vector.broadcast %353 : vector<1x128xf32> to vector<324x128xf32>
    %355 = vector.broadcast %cst_71 : f32 to vector<324x128xf32>
    %356 = arith.select %351, %354, %355 : vector<324x128xi1>, vector<324x128xf32>
    %357 = arith.addf %348, %356 : vector<324x128xf32>
    %358 = arith.truncf %357 : vector<324x128xf32> to vector<324x128xbf16>
    %359 = vector.extract_strided_slice %6 {offsets = [48, 0], sizes = [8, 324], strides = [1, 1]} : vector<72x324xbf16> to vector<8x324xbf16>
    %cst_72 = arith.constant dense<0.000000e+00> : vector<8x128xf32>
    %360 = tpu.matmul %359, %358, %cst_72 {dimension_numbers = #tpu.dot_dimension_numbers<[1], [0], [0], [1], [0, 0, 1, 1], [], []>} : vector<8x324xbf16>, vector<324x128xbf16>, vector<8x128xf32> -> vector<8x128xf32>
    %361 = arith.addf %322, %360 : vector<8x128xf32>
    %362 = vector.extract_strided_slice %77 {offsets = [7, 0], sizes = [1, 128], strides = [1, 1]} : vector<9x128xi32> to vector<1x128xi32>
    %363 = vector.broadcast %362 : vector<1x128xi32> to vector<324x128xi32>
    %364 = arith.cmpi eq, %363, %87 : vector<324x128xi32>
    %365 = vector.extract_strided_slice %49 {offsets = [7, 0], sizes = [1, 128], strides = [1, 1]} : vector<9x128xf32> to vector<1x128xf32>
    %cst_73 = arith.constant 0.000000e+00 : f32
    %366 = vector.shape_cast %365 : vector<1x128xf32> to vector<1x128xf32>
    %367 = vector.broadcast %366 : vector<1x128xf32> to vector<324x128xf32>
    %368 = vector.broadcast %cst_73 : f32 to vector<324x128xf32>
    %369 = arith.select %364, %367, %368 : vector<324x128xi1>, vector<324x128xf32>
    %370 = vector.extract_strided_slice %80 {offsets = [7, 0], sizes = [1, 128], strides = [1, 1]} : vector<9x128xi32> to vector<1x128xi32>
    %371 = vector.broadcast %370 : vector<1x128xi32> to vector<324x128xi32>
    %372 = arith.cmpi eq, %371, %87 : vector<324x128xi32>
    %373 = vector.extract_strided_slice %56 {offsets = [7, 0], sizes = [1, 128], strides = [1, 1]} : vector<9x128xf32> to vector<1x128xf32>
    %cst_74 = arith.constant 0.000000e+00 : f32
    %374 = vector.shape_cast %373 : vector<1x128xf32> to vector<1x128xf32>
    %375 = vector.broadcast %374 : vector<1x128xf32> to vector<324x128xf32>
    %376 = vector.broadcast %cst_74 : f32 to vector<324x128xf32>
    %377 = arith.select %372, %375, %376 : vector<324x128xi1>, vector<324x128xf32>
    %378 = arith.addf %369, %377 : vector<324x128xf32>
    %379 = vector.extract_strided_slice %83 {offsets = [7, 0], sizes = [1, 128], strides = [1, 1]} : vector<9x128xi32> to vector<1x128xi32>
    %380 = vector.broadcast %379 : vector<1x128xi32> to vector<324x128xi32>
    %381 = arith.cmpi eq, %380, %87 : vector<324x128xi32>
    %382 = vector.extract_strided_slice %63 {offsets = [7, 0], sizes = [1, 128], strides = [1, 1]} : vector<9x128xf32> to vector<1x128xf32>
    %cst_75 = arith.constant 0.000000e+00 : f32
    %383 = vector.shape_cast %382 : vector<1x128xf32> to vector<1x128xf32>
    %384 = vector.broadcast %383 : vector<1x128xf32> to vector<324x128xf32>
    %385 = vector.broadcast %cst_75 : f32 to vector<324x128xf32>
    %386 = arith.select %381, %384, %385 : vector<324x128xi1>, vector<324x128xf32>
    %387 = arith.addf %378, %386 : vector<324x128xf32>
    %388 = vector.extract_strided_slice %86 {offsets = [7, 0], sizes = [1, 128], strides = [1, 1]} : vector<9x128xi32> to vector<1x128xi32>
    %389 = vector.broadcast %388 : vector<1x128xi32> to vector<324x128xi32>
    %390 = arith.cmpi eq, %389, %87 : vector<324x128xi32>
    %391 = vector.extract_strided_slice %70 {offsets = [7, 0], sizes = [1, 128], strides = [1, 1]} : vector<9x128xf32> to vector<1x128xf32>
    %cst_76 = arith.constant 0.000000e+00 : f32
    %392 = vector.shape_cast %391 : vector<1x128xf32> to vector<1x128xf32>
    %393 = vector.broadcast %392 : vector<1x128xf32> to vector<324x128xf32>
    %394 = vector.broadcast %cst_76 : f32 to vector<324x128xf32>
    %395 = arith.select %390, %393, %394 : vector<324x128xi1>, vector<324x128xf32>
    %396 = arith.addf %387, %395 : vector<324x128xf32>
    %397 = arith.truncf %396 : vector<324x128xf32> to vector<324x128xbf16>
    %398 = vector.extract_strided_slice %6 {offsets = [56, 0], sizes = [8, 324], strides = [1, 1]} : vector<72x324xbf16> to vector<8x324xbf16>
    %cst_77 = arith.constant dense<0.000000e+00> : vector<8x128xf32>
    %399 = tpu.matmul %398, %397, %cst_77 {dimension_numbers = #tpu.dot_dimension_numbers<[1], [0], [0], [1], [0, 0, 1, 1], [], []>} : vector<8x324xbf16>, vector<324x128xbf16>, vector<8x128xf32> -> vector<8x128xf32>
    %400 = arith.addf %361, %399 : vector<8x128xf32>
    %401 = vector.extract_strided_slice %77 {offsets = [8, 0], sizes = [1, 128], strides = [1, 1]} : vector<9x128xi32> to vector<1x128xi32>
    %402 = vector.broadcast %401 : vector<1x128xi32> to vector<324x128xi32>
    %403 = arith.cmpi eq, %402, %87 : vector<324x128xi32>
    %404 = vector.extract_strided_slice %49 {offsets = [8, 0], sizes = [1, 128], strides = [1, 1]} : vector<9x128xf32> to vector<1x128xf32>
    %cst_78 = arith.constant 0.000000e+00 : f32
    %405 = vector.shape_cast %404 : vector<1x128xf32> to vector<1x128xf32>
    %406 = vector.broadcast %405 : vector<1x128xf32> to vector<324x128xf32>
    %407 = vector.broadcast %cst_78 : f32 to vector<324x128xf32>
    %408 = arith.select %403, %406, %407 : vector<324x128xi1>, vector<324x128xf32>
    %409 = vector.extract_strided_slice %80 {offsets = [8, 0], sizes = [1, 128], strides = [1, 1]} : vector<9x128xi32> to vector<1x128xi32>
    %410 = vector.broadcast %409 : vector<1x128xi32> to vector<324x128xi32>
    %411 = arith.cmpi eq, %410, %87 : vector<324x128xi32>
    %412 = vector.extract_strided_slice %56 {offsets = [8, 0], sizes = [1, 128], strides = [1, 1]} : vector<9x128xf32> to vector<1x128xf32>
    %cst_79 = arith.constant 0.000000e+00 : f32
    %413 = vector.shape_cast %412 : vector<1x128xf32> to vector<1x128xf32>
    %414 = vector.broadcast %413 : vector<1x128xf32> to vector<324x128xf32>
    %415 = vector.broadcast %cst_79 : f32 to vector<324x128xf32>
    %416 = arith.select %411, %414, %415 : vector<324x128xi1>, vector<324x128xf32>
    %417 = arith.addf %408, %416 : vector<324x128xf32>
    %418 = vector.extract_strided_slice %83 {offsets = [8, 0], sizes = [1, 128], strides = [1, 1]} : vector<9x128xi32> to vector<1x128xi32>
    %419 = vector.broadcast %418 : vector<1x128xi32> to vector<324x128xi32>
    %420 = arith.cmpi eq, %419, %87 : vector<324x128xi32>
    %421 = vector.extract_strided_slice %63 {offsets = [8, 0], sizes = [1, 128], strides = [1, 1]} : vector<9x128xf32> to vector<1x128xf32>
    %cst_80 = arith.constant 0.000000e+00 : f32
    %422 = vector.shape_cast %421 : vector<1x128xf32> to vector<1x128xf32>
    %423 = vector.broadcast %422 : vector<1x128xf32> to vector<324x128xf32>
    %424 = vector.broadcast %cst_80 : f32 to vector<324x128xf32>
    %425 = arith.select %420, %423, %424 : vector<324x128xi1>, vector<324x128xf32>
    %426 = arith.addf %417, %425 : vector<324x128xf32>
    %427 = vector.extract_strided_slice %86 {offsets = [8, 0], sizes = [1, 128], strides = [1, 1]} : vector<9x128xi32> to vector<1x128xi32>
    %428 = vector.broadcast %427 : vector<1x128xi32> to vector<324x128xi32>
    %429 = arith.cmpi eq, %428, %87 : vector<324x128xi32>
    %430 = vector.extract_strided_slice %70 {offsets = [8, 0], sizes = [1, 128], strides = [1, 1]} : vector<9x128xf32> to vector<1x128xf32>
    %cst_81 = arith.constant 0.000000e+00 : f32
    %431 = vector.shape_cast %430 : vector<1x128xf32> to vector<1x128xf32>
    %432 = vector.broadcast %431 : vector<1x128xf32> to vector<324x128xf32>
    %433 = vector.broadcast %cst_81 : f32 to vector<324x128xf32>
    %434 = arith.select %429, %432, %433 : vector<324x128xi1>, vector<324x128xf32>
    %435 = arith.addf %426, %434 : vector<324x128xf32>
    %436 = arith.truncf %435 : vector<324x128xf32> to vector<324x128xbf16>
    %437 = vector.extract_strided_slice %6 {offsets = [64, 0], sizes = [8, 324], strides = [1, 1]} : vector<72x324xbf16> to vector<8x324xbf16>
    %cst_82 = arith.constant dense<0.000000e+00> : vector<8x128xf32>
    %438 = tpu.matmul %437, %436, %cst_82 {dimension_numbers = #tpu.dot_dimension_numbers<[1], [0], [0], [1], [0, 0, 1, 1], [], []>} : vector<8x324xbf16>, vector<324x128xbf16>, vector<8x128xf32> -> vector<8x128xf32>
    %439 = arith.addf %400, %438 : vector<8x128xf32>
    %c0_83 = arith.constant 0 : index
    %c0_84 = arith.constant 0 : index
    %c0_85 = arith.constant 0 : index
    %440 = vector.load %arg7[%c0_83, %c0_84, %c0_85] : memref<1x8x128xf32, #tpu.memory_space<vmem>>, vector<1x8x128xf32>
    %441 = vector.shape_cast %440 : vector<1x8x128xf32> to vector<8x128xf32>
    %442 = vector.shape_cast %439 : vector<8x128xf32> to vector<1x8x128xf32>
    tpu.vector_store %arg7[%c0_83, %c0_84, %c0_85], %442 {strides = array<i32>} : memref<1x8x128xf32, #tpu.memory_space<vmem>>, vector<1x8x128xf32>,
    return
  }
  func.func @transform_0(%arg0: i32, %arg1: i32) -> (i32, i32, i32) {
    %c0_i32 = arith.constant 0 : i32
    %c0_i32_0 = arith.constant 0 : i32
    return %arg0, %c0_i32, %arg1 : i32, i32, i32
  }
  func.func @transform_1(%arg0: i32, %arg1: i32) -> (i32, i32, i32) {
    %c0_i32 = arith.constant 0 : i32
    %c0_i32_0 = arith.constant 0 : i32
    %c0_i32_1 = arith.constant 0 : i32
    return %arg0, %c0_i32, %c0_i32_0 : i32, i32, i32
  }
  func.func @transform_2(%arg0: i32, %arg1: i32) -> (i32, i32) {
    %c0_i32 = arith.constant 0 : i32
    %c0_i32_0 = arith.constant 0 : i32
    %c0_i32_1 = arith.constant 0 : i32
    return %c0_i32, %c0_i32_0 : i32, i32
  }
  func.func @transform_3(%arg0: i32, %arg1: i32) -> (i32, i32) {
    %c0_i32 = arith.constant 0 : i32
    %c0_i32_0 = arith.constant 0 : i32
    return %c0_i32, %arg1 : i32, i32
  }
  func.func @transform_4(%arg0: i32, %arg1: i32) -> (i32, i32) {
    %c0_i32 = arith.constant 0 : i32
    %c0_i32_0 = arith.constant 0 : i32
    %c0_i32_1 = arith.constant 0 : i32
    return %c0_i32, %c0_i32_0 : i32, i32
  }
  func.func @transform_5(%arg0: i32, %arg1: i32) -> (i32, i32, i32) {
    %c0_i32 = arith.constant 0 : i32
    %c0_i32_0 = arith.constant 0 : i32
    return %arg0, %c0_i32, %arg1 : i32, i32, i32
  }
}

</mosaic_0001>

<bundles_post_ra>
// kernel: tpu_custom_call.1
= control target key start
LH: loop header
LB: loop body
LE: loop exit
PB: predicated region body
PF: predicated region fallthrough
CT: control target
= control target key end

     0   :  { %s11229_s0 = inlined_call_operand.vmem [shape: f32[2,36,256], index: 0, kind: input, shape index: {}]   ;;  %s11230_s1 = inlined_call_operand.vmem [shape: f32[2,8,324], index: 1, kind: input, shape index: {}]   ;;  %s11231_s2 = inlined_call_operand.vmem [shape: f32[18,36], index: 2, kind: input, shape index: {}]   ;;  %s11232_s3 = inlined_call_operand.vmem [shape: f32[18,256], index: 3, kind: input, shape index: {}]   ;;  %s11233_s4 = inlined_call_operand.vmem [shape: f32[72,8], index: 4, kind: input, shape index: {}]   ;;  %s11234_s5 = inlined_call_operand.hbm [shape: f32[2,8,256], index: 5, kind: output, shape index: {}]  }
   0x1   :  { %11382 = sst [smem:[#allocation97_spill]] %s11229_s0 }
   0x2   :  { %10 = vsyncpa [#allocation5], 0 }
   0x3   :  { %12 = vsyncpa [#allocation5 + $0x1], 0  ;;  %s6009_s18 = smov 0   ;;  %s6011_s19 = smov 0  }
   0x4   :  { %s6013_s20 = smov 0   ;;  %s6015_s21 = smov 0  }
   0x5   :  { %s6017_s22 = smov 0   ;;  %s6019_s23 = smov 0  }
   0x6   :  { %s6021_s24 = smov 0   ;;  %s6023_s25 = smov 0  }
   0x7   :  { %s6025_s26 = smov 0   ;;  %s6027_s27 = smov 0  }
   0x8 LB: > { %s5698_s28 = sadd.s32 4294967295, %s5977_s27   ;;  %s5699_s29 = sadd.s32 4294967294, %s5977_s27   ;;  %s5977_s27 = sphi %s6027_s27, %s18_s27   ;;  %s5973_s26 = sphi %s6025_s26, %s11610_s26   ;;  %s5969_s25 = sphi %s6023_s25, %s11609_s25   ;;  %s5965_s24 = sphi %s6021_s24, %s11608_s24   ;;  %s5961_s23 = sphi %s6019_s23, %s11607_s23   ;;  %s5957_s22 = sphi %s6017_s22, %s11606_s22   ;;  %s5953_s21 = sphi %s6015_s21, %s11605_s21   ;;  %s5949_s20 = sphi %s6013_s20, %s11604_s20   ;;  %s5945_s19 = sphi %s6011_s19, %s11603_s19   ;;  %s5941_s18 = sphi %s6009_s18, %s11602_s18  }
   0x9   : > { %s27_s30 = sadd.s32 1, %s5969_s25  ;;  %s30_s6 = sadd.s32 1, %s5973_s26 }
   0xa   : > { %p28_p0 = scmp.ge.s32.totalorder %s27_s30, 2  ;;  %s39_s7 = sadd.s32 1, %s5957_s22 }
   0xb   : > { %p46_p1 = scmp.ne.s32.totalorder %s5957_s22, %s5953_s21  ;;  %p47_p2 = scmp.eq.s32.totalorder %s5977_s27, 0 }
   0xc   : > { %s11612_s30 = smov (%p28_p0, %s27_s30), 0  ;;  %s11614_s6 = smov (!%p28_p0, %s30_s6), %s5973_s26 }
   0xd   : > { %11383 = sst [smem:[#allocation7_spill]] %s11612_s30  ;;  %s35_s8 = ssub.s32 %s5969_s25, %s11612_s30 }
   0xe   : > { %p6075_p3 = por %p47_p2, %p46_p1  ;;  %p32_p4 = scmp.ge.s32.totalorder %s11614_s6, 2 }
   0xf   : > { %p110_p5 = scmp.eq.s32.totalorder %s35_s8, 0  ;;  %s112_s10 = sadd.s32 1, %s5949_s20 }
  0x10   : > { %p119_p6 = scmp.ne.s32.totalorder %s5949_s20, %s5945_s19  ;;  %s11616_s6 = smov (%p32_p4, %s11614_s6), 0 }
  0x11   : > { %11385 = sst [smem:[#allocation8_spill]] %s11616_s6  ;;  %s34_s12 = ssub.s32 %s5973_s26, %s11616_s6 }
  0x12   : > { %s6085_s11 = scalar_select %p110_p5, %s5949_s20, %s112_s10  }
  0x13   : > { %p6089_p7 = por %p119_p6, %p47_p2  ;;  %s36_s14 = sor.u32 %s35_s8, %s34_s12 }
  0x14   : > { %p172_p8 = scmp.eq.s32.totalorder %s5698_s28, 3  ;;  %p37_p9 = scmp.eq.s32.totalorder %s36_s14, 0 }
  0x15   : > { %p177_p10 = scmp.ne.s32.totalorder %s5953_s21, %s5941_s18  ;;  %p178_p12 = scmp.eq.s32.totalorder %s5699_s29, 3 }
  0x16   : > { %p6098_p11 = por %p172_p8, %p46_p1  ;;  %p5701_p0 = scmp.ge.s32.totalorder %s5977_s27, 4 }
  0x17   : > { %s6103_s16 = scalar_select %p37_p9, %s5957_s22, %s39_s7  }
  0x18   : > { %p6105_p13 = por %p178_p12, %p177_p10  ;;  %200 = sbr.rel (%p5701_p0) target bundleno = 50 (0x32), region = 24 }
  0x1d   : > { %203 = sbr.rel (!%p6075_p3) target bundleno = 43 (0x2b), region = 28  ;;  %s205_s28 = sand.u32 (%p6075_p3), 1, %s5957_s22  }
  0x1e   : > { %s5754_s8 = smul.u32 (%p6075_p3), 10, %s5973_s26  ;;  %s11389_s0 = sld [smem:[#allocation97_spill]] (%p6075_p3) }
  0x1f   : > { %s5753_s10 = smul.u32 (%p6075_p3), 40, %s205_s28 }
  0x20   : > { %s209_s12 = sadd.s32 (%p6075_p3), %s5969_s25, %s5754_s8 }
  0x21   : > { %s5702_s29 = sshll.u32 (%p6075_p3), %s209_s12, 3  ;;  %s207_s30 = scalar_lea.vmem (%p6075_p3), [#allocation2], %s5753_s10 }
  0x24   : > { %s211_s6 = scalar_lea.vmem %s11389_s0, %s5702_s29 }
  0x25   : > { %v248_v0 = vld [vmem:[%s211_s6] sm:$0xff]  ;;  %v250_v1 = vld [vmem:[%s211_s6 + $0x10] sm:$0xff] }
  0x26   : > { %v252_v2 = vld [vmem:[%s211_s6 + $0x20] sm:$0xff]  ;;  %249 = vst [vmem:[%s207_s30] sm:$0xff] %v248_v0  ;;  %v254_v3 = vld [vmem:[%s211_s6 + $0x30] sm:$0xff] }
  0x27   : > { %251 = vst [vmem:[%s207_s30 + $0x8] sm:$0xff] %v250_v1  ;;  %v256_v4 = vld [vmem:[%s211_s6 + $0x40] sm:$0xff] }
  0x28   : > { %253 = vst [vmem:[%s207_s30 + $0x10] sm:$0xff] %v252_v2 }
  0x29   : > { %255 = vst [vmem:[%s207_s30 + $0x18] sm:$0xff] %v254_v3 }
  0x2a   : > { %257 = vst [vmem:[%s207_s30 + $0x20] sm:$0xff] %v256_v4 }
  0x2b PF: > { %271 = sbr.rel (!%p6089_p7) target bundleno = 50 (0x32), region = 70  ;;  %s273_s9 = sand.u32 (%p6089_p7), 1, %s5949_s20  }
  0x2c   : > { %s5703_s28 = sshll.u32 (%p6089_p7), %s5969_s25, 3  ;;  %s5755_s8 = smul.u32 (%p6089_p7), 24, %s273_s9 }
  0x2d   : > { %s277_s10 = scalar_lea.vmem (%p6089_p7), %s11232_s3, %s5703_s28 }
  0x2e   : > { %v310_v5 = vld [vmem:[%s277_s10] sm:$0xff] (%p6089_p7)  ;;  %v312_v6 = vld [vmem:[%s277_s10 + $0x10] sm:$0xff] (%p6089_p7)  ;;  %s275_s6 = scalar_lea.vmem (%p6089_p7), [#allocation3], %s5755_s8 }
  0x2f   : > { %v314_v7 = vld [vmem:[%s277_s10 + $0x20] sm:$0xff] (%p6089_p7)  ;;  %311 = vst [vmem:[%s275_s6] sm:$0xff] (%p6089_p7), %v310_v5 }
  0x30   : > { %313 = vst [vmem:[%s275_s6 + $0x8] sm:$0xff] %v312_v6 }
  0x31   : > { %315 = vst [vmem:[%s275_s6 + $0x10] sm:$0xff] %v314_v7 }
  0x32 PF: > { %p5704_p1 = scmp.ge.s32.totalorder %s5977_s27, 1  ;;  %p320_p2 = scmp.lt.s32.totalorder %s5977_s27, 5 }
  0x34   : > { %p321_p3 = pnand %p5704_p1, %p320_p2 }
  0x36   : > { %324 = sbr.rel (%p321_p3) target bundleno = 1534 (0x5fe), region = 108 }
  0x3b   : > { %p370_p4 = scmp.lt.s32.totalorder %s5965_s24, 1  ;;  %s6129_s30 = sand.u32 1, %s5953_s21   ;;  %v384_v8 = vld [vmem:[%s11233_s4] sm:$0xff]  ;;  %vm393_vm0 = vcmask 64512   ;;  %vm587_vm1 = vcmask 1043456   ;;  %v385_v16 = vld [vmem:[%s11233_s4 + $0x8] sm:$0xff]  ;;  %v703_v1 = vlaneseq }
  0x3c   : > { %s5756_s13 = smul.u32 40, %s6129_s30  ;;  %v392_v12 = vld [vmem:[%s11233_s4 + $0x40] sm:$0xff]  ;;  %vm577_vm2 = vcmask 293888   ;;  %v386_v19 = vld [vmem:[%s11233_s4 + $0x10] sm:$0xff]  ;;  %v575_v20 = vld [vmem:[%s11231_s2 + $0x8] sm:$0xff]  ;;  %s334_s6 = sand.u32 1, %s5945_s19  }
  0x3d   : > { %s371_s7 = scalar_select %p370_p4, %s5965_s24, 1  ;;  %v574_v18 = vld [vmem:[%s11231_s2] sm:$0xff]  ;;  %v387_v21 = vld [vmem:[%s11233_s4 + $0x18] sm:$0xff]  ;;  %v576_v22 = vld [vmem:[%s11231_s2 + $0x10] sm:$0x3]  ;;  %vm652_vm4 = vcmask 1046528  }
  0x3e   : > { %s329_s10 = scalar_lea.vmem [#allocation2], %s5756_s13  ;;  %v388_v23 = vld [vmem:[%s11233_s4 + $0x20] sm:$0xff]  ;;  %v389_v25 = vld [vmem:[%s11233_s4 + $0x28] sm:$0xff]  ;;  %v390_v26 = vld [vmem:[%s11233_s4 + $0x30] sm:$0xff]  ;;  %s5757_s13 = smul.u32 24, %s334_s6 }
  0x3f   : > { %s5758_s14 = smul.u32 24, %s371_s7  ;;  %v380_v9 = vld [vmem:[%s329_s10 + $0x20] sm:$0xf]  ;;  %v379_v13 = vld [vmem:[%s329_s10 + $0x18] sm:$0xff]  ;;  %v378_v14 = vld [vmem:[%s329_s10 + $0x10] sm:$0xff]  ;;  %s5748_s19 = sshll.u32 %s5965_s24, 1 }
  0x40   : > { %v377_v15 = vld [vmem:[%s329_s10 + $0x8] sm:$0xff]  ;;  %v376_v17 = vld [vmem:[%s329_s10] sm:$0xff]  ;;  %v391_v27 = vld [vmem:[%s11233_s4 + $0x38] sm:$0xff]  ;;  %s336_s7 = scalar_lea.vmem [#allocation3], %s5757_s13  ;;  %s5581_s0 = sadd.s32 %s5961_s23, %s5748_s19 }
  0x41   : > { %s6136_s8 = scalar_lea.vmem %s11230_s1, %s5758_s14  ;;  %v571_v31 = vld [vmem:[%s336_s7] sm:$0xff]  ;;  %v572_v37 = vld [vmem:[%s336_s7 + $0x8] sm:$0xff]  ;;  %v573_v52 = vld [vmem:[%s336_s7 + $0x10] sm:$0x3]  ;;  %s5705_s14 = sshll.u32 %s6129_s30, 3 }
  0x42   : > { %v381_v10 = vld [vmem:[%s6136_s8] sm:$0xff]  ;;  %v382_v11 = vld [vmem:[%s6136_s8 + $0x8] sm:$0xff]  ;;  %v383_v24 = vld [vmem:[%s6136_s8 + $0x10] sm:$0xff]  ;;  %s5749_s9 = sshll.u32 %s5581_s0, 3  ;;  %s369_s8 = scalar_lea.vmem [#allocation4], %s5705_s14 }
  0x43   : > { %436 = vmatpush.msra.mxu0 %v381_v10  ;;  %5752 = vmatpush.msra.mxu3 %v382_v11  ;;  %s5583_s29 = scalar_lea.hbm %s11234_s5, %s5749_s9  ;;  %s5585_s10 = sshll.u32 %s369_s8, 4  ;;  %s5586_s10 = int_to_ptr.vmem [resolvable:$true] %s5585_s10 }
  0x44   : > { %5707 = vmatmul.msk.f32.vlgmr.msra.gmra.mxu0 %vm393_vm0, %v384_v8  ;;  %5724 = vmatmul.msk.f32.vlgmr.msra.gmra.mxu3 %vm393_vm0, %v392_v12  ;;  %s5587_s6 = sshll.u32 %s5583_s29, 4  ;;  %s5571_s23 = scalar_lea.sflag [#allocation5], %s6129_s30  ;;  %s5588_s6 = int_to_ptr.hbm [resolvable:$true] %s5587_s6 }
  0x45   : > { %5734 = vmatpush.msk.msrb.mxu3 %vm587_vm1, %v380_v9  ;;  %480 = vmatpush.msra.mxu1 %v382_v11  ;;  %s5881_s24 = sshra.s32 %s5588_s6, 4  ;;  %s5887_s0 = scalar_lea.hbm %s11234_s5, 32  ;;  %s5882_s24 = int_to_ptr.hbm [resolvable:$true] %s5881_s24 }
  0x46   : > { %5716 = vmatmul.msk.f32.vlgmr.msra.gmra.mxu1 %vm393_vm0, %v384_v8  ;;  %524 = vmatpush.msra.mxu2 %v383_v24  ;;  %s5883_s13 = scalar_lea.hbm %s5882_s24, 8  ;;  %p5888_p8 = scmp.lt.s32.totalorder %s5882_s24, %s11234_s5 }
  0x47   : > { %603 = vmatpush.msrb.mxu3 %v379_v13  ;;  %5725 = vmatmul.msk.f32.vlgmr.msra.gmra.mxu2 %vm393_vm0, %v384_v8  ;;  %p5884_p5 = scmp.ne.s32.totalorder %s5882_s24, %s5883_s13  ;;  %p5889_p9 = scmp.lt.s32.totalorder %s5887_s0, %s5883_s13 }
  0x49   : > { %604 = vmatpush.msrb.mxu3 %v378_v14  ;;  %p5885_p6 = pnand %p5884_p5, %p6098_p11  ;;  %p5890_p10 = por %p5889_p9, %p5888_p8 }
  0x4b   : > { %605 = vmatpush.msrb.mxu3 %v377_v15  ;;  %p5886_p7 = pneg %p5885_p6 }
  0x4c   : > { %5708 = vmatmul.msk.f32.gmra.mxu0 %vm393_vm0, %v385_v16 }
  0x4d   : > { %606 = vmatpush.msrb.mxu3 %v376_v17  ;;  %p5891_p12 = pnand %p5890_p10, %p5886_p7 }
  0x4e   : > { %5735 = vmatmul.msk.f32.vlgmr.msrb.gmra.mxu3 %vm577_vm2, %v574_v18  ;;  %5717 = vmatmul.msk.f32.gmra.mxu1 %vm393_vm0, %v385_v16 }
  0x4f   : > { %5726 = vmatmul.msk.f32.gmra.mxu2 %vm393_vm0, %v385_v16  ;;  %v6222_v16 = vshrl.u32 %v703_v1, 7 }
  0x51   : > { %11393 = vst [vmem:[#allocation12_spill] sm:$0xff] %v6222_v16 }
  0x54   : > { %5709 = vmatmul.msk.f32.gmra.mxu0 %vm393_vm0, %v386_v19 }
  0x56   : > { %5736 = vmatmul.msk.f32.gmra.mxu3 %vm577_vm2, %v575_v20  ;;  %5718 = vmatmul.msk.f32.gmra.mxu1 %vm393_vm0, %v386_v19 }
  0x57   : > { %5727 = vmatmul.msk.f32.gmra.mxu2 %vm393_vm0, %v386_v19 }
  0x5c   : > { %5710 = vmatmul.msk.f32.gmra.mxu0 %vm393_vm0, %v387_v21 }
  0x5e   : > { %5737 = vmatmul.msk.f32.gmra.mxu3 %vm577_vm2, %v576_v22  ;;  %5719 = vmatmul.msk.f32.gmra.mxu1 %vm393_vm0, %v387_v21 }
  0x5f   : > { %5728 = vmatmul.msk.f32.gmra.mxu2 %vm393_vm0, %v387_v21 }
  0x64   : > { %5711 = vmatmul.msk.f32.gmra.mxu0 %vm393_vm0, %v388_v23 }
  0x66   : > { %5720 = vmatmul.msk.f32.gmra.mxu1 %vm393_vm0, %v388_v23 }
  0x67   : > { %5729 = vmatmul.msk.f32.gmra.mxu2 %vm393_vm0, %v388_v23 }
  0x6c   : > { %5712 = vmatmul.msk.f32.gmra.mxu0 %vm393_vm0, %v389_v25 }
  0x6e   : > { %5721 = vmatmul.msk.f32.gmra.mxu1 %vm393_vm0, %v389_v25 }
  0x6f   : > { %5730 = vmatmul.msk.f32.gmra.mxu2 %vm393_vm0, %v389_v25 }
  0x74   : > { %5713 = vmatmul.msk.f32.gmra.mxu0 %vm393_vm0, %v390_v26 }
  0x76   : > { %5722 = vmatmul.msk.f32.gmra.mxu1 %vm393_vm0, %v390_v26 }
  0x77   : > { %5731 = vmatmul.msk.f32.gmra.mxu2 %vm393_vm0, %v390_v26 }
  0x7c   : > { %5714 = vmatmul.msk.f32.gmra.mxu0 %vm393_vm0, %v391_v27 }
  0x7e   : > { %5723 = vmatmul.msk.f32.gmra.mxu1 %vm393_vm0, %v391_v27 }
  0x7f   : > { %5732 = vmatmul.msk.f32.gmra.mxu2 %vm393_vm0, %v391_v27 }
  0x84   : > { %5715 = vmatmul.msk.f32.gmra.mxu0 %vm393_vm0, %v392_v12 }
  0x87   : > { %5733 = vmatmul.msk.f32.gmra.mxu2 %vm393_vm0, %v392_v12 }
  0xc1   : > { %v6204_v28 = vpop.f32.mrf.mxu0 }
  0xc7   : > { %v6207_v29 = vpop.f32.mrf.mxu3 }
  0xc9   : > { %v6209_v30 = vpop.f32.mrf.mxu0 }
  0xd1   : > { %v608_v32 = vpop.f32.mrf.mxu3  ;;  %v6211_v34 = vpop.f32.mrf.mxu0 }
  0xd2   : > { %v617_v33 = vadd.f32 %v608_v32, %v571_v31  ;;  %11390 = vst [vmem:[#allocation9_spill] sm:$0xff] %v6211_v34 }
  0xd4   : > { %v620_v35 = vfloor.f32 %v617_v33  ;;  %v638_v44 = vmax.f32 %v617_v33, 0.0 }
  0xd6   : > { %v629_v36 = vadd.f32 1.0, %v620_v35  ;;  %v623_v40 = vmax.f32 %v620_v35, 0.0  ;;  %v640_v53 = vmin.f32 %v638_v44, 17.0 }
  0xd8   : > { %v631_v38 = vmax.f32 %v629_v36, 0.0  ;;  %v625_v49 = vmin.f32 %v623_v40, 17.0  ;;  %v6229_v36 = vadd.s32 112, %v6222_v16 }
  0xd9   : > { %v611_v39 = vpop.f32.mrf.mxu3  ;;  %v6213_v43 = vpop.f32.mrf.mxu0 }
  0xda   : > { %v633_v41 = vmin.f32 %v631_v38, 17.0  ;;  %v618_v42 = vadd.f32 %v611_v39, %v572_v37  ;;  %11391 = vst [vmem:[#allocation10_spill] sm:$0xff] %v6213_v43  ;;  %v644_v59 = vsub.f32 %v625_v49, %v640_v53  ;;  %v6217_v62 = vcvt.f32.s32 %v625_v49 }
  0xdb   : > { %v6232_v37 = vadd.s32 120, %v6222_v16 }
  0xdc   : > { %v5766_v45 = vceil.f32 %v633_v41  ;;  %v5767_v46 = vfloor.f32 %v633_v41  ;;  %v621_v47 = vfloor.f32 %v618_v42  ;;  %v639_v48 = vmax.f32 %v618_v42, 0.0 }
  0xdd   : > { %vm5765_vm3 = vcmp.lt.s32.totalorder %v633_v41, 0  ;;  %v660_v2 = vsub.f32 %v633_v41, %v640_v53  ;;  %v646_v9 = vadd.f32 1.0, %v644_v59  ;;  %v685_v13 = vmul.u32 18, %v6217_v62  ;;  %11395 = vst [vmem:[#allocation14_spill] sm:$0xff] %v6232_v37 }
  0xde   : > { %v624_v50 = vmax.f32 %v621_v47, 0.0  ;;  %v630_v51 = vadd.f32 1.0, %v621_v47  ;;  %v641_v56 = vmin.f32 %v639_v48, 17.0  ;;  %v5768_v58 = vsel %vm5765_vm3, %v5766_v45, %v5767_v46 }
  0xdf   : > { %v5769_v5 = vcvt.f32.s32 %v5768_v58  ;;  %v662_v17 = vsub.f32 1.0, %v660_v2  ;;  %v6235_v41 = vadd.s32 240, %v6222_v16  ;;  %v6254_v62 = vadd.s32 248, %v6222_v16 }
  0xe0   : > { %v626_v54 = vmin.f32 %v624_v50, 17.0  ;;  %v632_v55 = vmax.f32 %v630_v51, 0.0 }
  0xe1   : > { %v614_v57 = vpop.f32.mrf.mxu3  ;;  %v6215_v61 = vpop.f32.mrf.mxu0  ;;  %v692_v24 = vmul.u32 18, %v5769_v5  ;;  %11396 = vst [vmem:[#allocation15_spill] sm:$0xff] %v6235_v41 }
  0xe2   : > { %v619_v60 = vadd.f32 %v614_v57, %v573_v52  ;;  %11392 = vst [vmem:[#allocation11_spill] sm:$0xff] %v6215_v61  ;;  %v634_v63 = vmin.f32 %v632_v55, 17.0  ;;  %v645_v0 = vsub.f32 %v626_v54, %v641_v56  ;;  %v6219_v7 = vcvt.f32.s32 %v626_v54 }
  0xe3   : > { %11397 = vst [vmem:[#allocation16_spill] sm:$0xff] %v6254_v62 }
  0xe4   : > { %v622_v3 = vfloor.f32 %v619_v60  ;;  %v642_v4 = vmax.f32 %v619_v60, 0.0  ;;  %v661_v6 = vsub.f32 %v634_v63, %v641_v56  ;;  %vm5770_vm5 = vcmp.lt.s32.totalorder %v634_v63, 0 }
  0xe5   : > { %v5771_v8 = vceil.f32 %v634_v63  ;;  %v647_v10 = vadd.f32 1.0, %v645_v0  ;;  %v5772_v11 = vfloor.f32 %v634_v63  ;;  %v686_v21 = vmul.u32 18, %v6219_v7 }
  0xe6   : > { %v627_v12 = vmax.f32 %v622_v3, 0.0  ;;  %v663_v14 = vsub.f32 1.0, %v661_v6  ;;  %v635_v15 = vadd.f32 1.0, %v622_v3  ;;  %v643_v20 = vmin.f32 %v642_v4, 17.0 }
  0xe7   : > { %v5773_v18 = vsel %vm5770_vm5, %v5771_v8, %v5772_v11  ;;  %v653_v25 = vrot.slane %v647_v10, 1  ;;  %v687_v26 = vrot.slane %v6219_v7, 1 }
  0xe8   : > { %v628_v19 = vmin.f32 %v627_v12, 17.0  ;;  %v636_v22 = vmax.f32 %v635_v15, 0.0  ;;  %v5774_v23 = vcvt.f32.s32 %v5773_v18  ;;  %v668_v33 = vrot.slane %v663_v14, 1 }
  0xe9   : > { %v6226_v32 = vpop.f32.mrf.mxu0 }
  0xea   : > { %v648_v27 = vsub.f32 %v628_v19, %v643_v20  ;;  %v5764_v31 = vcvt.f32.s32 %v628_v19  ;;  %11394 = vst [vmem:[#allocation13_spill] sm:$0xff] %v6226_v32  ;;  %v637_v35 = vmin.f32 %v636_v22, 17.0  ;;  %v693_v40 = vmul.u32 18, %v5774_v23 }
  0xeb   : > { %v694_v60 = vrot.slane %v5774_v23, 1 }
  0xec   : > { %v649_v38 = vadd.f32 1.0, %v648_v27  ;;  %v688_v39 = vrot.slane %v5764_v31, 1  ;;  %v664_v42 = vsub.f32 %v637_v35, %v643_v20  ;;  %vm5775_vm6 = vcmp.lt.s32.totalorder %v637_v35, 0 }
  0xed   : > { %v5776_v44 = vceil.f32 %v637_v35  ;;  %v5777_v45 = vfloor.f32 %v637_v35 }
  0xee   : > { %v654_v46 = vrot.slane %v649_v38, 1  ;;  %v689_v47 = vsel %vm652_vm4, %v687_v26, %v688_v39  ;;  %v6238_v48 = vadd.s32 %v688_v39, %v686_v21  ;;  %v6240_v49 = vadd.s32 %v693_v40, %v688_v39 }
  0xef   : > { %v665_v50 = vsub.f32 1.0, %v664_v42  ;;  %v5778_v51 = vsel %vm5775_vm6, %v5776_v44, %v5777_v45  ;;  %v6242_v52 = vadd.s32 %v689_v47, %v685_v13  ;;  %v6244_v53 = vadd.s32 %v692_v24, %v689_v47 }
  0xf0   : > { %v655_v54 = vsel %vm652_vm4, %v653_v25, %v654_v46  ;;  %v6247_v55 = vmul.f32 %v654_v46, %v647_v10  ;;  %v6249_v56 = vmul.f32 %v663_v14, %v654_v46  ;;  %v5779_v57 = vcvt.f32.s32 %v5778_v51 }
  0xf1   : > { %v6251_v58 = vmul.f32 %v655_v54, %v646_v9  ;;  %v669_v59 = vrot.slane %v665_v50, 1  ;;  %v6256_v63 = vmul.f32 %v662_v17, %v655_v54  ;;  %v6259_v1 = vperm.slane %v6242_v52, 0  ;;  %v6264_v3 = vpop.f32.mrf.mxu0 }
  0xf2   : > { %v695_v0 = vrot.slane %v5779_v57, 1  ;;  %v6262_v2 = vperm.slane %v6244_v53, 0  ;;  %11398 = vst [vmem:[#allocation17_spill] sm:$0xff] %v6264_v3  ;;  %v6272_v7 = vperm.slane %v6242_v52, 1  ;;  %v6335_v44 = vperm.slane %v6244_v53, 2 }
  0xf3   : > { %v670_v4 = vsel %vm652_vm4, %v668_v33, %v669_v59  ;;  %v6267_v5 = vmul.f32 %v669_v59, %v663_v14  ;;  %v6269_v6 = vmul.f32 %v669_v59, %v647_v10  ;;  %v6284_v14 = vperm.slane %v6244_v53, 1 }
  0xf4   : > { %v6274_v8 = vmul.f32 %v670_v4, %v662_v17  ;;  %v6276_v11 = vmul.f32 %v670_v4, %v646_v9  ;;  %v696_v12 = vsel %vm652_vm4, %v694_v60, %v695_v0  ;;  %v6279_v15 = vadd.s32 %v695_v0, %v693_v40 }
  0xf5   : > { %v697_v18 = vadd.s32 %v696_v12, %v692_v24  ;;  %v699_v19 = vadd.s32 %v696_v12, %v685_v13  ;;  %v6281_v20 = vadd.s32 %v695_v0, %v686_v21  ;;  %v6287_v10 = vperm.slane %v6251_v58, 0 }
  0xf6   : > { %v6290_v22 = vperm.slane %v6274_v8, 0  ;;  %v6293_v9 = vperm.slane %v6276_v11, 0  ;;  %v6296_v17 = vperm.slane %v6256_v63, 0  ;;  %v6303_v21 = vperm.slane %v6251_v58, 1 }
  0xf7   : > { %v6298_v23 = vperm.slane %v697_v18, 0  ;;  %v6300_v13 = vperm.slane %v699_v19, 0  ;;  %v6306_v24 = vperm.slane %v6274_v8, 1  ;;  %v6308_v25 = vperm.slane %v697_v18, 1 }
  0xf8   : > { %v6310_v26 = vperm.slane %v699_v19, 1  ;;  %v6313_v27 = vperm.slane %v6276_v11, 1  ;;  %v6316_v31 = vperm.slane %v6256_v63, 1  ;;  %v6319_v33 = vperm.slane %v6242_v52, 2 }
  0xf9   : > { %v6322_v35 = vperm.slane %v6251_v58, 2  ;;  %v6324_v38 = vperm.slane %v697_v18, 2  ;;  %v6327_v39 = vperm.slane %v6274_v8, 2  ;;  %v6329_v40 = vperm.slane %v699_v19, 2  ;;  %v6340_v46 = vpop.f32.mrf.mxu0 }
  0xfa   : > { %v6332_v42 = vperm.slane %v6276_v11, 2  ;;  %v6338_v45 = vperm.slane %v6256_v63, 2  ;;  %11399 = vst [vmem:[#allocation18_spill] sm:$0xff] %v6340_v46  ;;  %v6343_v47 = vperm.slane %v6242_v52, 3  ;;  %v6346_v50 = vperm.slane %v6251_v58, 3 }
  0xfb   : > { %v6348_v51 = vperm.slane %v697_v18, 3  ;;  %v6351_v54 = vperm.slane %v6274_v8, 3  ;;  %v6353_v57 = vperm.slane %v699_v19, 3  ;;  %v6356_v59 = vperm.slane %v6276_v11, 3 }
  0xfc   : > { %11400 = vst [vmem:[#allocation19_spill] sm:$0xff] %v6343_v47  ;;  %v6359_v60 = vperm.slane %v6244_v53, 3  ;;  %v6362_v0 = vperm.slane %v6256_v63, 3  ;;  %v6365_v4 = vperm.slane %v6242_v52, 4  ;;  %v6368_v12 = vperm.slane %v6251_v58, 4 }
  0xfd   : > { %11401 = vst [vmem:[#allocation20_spill] sm:$0xff] %v6346_v50  ;;  %v6370_v46 = vperm.slane %v697_v18, 4  ;;  %v6373_v3 = vperm.slane %v6274_v8, 4  ;;  %v6375_v32 = vperm.slane %v699_v19, 4  ;;  %v6378_v61 = vperm.slane %v6276_v11, 4 }
  0xfe   : > { %11402 = vst [vmem:[#allocation21_spill] sm:$0xff] %v6348_v51  ;;  %v6381_v43 = vperm.slane %v6244_v53, 4  ;;  %v6384_v34 = vperm.slane %v6256_v63, 4  ;;  %vm1240_vm7 = vcmp.eq.s32.totalorder %v6272_v7, %v6229_v36  ;;  %vm1241_vm8 = vcmp.eq.s32.totalorder %v6272_v7, %v6232_v37 }
  0xff   : > { %11403 = vst [vmem:[#allocation22_spill] sm:$0xff] %v6351_v54  ;;  %vm1324_vm9 = vcmp.eq.s32.totalorder %v6308_v25, %v6229_v36  ;;  %vm1325_vm10 = vcmp.eq.s32.totalorder %v6308_v25, %v6232_v37  ;;  %vm1449_vm11 = vcmp.eq.s32.totalorder %v6310_v26, %v6229_v36  ;;  %vm1450_vm12 = vcmp.eq.s32.totalorder %v6310_v26, %v6232_v37 }
 0x100   : > { %11404 = vst [vmem:[#allocation23_spill] sm:$0xff] %v6353_v57  ;;  %vm1574_vm13 = vcmp.eq.s32.totalorder %v6284_v14, %v6229_v36  ;;  %vm1575_vm14 = vcmp.eq.s32.totalorder %v6284_v14, %v6232_v37  ;;  %vm1256_vm15 = vcmp.eq.s32.totalorder %v6272_v7, %v6235_v41  ;;  %vm1257_vm0 = vcmp.eq.s32.totalorder %v6272_v7, %v6254_v62 }
 0x101   : > { %11405 = vst [vmem:[#allocation24_spill] sm:$0xff] %v6356_v59  ;;  %vm1340_vm1 = vcmp.eq.s32.totalorder %v6308_v25, %v6235_v41  ;;  %vm1341_vm2 = vcmp.eq.s32.totalorder %v6308_v25, %v6254_v62  ;;  %vm1465_vm3 = vcmp.eq.s32.totalorder %v6310_v26, %v6235_v41  ;;  %vm1466_vm4 = vcmp.eq.s32.totalorder %v6310_v26, %v6254_v62 }
 0x102   : > { %11406 = vst [vmem:[#allocation25_spill] sm:$0xff] %v6359_v60  ;;  %vm1590_vm5 = vcmp.eq.s32.totalorder %v6284_v14, %v6235_v41  ;;  %vm1591_vm6 = vcmp.eq.s32.totalorder %v6284_v14, %v6254_v62 }
 0x103   : > { %11407 = vst [vmem:[#allocation26_spill] sm:$0xff] %v6362_v0  ;;  %v6441_v0 = vperm.slane %v699_v19, 7 }
 0x104   : > { %11408 = vst [vmem:[#allocation27_spill] sm:$0xff] %v6365_v4  ;;  %v6387_v4 = vperm.slane %v6242_v52, 5 }
 0x105   : > { %11409 = vst [vmem:[#allocation28_spill] sm:$0xff] %v6368_v12  ;;  %v6390_v12 = vperm.slane %v6251_v58, 5 }
 0x106   : > { %11410 = vst [vmem:[#allocation29_spill] sm:$0xff] %v6370_v46  ;;  %v6392_v46 = vperm.slane %v697_v18, 5 }
 0x107   : > { %11411 = vst [vmem:[#allocation30_spill] sm:$0xff] %v6373_v3  ;;  %v6395_v3 = vperm.slane %v6274_v8, 5 }
 0x108   : > { %11412 = vst [vmem:[#allocation31_spill] sm:$0xff] %v6375_v32  ;;  %v6397_v32 = vperm.slane %v699_v19, 5 }
 0x109   : > { %11413 = vst [vmem:[#allocation32_spill] sm:$0xff] %v6378_v61  ;;  %v6400_v61 = vperm.slane %v6276_v11, 5 }
 0x10a   : > { %11414 = vst [vmem:[#allocation33_spill] sm:$0xff] %v6381_v43  ;;  %v6403_v43 = vperm.slane %v6244_v53, 5 }
 0x10b   : > { %11415 = vst [vmem:[#allocation34_spill] sm:$0xff] %v6384_v34  ;;  %v6406_v34 = vperm.slane %v6256_v63, 5 }
 0x10c   : > { %11416 = vst [vmem:[#allocation35_spill] sm:$0xff] %v6387_v4  ;;  %v6409_v4 = vperm.slane %v6242_v52, 6 }
 0x10d   : > { %11417 = vst [vmem:[#allocation36_spill] sm:$0xff] %v6390_v12  ;;  %v6412_v12 = vperm.slane %v6251_v58, 6 }
 0x10e   : > { %11418 = vst [vmem:[#allocation37_spill] sm:$0xff] %v6392_v46  ;;  %v6414_v46 = vperm.slane %v697_v18, 6 }
 0x10f   : > { %11419 = vst [vmem:[#allocation38_spill] sm:$0xff] %v6395_v3  ;;  %v6417_v3 = vperm.slane %v6274_v8, 6 }
 0x110   : > { %11420 = vst [vmem:[#allocation39_spill] sm:$0xff] %v6397_v32  ;;  %v6419_v32 = vperm.slane %v699_v19, 6  ;;  %v6462_v19 = vperm.slane %v6267_v5, 0  ;;  %v1366_v5 = vsel %vm1324_vm9, %v6306_v24, 0.0  ;;  %vm844_vm9 = vcmp.eq.s32.totalorder %v6298_v23, %v6229_v36 }
 0x111   : > { %11421 = vst [vmem:[#allocation40_spill] sm:$0xff] %v6400_v61  ;;  %v6422_v61 = vperm.slane %v6276_v11, 6 }
 0x112   : > { %11422 = vst [vmem:[#allocation41_spill] sm:$0xff] %v6403_v43  ;;  %v6425_v43 = vperm.slane %v6244_v53, 6 }
 0x113   : > { %11423 = vst [vmem:[#allocation42_spill] sm:$0xff] %v6406_v34  ;;  %v6428_v34 = vperm.slane %v6256_v63, 6 }
 0x114   : > { %11424 = vst [vmem:[#allocation43_spill] sm:$0xff] %v6409_v4  ;;  %v6431_v4 = vperm.slane %v6242_v52, 7  ;;  %v6450_v52 = vperm.slane %v6256_v63, 7 }
 0x115   : > { %11425 = vst [vmem:[#allocation44_spill] sm:$0xff] %v6412_v12  ;;  %v6434_v12 = vperm.slane %v6251_v58, 7  ;;  %v6453_v58 = vperm.slane %v6238_v48, 0  ;;  %v6476_v48 = vperm.slane %v6240_v49, 0  ;;  %v1367_v49 = vsel %vm1325_vm10, %v6306_v24, 0.0 }
 0x116   : > { %11426 = vst [vmem:[#allocation45_spill] sm:$0xff] %v6414_v46  ;;  %v6436_v46 = vperm.slane %v697_v18, 7  ;;  %v6456_v18 = vperm.slane %v6247_v55, 0  ;;  %v6485_v55 = vperm.slane %v6249_v56, 0  ;;  %vm845_vm10 = vcmp.eq.s32.totalorder %v6298_v23, %v6232_v37 }
 0x117   : > { %11427 = vst [vmem:[#allocation46_spill] sm:$0xff] %v6417_v3  ;;  %v6439_v3 = vperm.slane %v6274_v8, 7  ;;  %v6459_v8 = vperm.slane %v6279_v15, 0 }
 0x118   : > { %11428 = vst [vmem:[#allocation47_spill] sm:$0xff] %v6419_v32  ;;  %v462_v32 = vpop.f32.mrf.mxu0 }
 0x119   : > { %11429 = vst [vmem:[#allocation48_spill] sm:$0xff] %v6422_v61  ;;  %v6444_v61 = vperm.slane %v6276_v11, 7  ;;  %v6465_v11 = vperm.slane %v6281_v20, 0  ;;  %v6471_v63 = vpack.c.bf16 %v6207_v29, %v462_v32  ;;  %v1282_v29 = vsel %vm1240_vm7, %v6303_v21, 0.0 }
 0x11a   : > { %11430 = vst [vmem:[#allocation49_spill] sm:$0xff] %v6425_v43  ;;  %v6447_v43 = vperm.slane %v6244_v53, 7  ;;  %v6468_v53 = vperm.slane %v6269_v6, 0  ;;  %v1283_v32 = vsel %vm1241_vm8, %v6303_v21, 0.0  ;;  %v1407_v6 = vadd.f32 %v1366_v5, %v1282_v29 }
 0x11b   : > { %11431 = vst [vmem:[#allocation50_spill] sm:$0xff] %v6428_v34  ;;  %v1408_v20 = vadd.f32 %v1367_v49, %v1283_v32  ;;  %v1616_v5 = vsel %vm1574_vm13, %v6316_v31, 0.0  ;;  %vm760_vm7 = vcmp.eq.s32.totalorder %v6259_v1, %v6229_v36  ;;  %vm761_vm8 = vcmp.eq.s32.totalorder %v6259_v1, %v6232_v37 }
 0x11c   : > { %11432 = vst [vmem:[#allocation51_spill] sm:$0xff] %v6431_v4  ;;  %vm1094_vm13 = vcmp.eq.s32.totalorder %v6262_v2, %v6229_v36 }
 0x11d   : > { %11433 = vst [vmem:[#allocation52_spill] sm:$0xff] %v6434_v12 }
 0x11e   : > { %11434 = vst [vmem:[#allocation53_spill] sm:$0xff] %v6436_v46 }
 0x11f   : > { %11435 = vst [vmem:[#allocation54_spill] sm:$0xff] %v6439_v3 }
 0x120   : > { %11436 = vst [vmem:[#allocation55_spill] sm:$0xff] %v6441_v0 }
 0x121   : > { %11437 = vst [vmem:[#allocation56_spill] sm:$0xff] %v6444_v61 }
 0x122   : > { %11438 = vst [vmem:[#allocation57_spill] sm:$0xff] %v6447_v43 }
 0x123   : > { %11439 = vst [vmem:[#allocation58_spill] sm:$0xff] %v6450_v52 }
 0x124   : > { %11440 = vst [vmem:[#allocation59_spill] sm:$0xff] %v6453_v58 }
 0x125   : > { %11441 = vst [vmem:[#allocation60_spill] sm:$0xff] %v6456_v18 }
 0x126   : > { %11442 = vst [vmem:[#allocation61_spill] sm:$0xff] %v6459_v8 }
 0x127   : > { %11443 = vst [vmem:[#allocation62_spill] sm:$0xff] %v6462_v19 }
 0x128   : > { %11444 = vst [vmem:[#allocation63_spill] sm:$0xff] %v6465_v11  ;;  %v1617_v11 = vsel %vm1575_vm14, %v6316_v31, 0.0  ;;  %vm1095_vm14 = vcmp.eq.s32.totalorder %v6262_v2, %v6232_v37 }
 0x129   : > { %11445 = vst [vmem:[#allocation64_spill] sm:$0xff] %v6468_v53 }
 0x12a   : > { %11446 = vst [vmem:[#allocation65_spill] sm:$0xff] %v6471_v63  ;;  %v1136_v63 = vsel %vm1094_vm13, %v6296_v17, 0.0 }
 0x12b   : > { %11447 = vst [vmem:[#allocation66_spill] sm:$0xff] %v6476_v48  ;;  %v1492_v48 = vsel %vm1450_vm12, %v6313_v27, 0.0  ;;  %vm970_vm12 = vcmp.eq.s32.totalorder %v6300_v13, %v6232_v37 }
 0x12c   : > { %11448 = vst [vmem:[#allocation67_spill] sm:$0xff] %v6485_v55  ;;  %v1491_v55 = vsel %vm1449_vm11, %v6313_v27, 0.0  ;;  %v1533_v29 = vadd.f32 %v1492_v48, %v1408_v20  ;;  %v1382_v48 = vsel %vm1340_vm1, %v6306_v24, 0.0  ;;  %v1383_v20 = vsel %vm1341_vm2, %v6306_v24, 0.0 }
 0x12d   : > { %v1532_v53 = vadd.f32 %v1491_v55, %v1407_v6  ;;  %v1298_v55 = vsel %vm1256_vm15, %v6303_v21, 0.0  ;;  %v1299_v6 = vsel %vm1257_vm0, %v6303_v21, 0.0  ;;  %vm969_vm11 = vcmp.eq.s32.totalorder %v6300_v13, %v6229_v36 }
 0x12e   : > { %v1658_v49 = vadd.f32 %v1617_v11, %v1533_v29  ;;  %v1423_v56 = vadd.f32 %v1382_v48, %v1298_v55  ;;  %v1507_v11 = vsel %vm1465_vm3, %v6313_v27, 0.0  ;;  %v1508_v29 = vsel %vm1466_vm4, %v6313_v27, 0.0 }
 0x12f   : > { %v1657_v32 = vadd.f32 %v1616_v5, %v1532_v53  ;;  %v1424_v5 = vadd.f32 %v1383_v20, %v1299_v6  ;;  %v1632_v48 = vsel %vm1590_vm5, %v6316_v31, 0.0  ;;  %v803_v6 = vsel %vm761_vm8, %v6287_v10, 0.0 }
 0x130   : > { %v1548_v15 = vadd.f32 %v1507_v11, %v1423_v56  ;;  %v802_v56 = vsel %vm760_vm7, %v6287_v10, 0.0  ;;  %vm776_vm15 = vcmp.eq.s32.totalorder %v6259_v1, %v6235_v41  ;;  %vm777_vm0 = vcmp.eq.s32.totalorder %v6259_v1, %v6254_v62 }
 0x131   : > { %v1691_v53 = vpack.c.bf16 %v1658_v49, %v1657_v32  ;;  %v1549_v55 = vadd.f32 %v1508_v29, %v1424_v5  ;;  %v1633_v32 = vsel %vm1591_vm6, %v6316_v31, 0.0  ;;  %v887_v5 = vsel %vm845_vm10, %v6290_v22, 0.0 }
 0x132   : > { %v1673_v49 = vadd.f32 %v1632_v48, %v1548_v15  ;;  %v1011_v15 = vsel %vm969_vm11, %v6293_v9, 0.0  ;;  %v928_v48 = vadd.f32 %v887_v5, %v803_v6  ;;  %vm860_vm1 = vcmp.eq.s32.totalorder %v6298_v23, %v6235_v41 }
 0x133   : > { %1723 = vmatpush.bf16.msra.mxu3 %v1691_v53  ;;  %v1674_v20 = vadd.f32 %v1633_v32, %v1549_v55  ;;  %v886_v53 = vsel %vm844_vm9, %v6290_v22, 0.0  ;;  %v1012_v55 = vsel %vm970_vm12, %v6293_v9, 0.0  ;;  %vm861_vm2 = vcmp.eq.s32.totalorder %v6298_v23, %v6254_v62 }
 0x134   : > { %v927_v11 = vadd.f32 %v886_v53, %v802_v56  ;;  %v1053_v56 = vadd.f32 %v1012_v55, %v928_v48  ;;  %v1137_v53 = vsel %vm1095_vm14, %v6296_v17, 0.0  ;;  %vm985_vm3 = vcmp.eq.s32.totalorder %v6300_v13, %v6235_v41 }
 0x135   : > { %v1699_v29 = vpack.c.bf16 %v1674_v20, %v1673_v49  ;;  %v818_v49 = vsel %vm776_vm15, %v6287_v10, 0.0  ;;  %v819_v20 = vsel %vm777_vm0, %v6287_v10, 0.0  ;;  %vm986_vm4 = vcmp.eq.s32.totalorder %v6300_v13, %v6254_v62 }
 0x136   : > { %v1052_v32 = vadd.f32 %v1011_v15, %v927_v11  ;;  %v1178_v5 = vadd.f32 %v1137_v53, %v1053_v56  ;;  %v902_v11 = vsel %vm860_vm1, %v6290_v22, 0.0  ;;  %v903_v15 = vsel %vm861_vm2, %v6290_v22, 0.0 }
 0x137   : > { %1736 = vmatpush.bf16.msrb.mxu0 %v1699_v29  ;;  %v943_v29 = vadd.f32 %v902_v11, %v818_v49  ;;  %v944_v48 = vadd.f32 %v903_v15, %v819_v20  ;;  %vm1110_vm5 = vcmp.eq.s32.totalorder %v6262_v2, %v6235_v41  ;;  %vm1111_vm6 = vcmp.eq.s32.totalorder %v6262_v2, %v6254_v62 }
 0x138   : > { %v1177_v6 = vadd.f32 %v1136_v63, %v1052_v32  ;;  %v1027_v63 = vsel %vm985_vm3, %v6293_v9, 0.0  ;;  %v1028_v32 = vsel %vm986_vm4, %v6293_v9, 0.0  ;;  %v1152_v19 = vsel %vm1110_vm5, %v6296_v17, 0.0 }
 0x139   : > { %v1068_v56 = vadd.f32 %v1027_v63, %v943_v29  ;;  %v1069_v53 = vadd.f32 %v1028_v32, %v944_v48  ;;  %v1153_v49 = vsel %vm1111_vm6, %v6296_v17, 0.0  ;;  %v6578_v20 = vadd.s32 96, %v6222_v16 }
 0x13a   : > { %v1211_v55 = vpack.c.bf16 %v1178_v5, %v1177_v6  ;;  %v6581_v6 = vadd.s32 104, %v6222_v16  ;;  %v6584_v5 = vadd.s32 224, %v6222_v16  ;;  %v6587_v11 = vadd.s32 232, %v6222_v16 }
 0x13b   : > { %11449 = vst [vmem:[#allocation68_spill] sm:$0xff] %v6578_v20  ;;  %v1193_v15 = vadd.f32 %v1152_v19, %v1068_v56  ;;  %v1194_v29 = vadd.f32 %v1153_v49, %v1069_v53  ;;  %v6590_v48 = vadd.s32 80, %v6222_v16  ;;  %v6593_v63 = vadd.s32 88, %v6222_v16 }
 0x13c   : > { %1778 = vmatpush.bf16.msrb.mxu1 %v1211_v55  ;;  %11450 = vst [vmem:[#allocation69_spill] sm:$0xff] %v6581_v6  ;;  %vm1238_vm7 = vcmp.eq.s32.totalorder %v6272_v7, %v6578_v20  ;;  %vm1239_vm8 = vcmp.eq.s32.totalorder %v6272_v7, %v6581_v6  ;;  %vm1322_vm9 = vcmp.eq.s32.totalorder %v6308_v25, %v6578_v20 }
 0x13d   : > { %11451 = vst [vmem:[#allocation70_spill] sm:$0xff] %v6584_v5  ;;  %vm1323_vm10 = vcmp.eq.s32.totalorder %v6308_v25, %v6581_v6  ;;  %v1219_v19 = vpack.c.bf16 %v1194_v29, %v1193_v15  ;;  %v1280_v55 = vsel %vm1238_vm7, %v6303_v21, 0.0  ;;  %v1281_v32 = vsel %vm1239_vm8, %v6303_v21, 0.0 }
 0x13e   : > { %11452 = vst [vmem:[#allocation71_spill] sm:$0xff] %v6587_v11  ;;  %v1364_v56 = vsel %vm1322_vm9, %v6306_v24, 0.0  ;;  %v1365_v53 = vsel %vm1323_vm10, %v6306_v24, 0.0  ;;  %vm1447_vm11 = vcmp.eq.s32.totalorder %v6310_v26, %v6578_v20  ;;  %vm1448_vm12 = vcmp.eq.s32.totalorder %v6310_v26, %v6581_v6 }
 0x13f   : > { %11453 = vst [vmem:[#allocation72_spill] sm:$0xff] %v6590_v48  ;;  %v1405_v49 = vadd.f32 %v1364_v56, %v1280_v55  ;;  %1791 = vmatpush.bf16.msrb.mxu2 %v1219_v19  ;;  %v1406_v18 = vadd.f32 %v1365_v53, %v1281_v32  ;;  %v1489_v8 = vsel %vm1447_vm11, %v6313_v27, 0.0  ;;  %v1490_v15 = vsel %vm1448_vm12, %v6313_v27, 0.0 }
 0x140   : > { %11454 = vst [vmem:[#allocation73_spill] sm:$0xff] %v6593_v63  ;;  %vm1572_vm13 = vcmp.eq.s32.totalorder %v6284_v14, %v6578_v20  ;;  %vm1573_vm14 = vcmp.eq.s32.totalorder %v6284_v14, %v6581_v6  ;;  %vm1254_vm15 = vcmp.eq.s32.totalorder %v6272_v7, %v6584_v5  ;;  %vm1255_vm0 = vcmp.eq.s32.totalorder %v6272_v7, %v6587_v11 }
 0x141   : > { %v1530_v29 = vadd.f32 %v1489_v8, %v1405_v49  ;;  %v1614_v55 = vsel %vm1572_vm13, %v6316_v31, 0.0  ;;  %v1531_v56 = vadd.f32 %v1490_v15, %v1406_v18  ;;  %v1615_v19 = vsel %vm1573_vm14, %v6316_v31, 0.0 }
 0x142   : > { %v1296_v32 = vsel %vm1254_vm15, %v6303_v21, 0.0  ;;  %v1297_v58 = vsel %vm1255_vm0, %v6303_v21, 0.0  ;;  %vm1338_vm1 = vcmp.eq.s32.totalorder %v6308_v25, %v6584_v5  ;;  %vm1339_vm2 = vcmp.eq.s32.totalorder %v6308_v25, %v6587_v11 }
 0x143   : > { %v1655_v53 = vadd.f32 %v1614_v55, %v1530_v29  ;;  %v1656_v8 = vadd.f32 %v1615_v19, %v1531_v56  ;;  %v1380_v49 = vsel %vm1338_vm1, %v6306_v24, 0.0  ;;  %v1381_v18 = vsel %vm1339_vm2, %v6306_v24, 0.0 }
 0x144   : > { %vm1463_vm3 = vcmp.eq.s32.totalorder %v6310_v26, %v6584_v5  ;;  %v1421_v15 = vadd.f32 %v1380_v49, %v1296_v32  ;;  %v1422_v52 = vadd.f32 %v1381_v18, %v1297_v58  ;;  %vm1464_vm4 = vcmp.eq.s32.totalorder %v6310_v26, %v6587_v11 }
 0x145   : > { %v1505_v29 = vsel %vm1463_vm3, %v6313_v27, 0.0  ;;  %v1690_v55 = vpack.c.bf16 %v1656_v8, %v1655_v53  ;;  %v1506_v43 = vsel %vm1464_vm4, %v6313_v27, 0.0  ;;  %vm1588_vm5 = vcmp.eq.s32.totalorder %v6284_v14, %v6584_v5 }
 0x146   : > { %vm1589_vm6 = vcmp.eq.s32.totalorder %v6284_v14, %v6587_v11  ;;  %v1546_v56 = vadd.f32 %v1505_v29, %v1421_v15  ;;  %v1547_v19 = vadd.f32 %v1506_v43, %v1422_v52  ;;  %v1630_v61 = vsel %vm1588_vm5, %v6316_v31, 0.0 }
 0x147   : > { %v1631_v58 = vsel %vm1589_vm6, %v6316_v31, 0.0  ;;  %1724 = vmatpush.bf16.msra.mxu3 %v1690_v55  ;;  %vm758_vm7 = vcmp.eq.s32.totalorder %v6259_v1, %v6578_v20  ;;  %vm759_vm8 = vcmp.eq.s32.totalorder %v6259_v1, %v6581_v6  ;;  %vm842_vm9 = vcmp.eq.s32.totalorder %v6298_v23, %v6578_v20 }
 0x148   : > { %vm843_vm10 = vcmp.eq.s32.totalorder %v6298_v23, %v6581_v6  ;;  %v1671_v32 = vadd.f32 %v1630_v61, %v1546_v56  ;;  %v1672_v53 = vadd.f32 %v1631_v58, %v1547_v19  ;;  %v800_v43 = vsel %vm758_vm7, %v6287_v10, 0.0 }
 0x149   : > { %v801_v52 = vsel %vm759_vm8, %v6287_v10, 0.0  ;;  %v884_v8 = vsel %vm842_vm9, %v6290_v22, 0.0  ;;  %v885_v49 = vsel %vm843_vm10, %v6290_v22, 0.0  ;;  %vm967_vm11 = vcmp.eq.s32.totalorder %v6300_v13, %v6578_v20 }
 0x14a   : > { %vm968_vm12 = vcmp.eq.s32.totalorder %v6300_v13, %v6581_v6  ;;  %v1698_v18 = vpack.c.bf16 %v1672_v53, %v1671_v32  ;;  %v925_v15 = vadd.f32 %v884_v8, %v800_v43  ;;  %v926_v29 = vadd.f32 %v885_v49, %v801_v52 }
 0x14b   : > { %v1009_v61 = vsel %vm967_vm11, %v6293_v9, 0.0  ;;  %v1010_v55 = vsel %vm968_vm12, %v6293_v9, 0.0  ;;  %vm1092_vm13 = vcmp.eq.s32.totalorder %v6262_v2, %v6578_v20  ;;  %vm1093_vm14 = vcmp.eq.s32.totalorder %v6262_v2, %v6581_v6 }
 0x14c   : > { %vm774_vm15 = vcmp.eq.s32.totalorder %v6259_v1, %v6584_v5  ;;  %1737 = vmatpush.bf16.msrb.mxu0 %v1698_v18  ;;  %v1050_v56 = vadd.f32 %v1009_v61, %v925_v15  ;;  %v1051_v19 = vadd.f32 %v1010_v55, %v926_v29  ;;  %v1134_v58 = vsel %vm1092_vm13, %v6296_v17, 0.0 }
 0x14d   : > { %v1135_v32 = vsel %vm1093_vm14, %v6296_v17, 0.0  ;;  %vm775_vm0 = vcmp.eq.s32.totalorder %v6259_v1, %v6587_v11  ;;  %v816_v53 = vsel %vm774_vm15, %v6287_v10, 0.0  ;;  %vm858_vm1 = vcmp.eq.s32.totalorder %v6298_v23, %v6584_v5 }
 0x14e   : > { %vm859_vm2 = vcmp.eq.s32.totalorder %v6298_v23, %v6587_v11  ;;  %v1175_v43 = vadd.f32 %v1134_v58, %v1050_v56  ;;  %v1176_v52 = vadd.f32 %v1135_v32, %v1051_v19  ;;  %v817_v8 = vsel %vm775_vm0, %v6287_v10, 0.0 }
 0x14f   : > { %v900_v49 = vsel %vm858_vm1, %v6290_v22, 0.0  ;;  %v901_v18 = vsel %vm859_vm2, %v6290_v22, 0.0  ;;  %vm983_vm3 = vcmp.eq.s32.totalorder %v6300_v13, %v6584_v5  ;;  %vm984_vm4 = vcmp.eq.s32.totalorder %v6300_v13, %v6587_v11 }
 0x150   : > { %v941_v15 = vadd.f32 %v900_v49, %v816_v53  ;;  %v1210_v29 = vpack.c.bf16 %v1176_v52, %v1175_v43  ;;  %v942_v61 = vadd.f32 %v901_v18, %v817_v8  ;;  %v1025_v55 = vsel %vm983_vm3, %v6293_v9, 0.0 }
 0x151   : > { %v1026_v56 = vsel %vm984_vm4, %v6293_v9, 0.0  ;;  %vm1108_vm5 = vcmp.eq.s32.totalorder %v6262_v2, %v6584_v5  ;;  %vm1109_vm6 = vcmp.eq.s32.totalorder %v6262_v2, %v6587_v11  ;;  %vm1236_vm7 = vcmp.eq.s32.totalorder %v6272_v7, %v6590_v48 }
 0x152   : > { %v1066_v19 = vadd.f32 %v1025_v55, %v941_v15  ;;  %1779 = vmatpush.bf16.msrb.mxu1 %v1210_v29  ;;  %v1067_v58 = vadd.f32 %v1026_v56, %v942_v61  ;;  %v1150_v32 = vsel %vm1108_vm5, %v6296_v17, 0.0  ;;  %v1151_v53 = vsel %vm1109_vm6, %v6296_v17, 0.0 }
 0x153   : > { %vm1237_vm8 = vcmp.eq.s32.totalorder %v6272_v7, %v6593_v63  ;;  %v1278_v52 = vsel %vm1236_vm7, %v6303_v21, 0.0  ;;  %vm1320_vm9 = vcmp.eq.s32.totalorder %v6308_v25, %v6590_v48  ;;  %vm1321_vm10 = vcmp.eq.s32.totalorder %v6308_v25, %v6593_v63 }
 0x154   : > { %v1191_v43 = vadd.f32 %v1150_v32, %v1066_v19  ;;  %v1279_v8 = vsel %vm1237_vm8, %v6303_v21, 0.0  ;;  %v1192_v49 = vadd.f32 %v1151_v53, %v1067_v58  ;;  %v1362_v18 = vsel %vm1320_vm9, %v6306_v24, 0.0 }
 0x155   : > { %vm1445_vm11 = vcmp.eq.s32.totalorder %v6310_v26, %v6590_v48  ;;  %v1363_v15 = vsel %vm1321_vm10, %v6306_v24, 0.0  ;;  %v1403_v29 = vadd.f32 %v1362_v18, %v1278_v52  ;;  %vm1446_vm12 = vcmp.eq.s32.totalorder %v6310_v26, %v6593_v63 }
 0x156   : > { %v1487_v61 = vsel %vm1445_vm11, %v6313_v27, 0.0  ;;  %v1218_v55 = vpack.c.bf16 %v1192_v49, %v1191_v43  ;;  %v1404_v56 = vadd.f32 %v1363_v15, %v1279_v8  ;;  %v1488_v19 = vsel %vm1446_vm12, %v6313_v27, 0.0 }
 0x157   : > { %vm1570_vm13 = vcmp.eq.s32.totalorder %v6284_v14, %v6590_v48  ;;  %v1528_v58 = vadd.f32 %v1487_v61, %v1403_v29  ;;  %vm1571_vm14 = vcmp.eq.s32.totalorder %v6284_v14, %v6593_v63  ;;  %v6715_v53 = vadd.s32 208, %v6222_v16 }
 0x158   : > { %v1612_v32 = vsel %vm1570_vm13, %v6316_v31, 0.0  ;;  %1792 = vmatpush.bf16.msrb.mxu2 %v1218_v55  ;;  %v1529_v52 = vadd.f32 %v1488_v19, %v1404_v56  ;;  %v1613_v18 = vsel %vm1571_vm14, %v6316_v31, 0.0  ;;  %v6719_v43 = vadd.s32 216, %v6222_v16 }
 0x159   : > { %11455 = vst [vmem:[#allocation74_spill] sm:$0xff] %v6715_v53  ;;  %vm756_vm15 = vcmp.eq.s32.totalorder %v6259_v1, %v6590_v48  ;;  %v1653_v8 = vadd.f32 %v1612_v32, %v1528_v58  ;;  %vm1252_vm0 = vcmp.eq.s32.totalorder %v6272_v7, %v6715_v53  ;;  %vm1336_vm1 = vcmp.eq.s32.totalorder %v6308_v25, %v6715_v53 }
 0x15a   : > { %11456 = vst [vmem:[#allocation75_spill] sm:$0xff] %v6719_v43  ;;  %vm1461_vm2 = vcmp.eq.s32.totalorder %v6310_v26, %v6715_v53  ;;  %v1654_v49 = vadd.f32 %v1613_v18, %v1529_v52  ;;  %vm1253_vm3 = vcmp.eq.s32.totalorder %v6272_v7, %v6719_v43  ;;  %v1294_v15 = vsel %vm1252_vm0, %v6303_v21, 0.0 }
 0x15b   : > { %vm1337_vm4 = vcmp.eq.s32.totalorder %v6308_v25, %v6719_v43  ;;  %v1295_v29 = vsel %vm1253_vm3, %v6303_v21, 0.0  ;;  %v1378_v61 = vsel %vm1336_vm1, %v6306_v24, 0.0  ;;  %vm1462_vm5 = vcmp.eq.s32.totalorder %v6310_v26, %v6719_v43 }
 0x15c   : > { %v1379_v55 = vsel %vm1337_vm4, %v6306_v24, 0.0  ;;  %v1689_v56 = vpack.c.bf16 %v1654_v49, %v1653_v8  ;;  %v1419_v19 = vadd.f32 %v1378_v61, %v1294_v15  ;;  %v1503_v32 = vsel %vm1461_vm2, %v6313_v27, 0.0 }
 0x15d   : > { %v1420_v58 = vadd.f32 %v1379_v55, %v1295_v29  ;;  %v1504_v52 = vsel %vm1462_vm5, %v6313_v27, 0.0  ;;  %vm1586_vm6 = vcmp.eq.s32.totalorder %v6284_v14, %v6715_v53  ;;  %vm1587_vm7 = vcmp.eq.s32.totalorder %v6284_v14, %v6719_v43 }
 0x15e   : > { %vm757_vm8 = vcmp.eq.s32.totalorder %v6259_v1, %v6593_v63  ;;  %1725 = vmatpush.bf16.msra.mxu3 %v1689_v56  ;;  %v1544_v18 = vadd.f32 %v1503_v32, %v1419_v19  ;;  %v1628_v8 = vsel %vm1586_vm6, %v6316_v31, 0.0  ;;  %v1629_v49 = vsel %vm1587_vm7, %v6316_v31, 0.0 }
 0x15f   : > { %v1545_v0 = vadd.f32 %v1504_v52, %v1420_v58  ;;  %v798_v15 = vsel %vm756_vm15, %v6287_v10, 0.0  ;;  %v799_v29 = vsel %vm757_vm8, %v6287_v10, 0.0  ;;  %vm840_vm9 = vcmp.eq.s32.totalorder %v6298_v23, %v6590_v48 }
 0x160   : > { %vm841_vm10 = vcmp.eq.s32.totalorder %v6298_v23, %v6593_v63  ;;  %v1669_v61 = vadd.f32 %v1628_v8, %v1544_v18  ;;  %v882_v56 = vsel %vm840_vm9, %v6290_v22, 0.0  ;;  %vm965_vm11 = vcmp.eq.s32.totalorder %v6300_v13, %v6590_v48 }
 0x161   : > { %v1670_v55 = vadd.f32 %v1629_v49, %v1545_v0  ;;  %v883_v19 = vsel %vm841_vm10, %v6290_v22, 0.0  ;;  %v923_v58 = vadd.f32 %v882_v56, %v798_v15  ;;  %vm966_vm12 = vcmp.eq.s32.totalorder %v6300_v13, %v6593_v63 }
 0x162   : > { %v924_v32 = vadd.f32 %v883_v19, %v799_v29  ;;  %v1007_v3 = vsel %vm965_vm11, %v6293_v9, 0.0  ;;  %v1008_v46 = vsel %vm966_vm12, %v6293_v9, 0.0  ;;  %vm1090_vm13 = vcmp.eq.s32.totalorder %v6262_v2, %v6590_v48 }
 0x163   : > { %v1697_v52 = vpack.c.bf16 %v1670_v55, %v1669_v61  ;;  %v1048_v0 = vadd.f32 %v1007_v3, %v923_v58  ;;  %vm1091_vm14 = vcmp.eq.s32.totalorder %v6262_v2, %v6593_v63  ;;  %v1132_v8 = vsel %vm1090_vm13, %v6296_v17, 0.0 }
 0x164   : > { %v1049_v18 = vadd.f32 %v1008_v46, %v924_v32  ;;  %v1133_v49 = vsel %vm1091_vm14, %v6296_v17, 0.0  ;;  %vm772_vm15 = vcmp.eq.s32.totalorder %v6259_v1, %v6715_v53  ;;  %vm773_vm0 = vcmp.eq.s32.totalorder %v6259_v1, %v6719_v43 }
 0x165   : > { %1738 = vmatpush.bf16.msrb.mxu0 %v1697_v52  ;;  %vm856_vm1 = vcmp.eq.s32.totalorder %v6298_v23, %v6715_v53  ;;  %v1173_v15 = vadd.f32 %v1132_v8, %v1048_v0  ;;  %v814_v46 = vsel %vm772_vm15, %v6287_v10, 0.0  ;;  %v815_v29 = vsel %vm773_vm0, %v6287_v10, 0.0 }
 0x166   : > { %v1174_v3 = vadd.f32 %v1133_v49, %v1049_v18  ;;  %vm857_vm2 = vcmp.eq.s32.totalorder %v6298_v23, %v6719_v43  ;;  %v898_v61 = vsel %vm856_vm1, %v6290_v22, 0.0  ;;  %vm981_vm3 = vcmp.eq.s32.totalorder %v6300_v13, %v6715_v53 }
 0x167   : > { %vm982_vm4 = vcmp.eq.s32.totalorder %v6300_v13, %v6719_v43  ;;  %v899_v56 = vsel %vm857_vm2, %v6290_v22, 0.0  ;;  %v939_v19 = vadd.f32 %v898_v61, %v814_v46  ;;  %v1023_v58 = vsel %vm981_vm3, %v6293_v9, 0.0 }
 0x168   : > { %v1209_v55 = vpack.c.bf16 %v1174_v3, %v1173_v15  ;;  %v940_v32 = vadd.f32 %v899_v56, %v815_v29  ;;  %v1024_v52 = vsel %vm982_vm4, %v6293_v9, 0.0  ;;  %vm1106_vm5 = vcmp.eq.s32.totalorder %v6262_v2, %v6715_v53 }
 0x169   : > { %vm1107_vm6 = vcmp.eq.s32.totalorder %v6262_v2, %v6719_v43  ;;  %v1064_v0 = vadd.f32 %v1023_v58, %v939_v19  ;;  %v1148_v18 = vsel %vm1106_vm5, %v6296_v17, 0.0  ;;  %v6797_v49 = vadd.s32 64, %v6222_v16 }
 0x16a   : > { %1780 = vmatpush.bf16.msrb.mxu1 %v1209_v55  ;;  %v1149_v8 = vsel %vm1107_vm6, %v6296_v17, 0.0  ;;  %v1065_v15 = vadd.f32 %v1024_v52, %v940_v32  ;;  %v6800_v3 = vadd.s32 72, %v6222_v16  ;;  %v6803_v46 = vadd.s32 192, %v6222_v16 }
 0x16b   : > { %11457 = vst [vmem:[#allocation76_spill] sm:$0xff] %v6797_v49  ;;  %v6806_v29 = vadd.s32 200, %v6222_v16  ;;  %v1189_v61 = vadd.f32 %v1148_v18, %v1064_v0  ;;  %vm1234_vm7 = vcmp.eq.s32.totalorder %v6272_v7, %v6797_v49  ;;  %vm1318_vm8 = vcmp.eq.s32.totalorder %v6308_v25, %v6797_v49 }
 0x16c   : > { %11458 = vst [vmem:[#allocation77_spill] sm:$0xff] %v6800_v3  ;;  %vm1443_vm9 = vcmp.eq.s32.totalorder %v6310_v26, %v6797_v49  ;;  %v1190_v55 = vadd.f32 %v1149_v8, %v1065_v15  ;;  %vm1235_vm10 = vcmp.eq.s32.totalorder %v6272_v7, %v6800_v3  ;;  %v1276_v56 = vsel %vm1234_vm7, %v6303_v21, 0.0 }
 0x16d   : > { %11459 = vst [vmem:[#allocation78_spill] sm:$0xff] %v6803_v46  ;;  %vm1319_vm11 = vcmp.eq.s32.totalorder %v6308_v25, %v6800_v3  ;;  %v1277_v19 = vsel %vm1235_vm10, %v6303_v21, 0.0  ;;  %v1360_v58 = vsel %vm1318_vm8, %v6306_v24, 0.0  ;;  %vm1444_vm12 = vcmp.eq.s32.totalorder %v6310_v26, %v6800_v3 }
 0x16e   : > { %11460 = vst [vmem:[#allocation79_spill] sm:$0xff] %v6806_v29  ;;  %v1361_v32 = vsel %vm1319_vm11, %v6306_v24, 0.0  ;;  %v1217_v52 = vpack.c.bf16 %v1190_v55, %v1189_v61  ;;  %v1401_v0 = vadd.f32 %v1360_v58, %v1276_v56  ;;  %v1485_v8 = vsel %vm1443_vm9, %v6313_v27, 0.0 }
 0x16f   : > { %v1402_v18 = vadd.f32 %v1361_v32, %v1277_v19  ;;  %v1486_v15 = vsel %vm1444_vm12, %v6313_v27, 0.0  ;;  %vm1568_vm13 = vcmp.eq.s32.totalorder %v6284_v14, %v6797_v49  ;;  %vm1569_vm14 = vcmp.eq.s32.totalorder %v6284_v14, %v6800_v3 }
 0x170   : > { %vm1250_vm15 = vcmp.eq.s32.totalorder %v6272_v7, %v6803_v46  ;;  %1793 = vmatpush.bf16.msrb.mxu2 %v1217_v52  ;;  %v1526_v12 = vadd.f32 %v1485_v8, %v1401_v0  ;;  %v1610_v61 = vsel %vm1568_vm13, %v6316_v31, 0.0  ;;  %v1611_v55 = vsel %vm1569_vm14, %v6316_v31, 0.0 }
 0x171   : > { %v1527_v4 = vadd.f32 %v1486_v15, %v1402_v18  ;;  %vm1251_vm0 = vcmp.eq.s32.totalorder %v6272_v7, %v6806_v29  ;;  %v1292_v56 = vsel %vm1250_vm15, %v6303_v21, 0.0  ;;  %vm1334_vm1 = vcmp.eq.s32.totalorder %v6308_v25, %v6803_v46 }
 0x172   : > { %vm1335_vm2 = vcmp.eq.s32.totalorder %v6308_v25, %v6806_v29  ;;  %v1651_v19 = vadd.f32 %v1610_v61, %v1526_v12  ;;  %v1293_v32 = vsel %vm1251_vm0, %v6303_v21, 0.0  ;;  %v1376_v52 = vsel %vm1334_vm1, %v6306_v24, 0.0 }
 0x173   : > { %v1652_v58 = vadd.f32 %v1611_v55, %v1527_v4  ;;  %v1377_v0 = vsel %vm1335_vm2, %v6306_v24, 0.0  ;;  %v1417_v18 = vadd.f32 %v1376_v52, %v1292_v56  ;;  %vm1459_vm3 = vcmp.eq.s32.totalorder %v6310_v26, %v6803_v46 }
 0x174   : > { %vm1460_vm4 = vcmp.eq.s32.totalorder %v6310_v26, %v6806_v29  ;;  %v1418_v15 = vadd.f32 %v1377_v0, %v1293_v32  ;;  %v1501_v34 = vsel %vm1459_vm3, %v6313_v27, 0.0  ;;  %vm1584_vm5 = vcmp.eq.s32.totalorder %v6284_v14, %v6803_v46 }
 0x175   : > { %v1688_v8 = vpack.c.bf16 %v1652_v58, %v1651_v19  ;;  %v1502_v12 = vsel %vm1460_vm4, %v6313_v27, 0.0  ;;  %v1542_v4 = vadd.f32 %v1501_v34, %v1417_v18  ;;  %vm1585_vm6 = vcmp.eq.s32.totalorder %v6284_v14, %v6806_v29 }
 0x176   : > { %vm754_vm7 = vcmp.eq.s32.totalorder %v6259_v1, %v6797_v49  ;;  %v1543_v61 = vadd.f32 %v1502_v12, %v1418_v15  ;;  %v1626_v55 = vsel %vm1584_vm5, %v6316_v31, 0.0  ;;  %v1627_v56 = vsel %vm1585_vm6, %v6316_v31, 0.0 }
 0x177   : > { %1726 = vmatpush.bf16.msra.mxu3 %v1688_v8  ;;  %vm755_vm8 = vcmp.eq.s32.totalorder %v6259_v1, %v6800_v3  ;;  %v1667_v19 = vadd.f32 %v1626_v55, %v1542_v4  ;;  %v796_v34 = vsel %vm754_vm7, %v6287_v10, 0.0  ;;  %vm838_vm9 = vcmp.eq.s32.totalorder %v6298_v23, %v6797_v49 }
 0x178   : > { %v797_v58 = vsel %vm755_vm8, %v6287_v10, 0.0  ;;  %v1668_v32 = vadd.f32 %v1627_v56, %v1543_v61  ;;  %vm839_vm10 = vcmp.eq.s32.totalorder %v6298_v23, %v6800_v3  ;;  %v880_v52 = vsel %vm838_vm9, %v6290_v22, 0.0 }
 0x179   : > { %vm963_vm11 = vcmp.eq.s32.totalorder %v6300_v13, %v6797_v49  ;;  %v881_v0 = vsel %vm839_vm10, %v6290_v22, 0.0  ;;  %v921_v18 = vadd.f32 %v880_v52, %v796_v34  ;;  %vm964_vm12 = vcmp.eq.s32.totalorder %v6300_v13, %v6800_v3 }
 0x17a   : > { %v1005_v8 = vsel %vm963_vm11, %v6293_v9, 0.0  ;;  %v1696_v15 = vpack.c.bf16 %v1668_v32, %v1667_v19  ;;  %v922_v12 = vadd.f32 %v881_v0, %v797_v58  ;;  %v1006_v4 = vsel %vm964_vm12, %v6293_v9, 0.0 }
 0x17b   : > { %vm1088_vm13 = vcmp.eq.s32.totalorder %v6262_v2, %v6797_v49  ;;  %v1046_v61 = vadd.f32 %v1005_v8, %v921_v18  ;;  %vm1089_vm14 = vcmp.eq.s32.totalorder %v6262_v2, %v6800_v3  ;;  %vm770_vm15 = vcmp.eq.s32.totalorder %v6259_v1, %v6803_v46 }
 0x17c   : > { %v1130_v55 = vsel %vm1088_vm13, %v6296_v17, 0.0  ;;  %1739 = vmatpush.bf16.msrb.mxu0 %v1696_v15  ;;  %v1047_v56 = vadd.f32 %v1006_v4, %v922_v12  ;;  %v1131_v34 = vsel %vm1089_vm14, %v6296_v17, 0.0  ;;  %vm771_vm0 = vcmp.eq.s32.totalorder %v6259_v1, %v6806_v29 }
 0x17d   : > { %v812_v19 = vsel %vm770_vm15, %v6287_v10, 0.0  ;;  %v1171_v58 = vadd.f32 %v1130_v55, %v1046_v61  ;;  %v813_v32 = vsel %vm771_vm0, %v6287_v10, 0.0  ;;  %vm854_vm1 = vcmp.eq.s32.totalorder %v6298_v23, %v6803_v46 }
 0x17e   : > { %vm855_vm2 = vcmp.eq.s32.totalorder %v6298_v23, %v6806_v29  ;;  %v1172_v52 = vadd.f32 %v1131_v34, %v1047_v56  ;;  %v896_v0 = vsel %vm854_vm1, %v6290_v22, 0.0  ;;  %vm979_vm3 = vcmp.eq.s32.totalorder %v6300_v13, %v6803_v46 }
 0x17f   : > { %v897_v18 = vsel %vm855_vm2, %v6290_v22, 0.0  ;;  %v937_v8 = vadd.f32 %v896_v0, %v812_v19  ;;  %vm980_vm4 = vcmp.eq.s32.totalorder %v6300_v13, %v6806_v29  ;;  %v1021_v12 = vsel %vm979_vm3, %v6293_v9, 0.0 }
 0x180   : > { %v938_v15 = vadd.f32 %v897_v18, %v813_v32  ;;  %v1208_v4 = vpack.c.bf16 %v1172_v52, %v1171_v58  ;;  %v1022_v61 = vsel %vm980_vm4, %v6293_v9, 0.0  ;;  %vm1104_vm5 = vcmp.eq.s32.totalorder %v6262_v2, %v6803_v46  ;;  %v482_v18 = vpop.f32.mrf.mxu1 }
 0x181   : > { %vm1105_vm6 = vcmp.eq.s32.totalorder %v6262_v2, %v6806_v29  ;;  %v1062_v55 = vadd.f32 %v1021_v12, %v937_v8  ;;  %v1146_v34 = vsel %vm1104_vm5, %v6296_v17, 0.0  ;;  %v6905_v32 = vadd.s32 48, %v6222_v16 }
 0x182   : > { %v1063_v56 = vadd.f32 %v1022_v61, %v938_v15  ;;  %v1147_v19 = vsel %vm1105_vm6, %v6296_v17, 0.0  ;;  %1781 = vmatpush.bf16.msrb.mxu1 %v1208_v4  ;;  %v6908_v58 = vadd.s32 56, %v6222_v16  ;;  %v6911_v52 = vadd.s32 176, %v6222_v16 }
 0x183   : > { %11461 = vst [vmem:[#allocation80_spill] sm:$0xff] %v6905_v32  ;;  %v6914_v0 = vadd.s32 184, %v6222_v16  ;;  %v1187_v8 = vadd.f32 %v1146_v34, %v1062_v55  ;;  %v6917_v12 = vpack.c.bf16 %v482_v18, %v6204_v28  ;;  %v6920_v4 = vadd.s32 32, %v6222_v16 }
 0x184   : > { %11462 = vst [vmem:[#allocation81_spill] sm:$0xff] %v6908_v58  ;;  %v1188_v15 = vadd.f32 %v1147_v19, %v1063_v56  ;;  %vm1232_vm7 = vcmp.eq.s32.totalorder %v6272_v7, %v6905_v32  ;;  %vm1233_vm8 = vcmp.eq.s32.totalorder %v6272_v7, %v6908_v58  ;;  %vm1316_vm9 = vcmp.eq.s32.totalorder %v6308_v25, %v6905_v32 }
 0x185   : > { %11463 = vst [vmem:[#allocation82_spill] sm:$0xff] %v6911_v52  ;;  %vm1317_vm10 = vcmp.eq.s32.totalorder %v6308_v25, %v6908_v58  ;;  %v1274_v55 = vsel %vm1232_vm7, %v6303_v21, 0.0  ;;  %v1275_v28 = vsel %vm1233_vm8, %v6303_v21, 0.0  ;;  %v1358_v56 = vsel %vm1316_vm9, %v6306_v24, 0.0 }
 0x186   : > { %11464 = vst [vmem:[#allocation83_spill] sm:$0xff] %v6914_v0  ;;  %v1216_v61 = vpack.c.bf16 %v1188_v15, %v1187_v8  ;;  %v1359_v34 = vsel %vm1317_vm10, %v6306_v24, 0.0  ;;  %v1399_v19 = vadd.f32 %v1358_v56, %v1274_v55  ;;  %vm1441_vm11 = vcmp.eq.s32.totalorder %v6310_v26, %v6905_v32 }
 0x187   : > { %11465 = vst [vmem:[#allocation84_spill] sm:$0xff] %v6920_v4  ;;  %vm1442_vm12 = vcmp.eq.s32.totalorder %v6310_v26, %v6908_v58  ;;  %v1400_v18 = vadd.f32 %v1359_v34, %v1275_v28  ;;  %v1483_v60 = vsel %vm1441_vm11, %v6313_v27, 0.0  ;;  %vm1566_vm13 = vcmp.eq.s32.totalorder %v6284_v14, %v6905_v32 }
 0x188   : > { %1794 = vmatpush.bf16.msrb.mxu2 %v1216_v61  ;;  %v1484_v8 = vsel %vm1442_vm12, %v6313_v27, 0.0  ;;  %v1524_v15 = vadd.f32 %v1483_v60, %v1399_v19  ;;  %vm1567_vm14 = vcmp.eq.s32.totalorder %v6284_v14, %v6908_v58  ;;  %v1608_v55 = vsel %vm1566_vm13, %v6316_v31, 0.0 }
 0x189   : > { %vm1248_vm15 = vcmp.eq.s32.totalorder %v6272_v7, %v6911_v52  ;;  %v1525_v56 = vadd.f32 %v1484_v8, %v1400_v18  ;;  %v1609_v61 = vsel %vm1567_vm14, %v6316_v31, 0.0  ;;  %vm1249_vm0 = vcmp.eq.s32.totalorder %v6272_v7, %v6914_v0 }
 0x18a   : > { %v1290_v28 = vsel %vm1248_vm15, %v6303_v21, 0.0  ;;  %v1649_v34 = vadd.f32 %v1608_v55, %v1524_v15  ;;  %v1291_v59 = vsel %vm1249_vm0, %v6303_v21, 0.0  ;;  %vm1332_vm1 = vcmp.eq.s32.totalorder %v6308_v25, %v6911_v52 }
 0x18b   : > { %vm1333_vm2 = vcmp.eq.s32.totalorder %v6308_v25, %v6914_v0  ;;  %v1650_v60 = vadd.f32 %v1609_v61, %v1525_v56  ;;  %v1374_v19 = vsel %vm1332_vm1, %v6306_v24, 0.0  ;;  %vm1457_vm3 = vcmp.eq.s32.totalorder %v6310_v26, %v6911_v52 }
 0x18c   : > { %v1375_v18 = vsel %vm1333_vm2, %v6306_v24, 0.0  ;;  %v1415_v8 = vadd.f32 %v1374_v19, %v1290_v28  ;;  %vm1458_vm4 = vcmp.eq.s32.totalorder %v6310_v26, %v6914_v0  ;;  %v1499_v15 = vsel %vm1457_vm3, %v6313_v27, 0.0 }
 0x18d   : > { %v1416_v57 = vadd.f32 %v1375_v18, %v1291_v59  ;;  %v1687_v55 = vpack.c.bf16 %v1650_v60, %v1649_v34  ;;  %v1500_v54 = vsel %vm1458_vm4, %v6313_v27, 0.0  ;;  %vm1582_vm5 = vcmp.eq.s32.totalorder %v6284_v14, %v6911_v52 }
 0x18e   : > { %vm1583_vm6 = vcmp.eq.s32.totalorder %v6284_v14, %v6914_v0  ;;  %v1540_v56 = vadd.f32 %v1499_v15, %v1415_v8  ;;  %v1624_v50 = vsel %vm1582_vm5, %v6316_v31, 0.0  ;;  %vm752_vm7 = vcmp.eq.s32.totalorder %v6259_v1, %v6905_v32 }
 0x18f   : > { %v1541_v61 = vadd.f32 %v1500_v54, %v1416_v57  ;;  %v1625_v59 = vsel %vm1583_vm6, %v6316_v31, 0.0  ;;  %1727 = vmatpush.bf16.msra.mxu3 %v1687_v55  ;;  %vm753_vm8 = vcmp.eq.s32.totalorder %v6259_v1, %v6908_v58  ;;  %vm836_vm9 = vcmp.eq.s32.totalorder %v6298_v23, %v6905_v32 }
 0x190   : > { %vm837_vm10 = vcmp.eq.s32.totalorder %v6298_v23, %v6908_v58  ;;  %v1665_v28 = vadd.f32 %v1624_v50, %v1540_v56  ;;  %v794_v54 = vsel %vm752_vm7, %v6287_v10, 0.0  ;;  %v795_v57 = vsel %vm753_vm8, %v6287_v10, 0.0 }
 0x191   : > { %v1666_v34 = vadd.f32 %v1625_v59, %v1541_v61  ;;  %v878_v60 = vsel %vm836_vm9, %v6290_v22, 0.0  ;;  %v879_v19 = vsel %vm837_vm10, %v6290_v22, 0.0  ;;  %vm961_vm11 = vcmp.eq.s32.totalorder %v6300_v13, %v6905_v32 }
 0x192   : > { %vm962_vm12 = vcmp.eq.s32.totalorder %v6300_v13, %v6908_v58  ;;  %v919_v8 = vadd.f32 %v878_v60, %v794_v54  ;;  %v920_v15 = vadd.f32 %v879_v19, %v795_v57  ;;  %v1003_v50 = vsel %vm961_vm11, %v6293_v9, 0.0 }
 0x193   : > { %v1695_v18 = vpack.c.bf16 %v1666_v34, %v1665_v28  ;;  %v1004_v55 = vsel %vm962_vm12, %v6293_v9, 0.0  ;;  %vm1086_vm13 = vcmp.eq.s32.totalorder %v6262_v2, %v6905_v32  ;;  %vm1087_vm14 = vcmp.eq.s32.totalorder %v6262_v2, %v6908_v58 }
 0x194   : > { %vm768_vm15 = vcmp.eq.s32.totalorder %v6259_v1, %v6911_v52  ;;  %v1044_v56 = vadd.f32 %v1003_v50, %v919_v8  ;;  %v1045_v61 = vadd.f32 %v1004_v55, %v920_v15  ;;  %v1128_v59 = vsel %vm1086_vm13, %v6296_v17, 0.0 }
 0x195   : > { %1740 = vmatpush.bf16.msrb.mxu0 %v1695_v18  ;;  %v1129_v28 = vsel %vm1087_vm14, %v6296_v17, 0.0  ;;  %vm769_vm0 = vcmp.eq.s32.totalorder %v6259_v1, %v6914_v0  ;;  %v810_v34 = vsel %vm768_vm15, %v6287_v10, 0.0  ;;  %vm852_vm1 = vcmp.eq.s32.totalorder %v6298_v23, %v6911_v52 }
 0x196   : > { %vm853_vm2 = vcmp.eq.s32.totalorder %v6298_v23, %v6914_v0  ;;  %v1169_v54 = vadd.f32 %v1128_v59, %v1044_v56  ;;  %v1170_v57 = vadd.f32 %v1129_v28, %v1045_v61  ;;  %v811_v60 = vsel %vm769_vm0, %v6287_v10, 0.0 }
 0x197   : > { %v894_v19 = vsel %vm852_vm1, %v6290_v22, 0.0  ;;  %v895_v18 = vsel %vm853_vm2, %v6290_v22, 0.0  ;;  %vm977_vm3 = vcmp.eq.s32.totalorder %v6300_v13, %v6911_v52  ;;  %vm978_vm4 = vcmp.eq.s32.totalorder %v6300_v13, %v6914_v0 }
 0x198   : > { %v935_v8 = vadd.f32 %v894_v19, %v810_v34  ;;  %v1207_v15 = vpack.c.bf16 %v1170_v57, %v1169_v54  ;;  %v936_v50 = vadd.f32 %v895_v18, %v811_v60  ;;  %v1019_v55 = vsel %vm977_vm3, %v6293_v9, 0.0 }
 0x199   : > { %v1020_v56 = vsel %vm978_vm4, %v6293_v9, 0.0  ;;  %vm1102_vm5 = vcmp.eq.s32.totalorder %v6262_v2, %v6911_v52  ;;  %vm1103_vm6 = vcmp.eq.s32.totalorder %v6262_v2, %v6914_v0  ;;  %v1764_v59 = vunpack.c.l.b16 %v6917_v12 }
 0x19a   : > { %v1060_v61 = vadd.f32 %v1019_v55, %v935_v8  ;;  %1782 = vmatpush.bf16.msrb.mxu1 %v1207_v15  ;;  %v1061_v28 = vadd.f32 %v1020_v56, %v936_v50  ;;  %v1144_v34 = vsel %vm1102_vm5, %v6296_v17, 0.0  ;;  %v1145_v54 = vsel %vm1103_vm6, %v6296_v17, 0.0 }
 0x19b   : > { %v1765_v57 = vunpack.c.h.b16 %v6917_v12  ;;  %v7020_v19 = vpack.c.b16 %v1764_v59, %v1764_v59  ;;  %v7023_v18 = vadd.s32 40, %v6222_v16  ;;  %vm1230_vm7 = vcmp.eq.s32.totalorder %v6272_v7, %v6920_v4 }
 0x19c   : > { %v1185_v60 = vadd.f32 %v1144_v34, %v1060_v61  ;;  %v1186_v8 = vadd.f32 %v1145_v54, %v1061_v28  ;;  %v1272_v15 = vsel %vm1230_vm7, %v6303_v21, 0.0  ;;  %vm1314_vm8 = vcmp.eq.s32.totalorder %v6308_v25, %v6920_v4 }
 0x19d   : > { %11466 = vst [vmem:[#allocation85_spill] sm:$0xff] %v7023_v18  ;;  %v7027_v55 = vpack.c.b16 %v1765_v57, %v1765_v57  ;;  %vm1231_vm9 = vcmp.eq.s32.totalorder %v6272_v7, %v7023_v18  ;;  %vm1315_vm10 = vcmp.eq.s32.totalorder %v6308_v25, %v7023_v18  ;;  %v1356_v12 = vsel %vm1314_vm8, %v6306_v24, 0.0 }
 0x19e   : > { %vm1439_vm11 = vcmp.eq.s32.totalorder %v6310_v26, %v6920_v4  ;;  %v1215_v50 = vpack.c.bf16 %v1186_v8, %v1185_v60  ;;  %v1273_v56 = vsel %vm1231_vm9, %v6303_v21, 0.0  ;;  %v1357_v61 = vsel %vm1315_vm10, %v6306_v24, 0.0 }
 0x19f   : > { %v1397_v59 = vadd.f32 %v1356_v12, %v1272_v15  ;;  %v1398_v28 = vadd.f32 %v1357_v61, %v1273_v56  ;;  %vm1440_vm12 = vcmp.eq.s32.totalorder %v6310_v26, %v7023_v18  ;;  %v1481_v34 = vsel %vm1439_vm11, %v6313_v27, 0.0 }
 0x1a0   : > { %vm1564_vm13 = vcmp.eq.s32.totalorder %v6284_v14, %v6920_v4  ;;  %1795 = vmatpush.bf16.msrb.mxu2 %v1215_v50  ;;  %v1482_v54 = vsel %vm1440_vm12, %v6313_v27, 0.0  ;;  %vm1565_vm14 = vcmp.eq.s32.totalorder %v6284_v14, %v7023_v18  ;;  %v7052_v12 = vadd.s32 160, %v6222_v16 }
 0x1a1   : > { %v1522_v57 = vadd.f32 %v1481_v34, %v1397_v59  ;;  %v1606_v60 = vsel %vm1564_vm13, %v6316_v31, 0.0  ;;  %v1523_v8 = vadd.f32 %v1482_v54, %v1398_v28  ;;  %v1607_v15 = vsel %vm1565_vm14, %v6316_v31, 0.0 }
 0x1a2   : > { %11467 = vst [vmem:[#allocation86_spill] sm:$0xff] %v7052_v12  ;;  %v7055_v56 = vadd.s32 168, %v6222_v16  ;;  %vm750_vm15 = vcmp.eq.s32.totalorder %v6259_v1, %v6920_v4  ;;  %vm751_vm0 = vcmp.eq.s32.totalorder %v6259_v1, %v7023_v18  ;;  %vm834_vm1 = vcmp.eq.s32.totalorder %v6298_v23, %v6920_v4 }
 0x1a3   : > { %v1647_v61 = vadd.f32 %v1606_v60, %v1522_v57  ;;  %v1648_v50 = vadd.f32 %v1607_v15, %v1523_v8  ;;  %vm1246_vm2 = vcmp.eq.s32.totalorder %v6272_v7, %v7052_v12  ;;  %vm1330_vm4 = vcmp.eq.s32.totalorder %v6308_v25, %v7052_v12 }
 0x1a4   : > { %11468 = vst [vmem:[#allocation87_spill] sm:$0xff] %v7055_v56  ;;  %vm1247_vm3 = vcmp.eq.s32.totalorder %v6272_v7, %v7055_v56  ;;  %v1288_v59 = vsel %vm1246_vm2, %v6303_v21, 0.0  ;;  %vm1331_vm5 = vcmp.eq.s32.totalorder %v6308_v25, %v7055_v56  ;;  %v1372_v34 = vsel %vm1330_vm4, %v6306_v24, 0.0 }
 0x1a5   : > { %v1289_v28 = vsel %vm1247_vm3, %v6303_v21, 0.0  ;;  %v1686_v54 = vpack.c.bf16 %v1648_v50, %v1647_v61  ;;  %v1373_v57 = vsel %vm1331_vm5, %v6306_v24, 0.0  ;;  %v1413_v60 = vadd.f32 %v1372_v34, %v1288_v59 }
 0x1a6   : > { %vm1455_vm6 = vcmp.eq.s32.totalorder %v6310_v26, %v7052_v12  ;;  %v1414_v8 = vadd.f32 %v1373_v57, %v1289_v28  ;;  %vm1456_vm7 = vcmp.eq.s32.totalorder %v6310_v26, %v7055_v56  ;;  %vm1580_vm8 = vcmp.eq.s32.totalorder %v6284_v14, %v7052_v12 }
 0x1a7   : > { %v1497_v15 = vsel %vm1455_vm6, %v6313_v27, 0.0  ;;  %1728 = vmatpush.bf16.msra.mxu3 %v1686_v54  ;;  %v1498_v51 = vsel %vm1456_vm7, %v6313_v27, 0.0  ;;  %vm1581_vm9 = vcmp.eq.s32.totalorder %v6284_v14, %v7055_v56  ;;  %v1622_v61 = vsel %vm1580_vm8, %v6316_v31, 0.0 }
 0x1a8   : > { %v1538_v47 = vadd.f32 %v1497_v15, %v1413_v60  ;;  %v1539_v50 = vadd.f32 %v1498_v51, %v1414_v8  ;;  %v1623_v59 = vsel %vm1581_vm9, %v6316_v31, 0.0  ;;  %v792_v28 = vsel %vm750_vm15, %v6287_v10, 0.0 }
 0x1a9   : > { %v793_v34 = vsel %vm751_vm0, %v6287_v10, 0.0  ;;  %vm835_vm10 = vcmp.eq.s32.totalorder %v6298_v23, %v7023_v18  ;;  %v876_v51 = vsel %vm834_vm1, %v6290_v22, 0.0  ;;  %vm959_vm11 = vcmp.eq.s32.totalorder %v6300_v13, %v6920_v4 }
 0x1aa   : > { %v1663_v54 = vadd.f32 %v1622_v61, %v1538_v47  ;;  %v1664_v57 = vadd.f32 %v1623_v59, %v1539_v50  ;;  %v877_v60 = vsel %vm835_vm10, %v6290_v22, 0.0  ;;  %v917_v8 = vadd.f32 %v876_v51, %v792_v28 }
 0x1ab   : > { %vm960_vm12 = vcmp.eq.s32.totalorder %v6300_v13, %v7023_v18  ;;  %v918_v15 = vadd.f32 %v877_v60, %v793_v34  ;;  %v1001_v47 = vsel %vm959_vm11, %v6293_v9, 0.0  ;;  %vm1084_vm13 = vcmp.eq.s32.totalorder %v6262_v2, %v6920_v4 }
 0x1ac   : > { %v1002_v61 = vsel %vm960_vm12, %v6293_v9, 0.0  ;;  %v1694_v0 = vpack.c.bf16 %v1664_v57, %v1663_v54  ;;  %v1042_v52 = vadd.f32 %v1001_v47, %v917_v8  ;;  %vm1085_vm14 = vcmp.eq.s32.totalorder %v6262_v2, %v7023_v18 }
 0x1ad   : > { %v1126_v50 = vsel %vm1084_vm13, %v6296_v17, 0.0  ;;  %v1043_v59 = vadd.f32 %v1002_v61, %v918_v15  ;;  %v1127_v28 = vsel %vm1085_vm14, %v6296_v17, 0.0  ;;  %vm766_vm15 = vcmp.eq.s32.totalorder %v6259_v1, %v7052_v12 }
 0x1ae   : > { %vm767_vm0 = vcmp.eq.s32.totalorder %v6259_v1, %v7055_v56  ;;  %1741 = vmatpush.bf16.msrb.mxu0 %v1694_v0  ;;  %v1167_v34 = vadd.f32 %v1126_v50, %v1042_v52  ;;  %v808_v51 = vsel %vm766_vm15, %v6287_v10, 0.0  ;;  %vm850_vm1 = vcmp.eq.s32.totalorder %v6298_v23, %v7052_v12 }
 0x1af   : > { %v809_v54 = vsel %vm767_vm0, %v6287_v10, 0.0  ;;  %v1168_v57 = vadd.f32 %v1127_v28, %v1043_v59  ;;  %vm851_vm2 = vcmp.eq.s32.totalorder %v6298_v23, %v7055_v56  ;;  %v892_v60 = vsel %vm850_vm1, %v6290_v22, 0.0 }
 0x1b0   : > { %vm975_vm3 = vcmp.eq.s32.totalorder %v6300_v13, %v7052_v12  ;;  %v893_v8 = vsel %vm851_vm2, %v6290_v22, 0.0  ;;  %v933_v0 = vadd.f32 %v892_v60, %v808_v51  ;;  %vm976_vm4 = vcmp.eq.s32.totalorder %v6300_v13, %v7055_v56 }
 0x1b1   : > { %v1017_v52 = vsel %vm975_vm3, %v6293_v9, 0.0  ;;  %v1206_v15 = vpack.c.bf16 %v1168_v57, %v1167_v34  ;;  %v934_v47 = vadd.f32 %v893_v8, %v809_v54  ;;  %v1018_v61 = vsel %vm976_vm4, %v6293_v9, 0.0 }
 0x1b2   : > { %vm1100_vm5 = vcmp.eq.s32.totalorder %v6262_v2, %v7052_v12  ;;  %v1058_v50 = vadd.f32 %v1017_v52, %v933_v0  ;;  %vm1101_vm6 = vcmp.eq.s32.totalorder %v6262_v2, %v7055_v56  ;;  %v7138_v28 = vadd.s32 16, %v6222_v16 }
 0x1b3   : > { %v1142_v59 = vsel %vm1100_vm5, %v6296_v17, 0.0  ;;  %1783 = vmatpush.bf16.msrb.mxu1 %v1206_v15  ;;  %v1059_v51 = vadd.f32 %v1018_v61, %v934_v47  ;;  %v1143_v60 = vsel %vm1101_vm6, %v6296_v17, 0.0  ;;  %v7142_v34 = vadd.s32 24, %v6222_v16 }
 0x1b4   : > { %11469 = vst [vmem:[#allocation88_spill] sm:$0xff] %v7138_v28  ;;  %v7145_v54 = vadd.s32 144, %v6222_v16  ;;  %v1183_v57 = vadd.f32 %v1142_v59, %v1058_v50  ;;  %vm1228_vm7 = vcmp.eq.s32.totalorder %v6272_v7, %v7138_v28  ;;  %vm1312_vm8 = vcmp.eq.s32.totalorder %v6308_v25, %v7138_v28 }
 0x1b5   : > { %11470 = vst [vmem:[#allocation89_spill] sm:$0xff] %v7142_v34  ;;  %vm1437_vm9 = vcmp.eq.s32.totalorder %v6310_v26, %v7138_v28  ;;  %v1184_v8 = vadd.f32 %v1143_v60, %v1059_v51  ;;  %vm1229_vm10 = vcmp.eq.s32.totalorder %v6272_v7, %v7142_v34  ;;  %v1270_v0 = vsel %vm1228_vm7, %v6303_v21, 0.0 }
 0x1b6   : > { %11471 = vst [vmem:[#allocation90_spill] sm:$0xff] %v7145_v54  ;;  %vm1313_vm11 = vcmp.eq.s32.totalorder %v6308_v25, %v7142_v34  ;;  %v1271_v52 = vsel %vm1229_vm10, %v6303_v21, 0.0  ;;  %v1354_v15 = vsel %vm1312_vm8, %v6306_v24, 0.0  ;;  %vm1438_vm12 = vcmp.eq.s32.totalorder %v6310_v26, %v7142_v34 }
 0x1b7   : > { %v1355_v47 = vsel %vm1313_vm11, %v6306_v24, 0.0  ;;  %v1214_v61 = vpack.c.bf16 %v1184_v8, %v1183_v57  ;;  %v1395_v50 = vadd.f32 %v1354_v15, %v1270_v0  ;;  %v1479_v51 = vsel %vm1437_vm9, %v6313_v27, 0.0 }
 0x1b8   : > { %v1396_v59 = vadd.f32 %v1355_v47, %v1271_v52  ;;  %v1480_v60 = vsel %vm1438_vm12, %v6313_v27, 0.0  ;;  %vm1562_vm13 = vcmp.eq.s32.totalorder %v6284_v14, %v7138_v28  ;;  %vm1563_vm14 = vcmp.eq.s32.totalorder %v6284_v14, %v7142_v34 }
 0x1b9   : > { %v7170_v56 = vadd.s32 152, %v6222_v16  ;;  %1796 = vmatpush.bf16.msrb.mxu2 %v1214_v61  ;;  %v1520_v12 = vadd.f32 %v1479_v51, %v1395_v50  ;;  %v1604_v57 = vsel %vm1562_vm13, %v6316_v31, 0.0  ;;  %v1605_v8 = vsel %vm1563_vm14, %v6316_v31, 0.0 }
 0x1ba   : > { %v1521_v18 = vadd.f32 %v1480_v60, %v1396_v59  ;;  %vm1244_vm15 = vcmp.eq.s32.totalorder %v6272_v7, %v7145_v54  ;;  %vm1328_vm1 = vcmp.eq.s32.totalorder %v6308_v25, %v7145_v54  ;;  %vm1453_vm3 = vcmp.eq.s32.totalorder %v6310_v26, %v7145_v54 }
 0x1bb   : > { %11472 = vst [vmem:[#allocation91_spill] sm:$0xff] %v7170_v56  ;;  %vm1245_vm0 = vcmp.eq.s32.totalorder %v6272_v7, %v7170_v56  ;;  %vm1329_vm2 = vcmp.eq.s32.totalorder %v6308_v25, %v7170_v56  ;;  %v1645_v0 = vadd.f32 %v1604_v57, %v1520_v12  ;;  %v1286_v15 = vsel %vm1244_vm15, %v6303_v21, 0.0 }
 0x1bc   : > { %v1646_v52 = vadd.f32 %v1605_v8, %v1521_v18  ;;  %v1287_v47 = vsel %vm1245_vm0, %v6303_v21, 0.0  ;;  %v1370_v61 = vsel %vm1328_vm1, %v6306_v24, 0.0  ;;  %v1371_v50 = vsel %vm1329_vm2, %v6306_v24, 0.0 }
 0x1bd   : > { %vm1454_vm4 = vcmp.eq.s32.totalorder %v6310_v26, %v7170_v56  ;;  %v1411_v51 = vadd.f32 %v1370_v61, %v1286_v15  ;;  %v1412_v60 = vadd.f32 %v1371_v50, %v1287_v47  ;;  %v1495_v12 = vsel %vm1453_vm3, %v6313_v27, 0.0 }
 0x1be   : > { %v1685_v59 = vpack.c.bf16 %v1646_v52, %v1645_v0  ;;  %v1496_v18 = vsel %vm1454_vm4, %v6313_v27, 0.0  ;;  %vm1578_vm5 = vcmp.eq.s32.totalorder %v6284_v14, %v7145_v54  ;;  %vm1579_vm6 = vcmp.eq.s32.totalorder %v6284_v14, %v7170_v56 }
 0x1bf   : > { %vm748_vm7 = vcmp.eq.s32.totalorder %v6259_v1, %v7138_v28  ;;  %v1536_v57 = vadd.f32 %v1495_v12, %v1411_v51  ;;  %v1537_v8 = vadd.f32 %v1496_v18, %v1412_v60  ;;  %v1620_v0 = vsel %vm1578_vm5, %v6316_v31, 0.0 }
 0x1c0   : > { %1729 = vmatpush.bf16.msra.mxu3 %v1685_v59  ;;  %v1621_v52 = vsel %vm1579_vm6, %v6316_v31, 0.0  ;;  %vm749_vm8 = vcmp.eq.s32.totalorder %v6259_v1, %v7142_v34  ;;  %v790_v15 = vsel %vm748_vm7, %v6287_v10, 0.0  ;;  %vm832_vm9 = vcmp.eq.s32.totalorder %v6298_v23, %v7138_v28 }
 0x1c1   : > { %vm833_vm10 = vcmp.eq.s32.totalorder %v6298_v23, %v7142_v34  ;;  %v1661_v47 = vadd.f32 %v1620_v0, %v1536_v57  ;;  %v1662_v61 = vadd.f32 %v1621_v52, %v1537_v8  ;;  %v791_v50 = vsel %vm749_vm8, %v6287_v10, 0.0 }
 0x1c2   : > { %v874_v59 = vsel %vm832_vm9, %v6290_v22, 0.0  ;;  %v875_v51 = vsel %vm833_vm10, %v6290_v22, 0.0  ;;  %vm957_vm11 = vcmp.eq.s32.totalorder %v6300_v13, %v7138_v28  ;;  %vm958_vm12 = vcmp.eq.s32.totalorder %v6300_v13, %v7142_v34 }
 0x1c3   : > { %v915_v60 = vadd.f32 %v874_v59, %v790_v15  ;;  %v1693_v12 = vpack.c.bf16 %v1662_v61, %v1661_v47  ;;  %v916_v18 = vadd.f32 %v875_v51, %v791_v50  ;;  %v999_v4 = vsel %vm957_vm11, %v6293_v9, 0.0  ;;  %v485_v51 = vpop.f32.mrf.mxu1 }
 0x1c4   : > { %v1000_v57 = vsel %vm958_vm12, %v6293_v9, 0.0  ;;  %vm1082_vm13 = vcmp.eq.s32.totalorder %v6262_v2, %v7138_v28  ;;  %vm1083_vm14 = vcmp.eq.s32.totalorder %v6262_v2, %v7142_v34  ;;  %vm764_vm15 = vcmp.eq.s32.totalorder %v6259_v1, %v7145_v54 }
 0x1c5   : > { %v1040_v8 = vadd.f32 %v999_v4, %v915_v60  ;;  %1742 = vmatpush.bf16.msrb.mxu0 %v1693_v12  ;;  %v1041_v0 = vadd.f32 %v1000_v57, %v916_v18  ;;  %v1124_v52 = vsel %vm1082_vm13, %v6296_v17, 0.0  ;;  %v1125_v15 = vsel %vm1083_vm14, %v6296_v17, 0.0 }
 0x1c6   : > { %vm765_vm0 = vcmp.eq.s32.totalorder %v6259_v1, %v7170_v56  ;;  %v806_v4 = vsel %vm764_vm15, %v6287_v10, 0.0  ;;  %vm848_vm1 = vcmp.eq.s32.totalorder %v6298_v23, %v7145_v54  ;;  %vm849_vm2 = vcmp.eq.s32.totalorder %v6298_v23, %v7170_v56 }
 0x1c7   : > { %v1165_v47 = vadd.f32 %v1124_v52, %v1040_v8  ;;  %v807_v61 = vsel %vm765_vm0, %v6287_v10, 0.0  ;;  %v1166_v50 = vadd.f32 %v1125_v15, %v1041_v0  ;;  %v890_v59 = vsel %vm848_vm1, %v6290_v22, 0.0 }
 0x1c8   : > { %vm973_vm3 = vcmp.eq.s32.totalorder %v6300_v13, %v7145_v54  ;;  %v891_v60 = vsel %vm849_vm2, %v6290_v22, 0.0  ;;  %v931_v12 = vadd.f32 %v890_v59, %v806_v4  ;;  %vm974_vm4 = vcmp.eq.s32.totalorder %v6300_v13, %v7170_v56 }
 0x1c9   : > { %v1015_v18 = vsel %vm973_vm3, %v6293_v9, 0.0  ;;  %v1205_v57 = vpack.c.bf16 %v1166_v50, %v1165_v47  ;;  %v932_v8 = vadd.f32 %v891_v60, %v807_v61  ;;  %v1016_v0 = vsel %vm974_vm4, %v6293_v9, 0.0 }
 0x1ca   : > { %vm1098_vm5 = vcmp.eq.s32.totalorder %v6262_v2, %v7145_v54  ;;  %v1056_v52 = vadd.f32 %v1015_v18, %v931_v12  ;;  %vm1099_vm6 = vcmp.eq.s32.totalorder %v6262_v2, %v7170_v56  ;;  %v555_v4 = vpack.c.bf16 %v485_v51, %v6209_v30 }
 0x1cb   : > { %v1140_v15 = vsel %vm1098_vm5, %v6296_v17, 0.0  ;;  %1784 = vmatpush.bf16.msrb.mxu1 %v1205_v57  ;;  %v1057_v59 = vadd.f32 %v1016_v0, %v932_v8  ;;  %v1141_v34 = vsel %vm1099_vm6, %v6296_v17, 0.0  ;;  %v7248_v47 = vadd.s32 8, %v6222_v16 }
 0x1cc   : > { %vm1226_vm7 = vcmp.eq.s32.totalorder %v6272_v7, %v6222_v16  ;;  %v1181_v61 = vadd.f32 %v1140_v15, %v1056_v52  ;;  %v1707_v50 = vunpack.c.l.b16 %v555_v4  ;;  %v1708_v60 = vunpack.c.h.b16 %v555_v4 }
 0x1cd   : > { %11473 = vst [vmem:[#allocation92_spill] sm:$0xff] %v7248_v47  ;;  %v1268_v12 = vsel %vm1226_vm7, %v6303_v21, 0.0  ;;  %v1182_v18 = vadd.f32 %v1141_v34, %v1057_v59  ;;  %vm1227_vm8 = vcmp.eq.s32.totalorder %v6272_v7, %v7248_v47  ;;  %vm1310_vm9 = vcmp.eq.s32.totalorder %v6308_v25, %v6222_v16 }
 0x1ce   : > { %vm1311_vm10 = vcmp.eq.s32.totalorder %v6308_v25, %v7248_v47  ;;  %v1710_v30 = vpack.c.b16 %v1707_v50, %v1707_v50  ;;  %v7259_v51 = vpack.c.b16 %v1708_v60, %v1708_v60  ;;  %v1269_v57 = vsel %vm1227_vm8, %v6303_v21, 0.0 }
 0x1cf   : > { %v1352_v8 = vsel %vm1310_vm9, %v6306_v24, 0.0  ;;  %v1213_v0 = vpack.c.bf16 %v1182_v18, %v1181_v61  ;;  %v1353_v52 = vsel %vm1311_vm10, %v6306_v24, 0.0  ;;  %vm1435_vm11 = vcmp.eq.s32.totalorder %v6310_v26, %v6222_v16 }
 0x1d0   : > { %v1393_v34 = vadd.f32 %v1352_v8, %v1268_v12  ;;  %v1394_v15 = vadd.f32 %v1353_v52, %v1269_v57  ;;  %vm1436_vm12 = vcmp.eq.s32.totalorder %v6310_v26, %v7248_v47  ;;  %v1477_v4 = vsel %vm1435_vm11, %v6313_v27, 0.0 }
 0x1d1   : > { %vm1560_vm13 = vcmp.eq.s32.totalorder %v6284_v14, %v6222_v16  ;;  %1797 = vmatpush.bf16.msrb.mxu2 %v1213_v0  ;;  %v1478_v59 = vsel %vm1436_vm12, %v6313_v27, 0.0  ;;  %vm1561_vm14 = vcmp.eq.s32.totalorder %v6284_v14, %v7248_v47  ;;  %v7277_v18 = vadd.s32 128, %v6222_v16 }
 0x1d2   : > { %v1518_v50 = vadd.f32 %v1477_v4, %v1393_v34  ;;  %v1602_v61 = vsel %vm1560_vm13, %v6316_v31, 0.0  ;;  %v1519_v60 = vadd.f32 %v1478_v59, %v1394_v15  ;;  %v1603_v12 = vsel %vm1561_vm14, %v6316_v31, 0.0 }
 0x1d3   : > { %11474 = vst [vmem:[#allocation93_spill] sm:$0xff] %v7277_v18  ;;  %v7280_v57 = vadd.s32 136, %v6222_v16  ;;  %vm746_vm15 = vcmp.eq.s32.totalorder %v6259_v1, %v6222_v16  ;;  %vm747_vm0 = vcmp.eq.s32.totalorder %v6259_v1, %v7248_v47  ;;  %vm830_vm1 = vcmp.eq.s32.totalorder %v6298_v23, %v6222_v16 }
 0x1d4   : > { %v1643_v8 = vadd.f32 %v1602_v61, %v1518_v50  ;;  %v1644_v0 = vadd.f32 %v1603_v12, %v1519_v60  ;;  %vm1242_vm2 = vcmp.eq.s32.totalorder %v6272_v7, %v7277_v18  ;;  %vm1326_vm4 = vcmp.eq.s32.totalorder %v6308_v25, %v7277_v18 }
 0x1d5   : > { %11475 = vst [vmem:[#allocation94_spill] sm:$0xff] %v7280_v57  ;;  %vm1243_vm3 = vcmp.eq.s32.totalorder %v6272_v7, %v7280_v57  ;;  %v1284_v52 = vsel %vm1242_vm2, %v6303_v21, 0.0  ;;  %vm1327_vm5 = vcmp.eq.s32.totalorder %v6308_v25, %v7280_v57  ;;  %v1368_v15 = vsel %vm1326_vm4, %v6306_v24, 0.0 }
 0x1d6   : > { %v1285_v34 = vsel %vm1243_vm3, %v6303_v21, 0.0  ;;  %v1684_v4 = vpack.c.bf16 %v1644_v0, %v1643_v8  ;;  %v1369_v59 = vsel %vm1327_vm5, %v6306_v24, 0.0  ;;  %v1409_v50 = vadd.f32 %v1368_v15, %v1284_v52 }
 0x1d7   : > { %vm1451_vm6 = vcmp.eq.s32.totalorder %v6310_v26, %v7277_v18  ;;  %v1410_v61 = vadd.f32 %v1369_v59, %v1285_v34  ;;  %vm1452_vm7 = vcmp.eq.s32.totalorder %v6310_v26, %v7280_v57  ;;  %vm1576_vm8 = vcmp.eq.s32.totalorder %v6284_v14, %v7277_v18 }
 0x1d8   : > { %v1493_v60 = vsel %vm1451_vm6, %v6313_v27, 0.0  ;;  %1730 = vmatpush.bf16.msra.mxu3 %v1684_v4  ;;  %v1494_v12 = vsel %vm1452_vm7, %v6313_v27, 0.0  ;;  %vm1577_vm9 = vcmp.eq.s32.totalorder %v6284_v14, %v7280_v57  ;;  %v1618_v8 = vsel %vm1576_vm8, %v6316_v31, 0.0 }
 0x1d9   : > { %v1534_v56 = vadd.f32 %v1493_v60, %v1409_v50  ;;  %v1535_v0 = vadd.f32 %v1494_v12, %v1410_v61  ;;  %v1619_v52 = vsel %vm1577_vm9, %v6316_v31, 0.0  ;;  %v788_v34 = vsel %vm746_vm15, %v6287_v10, 0.0 }
 0x1da   : > { %v789_v15 = vsel %vm747_vm0, %v6287_v10, 0.0  ;;  %vm831_vm10 = vcmp.eq.s32.totalorder %v6298_v23, %v7248_v47  ;;  %v872_v59 = vsel %vm830_vm1, %v6290_v22, 0.0  ;;  %vm955_vm11 = vcmp.eq.s32.totalorder %v6300_v13, %v6222_v16 }
 0x1db   : > { %v1659_v4 = vadd.f32 %v1618_v8, %v1534_v56  ;;  %v1660_v50 = vadd.f32 %v1619_v52, %v1535_v0  ;;  %v873_v61 = vsel %vm831_vm10, %v6290_v22, 0.0  ;;  %v913_v60 = vadd.f32 %v872_v59, %v788_v34  ;;  %1731 = vmatmul.bf16.vlgmr.msra.gmra.mxu3 %v1710_v30 }
 0x1dc   : > { %vm956_vm12 = vcmp.eq.s32.totalorder %v6300_v13, %v7248_v47  ;;  %v914_v56 = vadd.f32 %v873_v61, %v789_v15  ;;  %v997_v12 = vsel %vm955_vm11, %v6293_v9, 0.0  ;;  %vm1080_vm13 = vcmp.eq.s32.totalorder %v6262_v2, %v6222_v16 }
 0x1dd   : > { %v998_v8 = vsel %vm956_vm12, %v6293_v9, 0.0  ;;  %v1692_v54 = vpack.c.bf16 %v1660_v50, %v1659_v4  ;;  %v1038_v28 = vadd.f32 %v997_v12, %v913_v60  ;;  %vm1081_vm14 = vcmp.eq.s32.totalorder %v6262_v2, %v7248_v47 }
 0x1de   : > { %v1122_v0 = vsel %vm1080_vm13, %v6296_v17, 0.0  ;;  %v1039_v52 = vadd.f32 %v998_v8, %v914_v56  ;;  %v1123_v34 = vsel %vm1081_vm14, %v6296_v17, 0.0  ;;  %vm762_vm15 = vcmp.eq.s32.totalorder %v6259_v1, %v7277_v18 }
 0x1df   : > { %vm763_vm0 = vcmp.eq.s32.totalorder %v6259_v1, %v7280_v57  ;;  %1743 = vmatpush.bf16.msrb.mxu0 %v1692_v54  ;;  %v1163_v30 = vadd.f32 %v1122_v0, %v1038_v28  ;;  %v804_v15 = vsel %vm762_vm15, %v6287_v10, 0.0  ;;  %vm846_vm1 = vcmp.eq.s32.totalorder %v6298_v23, %v7277_v18 }
 0x1e0   : > { %v805_v4 = vsel %vm763_vm0, %v6287_v10, 0.0  ;;  %v1164_v59 = vadd.f32 %v1123_v34, %v1039_v52  ;;  %vm847_vm2 = vcmp.eq.s32.totalorder %v6298_v23, %v7280_v57  ;;  %v888_v50 = vsel %vm846_vm1, %v6290_v22, 0.0 }
 0x1e1   : > { %vm971_vm3 = vcmp.eq.s32.totalorder %v6300_v13, %v7277_v18  ;;  %v889_v61 = vsel %vm847_vm2, %v6290_v22, 0.0  ;;  %v929_v54 = vadd.f32 %v888_v50, %v804_v15  ;;  %vm972_vm4 = vcmp.eq.s32.totalorder %v6300_v13, %v7280_v57 }
 0x1e2   : > { %v1013_v28 = vsel %vm971_vm3, %v6293_v9, 0.0  ;;  %v1204_v60 = vpack.c.bf16 %v1164_v59, %v1163_v30  ;;  %v930_v56 = vadd.f32 %v889_v61, %v805_v4  ;;  %v1014_v12 = vsel %vm972_vm4, %v6293_v9, 0.0  ;;  %1744 = vmatmul.bf16.vlgmr.msrb.gmra.mxu0 %v7259_v51 }
 0x1e3   : > { %vm1096_vm5 = vcmp.eq.s32.totalorder %v6262_v2, %v7277_v18  ;;  %v1054_v8 = vadd.f32 %v1013_v28, %v929_v54  ;;  %vm1097_vm6 = vcmp.eq.s32.totalorder %v6262_v2, %v7280_v57  ;;  %v7364_v52 = vadd.s32 320, %v6222_v16 }
 0x1e4   : > { %v1138_v0 = vsel %vm1096_vm5, %v6296_v17, 0.0  ;;  %1785 = vmatpush.bf16.msrb.mxu1 %v1204_v60  ;;  %v1055_v34 = vadd.f32 %v1014_v12, %v930_v56  ;;  %v1139_v30 = vsel %vm1097_vm6, %v6296_v17, 0.0  ;;  %vm1719_vm7 = vcmask 1041408  }
 0x1e5   : > { %vm1832_vm8 = vcmp.eq.s32.totalorder %v6319_v33, %v6229_v36  ;;  %v1179_v15 = vadd.f32 %v1138_v0, %v1054_v8  ;;  %vm1266_vm9 = vcmp.eq.s32.totalorder %v6272_v7, %v7364_v52  ;;  %vm1350_vm10 = vcmp.eq.s32.totalorder %v6308_v25, %v7364_v52 }
 0x1e6   : > { %vm1475_vm11 = vcmp.eq.s32.totalorder %v6310_v26, %v7364_v52  ;;  %v1180_v51 = vadd.f32 %v1139_v30, %v1055_v34  ;;  %v1308_v4 = vsel %vm1266_vm9, %v6303_v21, 0.0  ;;  %v1392_v59 = vsel %vm1350_vm10, %v6306_v24, 0.0 }
 0x1e7   : > { %v1517_v50 = vsel %vm1475_vm11, %v6313_v27, 0.0  ;;  %v1433_v61 = vadd.f32 %v1392_v59, %v1308_v4  ;;  %vm1600_vm12 = vcmp.eq.s32.totalorder %v6284_v14, %v7364_v52  ;;  %vm1833_vm13 = vcmp.eq.s32.totalorder %v6319_v33, %v6232_v37  ;;  %1786 = vmatmul.bf16.vlgmr.msrb.gmra.mxu1 %v7020_v19 }
 0x1e8   : > { %v1874_v54 = vsel %vm1832_vm8, %v6322_v35, 0.0  ;;  %v1212_v28 = vpack.c.bf16 %v1180_v51, %v1179_v15  ;;  %v1642_v60 = vsel %vm1600_vm12, %v6316_v31, 0.0  ;;  %v1875_v56 = vsel %vm1833_vm13, %v6322_v35, 0.0 }
 0x1e9   : > { %vm1916_vm14 = vcmp.eq.s32.totalorder %v6324_v38, %v6229_v36  ;;  %v1558_v12 = vadd.f32 %v1517_v50, %v1433_v61  ;;  %vm1917_vm15 = vcmp.eq.s32.totalorder %v6324_v38, %v6232_v37  ;;  %vm2041_vm0 = vcmp.eq.s32.totalorder %v6329_v40, %v6229_v36 }
 0x1ea   : > { %v1958_v8 = vsel %vm1916_vm14, %v6327_v39, 0.0  ;;  %1798 = vmatpush.bf16.msrb.mxu2 %v1212_v28  ;;  %v1959_v19 = vsel %vm1917_vm15, %v6327_v39, 0.0  ;;  %vm2042_vm1 = vcmp.eq.s32.totalorder %v6329_v40, %v6232_v37  ;;  %v2083_v34 = vsel %vm2041_vm0, %v6332_v42, 0.0 }
 0x1eb   : > { %v1999_v0 = vadd.f32 %v1958_v8, %v1874_v54  ;;  %v1683_v30 = vadd.f32 %v1642_v60, %v1558_v12  ;;  %v2000_v15 = vadd.f32 %v1959_v19, %v1875_v56  ;;  %v2084_v51 = vsel %vm2042_vm1, %v6332_v42, 0.0 }
 0x1ec   : > { %vm2166_vm2 = vcmp.eq.s32.totalorder %v6335_v44, %v6229_v36  ;;  %vm2167_vm3 = vcmp.eq.s32.totalorder %v6335_v44, %v6232_v37  ;;  %vm1848_vm4 = vcmp.eq.s32.totalorder %v6319_v33, %v6235_v41  ;;  %vm1849_vm5 = vcmp.eq.s32.totalorder %v6319_v33, %v6254_v62 }
 0x1ed   : > { %v2124_v4 = vadd.f32 %v2083_v34, %v1999_v0  ;;  %v2208_v59 = vsel %vm2166_vm2, %v6338_v45, 0.0  ;;  %v1704_v50 = vpack.c.bf16 %v1683_v30, %v1683_v30  ;;  %v2125_v61 = vadd.f32 %v2084_v51, %v2000_v15  ;;  %1799 = vmatmul.bf16.vlgmr.msrb.gmra.mxu2 %v7027_v55 }
 0x1ee   : > { %v2209_v54 = vsel %vm2167_vm3, %v6338_v45, 0.0  ;;  %v1890_v60 = vsel %vm1848_vm4, %v6322_v35, 0.0  ;;  %v1891_v56 = vsel %vm1849_vm5, %v6322_v35, 0.0  ;;  %vm1932_vm6 = vcmp.eq.s32.totalorder %v6324_v38, %v6235_v41 }
 0x1ef   : > { %v2249_v28 = vadd.f32 %v2208_v59, %v2124_v4  ;;  %v1721_v12 = vsel %vm1719_vm7, %v1704_v50, 0  ;;  %v2250_v8 = vadd.f32 %v2209_v54, %v2125_v61  ;;  %vm1933_vm8 = vcmp.eq.s32.totalorder %v6324_v38, %v6254_v62 }
 0x1f0   : > { %v1974_v19 = vsel %vm1932_vm6, %v6327_v39, 0.0  ;;  %1752 = vmatpush.bf16.msrb.mxu3 %v1721_v12  ;;  %v1975_v0 = vsel %vm1933_vm8, %v6327_v39, 0.0  ;;  %vm2057_vm9 = vcmp.eq.s32.totalorder %v6329_v40, %v6235_v41  ;;  %vm2058_vm10 = vcmp.eq.s32.totalorder %v6329_v40, %v6254_v62 }
 0x1f1   : > { %v2015_v55 = vadd.f32 %v1974_v19, %v1890_v60  ;;  %v2283_v34 = vpack.c.bf16 %v2250_v8, %v2249_v28  ;;  %v2016_v30 = vadd.f32 %v1975_v0, %v1891_v56  ;;  %v2099_v15 = vsel %vm2057_vm9, %v6332_v42, 0.0  ;;  %v526_v19 = vpop.f32.mrf.mxu2 }
 0x1f2   : > { %v2100_v51 = vsel %vm2058_vm10, %v6332_v42, 0.0  ;;  %vm2182_vm11 = vcmp.eq.s32.totalorder %v6335_v44, %v6235_v41  ;;  %vm2183_vm12 = vcmp.eq.s32.totalorder %v6335_v44, %v6254_v62  ;;  %vm1858_vm13 = vcmp.eq.s32.totalorder %v6319_v33, %v7364_v52 }
 0x1f3   : > { %v2140_v4 = vadd.f32 %v2099_v15, %v2015_v55  ;;  %2313 = vmatpush.bf16.msra.mxu0 %v2283_v34  ;;  %v2141_v59 = vadd.f32 %v2100_v51, %v2016_v30  ;;  %v2224_v50 = vsel %vm2182_vm11, %v6338_v45, 0.0  ;;  %v2225_v61 = vsel %vm2183_vm12, %v6338_v45, 0.0 }
 0x1f4   : > { %v1900_v54 = vsel %vm1858_vm13, %v6322_v35, 0.0  ;;  %vm1942_vm14 = vcmp.eq.s32.totalorder %v6324_v38, %v7364_v52  ;;  %vm2067_vm15 = vcmp.eq.s32.totalorder %v6329_v40, %v7364_v52  ;;  %vm2192_vm0 = vcmp.eq.s32.totalorder %v6335_v44, %v7364_v52 }
 0x1f5   : > { %v2265_v28 = vadd.f32 %v2224_v50, %v2140_v4  ;;  %v2266_v60 = vadd.f32 %v2225_v61, %v2141_v59  ;;  %v1984_v56 = vsel %vm1942_vm14, %v6327_v39, 0.0  ;;  %v2109_v12 = vsel %vm2067_vm15, %v6332_v42, 0.0 }
 0x1f6   : > { %v2234_v8 = vsel %vm2192_vm0, %v6338_v45, 0.0  ;;  %v2025_v0 = vadd.f32 %v1984_v56, %v1900_v54  ;;  %v554_v55 = vpack.c.bf16 %v526_v19, %v526_v19  ;;  %v7443_v34 = vadd.s32 304, %v6222_v16 }
 0x1f7   : > { %v7446_v30 = vadd.s32 312, %v6222_v16  ;;  %v2291_v15 = vpack.c.bf16 %v2266_v60, %v2265_v28  ;;  %vm1830_vm1 = vcmp.eq.s32.totalorder %v6319_v33, %v6578_v20  ;;  %vm1831_vm2 = vcmp.eq.s32.totalorder %v6319_v33, %v6581_v6 }
 0x1f8   : > { %vm1914_vm3 = vcmp.eq.s32.totalorder %v6324_v38, %v6578_v20  ;;  %v2150_v51 = vadd.f32 %v2109_v12, %v2025_v0  ;;  %v7454_v4 = vunpack.c.l.b16 %v554_v55  ;;  %vm1264_vm4 = vcmp.eq.s32.totalorder %v6272_v7, %v7443_v34 }
 0x1f9   : > { %vm1265_vm5 = vcmp.eq.s32.totalorder %v6272_v7, %v7446_v30  ;;  %2326 = vmatpush.bf16.msra.mxu1 %v2291_v15  ;;  %v1306_v59 = vsel %vm1264_vm4, %v6303_v21, 0.0  ;;  %vm1348_vm6 = vcmp.eq.s32.totalorder %v6308_v25, %v7443_v34  ;;  %vm1349_vm8 = vcmp.eq.s32.totalorder %v6308_v25, %v7446_v30 }
 0x1fa   : > { %11476 = vst [vmem:[#allocation95_spill] sm:$0xff] %v7454_v4  ;;  %v1307_v50 = vsel %vm1265_vm5, %v6303_v21, 0.0  ;;  %v2275_v61 = vadd.f32 %v2234_v8, %v2150_v51  ;;  %v1390_v28 = vsel %vm1348_vm6, %v6306_v24, 0.0  ;;  %v1391_v60 = vsel %vm1349_vm8, %v6306_v24, 0.0 }
 0x1fb   : > { %v1431_v56 = vadd.f32 %v1390_v28, %v1306_v59  ;;  %v1432_v12 = vadd.f32 %v1391_v60, %v1307_v50  ;;  %vm1473_vm9 = vcmp.eq.s32.totalorder %v6310_v26, %v7443_v34  ;;  %vm1474_vm10 = vcmp.eq.s32.totalorder %v6310_v26, %v7446_v30 }
 0x1fc   : > { %v2296_v19 = vpack.c.bf16 %v2275_v61, %v2275_v61  ;;  %v1515_v0 = vsel %vm1473_vm9, %v6313_v27, 0.0  ;;  %v1516_v8 = vsel %vm1474_vm10, %v6313_v27, 0.0  ;;  %vm1598_vm11 = vcmp.eq.s32.totalorder %v6284_v14, %v7443_v34 }
 0x1fd   : > { %v1556_v55 = vadd.f32 %v1515_v0, %v1431_v56  ;;  %v1557_v15 = vadd.f32 %v1516_v8, %v1432_v12  ;;  %vm1599_vm12 = vcmp.eq.s32.totalorder %v6284_v14, %v7446_v30  ;;  %v1640_v51 = vsel %vm1598_vm11, %v6316_v31, 0.0 }
 0x1fe   : > { %v2311_v59 = vsel %vm1719_vm7, %v2296_v19, 0  ;;  %v1641_v50 = vsel %vm1599_vm12, %v6316_v31, 0.0  ;;  %v1872_v61 = vsel %vm1830_vm1, %v6322_v35, 0.0  ;;  %v1873_v28 = vsel %vm1831_vm2, %v6322_v35, 0.0 }
 0x1ff   : > { %2342 = vmatpush.bf16.msra.mxu2 %v2311_v59  ;;  %v1681_v60 = vadd.f32 %v1640_v51, %v1556_v55  ;;  %v1682_v56 = vadd.f32 %v1641_v50, %v1557_v15  ;;  %vm1915_vm13 = vcmp.eq.s32.totalorder %v6324_v38, %v6581_v6  ;;  %v1956_v12 = vsel %vm1914_vm3, %v6327_v39, 0.0 }
 0x200   : > { %v1957_v19 = vsel %vm1915_vm13, %v6327_v39, 0.0  ;;  %v1997_v0 = vadd.f32 %v1956_v12, %v1872_v61  ;;  %vm2039_vm14 = vcmp.eq.s32.totalorder %v6329_v40, %v6578_v20  ;;  %vm2040_vm15 = vcmp.eq.s32.totalorder %v6329_v40, %v6581_v6 }
 0x201   : > { %v1703_v8 = vpack.c.bf16 %v1682_v56, %v1681_v60  ;;  %v1998_v55 = vadd.f32 %v1957_v19, %v1873_v28  ;;  %v2081_v15 = vsel %vm2039_vm14, %v6332_v42, 0.0  ;;  %v2082_v51 = vsel %vm2040_vm15, %v6332_v42, 0.0 }
 0x202   : > { %v2122_v59 = vadd.f32 %v2081_v15, %v1997_v0  ;;  %vm2164_vm0 = vcmp.eq.s32.totalorder %v6335_v44, %v6578_v20  ;;  %vm2165_vm1 = vcmp.eq.s32.totalorder %v6335_v44, %v6581_v6  ;;  %vm1846_vm2 = vcmp.eq.s32.totalorder %v6319_v33, %v6584_v5 }
 0x203   : > { %1753 = vmatpush.bf16.msrb.mxu3 %v1703_v8  ;;  %v2123_v50 = vadd.f32 %v2082_v51, %v1998_v55  ;;  %v2206_v61 = vsel %vm2164_vm0, %v6338_v45, 0.0  ;;  %v2207_v28 = vsel %vm2165_vm1, %v6338_v45, 0.0  ;;  %vm1847_vm3 = vcmp.eq.s32.totalorder %v6319_v33, %v6587_v11 }
 0x204   : > { %v2247_v60 = vadd.f32 %v2206_v61, %v2122_v59  ;;  %v1888_v56 = vsel %vm1846_vm2, %v6322_v35, 0.0  ;;  %v1889_v12 = vsel %vm1847_vm3, %v6322_v35, 0.0  ;;  %vm1930_vm4 = vcmp.eq.s32.totalorder %v6324_v38, %v6584_v5 }
 0x205   : > { %v2248_v19 = vadd.f32 %v2207_v28, %v2123_v50  ;;  %vm1931_vm5 = vcmp.eq.s32.totalorder %v6324_v38, %v6587_v11  ;;  %v1972_v0 = vsel %vm1930_vm4, %v6327_v39, 0.0  ;;  %vm2055_vm6 = vcmp.eq.s32.totalorder %v6329_v40, %v6584_v5 }
 0x206   : > { %v1973_v8 = vsel %vm1931_vm5, %v6327_v39, 0.0  ;;  %v2013_v55 = vadd.f32 %v1972_v0, %v1888_v56  ;;  %vm2056_vm8 = vcmp.eq.s32.totalorder %v6329_v40, %v6587_v11  ;;  %v2097_v15 = vsel %vm2055_vm6, %v6332_v42, 0.0 }
 0x207   : > { %v2282_v51 = vpack.c.bf16 %v2248_v19, %v2247_v60  ;;  %v2014_v59 = vadd.f32 %v1973_v8, %v1889_v12  ;;  %v2098_v50 = vsel %vm2056_vm8, %v6332_v42, 0.0  ;;  %vm2180_vm9 = vcmp.eq.s32.totalorder %v6335_v44, %v6584_v5 }
 0x208   : > { %v2138_v61 = vadd.f32 %v2097_v15, %v2013_v55  ;;  %vm2181_vm10 = vcmp.eq.s32.totalorder %v6335_v44, %v6587_v11  ;;  %v2222_v28 = vsel %vm2180_vm9, %v6338_v45, 0.0  ;;  %vm1856_vm11 = vcmp.eq.s32.totalorder %v6319_v33, %v7443_v34 }
 0x209   : > { %2314 = vmatpush.bf16.msra.mxu0 %v2282_v51  ;;  %v2139_v56 = vadd.f32 %v2098_v50, %v2014_v59  ;;  %v2223_v0 = vsel %vm2181_vm10, %v6338_v45, 0.0  ;;  %vm1857_vm12 = vcmp.eq.s32.totalorder %v6319_v33, %v7446_v30  ;;  %v1898_v60 = vsel %vm1856_vm11, %v6322_v35, 0.0 }
 0x20a   : > { %v2263_v12 = vadd.f32 %v2222_v28, %v2138_v61  ;;  %v1899_v19 = vsel %vm1857_vm12, %v6322_v35, 0.0  ;;  %vm1940_vm13 = vcmp.eq.s32.totalorder %v6324_v38, %v7443_v34  ;;  %vm1941_vm14 = vcmp.eq.s32.totalorder %v6324_v38, %v7446_v30 }
 0x20b   : > { %v2264_v8 = vadd.f32 %v2223_v0, %v2139_v56  ;;  %v1982_v55 = vsel %vm1940_vm13, %v6327_v39, 0.0  ;;  %v1983_v15 = vsel %vm1941_vm14, %v6327_v39, 0.0  ;;  %vm2065_vm15 = vcmp.eq.s32.totalorder %v6329_v40, %v7443_v34 }
 0x20c   : > { %v2023_v51 = vadd.f32 %v1982_v55, %v1898_v60  ;;  %v2024_v59 = vadd.f32 %v1983_v15, %v1899_v19  ;;  %vm2066_vm0 = vcmp.eq.s32.totalorder %v6329_v40, %v7446_v30  ;;  %v2107_v50 = vsel %vm2065_vm15, %v6332_v42, 0.0 }
 0x20d   : > { %v2290_v61 = vpack.c.bf16 %v2264_v8, %v2263_v12  ;;  %v2108_v28 = vsel %vm2066_vm0, %v6332_v42, 0.0  ;;  %vm2190_vm1 = vcmp.eq.s32.totalorder %v6335_v44, %v7443_v34  ;;  %vm2191_vm2 = vcmp.eq.s32.totalorder %v6335_v44, %v7446_v30 }
 0x20e   : > { %v2148_v56 = vadd.f32 %v2107_v50, %v2023_v51  ;;  %v2149_v0 = vadd.f32 %v2108_v28, %v2024_v59  ;;  %v2232_v54 = vsel %vm2190_vm1, %v6338_v45, 0.0  ;;  %v2233_v60 = vsel %vm2191_vm2, %v6338_v45, 0.0 }
 0x20f   : > { %2327 = vmatpush.bf16.msra.mxu1 %v2290_v61  ;;  %v7559_v19 = vadd.s32 288, %v6222_v16  ;;  %v7562_v12 = vadd.s32 296, %v6222_v16  ;;  %vm1828_vm3 = vcmp.eq.s32.totalorder %v6319_v33, %v6590_v48  ;;  %vm1829_vm4 = vcmp.eq.s32.totalorder %v6319_v33, %v6593_v63 }
 0x210   : > { %v2273_v8 = vadd.f32 %v2232_v54, %v2148_v56  ;;  %v2274_v55 = vadd.f32 %v2233_v60, %v2149_v0  ;;  %v1870_v15 = vsel %vm1828_vm3, %v6322_v35, 0.0  ;;  %v1871_v51 = vsel %vm1829_vm4, %v6322_v35, 0.0 }
 0x211   : > { %11477 = vst [vmem:[#allocation96_spill] sm:$0xff] %v7559_v19  ;;  %vm1262_vm5 = vcmp.eq.s32.totalorder %v6272_v7, %v7559_v19  ;;  %vm1263_vm6 = vcmp.eq.s32.totalorder %v6272_v7, %v7562_v12  ;;  %vm1346_vm8 = vcmp.eq.s32.totalorder %v6308_v25, %v7559_v19  ;;  %vm1347_vm9 = vcmp.eq.s32.totalorder %v6308_v25, %v7562_v12 }
 0x212   : > { %v2295_v59 = vpack.c.bf16 %v2274_v55, %v2273_v8  ;;  %v1304_v54 = vsel %vm1262_vm5, %v6303_v21, 0.0  ;;  %v1305_v50 = vsel %vm1263_vm6, %v6303_v21, 0.0  ;;  %v1388_v61 = vsel %vm1346_vm8, %v6306_v24, 0.0 }
 0x213   : > { %v1389_v28 = vsel %vm1347_vm9, %v6306_v24, 0.0  ;;  %v1429_v56 = vadd.f32 %v1388_v61, %v1304_v54  ;;  %vm1471_vm10 = vcmp.eq.s32.totalorder %v6310_v26, %v7559_v19  ;;  %vm1472_vm11 = vcmp.eq.s32.totalorder %v6310_v26, %v7562_v12 }
 0x214   : > { %2343 = vmatpush.bf16.msra.mxu2 %v2295_v59  ;;  %v1430_v0 = vadd.f32 %v1389_v28, %v1305_v50  ;;  %v1513_v60 = vsel %vm1471_vm10, %v6313_v27, 0.0  ;;  %v1514_v8 = vsel %vm1472_vm11, %v6313_v27, 0.0  ;;  %vm1596_vm12 = vcmp.eq.s32.totalorder %v6284_v14, %v7559_v19 }
 0x215   : > { %v1554_v55 = vadd.f32 %v1513_v60, %v1429_v56  ;;  %vm1597_vm13 = vcmp.eq.s32.totalorder %v6284_v14, %v7562_v12  ;;  %v1638_v54 = vsel %vm1596_vm12, %v6316_v31, 0.0  ;;  %vm1912_vm14 = vcmp.eq.s32.totalorder %v6324_v38, %v6590_v48 }
 0x216   : > { %v1555_v61 = vadd.f32 %v1514_v8, %v1430_v0  ;;  %v1639_v59 = vsel %vm1597_vm13, %v6316_v31, 0.0  ;;  %vm1913_vm15 = vcmp.eq.s32.totalorder %v6324_v38, %v6593_v63  ;;  %v1954_v50 = vsel %vm1912_vm14, %v6327_v39, 0.0 }
 0x217   : > { %v1679_v28 = vadd.f32 %v1638_v54, %v1554_v55  ;;  %v1955_v6 = vsel %vm1913_vm15, %v6327_v39, 0.0  ;;  %v1995_v56 = vadd.f32 %v1954_v50, %v1870_v15  ;;  %vm2037_vm0 = vcmp.eq.s32.totalorder %v6329_v40, %v6590_v48 }
 0x218   : > { %v1680_v60 = vadd.f32 %v1639_v59, %v1555_v61  ;;  %v1996_v20 = vadd.f32 %v1955_v6, %v1871_v51  ;;  %vm2038_vm1 = vcmp.eq.s32.totalorder %v6329_v40, %v6593_v63  ;;  %v2079_v0 = vsel %vm2037_vm0, %v6332_v42, 0.0 }
 0x219   : > { %v2080_v8 = vsel %vm2038_vm1, %v6332_v42, 0.0  ;;  %v2120_v4 = vadd.f32 %v2079_v0, %v1995_v56  ;;  %vm2162_vm2 = vcmp.eq.s32.totalorder %v6335_v44, %v6590_v48  ;;  %vm2163_vm3 = vcmp.eq.s32.totalorder %v6335_v44, %v6593_v63 }
 0x21a   : > { %v1702_v15 = vpack.c.bf16 %v1680_v60, %v1679_v28  ;;  %v2121_v55 = vadd.f32 %v2080_v8, %v1996_v20  ;;  %v2204_v54 = vsel %vm2162_vm2, %v6338_v45, 0.0  ;;  %v2205_v6 = vsel %vm2163_vm3, %v6338_v45, 0.0 }
 0x21b   : > { %v2245_v51 = vadd.f32 %v2204_v54, %v2120_v4  ;;  %vm1844_vm4 = vcmp.eq.s32.totalorder %v6319_v33, %v6715_v53  ;;  %vm1845_vm5 = vcmp.eq.s32.totalorder %v6319_v33, %v6719_v43  ;;  %vm1928_vm6 = vcmp.eq.s32.totalorder %v6324_v38, %v6715_v53 }
 0x21c   : > { %1754 = vmatpush.bf16.msrb.mxu3 %v1702_v15  ;;  %v2246_v61 = vadd.f32 %v2205_v6, %v2121_v55  ;;  %v1886_v59 = vsel %vm1844_vm4, %v6322_v35, 0.0  ;;  %v1887_v20 = vsel %vm1845_vm5, %v6322_v35, 0.0  ;;  %vm1929_vm8 = vcmp.eq.s32.totalorder %v6324_v38, %v6719_v43 }
 0x21d   : > { %v1970_v4 = vsel %vm1928_vm6, %v6327_v39, 0.0  ;;  %v1971_v50 = vsel %vm1929_vm8, %v6327_v39, 0.0  ;;  %vm2053_vm9 = vcmp.eq.s32.totalorder %v6329_v40, %v6715_v53  ;;  %vm2054_vm10 = vcmp.eq.s32.totalorder %v6329_v40, %v6719_v43 }
 0x21e   : > { %v2281_v28 = vpack.c.bf16 %v2246_v61, %v2245_v51  ;;  %v2011_v56 = vadd.f32 %v1970_v4, %v1886_v59  ;;  %v2012_v60 = vadd.f32 %v1971_v50, %v1887_v20  ;;  %v2095_v0 = vsel %vm2053_vm9, %v6332_v42, 0.0  ;;  %v529_v50 = vpop.f32.mrf.mxu2 }
 0x21f   : > { %v2096_v8 = vsel %vm2054_vm10, %v6332_v42, 0.0  ;;  %vm2178_vm11 = vcmp.eq.s32.totalorder %v6335_v44, %v6715_v53  ;;  %vm2179_vm12 = vcmp.eq.s32.totalorder %v6335_v44, %v6719_v43  ;;  %vm1854_vm13 = vcmp.eq.s32.totalorder %v6319_v33, %v7559_v19 }
 0x220   : > { %2315 = vmatpush.bf16.msra.mxu0 %v2281_v28  ;;  %v2136_v15 = vadd.f32 %v2095_v0, %v2011_v56  ;;  %v2137_v55 = vadd.f32 %v2096_v8, %v2012_v60  ;;  %v2220_v54 = vsel %vm2178_vm11, %v6338_v45, 0.0  ;;  %v2221_v6 = vsel %vm2179_vm12, %v6338_v45, 0.0 }
 0x221   : > { %vm1855_vm14 = vcmp.eq.s32.totalorder %v6319_v33, %v7562_v12  ;;  %v1896_v51 = vsel %vm1854_vm13, %v6322_v35, 0.0  ;;  %vm1938_vm15 = vcmp.eq.s32.totalorder %v6324_v38, %v7559_v19  ;;  %vm1939_vm0 = vcmp.eq.s32.totalorder %v6324_v38, %v7562_v12 }
 0x222   : > { %v2261_v61 = vadd.f32 %v2220_v54, %v2136_v15  ;;  %v2262_v59 = vadd.f32 %v2221_v6, %v2137_v55  ;;  %v1897_v20 = vsel %vm1855_vm14, %v6322_v35, 0.0  ;;  %v1980_v4 = vsel %vm1938_vm15, %v6327_v39, 0.0 }
 0x223   : > { %v1981_v28 = vsel %vm1939_vm0, %v6327_v39, 0.0  ;;  %v2021_v56 = vadd.f32 %v1980_v4, %v1896_v51  ;;  %vm2063_vm1 = vcmp.eq.s32.totalorder %v6329_v40, %v7559_v19  ;;  %vm2064_vm2 = vcmp.eq.s32.totalorder %v6329_v40, %v7562_v12 }
 0x224   : > { %v2289_v60 = vpack.c.bf16 %v2262_v59, %v2261_v61  ;;  %v2022_v0 = vadd.f32 %v1981_v28, %v1897_v20  ;;  %v2105_v8 = vsel %vm2063_vm1, %v6332_v42, 0.0  ;;  %v2106_v15 = vsel %vm2064_vm2, %v6332_v42, 0.0 }
 0x225   : > { %v2146_v55 = vadd.f32 %v2105_v8, %v2021_v56  ;;  %vm2188_vm3 = vcmp.eq.s32.totalorder %v6335_v44, %v7559_v19  ;;  %vm2189_vm4 = vcmp.eq.s32.totalorder %v6335_v44, %v7562_v12  ;;  %v556_v54 = vpack.c.bf16 %v529_v50, %v529_v50 }
 0x226   : > { %2328 = vmatpush.bf16.msra.mxu1 %v2289_v60  ;;  %v2147_v6 = vadd.f32 %v2106_v15, %v2022_v0  ;;  %v2230_v51 = vsel %vm2188_vm3, %v6338_v45, 0.0  ;;  %v2231_v4 = vsel %vm2189_vm4, %v6338_v45, 0.0  ;;  %v7661_v61 = vadd.s32 272, %v6222_v16 }
 0x227   : > { %v2271_v59 = vadd.f32 %v2230_v51, %v2146_v55  ;;  %v7663_v20 = vunpack.c.l.b16 %v556_v54  ;;  %v7666_v28 = vadd.s32 280, %v6222_v16  ;;  %vm1826_vm5 = vcmp.eq.s32.totalorder %v6319_v33, %v6797_v49 }
 0x228   : > { %v2272_v56 = vadd.f32 %v2231_v4, %v2147_v6  ;;  %vm1260_vm6 = vcmp.eq.s32.totalorder %v6272_v7, %v7661_v61  ;;  %vm1344_vm8 = vcmp.eq.s32.totalorder %v6308_v25, %v7661_v61  ;;  %vm1469_vm9 = vcmp.eq.s32.totalorder %v6310_v26, %v7661_v61 }
 0x229   : > { %vm1261_vm10 = vcmp.eq.s32.totalorder %v6272_v7, %v7666_v28  ;;  %v1302_v60 = vsel %vm1260_vm6, %v6303_v21, 0.0  ;;  %vm1345_vm11 = vcmp.eq.s32.totalorder %v6308_v25, %v7666_v28  ;;  %v1386_v15 = vsel %vm1344_vm8, %v6306_v24, 0.0 }
 0x22a   : > { %v2294_v0 = vpack.c.bf16 %v2272_v56, %v2271_v59  ;;  %v1303_v8 = vsel %vm1261_vm10, %v6303_v21, 0.0  ;;  %v1387_v55 = vsel %vm1345_vm11, %v6306_v24, 0.0  ;;  %v1427_v54 = vadd.f32 %v1386_v15, %v1302_v60 }
 0x22b   : > { %v1428_v6 = vadd.f32 %v1387_v55, %v1303_v8  ;;  %vm1470_vm12 = vcmp.eq.s32.totalorder %v6310_v26, %v7666_v28  ;;  %v1511_v51 = vsel %vm1469_vm9, %v6313_v27, 0.0  ;;  %vm1594_vm13 = vcmp.eq.s32.totalorder %v6284_v14, %v7661_v61 }
 0x22c   : > { %2344 = vmatpush.bf16.msra.mxu2 %v2294_v0  ;;  %v1512_v4 = vsel %vm1470_vm12, %v6313_v27, 0.0  ;;  %vm1595_vm14 = vcmp.eq.s32.totalorder %v6284_v14, %v7666_v28  ;;  %vm1827_vm15 = vcmp.eq.s32.totalorder %v6319_v33, %v6800_v3  ;;  %v1552_v59 = vadd.f32 %v1511_v51, %v1427_v54 }
 0x22d   : > { %v1553_v56 = vadd.f32 %v1512_v4, %v1428_v6  ;;  %v1636_v60 = vsel %vm1594_vm13, %v6316_v31, 0.0  ;;  %v1637_v8 = vsel %vm1595_vm14, %v6316_v31, 0.0  ;;  %v1868_v0 = vsel %vm1826_vm5, %v6322_v35, 0.0 }
 0x22e   : > { %v1869_v15 = vsel %vm1827_vm15, %v6322_v35, 0.0  ;;  %vm1910_vm0 = vcmp.eq.s32.totalorder %v6324_v38, %v6797_v49  ;;  %vm1911_vm1 = vcmp.eq.s32.totalorder %v6324_v38, %v6800_v3  ;;  %v1677_v55 = vadd.f32 %v1636_v60, %v1552_v59 }
 0x22f   : > { %v1678_v54 = vadd.f32 %v1637_v8, %v1553_v56  ;;  %v1952_v6 = vsel %vm1910_vm0, %v6327_v39, 0.0  ;;  %v1953_v51 = vsel %vm1911_vm1, %v6327_v39, 0.0  ;;  %vm2035_vm2 = vcmp.eq.s32.totalorder %v6329_v40, %v6797_v49 }
 0x230   : > { %v1993_v4 = vadd.f32 %v1952_v6, %v1868_v0  ;;  %v1994_v50 = vadd.f32 %v1953_v51, %v1869_v15  ;;  %vm2036_vm3 = vcmp.eq.s32.totalorder %v6329_v40, %v6800_v3  ;;  %v2077_v48 = vsel %vm2035_vm2, %v6332_v42, 0.0 }
 0x231   : > { %v1701_v63 = vpack.c.bf16 %v1678_v54, %v1677_v55  ;;  %v2078_v37 = vsel %vm2036_vm3, %v6332_v42, 0.0  ;;  %vm2160_vm4 = vcmp.eq.s32.totalorder %v6335_v44, %v6797_v49  ;;  %vm2161_vm5 = vcmp.eq.s32.totalorder %v6335_v44, %v6800_v3  ;;  %v11487_v49 = vld [vmem:[#allocation26_spill] sm:$0xff] }
 0x232   : > { %v2118_v59 = vadd.f32 %v2077_v48, %v1993_v4  ;;  %v2119_v56 = vadd.f32 %v2078_v37, %v1994_v50  ;;  %v2202_v60 = vsel %vm2160_vm4, %v6338_v45, 0.0  ;;  %v2203_v8 = vsel %vm2161_vm5, %v6338_v45, 0.0 }
 0x233   : > { %1755 = vmatpush.bf16.msrb.mxu3 %v1701_v63  ;;  %vm1842_vm6 = vcmp.eq.s32.totalorder %v6319_v33, %v6803_v46  ;;  %vm1843_vm8 = vcmp.eq.s32.totalorder %v6319_v33, %v6806_v29  ;;  %vm1926_vm9 = vcmp.eq.s32.totalorder %v6324_v38, %v6803_v46  ;;  %vm1927_vm10 = vcmp.eq.s32.totalorder %v6324_v38, %v6806_v29 }
 0x234   : > { %v2243_v0 = vadd.f32 %v2202_v60, %v2118_v59  ;;  %v2244_v48 = vadd.f32 %v2203_v8, %v2119_v56  ;;  %v1884_v37 = vsel %vm1842_vm6, %v6322_v35, 0.0  ;;  %v1885_v50 = vsel %vm1843_vm8, %v6322_v35, 0.0 }
 0x235   : > { %v1968_v63 = vsel %vm1926_vm9, %v6327_v39, 0.0  ;;  %vm2051_vm11 = vcmp.eq.s32.totalorder %v6329_v40, %v6803_v46  ;;  %vm2052_vm12 = vcmp.eq.s32.totalorder %v6329_v40, %v6806_v29  ;;  %v1969_v55 = vsel %vm1927_vm10, %v6327_v39, 0.0 }
 0x236   : > { %v2280_v15 = vpack.c.bf16 %v2244_v48, %v2243_v0  ;;  %v2009_v54 = vadd.f32 %v1968_v63, %v1884_v37  ;;  %v2093_v6 = vsel %vm2051_vm11, %v6332_v42, 0.0  ;;  %v2010_v51 = vadd.f32 %v1969_v55, %v1885_v50 }
 0x237   : > { %v2094_v4 = vsel %vm2052_vm12, %v6332_v42, 0.0  ;;  %vm2176_vm13 = vcmp.eq.s32.totalorder %v6335_v44, %v6803_v46  ;;  %vm2177_vm14 = vcmp.eq.s32.totalorder %v6335_v44, %v6806_v29  ;;  %vm1852_vm15 = vcmp.eq.s32.totalorder %v6319_v33, %v7661_v61 }
 0x238   : > { %2316 = vmatpush.bf16.msra.mxu0 %v2280_v15  ;;  %v2134_v59 = vadd.f32 %v2093_v6, %v2009_v54  ;;  %v2218_v56 = vsel %vm2176_vm13, %v6338_v45, 0.0  ;;  %v2219_v60 = vsel %vm2177_vm14, %v6338_v45, 0.0  ;;  %v2135_v8 = vadd.f32 %v2094_v4, %v2010_v51 }
 0x239   : > { %vm1853_vm0 = vcmp.eq.s32.totalorder %v6319_v33, %v7666_v28  ;;  %v1894_v0 = vsel %vm1852_vm15, %v6322_v35, 0.0  ;;  %vm1936_vm1 = vcmp.eq.s32.totalorder %v6324_v38, %v7661_v61  ;;  %vm1937_vm2 = vcmp.eq.s32.totalorder %v6324_v38, %v7666_v28 }
 0x23a   : > { %v2259_v48 = vadd.f32 %v2218_v56, %v2134_v59  ;;  %v1895_v37 = vsel %vm1853_vm0, %v6322_v35, 0.0  ;;  %v1978_v50 = vsel %vm1936_vm1, %v6327_v39, 0.0  ;;  %v2260_v63 = vadd.f32 %v2219_v60, %v2135_v8 }
 0x23b   : > { %v1979_v15 = vsel %vm1937_vm2, %v6327_v39, 0.0  ;;  %v2019_v55 = vadd.f32 %v1978_v50, %v1894_v0  ;;  %vm2061_vm3 = vcmp.eq.s32.totalorder %v6329_v40, %v7661_v61  ;;  %vm2062_vm4 = vcmp.eq.s32.totalorder %v6329_v40, %v7666_v28 }
 0x23c   : > { %v2020_v54 = vadd.f32 %v1979_v15, %v1895_v37  ;;  %v2103_v6 = vsel %vm2061_vm3, %v6332_v42, 0.0  ;;  %vm2186_vm5 = vcmp.eq.s32.totalorder %v6335_v44, %v7661_v61  ;;  %v2288_v51 = vpack.c.bf16 %v2260_v63, %v2259_v48 }
 0x23d   : > { %v2104_v4 = vsel %vm2062_vm4, %v6332_v42, 0.0  ;;  %v2144_v59 = vadd.f32 %v2103_v6, %v2019_v55  ;;  %vm2187_vm6 = vcmp.eq.s32.totalorder %v6335_v44, %v7666_v28  ;;  %v2228_v60 = vsel %vm2186_vm5, %v6338_v45, 0.0 }
 0x23e   : > { %v2145_v56 = vadd.f32 %v2104_v4, %v2020_v54  ;;  %v2229_v8 = vsel %vm2187_vm6, %v6338_v45, 0.0  ;;  %v7770_v0 = vadd.s32 256, %v6222_v16  ;;  %2329 = vmatpush.bf16.msra.mxu1 %v2288_v51  ;;  %v7773_v50 = vadd.s32 264, %v6222_v16 }
 0x23f   : > { %v2269_v37 = vadd.f32 %v2228_v60, %v2144_v59  ;;  %vm1824_vm8 = vcmp.eq.s32.totalorder %v6319_v33, %v6905_v32  ;;  %vm1825_vm9 = vcmp.eq.s32.totalorder %v6319_v33, %v6908_v58  ;;  %vm1908_vm2 = vcmp.eq.s32.totalorder %v6324_v38, %v6905_v32 }
 0x240   : > { %v2270_v48 = vadd.f32 %v2229_v8, %v2145_v56  ;;  %vm1258_vm10 = vcmp.eq.s32.totalorder %v6272_v7, %v7770_v0  ;;  %vm1342_vm11 = vcmp.eq.s32.totalorder %v6308_v25, %v7770_v0  ;;  %vm1467_vm12 = vcmp.eq.s32.totalorder %v6310_v26, %v7770_v0 }
 0x241   : > { %vm1259_vm13 = vcmp.eq.s32.totalorder %v6272_v7, %v7773_v50  ;;  %v1300_v63 = vsel %vm1258_vm10, %v6303_v21, 0.0  ;;  %vm1343_vm14 = vcmp.eq.s32.totalorder %v6308_v25, %v7773_v50  ;;  %v1384_v15 = vsel %vm1342_vm11, %v6306_v24, 0.0 }
 0x242   : > { %v2293_v55 = vpack.c.bf16 %v2270_v48, %v2269_v37  ;;  %v1301_v54 = vsel %vm1259_vm13, %v6303_v21, 0.0  ;;  %v1385_v6 = vsel %vm1343_vm14, %v6306_v24, 0.0  ;;  %v1425_v51 = vadd.f32 %v1384_v15, %v1300_v63 }
 0x243   : > { %v1426_v4 = vadd.f32 %v1385_v6, %v1301_v54  ;;  %vm1468_vm15 = vcmp.eq.s32.totalorder %v6310_v26, %v7773_v50  ;;  %v1509_v59 = vsel %vm1467_vm12, %v6313_v27, 0.0  ;;  %vm1592_vm0 = vcmp.eq.s32.totalorder %v6284_v14, %v7770_v0  ;;  %v11478_v54 = vld [vmem:[#allocation82_spill] sm:$0xff] }
 0x244   : > { %2345 = vmatpush.bf16.msra.mxu2 %v2293_v55  ;;  %v1510_v7 = vsel %vm1468_vm15, %v6313_v27, 0.0  ;;  %v1550_v25 = vadd.f32 %v1509_v59, %v1425_v51  ;;  %vm1593_vm1 = vcmp.eq.s32.totalorder %v6284_v14, %v7773_v50  ;;  %v1634_v21 = vsel %vm1592_vm0, %v6316_v31, 0.0 }
 0x245   : > { %v1551_v24 = vadd.f32 %v1510_v7, %v1426_v4  ;;  %v1635_v56 = vsel %vm1593_vm1, %v6316_v31, 0.0  ;;  %v1866_v26 = vsel %vm1824_vm8, %v6322_v35, 0.0  ;;  %v1867_v60 = vsel %vm1825_vm9, %v6322_v35, 0.0  ;;  %v11479_v7 = vld [vmem:[#allocation83_spill] sm:$0xff] }
 0x246   : > { %v1675_v27 = vadd.f32 %v1634_v21, %v1550_v25  ;;  %vm1909_vm3 = vcmp.eq.s32.totalorder %v6324_v38, %v6908_v58  ;;  %vm2033_vm4 = vcmp.eq.s32.totalorder %v6329_v40, %v6905_v32  ;;  %v1950_v31 = vsel %vm1908_vm2, %v6327_v39, 0.0 }
 0x247   : > { %v1676_v14 = vadd.f32 %v1635_v56, %v1551_v24  ;;  %v1951_v8 = vsel %vm1909_vm3, %v6327_v39, 0.0  ;;  %vm2034_vm5 = vcmp.eq.s32.totalorder %v6329_v40, %v6908_v58  ;;  %v1991_v37 = vadd.f32 %v1950_v31, %v1866_v26 }
 0x248   : > { %v1992_v48 = vadd.f32 %v1951_v8, %v1867_v60  ;;  %v2075_v63 = vsel %vm2033_vm4, %v6332_v42, 0.0  ;;  %v2076_v15 = vsel %vm2034_vm5, %v6332_v42, 0.0  ;;  %vm2158_vm6 = vcmp.eq.s32.totalorder %v6335_v44, %v6905_v32 }
 0x249   : > { %v1700_v55 = vpack.c.bf16 %v1676_v14, %v1675_v27  ;;  %vm2159_vm8 = vcmp.eq.s32.totalorder %v6335_v44, %v6908_v58  ;;  %vm1840_vm9 = vcmp.eq.s32.totalorder %v6319_v33, %v11478_v54  ;;  %v2116_v6 = vadd.f32 %v2075_v63, %v1991_v37 }
 0x24a   : > { %v2117_v51 = vadd.f32 %v2076_v15, %v1992_v48  ;;  %v2200_v4 = vsel %vm2158_vm6, %v6338_v45, 0.0  ;;  %v2201_v59 = vsel %vm2159_vm8, %v6338_v45, 0.0  ;;  %vm1841_vm10 = vcmp.eq.s32.totalorder %v6319_v33, %v11479_v7 }
 0x24b   : > { %1756 = vmatpush.bf16.msrb.mxu3 %v1700_v55  ;;  %v1882_v25 = vsel %vm1840_vm9, %v6322_v35, 0.0  ;;  %vm1924_vm11 = vcmp.eq.s32.totalorder %v6324_v38, %v11478_v54  ;;  %vm1925_vm12 = vcmp.eq.s32.totalorder %v6324_v38, %v11479_v7  ;;  %v2241_v21 = vadd.f32 %v2200_v4, %v2116_v6 }
 0x24c   : > { %v2242_v24 = vadd.f32 %v2201_v59, %v2117_v51  ;;  %v1883_v56 = vsel %vm1841_vm10, %v6322_v35, 0.0  ;;  %v1966_v26 = vsel %vm1924_vm11, %v6327_v39, 0.0  ;;  %v1967_v60 = vsel %vm1925_vm12, %v6327_v39, 0.0 }
 0x24d   : > { %v2007_v27 = vadd.f32 %v1966_v26, %v1882_v25  ;;  %vm2049_vm13 = vcmp.eq.s32.totalorder %v6329_v40, %v11478_v54  ;;  %vm2050_vm14 = vcmp.eq.s32.totalorder %v6329_v40, %v11479_v7  ;;  %v2008_v31 = vadd.f32 %v1967_v60, %v1883_v56 }
 0x24e   : > { %v2279_v14 = vpack.c.bf16 %v2242_v24, %v2241_v21  ;;  %v2091_v8 = vsel %vm2049_vm13, %v6332_v42, 0.0  ;;  %v2092_v37 = vsel %vm2050_vm14, %v6332_v42, 0.0  ;;  %vm2174_vm15 = vcmp.eq.s32.totalorder %v6335_v44, %v11478_v54 }
 0x24f   : > { %v2132_v48 = vadd.f32 %v2091_v8, %v2007_v27  ;;  %vm2175_vm0 = vcmp.eq.s32.totalorder %v6335_v44, %v11479_v7  ;;  %vm1850_vm1 = vcmp.eq.s32.totalorder %v6319_v33, %v7770_v0  ;;  %v2133_v63 = vadd.f32 %v2092_v37, %v2008_v31 }
 0x250   : > { %2317 = vmatpush.bf16.msra.mxu0 %v2279_v14  ;;  %v2216_v15 = vsel %vm2174_vm15, %v6338_v45, 0.0  ;;  %v2217_v55 = vsel %vm2175_vm0, %v6338_v45, 0.0  ;;  %vm1851_vm2 = vcmp.eq.s32.totalorder %v6319_v33, %v7773_v50  ;;  %v1892_v51 = vsel %vm1850_vm1, %v6322_v35, 0.0 }
 0x251   : > { %v2257_v6 = vadd.f32 %v2216_v15, %v2132_v48  ;;  %v1893_v4 = vsel %vm1851_vm2, %v6322_v35, 0.0  ;;  %vm1934_vm3 = vcmp.eq.s32.totalorder %v6324_v38, %v7770_v0  ;;  %v2258_v59 = vadd.f32 %v2217_v55, %v2133_v63 }
 0x252   : > { %vm1935_vm4 = vcmp.eq.s32.totalorder %v6324_v38, %v7773_v50  ;;  %v1976_v25 = vsel %vm1934_vm3, %v6327_v39, 0.0  ;;  %vm2059_vm5 = vcmp.eq.s32.totalorder %v6329_v40, %v7770_v0  ;;  %vm2060_vm6 = vcmp.eq.s32.totalorder %v6329_v40, %v7773_v50 }
 0x253   : > { %v1977_v21 = vsel %vm1935_vm4, %v6327_v39, 0.0  ;;  %v2017_v24 = vadd.f32 %v1976_v25, %v1892_v51  ;;  %v2101_v56 = vsel %vm2059_vm5, %v6332_v42, 0.0  ;;  %v2287_v26 = vpack.c.bf16 %v2258_v59, %v2257_v6  ;;  %v11480_v59 = vld [vmem:[#allocation19_spill] sm:$0xff]  ;;  %v11481_v25 = vld [vmem:[#allocation21_spill] sm:$0xff] }
 0x254   : > { %v2018_v60 = vadd.f32 %v1977_v21, %v1893_v4  ;;  %v2102_v27 = vsel %vm2060_vm6, %v6332_v42, 0.0  ;;  %vm2184_vm8 = vcmp.eq.s32.totalorder %v6335_v44, %v7770_v0  ;;  %vm2185_vm9 = vcmp.eq.s32.totalorder %v6335_v44, %v7773_v50 }
 0x255   : > { %v2142_v14 = vadd.f32 %v2101_v56, %v2017_v24  ;;  %v2226_v31 = vsel %vm2184_vm8, %v6338_v45, 0.0  ;;  %vm786_vm10 = vcmp.eq.s32.totalorder %v6259_v1, %v7364_v52  ;;  %2330 = vmatpush.bf16.msra.mxu1 %v2287_v26  ;;  %v2227_v37 = vsel %vm2185_vm9, %v6338_v45, 0.0  ;;  %v11482_v56 = vld [vmem:[#allocation20_spill] sm:$0xff] }
 0x256   : > { %v2143_v8 = vadd.f32 %v2102_v27, %v2018_v60  ;;  %v828_v48 = vsel %vm786_vm10, %v6287_v10, 0.0  ;;  %vm870_vm11 = vcmp.eq.s32.totalorder %v6298_v23, %v7364_v52  ;;  %vm995_vm12 = vcmp.eq.s32.totalorder %v6300_v13, %v7364_v52  ;;  %v11483_v27 = vld [vmem:[#allocation22_spill] sm:$0xff] }
 0x257   : > { %v2267_v63 = vadd.f32 %v2226_v31, %v2142_v14  ;;  %v912_v15 = vsel %vm870_vm11, %v6290_v22, 0.0  ;;  %vm1120_vm13 = vcmp.eq.s32.totalorder %v6262_v2, %v7364_v52  ;;  %v1037_v51 = vsel %vm995_vm12, %v6293_v9, 0.0 }
 0x258   : > { %v2268_v55 = vadd.f32 %v2227_v37, %v2143_v8  ;;  %v953_v6 = vadd.f32 %v912_v15, %v828_v48  ;;  %v1162_v4 = vsel %vm1120_vm13, %v6296_v17, 0.0  ;;  %vm2384_vm14 = vcmp.eq.s32.totalorder %v11480_v59, %v6235_v41  ;;  %v11484_v8 = vld [vmem:[#allocation23_spill] sm:$0xff] }
 0x259   : > { %vm2385_vm15 = vcmp.eq.s32.totalorder %v11480_v59, %v6254_v62  ;;  %vm2468_vm0 = vcmp.eq.s32.totalorder %v11481_v25, %v6235_v41  ;;  %vm2469_vm1 = vcmp.eq.s32.totalorder %v11481_v25, %v6254_v62  ;;  %v2426_v26 = vsel %vm2384_vm14, %v11482_v56, 0.0 }
 0x25a   : > { %v2292_v21 = vpack.c.bf16 %v2268_v55, %v2267_v63  ;;  %v1078_v24 = vadd.f32 %v1037_v51, %v953_v6  ;;  %v2427_v60 = vsel %vm2385_vm15, %v11482_v56, 0.0  ;;  %v2510_v14 = vsel %vm2468_vm0, %v11483_v27, 0.0  ;;  %v11485_v63 = vld [vmem:[#allocation24_spill] sm:$0xff]  ;;  %v11486_v51 = vld [vmem:[#allocation25_spill] sm:$0xff] }
 0x25b   : > { %v2511_v31 = vsel %vm2469_vm1, %v11483_v27, 0.0  ;;  %vm2593_vm2 = vcmp.eq.s32.totalorder %v11484_v8, %v6235_v41  ;;  %vm2594_vm3 = vcmp.eq.s32.totalorder %v11484_v8, %v6254_v62  ;;  %v2551_v48 = vadd.f32 %v2510_v14, %v2426_v26  ;;  %v11490_v26 = vld [vmem:[#allocation85_spill] sm:$0xff] }
 0x25c   : > { %2346 = vmatpush.bf16.msra.mxu2 %v2292_v21  ;;  %v1203_v37 = vadd.f32 %v1162_v4, %v1078_v24  ;;  %v2552_v15 = vadd.f32 %v2511_v31, %v2427_v60  ;;  %v2635_v55 = vsel %vm2593_vm2, %v11485_v63, 0.0  ;;  %v2636_v6 = vsel %vm2594_vm3, %v11485_v63, 0.0  ;;  %v11489_v24 = vld [vmem:[#allocation84_spill] sm:$0xff] }
 0x25d   : > { %vm2718_vm4 = vcmp.eq.s32.totalorder %v11486_v51, %v6235_v41  ;;  %vm2719_vm5 = vcmp.eq.s32.totalorder %v11486_v51, %v6254_v62  ;;  %vm1715_vm6 = vcmask 556032   ;;  %v2676_v32 = vadd.f32 %v2635_v55, %v2551_v48 }
 0x25e   : > { %v1224_v58 = vpack.c.bf16 %v1203_v37, %v1203_v37  ;;  %v2677_v3 = vadd.f32 %v2636_v6, %v2552_v15  ;;  %v2760_v7 = vsel %vm2718_vm4, %v11487_v49, 0.0  ;;  %v11488_v4 = vpack.c.b16 %v7663_v20, %v7663_v20 }
 0x25f   : > { %v2761_v21 = vsel %vm2719_vm5, %v11487_v49, 0.0  ;;  %vm1822_vm8 = vcmp.eq.s32.totalorder %v6319_v33, %v11489_v24  ;;  %vm1823_vm9 = vcmp.eq.s32.totalorder %v6319_v33, %v11490_v26  ;;  %vm1906_vm10 = vcmp.eq.s32.totalorder %v6324_v38, %v11489_v24 }
 0x260   : > { %5738 = vmatmul.msk.bf16.vlgmr.msrb.gmra.mxu3 %vm1715_vm6, %v11488_v4  ;;  %v1776_v60 = vsel %vm1719_vm7, %v1224_v58, 0  ;;  %v2801_v14 = vadd.f32 %v2760_v7, %v2676_v32  ;;  %v2802_v31 = vadd.f32 %v2761_v21, %v2677_v3  ;;  %v1864_v37 = vsel %vm1822_vm8, %v6322_v35, 0.0  ;;  %v11491_v21 = vld [vmem:[#allocation86_spill] sm:$0xff] }
 0x261   : > { %1807 = vmatpush.bf16.msra.mxu3 %v1776_v60  ;;  %v1865_v20 = vsel %vm1823_vm9, %v6322_v35, 0.0  ;;  %vm1907_vm11 = vcmp.eq.s32.totalorder %v6324_v38, %v11490_v26  ;;  %v1948_v48 = vsel %vm1906_vm10, %v6327_v39, 0.0  ;;  %vm2031_vm12 = vcmp.eq.s32.totalorder %v6329_v40, %v11489_v24 }
 0x262   : > { %v2827_v15 = vpack.c.bf16 %v2802_v31, %v2801_v14  ;;  %v1949_v55 = vsel %vm1907_vm11, %v6327_v39, 0.0  ;;  %v1989_v6 = vadd.f32 %v1948_v48, %v1864_v37  ;;  %vm2032_vm13 = vcmp.eq.s32.totalorder %v6329_v40, %v11490_v26  ;;  %v11492_v31 = vld [vmem:[#allocation87_spill] sm:$0xff] }
 0x263   : > { %v1990_v3 = vadd.f32 %v1949_v55, %v1865_v20  ;;  %v2073_v32 = vsel %vm2031_vm12, %v6332_v42, 0.0  ;;  %v2074_v58 = vsel %vm2032_vm13, %v6332_v42, 0.0  ;;  %vm2156_vm14 = vcmp.eq.s32.totalorder %v6335_v44, %v11489_v24 }
 0x264   : > { %2862 = vmatpush.bf16.msrb.mxu2 %v2827_v15  ;;  %v2114_v7 = vadd.f32 %v2073_v32, %v1989_v6  ;;  %vm2157_vm15 = vcmp.eq.s32.totalorder %v6335_v44, %v11490_v26  ;;  %v2198_v4 = vsel %vm2156_vm14, %v6338_v45, 0.0  ;;  %vm1838_vm0 = vcmp.eq.s32.totalorder %v6319_v33, %v11491_v21 }
 0x265   : > { %v2115_v60 = vadd.f32 %v2074_v58, %v1990_v3  ;;  %v2199_v14 = vsel %vm2157_vm15, %v6338_v45, 0.0  ;;  %vm1839_vm1 = vcmp.eq.s32.totalorder %v6319_v33, %v11492_v31  ;;  %v1880_v37 = vsel %vm1838_vm0, %v6322_v35, 0.0 }
 0x266   : > { %v2239_v20 = vadd.f32 %v2198_v4, %v2114_v7  ;;  %v1881_v48 = vsel %vm1839_vm1, %v6322_v35, 0.0  ;;  %vm1922_vm2 = vcmp.eq.s32.totalorder %v6324_v38, %v11491_v21  ;;  %vm1923_vm3 = vcmp.eq.s32.totalorder %v6324_v38, %v11492_v31 }
 0x267   : > { %v2240_v15 = vadd.f32 %v2199_v14, %v2115_v60  ;;  %v1964_v55 = vsel %vm1922_vm2, %v6327_v39, 0.0  ;;  %v1965_v6 = vsel %vm1923_vm3, %v6327_v39, 0.0  ;;  %vm2047_vm4 = vcmp.eq.s32.totalorder %v6329_v40, %v11491_v21 }
 0x268   : > { %v2005_v3 = vadd.f32 %v1964_v55, %v1880_v37  ;;  %v2006_v32 = vadd.f32 %v1965_v6, %v1881_v48  ;;  %vm2048_vm5 = vcmp.eq.s32.totalorder %v6329_v40, %v11492_v31  ;;  %v2089_v58 = vsel %vm2047_vm4, %v6332_v42, 0.0 }
 0x269   : > { %v2278_v7 = vpack.c.bf16 %v2240_v15, %v2239_v20  ;;  %v2090_v4 = vsel %vm2048_vm5, %v6332_v42, 0.0  ;;  %vm2172_vm8 = vcmp.eq.s32.totalorder %v6335_v44, %v11491_v21  ;;  %vm2173_vm9 = vcmp.eq.s32.totalorder %v6335_v44, %v11492_v31 }
 0x26a   : > { %v2130_v60 = vadd.f32 %v2089_v58, %v2005_v3  ;;  %v2131_v14 = vadd.f32 %v2090_v4, %v2006_v32  ;;  %v2214_v62 = vsel %vm2172_vm8, %v6338_v45, 0.0  ;;  %v2215_v37 = vsel %vm2173_vm9, %v6338_v45, 0.0 }
 0x26b   : > { %2318 = vmatpush.bf16.msra.mxu0 %v2278_v7  ;;  %vm784_vm10 = vcmp.eq.s32.totalorder %v6259_v1, %v7443_v34  ;;  %vm785_vm11 = vcmp.eq.s32.totalorder %v6259_v1, %v7446_v30  ;;  %vm868_vm12 = vcmp.eq.s32.totalorder %v6298_v23, %v7443_v34  ;;  %vm869_vm13 = vcmp.eq.s32.totalorder %v6298_v23, %v7446_v30 }
 0x26c   : > { %v2255_v20 = vadd.f32 %v2214_v62, %v2130_v60  ;;  %v2256_v48 = vadd.f32 %v2215_v37, %v2131_v14  ;;  %v826_v15 = vsel %vm784_vm10, %v6287_v10, 0.0  ;;  %v827_v55 = vsel %vm785_vm11, %v6287_v10, 0.0 }
 0x26d   : > { %v910_v6 = vsel %vm868_vm12, %v6290_v22, 0.0  ;;  %v911_v3 = vsel %vm869_vm13, %v6290_v22, 0.0  ;;  %vm993_vm14 = vcmp.eq.s32.totalorder %v6300_v13, %v7443_v34  ;;  %vm994_vm15 = vcmp.eq.s32.totalorder %v6300_v13, %v7446_v30 }
 0x26e   : > { %v2286_v32 = vpack.c.bf16 %v2256_v48, %v2255_v20  ;;  %v951_v58 = vadd.f32 %v910_v6, %v826_v15  ;;  %v952_v7 = vadd.f32 %v911_v3, %v827_v55  ;;  %v1035_v62 = vsel %vm993_vm14, %v6293_v9, 0.0 }
 0x26f   : > { %v1036_v4 = vsel %vm994_vm15, %v6293_v9, 0.0  ;;  %vm1118_vm0 = vcmp.eq.s32.totalorder %v6262_v2, %v7443_v34  ;;  %vm1119_vm1 = vcmp.eq.s32.totalorder %v6262_v2, %v7446_v30  ;;  %vm2382_vm2 = vcmp.eq.s32.totalorder %v11480_v59, %v6584_v5 }
 0x270   : > { %2331 = vmatpush.bf16.msra.mxu1 %v2286_v32  ;;  %v1076_v60 = vadd.f32 %v1035_v62, %v951_v58  ;;  %v1077_v14 = vadd.f32 %v1036_v4, %v952_v7  ;;  %v1160_v37 = vsel %vm1118_vm0, %v6296_v17, 0.0  ;;  %v1161_v20 = vsel %vm1119_vm1, %v6296_v17, 0.0 }
 0x271   : > { %vm2383_vm3 = vcmp.eq.s32.totalorder %v11480_v59, %v6587_v11  ;;  %v2424_v48 = vsel %vm2382_vm2, %v11482_v56, 0.0  ;;  %vm2466_vm4 = vcmp.eq.s32.totalorder %v11481_v25, %v6584_v5  ;;  %vm2467_vm5 = vcmp.eq.s32.totalorder %v11481_v25, %v6587_v11 }
 0x272   : > { %v1201_v15 = vadd.f32 %v1160_v37, %v1076_v60  ;;  %v1202_v55 = vadd.f32 %v1161_v20, %v1077_v14  ;;  %v2425_v6 = vsel %vm2383_vm3, %v11482_v56, 0.0  ;;  %v2508_v3 = vsel %vm2466_vm4, %v11483_v27, 0.0  ;;  %v11493_v37 = vld [vmem:[#allocation88_spill] sm:$0xff] }
 0x273   : > { %v2509_v32 = vsel %vm2467_vm5, %v11483_v27, 0.0  ;;  %v2549_v58 = vadd.f32 %v2508_v3, %v2424_v48  ;;  %vm2591_vm8 = vcmp.eq.s32.totalorder %v11484_v8, %v6584_v5  ;;  %vm2592_vm9 = vcmp.eq.s32.totalorder %v11484_v8, %v6587_v11 }
 0x274   : > { %v1223_v7 = vpack.c.bf16 %v1202_v55, %v1201_v15  ;;  %v2550_v62 = vadd.f32 %v2509_v32, %v2425_v6  ;;  %v2633_v4 = vsel %vm2591_vm8, %v11485_v63, 0.0  ;;  %v2634_v60 = vsel %vm2592_vm9, %v11485_v63, 0.0  ;;  %v11494_v55 = vld [vmem:[#allocation89_spill] sm:$0xff] }
 0x275   : > { %v2674_v14 = vadd.f32 %v2633_v4, %v2549_v58  ;;  %vm2716_vm10 = vcmp.eq.s32.totalorder %v11486_v51, %v6584_v5  ;;  %vm2717_vm11 = vcmp.eq.s32.totalorder %v11486_v51, %v6587_v11  ;;  %vm1820_vm12 = vcmp.eq.s32.totalorder %v6319_v33, %v11493_v37  ;;  %v11495_v5 = vld [vmem:[#allocation90_spill] sm:$0xff] }
 0x276   : > { %1808 = vmatpush.bf16.msra.mxu3 %v1223_v7  ;;  %v2675_v20 = vadd.f32 %v2634_v60, %v2550_v62  ;;  %v2758_v48 = vsel %vm2716_vm10, %v11487_v49, 0.0  ;;  %v2759_v15 = vsel %vm2717_vm11, %v11487_v49, 0.0  ;;  %vm1821_vm13 = vcmp.eq.s32.totalorder %v6319_v33, %v11494_v55 }
 0x277   : > { %v2799_v6 = vadd.f32 %v2758_v48, %v2674_v14  ;;  %v1862_v3 = vsel %vm1820_vm12, %v6322_v35, 0.0  ;;  %v1863_v32 = vsel %vm1821_vm13, %v6322_v35, 0.0  ;;  %vm1904_vm14 = vcmp.eq.s32.totalorder %v6324_v38, %v11493_v37 }
 0x278   : > { %v2800_v58 = vadd.f32 %v2759_v15, %v2675_v20  ;;  %vm1905_vm15 = vcmp.eq.s32.totalorder %v6324_v38, %v11494_v55  ;;  %v1946_v7 = vsel %vm1904_vm14, %v6327_v39, 0.0  ;;  %vm2029_vm0 = vcmp.eq.s32.totalorder %v6329_v40, %v11493_v37 }
 0x279   : > { %v1947_v62 = vsel %vm1905_vm15, %v6327_v39, 0.0  ;;  %v1987_v4 = vadd.f32 %v1946_v7, %v1862_v3  ;;  %vm2030_vm1 = vcmp.eq.s32.totalorder %v6329_v40, %v11494_v55  ;;  %v2071_v60 = vsel %vm2029_vm0, %v6332_v42, 0.0 }
 0x27a   : > { %v2826_v14 = vpack.c.bf16 %v2800_v58, %v2799_v6  ;;  %v1988_v48 = vadd.f32 %v1947_v62, %v1863_v32  ;;  %v2072_v20 = vsel %vm2030_vm1, %v6332_v42, 0.0  ;;  %vm2154_vm2 = vcmp.eq.s32.totalorder %v6335_v44, %v11493_v37  ;;  %v11496_v6 = vld [vmem:[#allocation91_spill] sm:$0xff] }
 0x27b   : > { %v2112_v15 = vadd.f32 %v2071_v60, %v1987_v4  ;;  %vm2155_vm3 = vcmp.eq.s32.totalorder %v6335_v44, %v11494_v55  ;;  %v2196_v11 = vsel %vm2154_vm2, %v6338_v45, 0.0  ;;  %vm1836_vm4 = vcmp.eq.s32.totalorder %v6319_v33, %v11495_v5 }
 0x27c   : > { %2863 = vmatpush.bf16.msrb.mxu2 %v2826_v14  ;;  %v2113_v3 = vadd.f32 %v2072_v20, %v1988_v48  ;;  %v2197_v7 = vsel %vm2155_vm3, %v6338_v45, 0.0  ;;  %vm1837_vm5 = vcmp.eq.s32.totalorder %v6319_v33, %v11496_v6  ;;  %v1878_v32 = vsel %vm1836_vm4, %v6322_v35, 0.0 }
 0x27d   : > { %v2237_v58 = vadd.f32 %v2196_v11, %v2112_v15  ;;  %v1879_v62 = vsel %vm1837_vm5, %v6322_v35, 0.0  ;;  %vm1920_vm8 = vcmp.eq.s32.totalorder %v6324_v38, %v11495_v5  ;;  %vm1921_vm9 = vcmp.eq.s32.totalorder %v6324_v38, %v11496_v6 }
 0x27e   : > { %v2238_v4 = vadd.f32 %v2197_v7, %v2113_v3  ;;  %v1962_v60 = vsel %vm1920_vm8, %v6327_v39, 0.0  ;;  %v1963_v14 = vsel %vm1921_vm9, %v6327_v39, 0.0  ;;  %vm2045_vm10 = vcmp.eq.s32.totalorder %v6329_v40, %v11495_v5 }
 0x27f   : > { %v2003_v48 = vadd.f32 %v1962_v60, %v1878_v32  ;;  %v2004_v20 = vadd.f32 %v1963_v14, %v1879_v62  ;;  %vm2046_vm11 = vcmp.eq.s32.totalorder %v6329_v40, %v11496_v6  ;;  %v2087_v11 = vsel %vm2045_vm10, %v6332_v42, 0.0 }
 0x280   : > { %v2277_v15 = vpack.c.bf16 %v2238_v4, %v2237_v58  ;;  %v2088_v41 = vsel %vm2046_vm11, %v6332_v42, 0.0  ;;  %vm2170_vm12 = vcmp.eq.s32.totalorder %v6335_v44, %v11495_v5  ;;  %vm2171_vm13 = vcmp.eq.s32.totalorder %v6335_v44, %v11496_v6 }
 0x281   : > { %v2128_v3 = vadd.f32 %v2087_v11, %v2003_v48  ;;  %v2129_v7 = vadd.f32 %v2088_v41, %v2004_v20  ;;  %v2212_v55 = vsel %vm2170_vm12, %v6338_v45, 0.0  ;;  %v2213_v32 = vsel %vm2171_vm13, %v6338_v45, 0.0 }
 0x282   : > { %2319 = vmatpush.bf16.msra.mxu0 %v2277_v15  ;;  %vm782_vm14 = vcmp.eq.s32.totalorder %v6259_v1, %v7559_v19  ;;  %vm783_vm15 = vcmp.eq.s32.totalorder %v6259_v1, %v7562_v12  ;;  %vm866_vm0 = vcmp.eq.s32.totalorder %v6298_v23, %v7559_v19  ;;  %vm867_vm1 = vcmp.eq.s32.totalorder %v6298_v23, %v7562_v12 }
 0x283   : > { %v2253_v58 = vadd.f32 %v2212_v55, %v2128_v3  ;;  %v2254_v62 = vadd.f32 %v2213_v32, %v2129_v7  ;;  %v824_v41 = vsel %vm782_vm14, %v6287_v10, 0.0  ;;  %v825_v4 = vsel %vm783_vm15, %v6287_v10, 0.0 }
 0x284   : > { %v908_v60 = vsel %vm866_vm0, %v6290_v22, 0.0  ;;  %v909_v14 = vsel %vm867_vm1, %v6290_v22, 0.0  ;;  %vm991_vm2 = vcmp.eq.s32.totalorder %v6300_v13, %v7559_v19  ;;  %vm992_vm3 = vcmp.eq.s32.totalorder %v6300_v13, %v7562_v12 }
 0x285   : > { %v2285_v48 = vpack.c.bf16 %v2254_v62, %v2253_v58  ;;  %v949_v20 = vadd.f32 %v908_v60, %v824_v41  ;;  %v950_v11 = vadd.f32 %v909_v14, %v825_v4  ;;  %v1033_v55 = vsel %vm991_vm2, %v6293_v9, 0.0 }
 0x286   : > { %v1034_v15 = vsel %vm992_vm3, %v6293_v9, 0.0  ;;  %vm1116_vm4 = vcmp.eq.s32.totalorder %v6262_v2, %v7559_v19  ;;  %vm1117_vm5 = vcmp.eq.s32.totalorder %v6262_v2, %v7562_v12  ;;  %vm2380_vm8 = vcmp.eq.s32.totalorder %v11480_v59, %v6715_v53 }
 0x287   : > { %2332 = vmatpush.bf16.msra.mxu1 %v2285_v48  ;;  %v1074_v3 = vadd.f32 %v1033_v55, %v949_v20  ;;  %v1075_v7 = vadd.f32 %v1034_v15, %v950_v11  ;;  %v1158_v32 = vsel %vm1116_vm4, %v6296_v17, 0.0  ;;  %v1159_v58 = vsel %vm1117_vm5, %v6296_v17, 0.0 }
 0x288   : > { %vm2381_vm9 = vcmp.eq.s32.totalorder %v11480_v59, %v6719_v43  ;;  %v2422_v62 = vsel %vm2380_vm8, %v11482_v56, 0.0  ;;  %vm2464_vm10 = vcmp.eq.s32.totalorder %v11481_v25, %v6715_v53  ;;  %vm2465_vm11 = vcmp.eq.s32.totalorder %v11481_v25, %v6719_v43 }
 0x289   : > { %v1199_v41 = vadd.f32 %v1158_v32, %v1074_v3  ;;  %v1200_v4 = vadd.f32 %v1159_v58, %v1075_v7  ;;  %v2423_v60 = vsel %vm2381_vm9, %v11482_v56, 0.0  ;;  %v2506_v14 = vsel %vm2464_vm10, %v11483_v27, 0.0 }
 0x28a   : > { %v2507_v48 = vsel %vm2465_vm11, %v11483_v27, 0.0  ;;  %v2547_v20 = vadd.f32 %v2506_v14, %v2422_v62  ;;  %vm2589_vm12 = vcmp.eq.s32.totalorder %v11484_v8, %v6715_v53  ;;  %vm2590_vm13 = vcmp.eq.s32.totalorder %v11484_v8, %v6719_v43 }
 0x28b   : > { %v1222_v11 = vpack.c.bf16 %v1200_v4, %v1199_v41  ;;  %v2548_v55 = vadd.f32 %v2507_v48, %v2423_v60  ;;  %v2631_v15 = vsel %vm2589_vm12, %v11485_v63, 0.0  ;;  %v2632_v3 = vsel %vm2590_vm13, %v11485_v63, 0.0 }
 0x28c   : > { %v2672_v7 = vadd.f32 %v2631_v15, %v2547_v20  ;;  %vm2714_vm14 = vcmp.eq.s32.totalorder %v11486_v51, %v6715_v53  ;;  %vm2715_vm15 = vcmp.eq.s32.totalorder %v11486_v51, %v6719_v43  ;;  %vm1818_vm0 = vcmp.eq.s32.totalorder %v6319_v33, %v6222_v16 }
 0x28d   : > { %1809 = vmatpush.bf16.msra.mxu3 %v1222_v11  ;;  %v2673_v32 = vadd.f32 %v2632_v3, %v2548_v55  ;;  %v2756_v58 = vsel %vm2714_vm14, %v11487_v49, 0.0  ;;  %v2757_v62 = vsel %vm2715_vm15, %v11487_v49, 0.0  ;;  %vm1819_vm1 = vcmp.eq.s32.totalorder %v6319_v33, %v7248_v47 }
 0x28e   : > { %v2797_v41 = vadd.f32 %v2756_v58, %v2672_v7  ;;  %v1860_v4 = vsel %vm1818_vm0, %v6322_v35, 0.0  ;;  %v1861_v60 = vsel %vm1819_vm1, %v6322_v35, 0.0  ;;  %vm1902_vm2 = vcmp.eq.s32.totalorder %v6324_v38, %v6222_v16 }
 0x28f   : > { %v2798_v14 = vadd.f32 %v2757_v62, %v2673_v32  ;;  %vm1903_vm3 = vcmp.eq.s32.totalorder %v6324_v38, %v7248_v47  ;;  %v1944_v48 = vsel %vm1902_vm2, %v6327_v39, 0.0  ;;  %vm2027_vm4 = vcmp.eq.s32.totalorder %v6329_v40, %v6222_v16 }
 0x290   : > { %v1945_v20 = vsel %vm1903_vm3, %v6327_v39, 0.0  ;;  %v1985_v11 = vadd.f32 %v1944_v48, %v1860_v4  ;;  %vm2028_vm5 = vcmp.eq.s32.totalorder %v6329_v40, %v7248_v47  ;;  %v2069_v55 = vsel %vm2027_vm4, %v6332_v42, 0.0 }
 0x291   : > { %v2825_v15 = vpack.c.bf16 %v2798_v14, %v2797_v41  ;;  %v1986_v3 = vadd.f32 %v1945_v20, %v1861_v60  ;;  %v2070_v7 = vsel %vm2028_vm5, %v6332_v42, 0.0  ;;  %vm2152_vm8 = vcmp.eq.s32.totalorder %v6335_v44, %v6222_v16 }
 0x292   : > { %v2110_v32 = vadd.f32 %v2069_v55, %v1985_v11  ;;  %vm2153_vm9 = vcmp.eq.s32.totalorder %v6335_v44, %v7248_v47  ;;  %v2194_v58 = vsel %vm2152_vm8, %v6338_v45, 0.0  ;;  %vm1834_vm10 = vcmp.eq.s32.totalorder %v6319_v33, %v7277_v18  ;;  %v11506_v47 = vld [vmem:[#allocation34_spill] sm:$0xff] }
 0x293   : > { %2864 = vmatpush.bf16.msrb.mxu2 %v2825_v15  ;;  %v2111_v62 = vadd.f32 %v2070_v7, %v1986_v3  ;;  %v2195_v4 = vsel %vm2153_vm9, %v6338_v45, 0.0  ;;  %vm1835_vm11 = vcmp.eq.s32.totalorder %v6319_v33, %v7280_v57  ;;  %v1876_v41 = vsel %vm1834_vm10, %v6322_v35, 0.0  ;;  %v532_v15 = vpop.f32.mrf.mxu2 }
 0x294   : > { %v2235_v60 = vadd.f32 %v2194_v58, %v2110_v32  ;;  %v1877_v14 = vsel %vm1835_vm11, %v6322_v35, 0.0  ;;  %vm1918_vm12 = vcmp.eq.s32.totalorder %v6324_v38, %v7277_v18  ;;  %vm1919_vm13 = vcmp.eq.s32.totalorder %v6324_v38, %v7280_v57 }
 0x295   : > { %v2236_v48 = vadd.f32 %v2195_v4, %v2111_v62  ;;  %v1960_v20 = vsel %vm1918_vm12, %v6327_v39, 0.0  ;;  %v1961_v11 = vsel %vm1919_vm13, %v6327_v39, 0.0  ;;  %vm2043_vm14 = vcmp.eq.s32.totalorder %v6329_v40, %v7277_v18 }
 0x296   : > { %v2001_v33 = vadd.f32 %v1960_v20, %v1876_v41  ;;  %v2002_v55 = vadd.f32 %v1961_v11, %v1877_v14  ;;  %vm2044_vm15 = vcmp.eq.s32.totalorder %v6329_v40, %v7280_v57  ;;  %v2085_v35 = vsel %vm2043_vm14, %v6332_v42, 0.0 }
 0x297   : > { %v2276_v3 = vpack.c.bf16 %v2236_v48, %v2235_v60  ;;  %v2086_v7 = vsel %vm2044_vm15, %v6332_v42, 0.0  ;;  %vm2168_vm0 = vcmp.eq.s32.totalorder %v6335_v44, %v7277_v18  ;;  %vm2169_vm1 = vcmp.eq.s32.totalorder %v6335_v44, %v7280_v57 }
 0x298   : > { %v2126_v38 = vadd.f32 %v2085_v35, %v2001_v33  ;;  %v2127_v39 = vadd.f32 %v2086_v7, %v2002_v55  ;;  %v2210_v32 = vsel %vm2168_vm0, %v6338_v45, 0.0  ;;  %v2211_v58 = vsel %vm2169_vm1, %v6338_v45, 0.0 }
 0x299   : > { %2320 = vmatpush.bf16.msra.mxu0 %v2276_v3  ;;  %v558_v40 = vpack.c.bf16 %v532_v15, %v532_v15  ;;  %vm780_vm2 = vcmp.eq.s32.totalorder %v6259_v1, %v7661_v61  ;;  %vm781_vm3 = vcmp.eq.s32.totalorder %v6259_v1, %v7666_v28  ;;  %vm864_vm4 = vcmp.eq.s32.totalorder %v6298_v23, %v7661_v61 }
 0x29a   : > { %v2251_v42 = vadd.f32 %v2210_v32, %v2126_v38  ;;  %v2252_v62 = vadd.f32 %v2211_v58, %v2127_v39  ;;  %v822_v44 = vsel %vm780_vm2, %v6287_v10, 0.0  ;;  %v823_v4 = vsel %vm781_vm3, %v6287_v10, 0.0 }
 0x29b   : > { %v2301_v41 = vunpack.c.l.b16 %v558_v40  ;;  %vm865_vm5 = vcmp.eq.s32.totalorder %v6298_v23, %v7666_v28  ;;  %v906_v45 = vsel %vm864_vm4, %v6290_v22, 0.0  ;;  %vm989_vm8 = vcmp.eq.s32.totalorder %v6300_v13, %v7661_v61 }
 0x29c   : > { %v2284_v60 = vpack.c.bf16 %v2252_v62, %v2251_v42  ;;  %v907_v14 = vsel %vm865_vm5, %v6290_v22, 0.0  ;;  %v947_v48 = vadd.f32 %v906_v45, %v822_v44  ;;  %vm990_vm9 = vcmp.eq.s32.totalorder %v6300_v13, %v7666_v28 }
 0x29d   : > { %v2304_v20 = vpack.c.b16 %v2301_v41, %v2301_v41  ;;  %v948_v11 = vadd.f32 %v907_v14, %v823_v4  ;;  %v1031_v33 = vsel %vm989_vm8, %v6293_v9, 0.0  ;;  %v1032_v55 = vsel %vm990_vm9, %v6293_v9, 0.0 }
 0x29e   : > { %2333 = vmatpush.bf16.msra.mxu1 %v2284_v60  ;;  %v1072_v35 = vadd.f32 %v1031_v33, %v947_v48  ;;  %vm1114_vm10 = vcmp.eq.s32.totalorder %v6262_v2, %v7661_v61  ;;  %vm1115_vm11 = vcmp.eq.s32.totalorder %v6262_v2, %v7666_v28  ;;  %vm2378_vm12 = vcmp.eq.s32.totalorder %v11480_v59, %v6803_v46 }
 0x29f   : > { %v1073_v15 = vadd.f32 %v1032_v55, %v948_v11  ;;  %v1156_v3 = vsel %vm1114_vm10, %v6296_v17, 0.0  ;;  %v1157_v7 = vsel %vm1115_vm11, %v6296_v17, 0.0  ;;  %vm2379_vm13 = vcmp.eq.s32.totalorder %v11480_v59, %v6806_v29  ;;  %5740 = vmatmul.msk.bf16.vlgmr.msra.gmra.mxu2 %vm1715_vm6, %v2304_v20 }
 0x2a0   : > { %v1197_v38 = vadd.f32 %v1156_v3, %v1072_v35  ;;  %v2420_v39 = vsel %vm2378_vm12, %v11482_v56, 0.0  ;;  %v2421_v32 = vsel %vm2379_vm13, %v11482_v56, 0.0  ;;  %vm2462_vm14 = vcmp.eq.s32.totalorder %v11481_v25, %v6803_v46 }
 0x2a1   : > { %v1198_v58 = vadd.f32 %v1157_v7, %v1073_v15  ;;  %vm2463_vm15 = vcmp.eq.s32.totalorder %v11481_v25, %v6806_v29  ;;  %v2504_v40 = vsel %vm2462_vm14, %v11483_v27, 0.0  ;;  %vm2587_vm0 = vcmp.eq.s32.totalorder %v11484_v8, %v6803_v46 }
 0x2a2   : > { %v2505_v42 = vsel %vm2463_vm15, %v11483_v27, 0.0  ;;  %v2545_v62 = vadd.f32 %v2504_v40, %v2420_v39  ;;  %vm2588_vm1 = vcmp.eq.s32.totalorder %v11484_v8, %v6806_v29  ;;  %v2629_v44 = vsel %vm2587_vm0, %v11485_v63, 0.0  ;;  %v11498_v39 = vld [vmem:[#allocation14_spill] sm:$0xff] }
 0x2a3   : > { %v1221_v4 = vpack.c.bf16 %v1198_v58, %v1197_v38  ;;  %v2546_v41 = vadd.f32 %v2505_v42, %v2421_v32  ;;  %v2630_v45 = vsel %vm2588_vm1, %v11485_v63, 0.0  ;;  %vm2712_vm2 = vcmp.eq.s32.totalorder %v11486_v51, %v6803_v46  ;;  %v11497_v38 = vld [vmem:[#allocation27_spill] sm:$0xff]  ;;  %v11499_v32 = vld [vmem:[#allocation29_spill] sm:$0xff]  ;;  %v11500_v42 = vld [vmem:[#allocation28_spill] sm:$0xff] }
 0x2a4   : > { %v2670_v60 = vadd.f32 %v2629_v44, %v2545_v62  ;;  %vm2713_vm3 = vcmp.eq.s32.totalorder %v11486_v51, %v6806_v29  ;;  %v2754_v14 = vsel %vm2712_vm2, %v11487_v49, 0.0  ;;  %vm2394_vm4 = vcmp.eq.s32.totalorder %v11480_v59, %v7364_v52 }
 0x2a5   : > { %1810 = vmatpush.bf16.msra.mxu3 %v1221_v4  ;;  %v2671_v48 = vadd.f32 %v2630_v45, %v2546_v41  ;;  %v2755_v20 = vsel %vm2713_vm3, %v11487_v49, 0.0  ;;  %v2436_v11 = vsel %vm2394_vm4, %v11482_v56, 0.0  ;;  %vm2478_vm5 = vcmp.eq.s32.totalorder %v11481_v25, %v7364_v52  ;;  %v488_v4 = vpop.f32.mrf.mxu1  ;;  %v11501_v41 = vld [vmem:[#allocation30_spill] sm:$0xff] }
 0x2a6   : > { %v2795_v33 = vadd.f32 %v2754_v14, %v2670_v60  ;;  %v2520_v55 = vsel %vm2478_vm5, %v11483_v27, 0.0  ;;  %vm2603_vm8 = vcmp.eq.s32.totalorder %v11484_v8, %v7364_v52  ;;  %vm2728_vm9 = vcmp.eq.s32.totalorder %v11486_v51, %v7364_v52  ;;  %v11502_v14 = vld [vmem:[#allocation31_spill] sm:$0xff] }
 0x2a7   : > { %v2796_v35 = vadd.f32 %v2755_v20, %v2671_v48  ;;  %v2561_v15 = vadd.f32 %v2520_v55, %v2436_v11  ;;  %v2645_v3 = vsel %vm2603_vm8, %v11485_v63, 0.0  ;;  %v2770_v7 = vsel %vm2728_vm9, %v11487_v49, 0.0 }
 0x2a8   : > { %vm2904_vm10 = vcmp.eq.s32.totalorder %v11497_v38, %v6229_v36  ;;  %vm2905_vm11 = vcmp.eq.s32.totalorder %v11497_v38, %v11498_v39  ;;  %vm2988_vm12 = vcmp.eq.s32.totalorder %v11499_v32, %v6229_v36  ;;  %vm2989_vm13 = vcmp.eq.s32.totalorder %v11499_v32, %v11498_v39 }
 0x2a9   : > { %v2824_v58 = vpack.c.bf16 %v2796_v35, %v2795_v33  ;;  %v2686_v40 = vadd.f32 %v2645_v3, %v2561_v15  ;;  %v2946_v62 = vsel %vm2904_vm10, %v11500_v42, 0.0  ;;  %v2947_v44 = vsel %vm2905_vm11, %v11500_v42, 0.0  ;;  %v11503_v33 = vld [vmem:[#allocation32_spill] sm:$0xff]  ;;  %v11504_v15 = vld [vmem:[#allocation33_spill] sm:$0xff] }
 0x2aa   : > { %v3030_v45 = vsel %vm2988_vm12, %v11501_v41, 0.0  ;;  %v3031_v60 = vsel %vm2989_vm13, %v11501_v41, 0.0  ;;  %vm3113_vm14 = vcmp.eq.s32.totalorder %v11502_v14, %v6229_v36  ;;  %vm3114_vm15 = vcmp.eq.s32.totalorder %v11502_v14, %v11498_v39  ;;  %v11505_v3 = vld [vmem:[#allocation9_spill] sm:$0xff] }
 0x2ab   : > { %2865 = vmatpush.bf16.msrb.mxu2 %v2824_v58  ;;  %v2811_v48 = vadd.f32 %v2770_v7, %v2686_v40  ;;  %v3071_v20 = vadd.f32 %v3030_v45, %v2946_v62  ;;  %v3072_v11 = vadd.f32 %v3031_v60, %v2947_v44  ;;  %v3155_v55 = vsel %vm3113_vm14, %v11503_v33, 0.0 }
 0x2ac   : > { %v3156_v35 = vsel %vm3114_vm15, %v11503_v33, 0.0  ;;  %vm3238_vm0 = vcmp.eq.s32.totalorder %v11504_v15, %v6229_v36  ;;  %vm3239_vm1 = vcmp.eq.s32.totalorder %v11504_v15, %v11498_v39  ;;  %v557_v29 = vpack.c.bf16 %v488_v4, %v11505_v3 }
 0x2ad   : > { %v2832_v46 = vpack.c.bf16 %v2811_v48, %v2811_v48  ;;  %v3196_v43 = vadd.f32 %v3155_v55, %v3071_v20  ;;  %v3197_v53 = vadd.f32 %v3156_v35, %v3072_v11  ;;  %v3280_v58 = vsel %vm3238_vm0, %v11506_v47, 0.0 }
 0x2ae   : > { %v3281_v7 = vsel %vm3239_vm1, %v11506_v47, 0.0  ;;  %v2299_v40 = vunpack.c.l.b16 %v557_v29  ;;  %v2300_v62 = vunpack.c.h.b16 %v557_v29  ;;  %vm778_vm2 = vcmp.eq.s32.totalorder %v6259_v1, %v7770_v0 }
 0x2af   : > { %v2847_v44 = vsel %vm1719_vm7, %v2832_v46, 0  ;;  %v3321_v45 = vadd.f32 %v3280_v58, %v3196_v43  ;;  %v3322_v60 = vadd.f32 %v3281_v7, %v3197_v53  ;;  %vm779_vm3 = vcmp.eq.s32.totalorder %v6259_v1, %v7773_v50 }
 0x2b0   : > { %2878 = vmatpush.bf16.msrb.mxu0 %v2847_v44  ;;  %v2302_v4 = vpack.c.b16 %v2299_v40, %v2299_v40  ;;  %v2303_v48 = vpack.c.b16 %v2300_v62, %v2300_v62  ;;  %v820_v20 = vsel %vm778_vm2, %v6287_v10, 0.0  ;;  %v821_v11 = vsel %vm779_vm3, %v6287_v10, 0.0 }
 0x2b1   : > { %v3355_v55 = vpack.c.bf16 %v3322_v60, %v3321_v45  ;;  %vm862_vm4 = vcmp.eq.s32.totalorder %v6298_v23, %v7770_v0  ;;  %vm863_vm5 = vcmp.eq.s32.totalorder %v6298_v23, %v7773_v50  ;;  %vm987_vm8 = vcmp.eq.s32.totalorder %v6300_v13, %v7770_v0  ;;  %v11507_v23 = vld [vmem:[#allocation83_spill] sm:$0xff] }
 0x2b2   : > { %v904_v53 = vsel %vm862_vm4, %v6290_v22, 0.0  ;;  %v905_v1 = vsel %vm863_vm5, %v6290_v22, 0.0  ;;  %vm988_vm9 = vcmp.eq.s32.totalorder %v6300_v13, %v7773_v50  ;;  %v1029_v43 = vsel %vm987_vm8, %v6293_v9, 0.0  ;;  %2321 = vmatmul.bf16.vlgmr.msra.gmra.mxu0 %v2302_v4  ;;  %2334 = vmatmul.bf16.vlgmr.msra.gmra.mxu1 %v2303_v48 }
 0x2b3   : > { %3385 = vmatpush.bf16.msrb.mxu1 %v3355_v55  ;;  %v945_v10 = vadd.f32 %v904_v53, %v820_v20  ;;  %v946_v46 = vadd.f32 %v905_v1, %v821_v11  ;;  %v1030_v29 = vsel %vm988_vm9, %v6293_v9, 0.0  ;;  %vm1112_vm10 = vcmp.eq.s32.totalorder %v6262_v2, %v7770_v0 }
 0x2b4   : > { %vm1113_vm11 = vcmp.eq.s32.totalorder %v6262_v2, %v7773_v50  ;;  %v1154_v22 = vsel %vm1112_vm10, %v6296_v17, 0.0  ;;  %vm2376_vm12 = vcmp.eq.s32.totalorder %v11480_v59, %v11478_v54  ;;  %vm2377_vm13 = vcmp.eq.s32.totalorder %v11480_v59, %v11507_v23 }
 0x2b5   : > { %v1070_v13 = vadd.f32 %v1029_v43, %v945_v10  ;;  %v1071_v35 = vadd.f32 %v1030_v29, %v946_v46  ;;  %v1155_v3 = vsel %vm1113_vm11, %v6296_v17, 0.0  ;;  %v2418_v9 = vsel %vm2376_vm12, %v11482_v56, 0.0 }
 0x2b6   : > { %v2419_v58 = vsel %vm2377_vm13, %v11482_v56, 0.0  ;;  %vm2460_vm14 = vcmp.eq.s32.totalorder %v11481_v25, %v11478_v54  ;;  %vm2461_vm15 = vcmp.eq.s32.totalorder %v11481_v25, %v11507_v23  ;;  %vm2585_vm0 = vcmp.eq.s32.totalorder %v11484_v8, %v11478_v54 }
 0x2b7   : > { %v1195_v2 = vadd.f32 %v1154_v22, %v1070_v13  ;;  %v1196_v7 = vadd.f32 %v1155_v3, %v1071_v35  ;;  %v2502_v40 = vsel %vm2460_vm14, %v11483_v27, 0.0  ;;  %v2503_v62 = vsel %vm2461_vm15, %v11483_v27, 0.0 }
 0x2b8   : > { %v2543_v17 = vadd.f32 %v2502_v40, %v2418_v9  ;;  %v2544_v44 = vadd.f32 %v2503_v62, %v2419_v58  ;;  %vm2586_vm1 = vcmp.eq.s32.totalorder %v11484_v8, %v11507_v23  ;;  %v2627_v45 = vsel %vm2585_vm0, %v11485_v63, 0.0  ;;  %v11508_v9 = vld [vmem:[#allocation95_spill] sm:$0xff] }
 0x2b9   : > { %v1220_v60 = vpack.c.bf16 %v1196_v7, %v1195_v2  ;;  %v2628_v4 = vsel %vm2586_vm1, %v11485_v63, 0.0  ;;  %vm2710_vm2 = vcmp.eq.s32.totalorder %v11486_v51, %v11478_v54  ;;  %vm2711_vm3 = vcmp.eq.s32.totalorder %v11486_v51, %v11507_v23  ;;  %v11510_v7 = vld [vmem:[#allocation68_spill] sm:$0xff] }
 0x2ba   : > { %v2668_v48 = vadd.f32 %v2627_v45, %v2543_v17  ;;  %v2669_v20 = vadd.f32 %v2628_v4, %v2544_v44  ;;  %v2752_v11 = vsel %vm2710_vm2, %v11487_v49, 0.0  ;;  %v2753_v55 = vsel %vm2711_vm3, %v11487_v49, 0.0  ;;  %v11511_v45 = vld [vmem:[#allocation69_spill] sm:$0xff] }
 0x2bb   : > { %1811 = vmatpush.bf16.msra.mxu3 %v1220_v60  ;;  %vm2392_vm4 = vcmp.eq.s32.totalorder %v11480_v59, %v7443_v34  ;;  %vm2393_vm5 = vcmp.eq.s32.totalorder %v11480_v59, %v7446_v30  ;;  %vm2476_vm8 = vcmp.eq.s32.totalorder %v11481_v25, %v7443_v34  ;;  %vm2477_vm9 = vcmp.eq.s32.totalorder %v11481_v25, %v7446_v30 }
 0x2bc   : > { %v2793_v53 = vadd.f32 %v2752_v11, %v2668_v48  ;;  %v2794_v1 = vadd.f32 %v2753_v55, %v2669_v20  ;;  %v2434_v43 = vsel %vm2392_vm4, %v11482_v56, 0.0  ;;  %v2435_v10 = vsel %vm2393_vm5, %v11482_v56, 0.0 }
 0x2bd   : > { %v2518_v46 = vsel %vm2476_vm8, %v11483_v27, 0.0  ;;  %v2519_v29 = vsel %vm2477_vm9, %v11483_v27, 0.0  ;;  %vm2601_vm10 = vcmp.eq.s32.totalorder %v11484_v8, %v7443_v34  ;;  %vm2602_vm11 = vcmp.eq.s32.totalorder %v11484_v8, %v7446_v30 }
 0x2be   : > { %v2823_v22 = vpack.c.bf16 %v2794_v1, %v2793_v53  ;;  %v2559_v13 = vadd.f32 %v2518_v46, %v2434_v43  ;;  %v2560_v35 = vadd.f32 %v2519_v29, %v2435_v10  ;;  %v2643_v3 = vsel %vm2601_vm10, %v11485_v63, 0.0 }
 0x2bf   : > { %v11509_v58 = vpack.c.b16 %v11508_v9, %v11508_v9  ;;  %v2644_v2 = vsel %vm2602_vm11, %v11485_v63, 0.0  ;;  %vm2726_vm12 = vcmp.eq.s32.totalorder %v11486_v51, %v7443_v34  ;;  %vm2727_vm13 = vcmp.eq.s32.totalorder %v11486_v51, %v7446_v30 }
 0x2c0   : > { %vm2902_vm14 = vcmp.eq.s32.totalorder %v11497_v38, %v11510_v7  ;;  %2866 = vmatpush.bf16.msrb.mxu2 %v2823_v22  ;;  %v2684_v40 = vadd.f32 %v2643_v3, %v2559_v13  ;;  %v2685_v62 = vadd.f32 %v2644_v2, %v2560_v35  ;;  %v2768_v17 = vsel %vm2726_vm12, %v11487_v49, 0.0 }
 0x2c1   : > { %5739 = vmatmul.msk.bf16.vlgmr.msra.gmra.mxu3 %vm1715_vm6, %v11509_v58  ;;  %v2769_v44 = vsel %vm2727_vm13, %v11487_v49, 0.0  ;;  %vm2903_vm15 = vcmp.eq.s32.totalorder %v11497_v38, %v11511_v45  ;;  %v2944_v60 = vsel %vm2902_vm14, %v11500_v42, 0.0  ;;  %vm2986_vm0 = vcmp.eq.s32.totalorder %v11499_v32, %v11510_v7 }
 0x2c2   : > { %vm2987_vm1 = vcmp.eq.s32.totalorder %v11499_v32, %v11511_v45  ;;  %v2809_v4 = vadd.f32 %v2768_v17, %v2684_v40  ;;  %v2810_v48 = vadd.f32 %v2769_v44, %v2685_v62  ;;  %v2945_v20 = vsel %vm2903_vm15, %v11500_v42, 0.0 }
 0x2c3   : > { %v3028_v11 = vsel %vm2986_vm0, %v11501_v41, 0.0  ;;  %v3029_v55 = vsel %vm2987_vm1, %v11501_v41, 0.0  ;;  %vm3111_vm2 = vcmp.eq.s32.totalorder %v11502_v14, %v11510_v7  ;;  %vm3112_vm3 = vcmp.eq.s32.totalorder %v11502_v14, %v11511_v45 }
 0x2c4   : > { %v3069_v53 = vadd.f32 %v3028_v11, %v2944_v60  ;;  %v2831_v1 = vpack.c.bf16 %v2810_v48, %v2809_v4  ;;  %v3070_v43 = vadd.f32 %v3029_v55, %v2945_v20  ;;  %v3153_v10 = vsel %vm3111_vm2, %v11503_v33, 0.0 }
 0x2c5   : > { %v3154_v46 = vsel %vm3112_vm3, %v11503_v33, 0.0  ;;  %vm3236_vm4 = vcmp.eq.s32.totalorder %v11504_v15, %v11510_v7  ;;  %vm3237_vm5 = vcmp.eq.s32.totalorder %v11504_v15, %v11511_v45  ;;  %vm2368_vm8 = vcmp.eq.s32.totalorder %v11480_v59, %v6229_v36 }
 0x2c6   : > { %v3194_v29 = vadd.f32 %v3153_v10, %v3069_v53  ;;  %2879 = vmatpush.bf16.msrb.mxu0 %v2831_v1  ;;  %v3195_v22 = vadd.f32 %v3154_v46, %v3070_v43  ;;  %v3278_v13 = vsel %vm3236_vm4, %v11506_v47, 0.0  ;;  %v3279_v35 = vsel %vm3237_vm5, %v11506_v47, 0.0 }
 0x2c7   : > { %vm2369_vm9 = vcmp.eq.s32.totalorder %v11480_v59, %v11498_v39  ;;  %v2410_v9 = vsel %vm2368_vm8, %v11482_v56, 0.0  ;;  %vm2452_vm10 = vcmp.eq.s32.totalorder %v11481_v25, %v6229_v36  ;;  %vm2453_vm11 = vcmp.eq.s32.totalorder %v11481_v25, %v11498_v39 }
 0x2c8   : > { %v3319_v3 = vadd.f32 %v3278_v13, %v3194_v29  ;;  %v2411_v58 = vsel %vm2369_vm9, %v11482_v56, 0.0  ;;  %v3320_v2 = vadd.f32 %v3279_v35, %v3195_v22  ;;  %v2494_v40 = vsel %vm2452_vm10, %v11483_v27, 0.0 }
 0x2c9   : > { %vm2577_vm12 = vcmp.eq.s32.totalorder %v11484_v8, %v6229_v36  ;;  %v2495_v62 = vsel %vm2453_vm11, %v11483_v27, 0.0  ;;  %v2535_v17 = vadd.f32 %v2494_v40, %v2410_v9  ;;  %vm2578_vm13 = vcmp.eq.s32.totalorder %v11484_v8, %v11498_v39 }
 0x2ca   : > { %v2619_v44 = vsel %vm2577_vm12, %v11485_v63, 0.0  ;;  %v3354_v60 = vpack.c.bf16 %v3320_v2, %v3319_v3  ;;  %v2536_v4 = vadd.f32 %v2495_v62, %v2411_v58  ;;  %v2620_v48 = vsel %vm2578_vm13, %v11485_v63, 0.0 }
 0x2cb   : > { %vm2702_vm14 = vcmp.eq.s32.totalorder %v11486_v51, %v6229_v36  ;;  %v2660_v20 = vadd.f32 %v2619_v44, %v2535_v17  ;;  %vm2703_vm15 = vcmp.eq.s32.totalorder %v11486_v51, %v11498_v39  ;;  %vm2374_vm0 = vcmp.eq.s32.totalorder %v11480_v59, %v11491_v21 }
 0x2cc   : > { %v2744_v11 = vsel %vm2702_vm14, %v11487_v49, 0.0  ;;  %3386 = vmatpush.bf16.msrb.mxu1 %v3354_v60  ;;  %v2661_v55 = vadd.f32 %v2620_v48, %v2536_v4  ;;  %v2745_v53 = vsel %vm2703_vm15, %v11487_v49, 0.0  ;;  %vm2375_vm1 = vcmp.eq.s32.totalorder %v11480_v59, %v11492_v31 }
 0x2cd   : > { %v2416_v1 = vsel %vm2374_vm0, %v11482_v56, 0.0  ;;  %v2785_v43 = vadd.f32 %v2744_v11, %v2660_v20  ;;  %v2417_v10 = vsel %vm2375_vm1, %v11482_v56, 0.0  ;;  %vm2458_vm2 = vcmp.eq.s32.totalorder %v11481_v25, %v11491_v21 }
 0x2ce   : > { %vm2459_vm3 = vcmp.eq.s32.totalorder %v11481_v25, %v11492_v31  ;;  %v2786_v46 = vadd.f32 %v2745_v53, %v2661_v55  ;;  %v2500_v29 = vsel %vm2458_vm2, %v11483_v27, 0.0  ;;  %vm2583_vm4 = vcmp.eq.s32.totalorder %v11484_v8, %v11491_v21 }
 0x2cf   : > { %v2501_v22 = vsel %vm2459_vm3, %v11483_v27, 0.0  ;;  %v2541_v13 = vadd.f32 %v2500_v29, %v2416_v1  ;;  %vm2584_vm5 = vcmp.eq.s32.totalorder %v11484_v8, %v11492_v31  ;;  %v2625_v3 = vsel %vm2583_vm4, %v11485_v63, 0.0 }
 0x2d0   : > { %v2542_v35 = vadd.f32 %v2501_v22, %v2417_v10  ;;  %v2819_v9 = vpack.c.bf16 %v2786_v46, %v2785_v43  ;;  %v2626_v58 = vsel %vm2584_vm5, %v11485_v63, 0.0  ;;  %vm2708_vm8 = vcmp.eq.s32.totalorder %v11486_v51, %v11491_v21  ;;  %v11512_v46 = vld [vmem:[#allocation72_spill] sm:$0xff] }
 0x2d1   : > { %vm2709_vm9 = vcmp.eq.s32.totalorder %v11486_v51, %v11492_v31  ;;  %v2666_v2 = vadd.f32 %v2625_v3, %v2541_v13  ;;  %v2750_v62 = vsel %vm2708_vm8, %v11487_v49, 0.0  ;;  %vm2390_vm10 = vcmp.eq.s32.totalorder %v11480_v59, %v7559_v19  ;;  %v11513_v3 = vld [vmem:[#allocation73_spill] sm:$0xff] }
 0x2d2   : > { %v2667_v40 = vadd.f32 %v2626_v58, %v2542_v35  ;;  %v2751_v17 = vsel %vm2709_vm9, %v11487_v49, 0.0  ;;  %2849 = vmatpush.bf16.msrb.mxu3 %v2819_v9  ;;  %vm2391_vm11 = vcmp.eq.s32.totalorder %v11480_v59, %v7562_v12  ;;  %vm2474_vm12 = vcmp.eq.s32.totalorder %v11481_v25, %v7559_v19 }
 0x2d3   : > { %vm2475_vm13 = vcmp.eq.s32.totalorder %v11481_v25, %v7562_v12  ;;  %v2791_v44 = vadd.f32 %v2750_v62, %v2666_v2  ;;  %v2432_v4 = vsel %vm2390_vm10, %v11482_v56, 0.0  ;;  %v2433_v48 = vsel %vm2391_vm11, %v11482_v56, 0.0 }
 0x2d4   : > { %v2792_v60 = vadd.f32 %v2751_v17, %v2667_v40  ;;  %v2516_v20 = vsel %vm2474_vm12, %v11483_v27, 0.0  ;;  %v2517_v11 = vsel %vm2475_vm13, %v11483_v27, 0.0  ;;  %vm2599_vm14 = vcmp.eq.s32.totalorder %v11484_v8, %v7559_v19 }
 0x2d5   : > { %vm2600_vm15 = vcmp.eq.s32.totalorder %v11484_v8, %v7562_v12  ;;  %v2557_v53 = vadd.f32 %v2516_v20, %v2432_v4  ;;  %v2558_v1 = vadd.f32 %v2517_v11, %v2433_v48  ;;  %v2641_v43 = vsel %vm2599_vm14, %v11485_v63, 0.0 }
 0x2d6   : > { %v2822_v55 = vpack.c.bf16 %v2792_v60, %v2791_v44  ;;  %v2642_v10 = vsel %vm2600_vm15, %v11485_v63, 0.0  ;;  %vm2724_vm0 = vcmp.eq.s32.totalorder %v11486_v51, %v7559_v19  ;;  %vm2725_vm1 = vcmp.eq.s32.totalorder %v11486_v51, %v7562_v12 }
 0x2d7   : > { %vm2900_vm2 = vcmp.eq.s32.totalorder %v11497_v38, %v11512_v46  ;;  %v2682_v29 = vadd.f32 %v2641_v43, %v2557_v53  ;;  %v2683_v22 = vadd.f32 %v2642_v10, %v2558_v1  ;;  %v2766_v13 = vsel %vm2724_vm0, %v11487_v49, 0.0 }
 0x2d8   : > { %2867 = vmatpush.bf16.msrb.mxu2 %v2822_v55  ;;  %v2767_v35 = vsel %vm2725_vm1, %v11487_v49, 0.0  ;;  %vm2901_vm3 = vcmp.eq.s32.totalorder %v11497_v38, %v11513_v3  ;;  %v2942_v9 = vsel %vm2900_vm2, %v11500_v42, 0.0  ;;  %vm2984_vm4 = vcmp.eq.s32.totalorder %v11499_v32, %v11512_v46 }
 0x2d9   : > { %vm2985_vm5 = vcmp.eq.s32.totalorder %v11499_v32, %v11513_v3  ;;  %v2807_v58 = vadd.f32 %v2766_v13, %v2682_v29  ;;  %v2808_v2 = vadd.f32 %v2767_v35, %v2683_v22  ;;  %v2943_v40 = vsel %vm2901_vm3, %v11500_v42, 0.0 }
 0x2da   : > { %v3026_v62 = vsel %vm2984_vm4, %v11501_v41, 0.0  ;;  %v3027_v17 = vsel %vm2985_vm5, %v11501_v41, 0.0  ;;  %vm3109_vm8 = vcmp.eq.s32.totalorder %v11502_v14, %v11512_v46  ;;  %vm3110_vm9 = vcmp.eq.s32.totalorder %v11502_v14, %v11513_v3 }
 0x2db   : > { %v3067_v44 = vadd.f32 %v3026_v62, %v2942_v9  ;;  %v2830_v60 = vpack.c.bf16 %v2808_v2, %v2807_v58  ;;  %v3068_v4 = vadd.f32 %v3027_v17, %v2943_v40  ;;  %v3151_v48 = vsel %vm3109_vm8, %v11503_v33, 0.0 }
 0x2dc   : > { %v3152_v20 = vsel %vm3110_vm9, %v11503_v33, 0.0  ;;  %vm3234_vm10 = vcmp.eq.s32.totalorder %v11504_v15, %v11512_v46  ;;  %vm3235_vm11 = vcmp.eq.s32.totalorder %v11504_v15, %v11513_v3  ;;  %vm2366_vm12 = vcmp.eq.s32.totalorder %v11480_v59, %v11510_v7 }
 0x2dd   : > { %v3192_v11 = vadd.f32 %v3151_v48, %v3067_v44  ;;  %2880 = vmatpush.bf16.msrb.mxu0 %v2830_v60  ;;  %v3193_v55 = vadd.f32 %v3152_v20, %v3068_v4  ;;  %v3276_v53 = vsel %vm3234_vm10, %v11506_v47, 0.0  ;;  %v3277_v1 = vsel %vm3235_vm11, %v11506_v47, 0.0 }
 0x2de   : > { %vm2367_vm13 = vcmp.eq.s32.totalorder %v11480_v59, %v11511_v45  ;;  %v2408_v10 = vsel %vm2366_vm12, %v11482_v56, 0.0  ;;  %vm2450_vm14 = vcmp.eq.s32.totalorder %v11481_v25, %v11510_v7  ;;  %vm2451_vm15 = vcmp.eq.s32.totalorder %v11481_v25, %v11511_v45 }
 0x2df   : > { %v3317_v43 = vadd.f32 %v3276_v53, %v3192_v11  ;;  %v2409_v29 = vsel %vm2367_vm13, %v11482_v56, 0.0  ;;  %v3318_v22 = vadd.f32 %v3277_v1, %v3193_v55  ;;  %v2492_v13 = vsel %vm2450_vm14, %v11483_v27, 0.0 }
 0x2e0   : > { %vm2575_vm0 = vcmp.eq.s32.totalorder %v11484_v8, %v11510_v7  ;;  %v2493_v35 = vsel %vm2451_vm15, %v11483_v27, 0.0  ;;  %v2533_v9 = vadd.f32 %v2492_v13, %v2408_v10  ;;  %vm2576_vm1 = vcmp.eq.s32.totalorder %v11484_v8, %v11511_v45 }
 0x2e1   : > { %v2617_v58 = vsel %vm2575_vm0, %v11485_v63, 0.0  ;;  %v3353_v2 = vpack.c.bf16 %v3318_v22, %v3317_v43  ;;  %v2534_v40 = vadd.f32 %v2493_v35, %v2409_v29  ;;  %v2618_v62 = vsel %vm2576_vm1, %v11485_v63, 0.0 }
 0x2e2   : > { %vm2700_vm2 = vcmp.eq.s32.totalorder %v11486_v51, %v11510_v7  ;;  %v2658_v17 = vadd.f32 %v2617_v58, %v2533_v9  ;;  %vm2701_vm3 = vcmp.eq.s32.totalorder %v11486_v51, %v11511_v45  ;;  %vm2372_vm4 = vcmp.eq.s32.totalorder %v11480_v59, %v11495_v5 }
 0x2e3   : > { %v2742_v44 = vsel %vm2700_vm2, %v11487_v49, 0.0  ;;  %3387 = vmatpush.bf16.msrb.mxu1 %v3353_v2  ;;  %v2659_v60 = vadd.f32 %v2618_v62, %v2534_v40  ;;  %v2743_v4 = vsel %vm2701_vm3, %v11487_v49, 0.0  ;;  %vm2373_vm5 = vcmp.eq.s32.totalorder %v11480_v59, %v11496_v6 }
 0x2e4   : > { %v2414_v48 = vsel %vm2372_vm4, %v11482_v56, 0.0  ;;  %v2783_v20 = vadd.f32 %v2742_v44, %v2658_v17  ;;  %v2415_v11 = vsel %vm2373_vm5, %v11482_v56, 0.0  ;;  %vm2456_vm8 = vcmp.eq.s32.totalorder %v11481_v25, %v11495_v5 }
 0x2e5   : > { %vm2457_vm9 = vcmp.eq.s32.totalorder %v11481_v25, %v11496_v6  ;;  %v2784_v55 = vadd.f32 %v2743_v4, %v2659_v60  ;;  %v2498_v53 = vsel %vm2456_vm8, %v11483_v27, 0.0  ;;  %vm2581_vm10 = vcmp.eq.s32.totalorder %v11484_v8, %v11495_v5 }
 0x2e6   : > { %v2499_v1 = vsel %vm2457_vm9, %v11483_v27, 0.0  ;;  %v2539_v43 = vadd.f32 %v2498_v53, %v2414_v48  ;;  %vm2582_vm11 = vcmp.eq.s32.totalorder %v11484_v8, %v11496_v6  ;;  %v2623_v29 = vsel %vm2581_vm10, %v11485_v63, 0.0 }
 0x2e7   : > { %v2540_v10 = vadd.f32 %v2499_v1, %v2415_v11  ;;  %v2818_v22 = vpack.c.bf16 %v2784_v55, %v2783_v20  ;;  %v2624_v13 = vsel %vm2582_vm11, %v11485_v63, 0.0  ;;  %vm2706_vm12 = vcmp.eq.s32.totalorder %v11486_v51, %v11495_v5  ;;  %v11514_v1 = vld [vmem:[#allocation76_spill] sm:$0xff] }
 0x2e8   : > { %vm2707_vm13 = vcmp.eq.s32.totalorder %v11486_v51, %v11496_v6  ;;  %v2664_v35 = vadd.f32 %v2623_v29, %v2539_v43  ;;  %v2748_v58 = vsel %vm2706_vm12, %v11487_v49, 0.0  ;;  %vm2388_vm14 = vcmp.eq.s32.totalorder %v11480_v59, %v7661_v61 }
 0x2e9   : > { %v2665_v9 = vadd.f32 %v2624_v13, %v2540_v10  ;;  %v2749_v2 = vsel %vm2707_vm13, %v11487_v49, 0.0  ;;  %2850 = vmatpush.bf16.msrb.mxu3 %v2818_v22  ;;  %vm2389_vm15 = vcmp.eq.s32.totalorder %v11480_v59, %v7666_v28  ;;  %vm2472_vm0 = vcmp.eq.s32.totalorder %v11481_v25, %v7661_v61  ;;  %v11515_v13 = vld [vmem:[#allocation77_spill] sm:$0xff] }
 0x2ea   : > { %vm2473_vm1 = vcmp.eq.s32.totalorder %v11481_v25, %v7666_v28  ;;  %v2789_v40 = vadd.f32 %v2748_v58, %v2664_v35  ;;  %v2430_v17 = vsel %vm2388_vm14, %v11482_v56, 0.0  ;;  %v2431_v44 = vsel %vm2389_vm15, %v11482_v56, 0.0 }
 0x2eb   : > { %v2790_v62 = vadd.f32 %v2749_v2, %v2665_v9  ;;  %v2514_v60 = vsel %vm2472_vm0, %v11483_v27, 0.0  ;;  %v2515_v4 = vsel %vm2473_vm1, %v11483_v27, 0.0  ;;  %vm2597_vm2 = vcmp.eq.s32.totalorder %v11484_v8, %v7661_v61 }
 0x2ec   : > { %vm2598_vm3 = vcmp.eq.s32.totalorder %v11484_v8, %v7666_v28  ;;  %v2555_v20 = vadd.f32 %v2514_v60, %v2430_v17  ;;  %v2556_v11 = vadd.f32 %v2515_v4, %v2431_v44  ;;  %v2639_v55 = vsel %vm2597_vm2, %v11485_v63, 0.0 }
 0x2ed   : > { %v2821_v48 = vpack.c.bf16 %v2790_v62, %v2789_v40  ;;  %v2640_v53 = vsel %vm2598_vm3, %v11485_v63, 0.0  ;;  %vm2722_vm4 = vcmp.eq.s32.totalorder %v11486_v51, %v7661_v61  ;;  %vm2723_vm5 = vcmp.eq.s32.totalorder %v11486_v51, %v7666_v28 }
 0x2ee   : > { %vm2898_vm8 = vcmp.eq.s32.totalorder %v11497_v38, %v11514_v1  ;;  %v2680_v43 = vadd.f32 %v2639_v55, %v2555_v20  ;;  %v2681_v10 = vadd.f32 %v2640_v53, %v2556_v11  ;;  %v2764_v29 = vsel %vm2722_vm4, %v11487_v49, 0.0 }
 0x2ef   : > { %2868 = vmatpush.bf16.msrb.mxu2 %v2821_v48  ;;  %v2765_v22 = vsel %vm2723_vm5, %v11487_v49, 0.0  ;;  %vm2899_vm9 = vcmp.eq.s32.totalorder %v11497_v38, %v11515_v13  ;;  %v2940_v35 = vsel %vm2898_vm8, %v11500_v42, 0.0  ;;  %vm2982_vm10 = vcmp.eq.s32.totalorder %v11499_v32, %v11514_v1 }
 0x2f0   : > { %vm2983_vm11 = vcmp.eq.s32.totalorder %v11499_v32, %v11515_v13  ;;  %v2805_v9 = vadd.f32 %v2764_v29, %v2680_v43  ;;  %v2806_v58 = vadd.f32 %v2765_v22, %v2681_v10  ;;  %v2941_v2 = vsel %vm2899_vm9, %v11500_v42, 0.0 }
 0x2f1   : > { %v3024_v40 = vsel %vm2982_vm10, %v11501_v41, 0.0  ;;  %v3025_v62 = vsel %vm2983_vm11, %v11501_v41, 0.0  ;;  %vm3107_vm12 = vcmp.eq.s32.totalorder %v11502_v14, %v11514_v1  ;;  %vm3108_vm13 = vcmp.eq.s32.totalorder %v11502_v14, %v11515_v13 }
 0x2f2   : > { %v3065_v17 = vadd.f32 %v3024_v40, %v2940_v35  ;;  %v2829_v44 = vpack.c.bf16 %v2806_v58, %v2805_v9  ;;  %v3066_v60 = vadd.f32 %v3025_v62, %v2941_v2  ;;  %v3149_v4 = vsel %vm3107_vm12, %v11503_v33, 0.0 }
 0x2f3   : > { %v3150_v48 = vsel %vm3108_vm13, %v11503_v33, 0.0  ;;  %vm3232_vm14 = vcmp.eq.s32.totalorder %v11504_v15, %v11514_v1  ;;  %vm3233_vm15 = vcmp.eq.s32.totalorder %v11504_v15, %v11515_v13  ;;  %vm2364_vm0 = vcmp.eq.s32.totalorder %v11480_v59, %v11512_v46 }
 0x2f4   : > { %v3190_v20 = vadd.f32 %v3149_v4, %v3065_v17  ;;  %2881 = vmatpush.bf16.msrb.mxu0 %v2829_v44  ;;  %v3191_v11 = vadd.f32 %v3150_v48, %v3066_v60  ;;  %v3274_v55 = vsel %vm3232_vm14, %v11506_v47, 0.0  ;;  %v3275_v53 = vsel %vm3233_vm15, %v11506_v47, 0.0 }
 0x2f5   : > { %vm2365_vm1 = vcmp.eq.s32.totalorder %v11480_v59, %v11513_v3  ;;  %v2406_v10 = vsel %vm2364_vm0, %v11482_v56, 0.0  ;;  %vm2448_vm2 = vcmp.eq.s32.totalorder %v11481_v25, %v11512_v46  ;;  %vm2449_vm3 = vcmp.eq.s32.totalorder %v11481_v25, %v11513_v3 }
 0x2f6   : > { %v3315_v43 = vadd.f32 %v3274_v55, %v3190_v20  ;;  %v2407_v29 = vsel %vm2365_vm1, %v11482_v56, 0.0  ;;  %v3316_v22 = vadd.f32 %v3275_v53, %v3191_v11  ;;  %v2490_v35 = vsel %vm2448_vm2, %v11483_v27, 0.0 }
 0x2f7   : > { %vm2573_vm4 = vcmp.eq.s32.totalorder %v11484_v8, %v11512_v46  ;;  %v2491_v9 = vsel %vm2449_vm3, %v11483_v27, 0.0  ;;  %v2531_v58 = vadd.f32 %v2490_v35, %v2406_v10  ;;  %vm2574_vm5 = vcmp.eq.s32.totalorder %v11484_v8, %v11513_v3 }
 0x2f8   : > { %v2615_v2 = vsel %vm2573_vm4, %v11485_v63, 0.0  ;;  %v3352_v40 = vpack.c.bf16 %v3316_v22, %v3315_v43  ;;  %v2532_v62 = vadd.f32 %v2491_v9, %v2407_v29  ;;  %v2616_v17 = vsel %vm2574_vm5, %v11485_v63, 0.0 }
 0x2f9   : > { %vm2698_vm8 = vcmp.eq.s32.totalorder %v11486_v51, %v11512_v46  ;;  %v2656_v44 = vadd.f32 %v2615_v2, %v2531_v58  ;;  %vm2699_vm9 = vcmp.eq.s32.totalorder %v11486_v51, %v11513_v3  ;;  %vm2370_vm10 = vcmp.eq.s32.totalorder %v11480_v59, %v7277_v18 }
 0x2fa   : > { %v2740_v60 = vsel %vm2698_vm8, %v11487_v49, 0.0  ;;  %3388 = vmatpush.bf16.msrb.mxu1 %v3352_v40  ;;  %v2657_v4 = vadd.f32 %v2616_v17, %v2532_v62  ;;  %v2741_v48 = vsel %vm2699_vm9, %v11487_v49, 0.0  ;;  %vm2371_vm11 = vcmp.eq.s32.totalorder %v11480_v59, %v7280_v57 }
 0x2fb   : > { %v2412_v20 = vsel %vm2370_vm10, %v11482_v56, 0.0  ;;  %v2781_v11 = vadd.f32 %v2740_v60, %v2656_v44  ;;  %v2413_v55 = vsel %vm2371_vm11, %v11482_v56, 0.0  ;;  %vm2454_vm12 = vcmp.eq.s32.totalorder %v11481_v25, %v7277_v18 }
 0x2fc   : > { %vm2455_vm13 = vcmp.eq.s32.totalorder %v11481_v25, %v7280_v57  ;;  %v2782_v53 = vadd.f32 %v2741_v48, %v2657_v4  ;;  %v2496_v43 = vsel %vm2454_vm12, %v11483_v27, 0.0  ;;  %vm2579_vm14 = vcmp.eq.s32.totalorder %v11484_v8, %v7277_v18 }
 0x2fd   : > { %v2497_v10 = vsel %vm2455_vm13, %v11483_v27, 0.0  ;;  %v2537_v29 = vadd.f32 %v2496_v43, %v2412_v20  ;;  %vm2580_vm15 = vcmp.eq.s32.totalorder %v11484_v8, %v7280_v57  ;;  %v2621_v35 = vsel %vm2579_vm14, %v11485_v63, 0.0 }
 0x2fe   : > { %v2538_v22 = vadd.f32 %v2497_v10, %v2413_v55  ;;  %v2817_v9 = vpack.c.bf16 %v2782_v53, %v2781_v11  ;;  %v2622_v58 = vsel %vm2580_vm15, %v11485_v63, 0.0  ;;  %vm2704_vm0 = vcmp.eq.s32.totalorder %v11486_v51, %v7277_v18 }
 0x2ff   : > { %vm2705_vm1 = vcmp.eq.s32.totalorder %v11486_v51, %v7280_v57  ;;  %v2662_v2 = vadd.f32 %v2621_v35, %v2537_v29  ;;  %v2746_v62 = vsel %vm2704_vm0, %v11487_v49, 0.0  ;;  %vm2386_vm2 = vcmp.eq.s32.totalorder %v11480_v59, %v7770_v0 }
 0x300   : > { %v2663_v40 = vadd.f32 %v2622_v58, %v2538_v22  ;;  %v2747_v17 = vsel %vm2705_vm1, %v11487_v49, 0.0  ;;  %2851 = vmatpush.bf16.msrb.mxu3 %v2817_v9  ;;  %vm2387_vm3 = vcmp.eq.s32.totalorder %v11480_v59, %v7773_v50  ;;  %vm2470_vm4 = vcmp.eq.s32.totalorder %v11481_v25, %v7770_v0  ;;  %v11516_v22 = vld [vmem:[#allocation80_spill] sm:$0xff] }
 0x301   : > { %vm2471_vm5 = vcmp.eq.s32.totalorder %v11481_v25, %v7773_v50  ;;  %v2787_v44 = vadd.f32 %v2746_v62, %v2662_v2  ;;  %v2428_v4 = vsel %vm2386_vm2, %v11482_v56, 0.0  ;;  %v2429_v48 = vsel %vm2387_vm3, %v11482_v56, 0.0 }
 0x302   : > { %v2788_v60 = vadd.f32 %v2747_v17, %v2663_v40  ;;  %v2512_v20 = vsel %vm2470_vm4, %v11483_v27, 0.0  ;;  %v2513_v11 = vsel %vm2471_vm5, %v11483_v27, 0.0  ;;  %vm2595_vm8 = vcmp.eq.s32.totalorder %v11484_v8, %v7770_v0  ;;  %v11517_v40 = vld [vmem:[#allocation81_spill] sm:$0xff] }
 0x303   : > { %vm2596_vm9 = vcmp.eq.s32.totalorder %v11484_v8, %v7773_v50  ;;  %v2553_v53 = vadd.f32 %v2512_v20, %v2428_v4  ;;  %v2554_v43 = vadd.f32 %v2513_v11, %v2429_v48  ;;  %v2637_v10 = vsel %vm2595_vm8, %v11485_v63, 0.0 }
 0x304   : > { %v2820_v55 = vpack.c.bf16 %v2788_v60, %v2787_v44  ;;  %v2638_v29 = vsel %vm2596_vm9, %v11485_v63, 0.0  ;;  %vm2720_vm10 = vcmp.eq.s32.totalorder %v11486_v51, %v7770_v0  ;;  %vm2721_vm11 = vcmp.eq.s32.totalorder %v11486_v51, %v7773_v50 }
 0x305   : > { %vm2896_vm12 = vcmp.eq.s32.totalorder %v11497_v38, %v11516_v22  ;;  %v2678_v35 = vadd.f32 %v2637_v10, %v2553_v53  ;;  %v2679_v9 = vadd.f32 %v2638_v29, %v2554_v43  ;;  %v2762_v58 = vsel %vm2720_vm10, %v11487_v49, 0.0 }
 0x306   : > { %2869 = vmatpush.bf16.msrb.mxu2 %v2820_v55  ;;  %v2763_v2 = vsel %vm2721_vm11, %v11487_v49, 0.0  ;;  %vm2897_vm13 = vcmp.eq.s32.totalorder %v11497_v38, %v11517_v40  ;;  %v2938_v62 = vsel %vm2896_vm12, %v11500_v42, 0.0  ;;  %vm2980_vm14 = vcmp.eq.s32.totalorder %v11499_v32, %v11516_v22 }
 0x307   : > { %vm2981_vm15 = vcmp.eq.s32.totalorder %v11499_v32, %v11517_v40  ;;  %v2803_v17 = vadd.f32 %v2762_v58, %v2678_v35  ;;  %v2804_v44 = vadd.f32 %v2763_v2, %v2679_v9  ;;  %v2939_v60 = vsel %vm2897_vm13, %v11500_v42, 0.0 }
 0x308   : > { %v3022_v4 = vsel %vm2980_vm14, %v11501_v41, 0.0  ;;  %v3023_v48 = vsel %vm2981_vm15, %v11501_v41, 0.0  ;;  %vm3105_vm0 = vcmp.eq.s32.totalorder %v11502_v14, %v11516_v22  ;;  %vm3106_vm1 = vcmp.eq.s32.totalorder %v11502_v14, %v11517_v40 }
 0x309   : > { %v3063_v20 = vadd.f32 %v3022_v4, %v2938_v62  ;;  %v2828_v11 = vpack.c.bf16 %v2804_v44, %v2803_v17  ;;  %v3064_v55 = vadd.f32 %v3023_v48, %v2939_v60  ;;  %v3147_v53 = vsel %vm3105_vm0, %v11503_v33, 0.0 }
 0x30a   : > { %v3148_v43 = vsel %vm3106_vm1, %v11503_v33, 0.0  ;;  %vm3230_vm2 = vcmp.eq.s32.totalorder %v11504_v15, %v11516_v22  ;;  %vm3231_vm3 = vcmp.eq.s32.totalorder %v11504_v15, %v11517_v40  ;;  %vm2362_vm4 = vcmp.eq.s32.totalorder %v11480_v59, %v11514_v1 }
 0x30b   : > { %v3188_v10 = vadd.f32 %v3147_v53, %v3063_v20  ;;  %2882 = vmatpush.bf16.msrb.mxu0 %v2828_v11  ;;  %v3189_v29 = vadd.f32 %v3148_v43, %v3064_v55  ;;  %v3272_v35 = vsel %vm3230_vm2, %v11506_v47, 0.0  ;;  %v3273_v9 = vsel %vm3231_vm3, %v11506_v47, 0.0 }
 0x30c   : > { %vm2363_vm5 = vcmp.eq.s32.totalorder %v11480_v59, %v11515_v13  ;;  %v2404_v2 = vsel %vm2362_vm4, %v11482_v56, 0.0  ;;  %vm2446_vm8 = vcmp.eq.s32.totalorder %v11481_v25, %v11514_v1  ;;  %vm2447_vm9 = vcmp.eq.s32.totalorder %v11481_v25, %v11515_v13 }
 0x30d   : > { %v3313_v58 = vadd.f32 %v3272_v35, %v3188_v10  ;;  %v2405_v62 = vsel %vm2363_vm5, %v11482_v56, 0.0  ;;  %v3314_v17 = vadd.f32 %v3273_v9, %v3189_v29  ;;  %v2488_v44 = vsel %vm2446_vm8, %v11483_v27, 0.0 }
 0x30e   : > { %vm2571_vm10 = vcmp.eq.s32.totalorder %v11484_v8, %v11514_v1  ;;  %v2489_v60 = vsel %vm2447_vm9, %v11483_v27, 0.0  ;;  %v2529_v4 = vadd.f32 %v2488_v44, %v2404_v2  ;;  %vm2572_vm11 = vcmp.eq.s32.totalorder %v11484_v8, %v11515_v13 }
 0x30f   : > { %v2613_v48 = vsel %vm2571_vm10, %v11485_v63, 0.0  ;;  %v3351_v20 = vpack.c.bf16 %v3314_v17, %v3313_v58  ;;  %v2530_v11 = vadd.f32 %v2489_v60, %v2405_v62  ;;  %v2614_v55 = vsel %vm2572_vm11, %v11485_v63, 0.0  ;;  %v11518_v60 = vld [vmem:[#allocation35_spill] sm:$0xff] }
 0x310   : > { %vm2696_vm12 = vcmp.eq.s32.totalorder %v11486_v51, %v11514_v1  ;;  %v2654_v53 = vadd.f32 %v2613_v48, %v2529_v4  ;;  %vm2697_vm13 = vcmp.eq.s32.totalorder %v11486_v51, %v11515_v13  ;;  %vm2930_vm14 = vcmp.eq.s32.totalorder %v11497_v38, %v7364_v52  ;;  %v11519_v4 = vld [vmem:[#allocation37_spill] sm:$0xff] }
 0x311   : > { %v2738_v43 = vsel %vm2696_vm12, %v11487_v49, 0.0  ;;  %3389 = vmatpush.bf16.msrb.mxu1 %v3351_v20  ;;  %v2655_v10 = vadd.f32 %v2614_v55, %v2530_v11  ;;  %v2739_v29 = vsel %vm2697_vm13, %v11487_v49, 0.0  ;;  %v2972_v35 = vsel %vm2930_vm14, %v11500_v42, 0.0  ;;  %v11520_v11 = vld [vmem:[#allocation36_spill] sm:$0xff] }
 0x312   : > { %vm3014_vm15 = vcmp.eq.s32.totalorder %v11499_v32, %v7364_v52  ;;  %v2779_v9 = vadd.f32 %v2738_v43, %v2654_v53  ;;  %vm3139_vm0 = vcmp.eq.s32.totalorder %v11502_v14, %v7364_v52  ;;  %vm3264_vm1 = vcmp.eq.s32.totalorder %v11504_v15, %v7364_v52  ;;  %v11521_v43 = vld [vmem:[#allocation38_spill] sm:$0xff] }
 0x313   : > { %v3056_v58 = vsel %vm3014_vm15, %v11501_v41, 0.0  ;;  %v2780_v2 = vadd.f32 %v2739_v29, %v2655_v10  ;;  %v3181_v17 = vsel %vm3139_vm0, %v11503_v33, 0.0  ;;  %v3306_v44 = vsel %vm3264_vm1, %v11506_v47, 0.0 }
 0x314   : > { %v3097_v62 = vadd.f32 %v3056_v58, %v2972_v35  ;;  %vm3440_vm2 = vcmp.eq.s32.totalorder %v11518_v60, %v6229_v36  ;;  %vm3441_vm3 = vcmp.eq.s32.totalorder %v11518_v60, %v11498_v39  ;;  %vm3524_vm4 = vcmp.eq.s32.totalorder %v11519_v4, %v6229_v36  ;;  %v11522_v35 = vld [vmem:[#allocation39_spill] sm:$0xff] }
 0x315   : > { %vm3525_vm5 = vcmp.eq.s32.totalorder %v11519_v4, %v11498_v39  ;;  %v2816_v48 = vpack.c.bf16 %v2780_v2, %v2779_v9  ;;  %v3482_v55 = vsel %vm3440_vm2, %v11520_v11, 0.0  ;;  %v3483_v53 = vsel %vm3441_vm3, %v11520_v11, 0.0  ;;  %v11523_v9 = vld [vmem:[#allocation40_spill] sm:$0xff] }
 0x316   : > { %v3222_v20 = vadd.f32 %v3181_v17, %v3097_v62  ;;  %v3566_v10 = vsel %vm3524_vm4, %v11521_v43, 0.0  ;;  %v3567_v29 = vsel %vm3525_vm5, %v11521_v43, 0.0  ;;  %vm3649_vm8 = vcmp.eq.s32.totalorder %v11522_v35, %v6229_v36  ;;  %v11524_v17 = vld [vmem:[#allocation41_spill] sm:$0xff] }
 0x317   : > { %vm3650_vm9 = vcmp.eq.s32.totalorder %v11522_v35, %v11498_v39  ;;  %2852 = vmatpush.bf16.msrb.mxu3 %v2816_v48  ;;  %v3607_v57 = vadd.f32 %v3566_v10, %v3482_v55  ;;  %v3608_v18 = vadd.f32 %v3567_v29, %v3483_v53  ;;  %v3691_v2 = vsel %vm3649_vm8, %v11523_v9, 0.0  ;;  %v11525_v48 = vld [vmem:[#allocation42_spill] sm:$0xff] }
 0x318   : > { %v3347_v58 = vadd.f32 %v3306_v44, %v3222_v20  ;;  %v3692_v62 = vsel %vm3650_vm9, %v11523_v9, 0.0  ;;  %vm3774_vm10 = vcmp.eq.s32.totalorder %v11524_v17, %v6229_v36  ;;  %vm3775_vm11 = vcmp.eq.s32.totalorder %v11524_v17, %v11498_v39 }
 0x319   : > { %vm2894_vm12 = vcmp.eq.s32.totalorder %v11497_v38, %v11489_v24  ;;  %v3732_v5 = vadd.f32 %v3691_v2, %v3607_v57  ;;  %v3733_v31 = vadd.f32 %v3692_v62, %v3608_v18  ;;  %v3816_v44 = vsel %vm3774_vm10, %v11525_v48, 0.0 }
 0x31a   : > { %v3368_v6 = vpack.c.bf16 %v3347_v58, %v3347_v58  ;;  %v3817_v20 = vsel %vm3775_vm11, %v11525_v48, 0.0  ;;  %vm2895_vm13 = vcmp.eq.s32.totalorder %v11497_v38, %v11490_v26  ;;  %v2936_v55 = vsel %vm2894_vm12, %v11500_v42, 0.0 }
 0x31b   : > { %vm2978_vm14 = vcmp.eq.s32.totalorder %v11499_v32, %v11489_v24  ;;  %v3857_v10 = vadd.f32 %v3816_v44, %v3732_v5  ;;  %v3858_v29 = vadd.f32 %v3817_v20, %v3733_v31  ;;  %v2937_v58 = vsel %vm2895_vm13, %v11500_v42, 0.0 }
 0x31c   : > { %v3383_v53 = vsel %vm1719_vm7, %v3368_v6, 0  ;;  %vm2979_vm15 = vcmp.eq.s32.totalorder %v11499_v32, %v11490_v26  ;;  %v3020_v18 = vsel %vm2978_vm14, %v11501_v41, 0.0  ;;  %vm3103_vm0 = vcmp.eq.s32.totalorder %v11502_v14, %v11489_v24 }
 0x31d   : > { %3414 = vmatpush.bf16.msra.mxu0 %v3383_v53  ;;  %vm3104_vm1 = vcmp.eq.s32.totalorder %v11502_v14, %v11490_v26  ;;  %v3891_v57 = vpack.c.bf16 %v3858_v29, %v3857_v10  ;;  %v3021_v2 = vsel %vm2979_vm15, %v11501_v41, 0.0  ;;  %v3061_v6 = vadd.f32 %v3020_v18, %v2936_v55 }
 0x31e   : > { %v3145_v5 = vsel %vm3103_vm0, %v11503_v33, 0.0  ;;  %v3062_v31 = vadd.f32 %v3021_v2, %v2937_v58  ;;  %v3146_v62 = vsel %vm3104_vm1, %v11503_v33, 0.0  ;;  %vm3228_vm2 = vcmp.eq.s32.totalorder %v11504_v15, %v11489_v24 }
 0x31f   : > { %vm3229_vm3 = vcmp.eq.s32.totalorder %v11504_v15, %v11490_v26  ;;  %3921 = vmatpush.bf16.msra.mxu2 %v3891_v57  ;;  %v3186_v44 = vadd.f32 %v3145_v5, %v3061_v6  ;;  %v3270_v20 = vsel %vm3228_vm2, %v11506_v47, 0.0  ;;  %vm2360_vm4 = vcmp.eq.s32.totalorder %v11480_v59, %v11516_v22 }
 0x320   : > { %v3271_v53 = vsel %vm3229_vm3, %v11506_v47, 0.0  ;;  %v3187_v55 = vadd.f32 %v3146_v62, %v3062_v31  ;;  %vm2361_vm5 = vcmp.eq.s32.totalorder %v11480_v59, %v11517_v40  ;;  %v2402_v10 = vsel %vm2360_vm4, %v11482_v56, 0.0 }
 0x321   : > { %vm2444_vm8 = vcmp.eq.s32.totalorder %v11481_v25, %v11516_v22  ;;  %v3311_v29 = vadd.f32 %v3270_v20, %v3186_v44  ;;  %v2403_v58 = vsel %vm2361_vm5, %v11482_v56, 0.0  ;;  %vm2445_vm9 = vcmp.eq.s32.totalorder %v11481_v25, %v11517_v40 }
 0x322   : > { %v2486_v18 = vsel %vm2444_vm8, %v11483_v27, 0.0  ;;  %v3312_v57 = vadd.f32 %v3271_v53, %v3187_v55  ;;  %v2487_v2 = vsel %vm2445_vm9, %v11483_v27, 0.0  ;;  %vm2569_vm10 = vcmp.eq.s32.totalorder %v11484_v8, %v11516_v22 }
 0x323   : > { %v2527_v6 = vadd.f32 %v2486_v18, %v2402_v10  ;;  %v2528_v5 = vadd.f32 %v2487_v2, %v2403_v58  ;;  %vm2570_vm11 = vcmp.eq.s32.totalorder %v11484_v8, %v11517_v40  ;;  %v2611_v31 = vsel %vm2569_vm10, %v11485_v63, 0.0 }
 0x324   : > { %vm2694_vm12 = vcmp.eq.s32.totalorder %v11486_v51, %v11516_v22  ;;  %v3350_v62 = vpack.c.bf16 %v3312_v57, %v3311_v29  ;;  %v2612_v44 = vsel %vm2570_vm11, %v11485_v63, 0.0  ;;  %vm2695_vm13 = vcmp.eq.s32.totalorder %v11486_v51, %v11517_v40 }
 0x325   : > { %v2652_v20 = vadd.f32 %v2611_v31, %v2527_v6  ;;  %v2653_v53 = vadd.f32 %v2612_v44, %v2528_v5  ;;  %v2736_v55 = vsel %vm2694_vm12, %v11487_v49, 0.0  ;;  %v2737_v10 = vsel %vm2695_vm13, %v11487_v49, 0.0 }
 0x326   : > { %vm2928_vm14 = vcmp.eq.s32.totalorder %v11497_v38, %v7443_v34  ;;  %3390 = vmatpush.bf16.msrb.mxu1 %v3350_v62  ;;  %vm2929_vm15 = vcmp.eq.s32.totalorder %v11497_v38, %v7446_v30  ;;  %vm3012_vm0 = vcmp.eq.s32.totalorder %v11499_v32, %v7443_v34  ;;  %vm3013_vm1 = vcmp.eq.s32.totalorder %v11499_v32, %v7446_v30 }
 0x327   : > { %v2777_v58 = vadd.f32 %v2736_v55, %v2652_v20  ;;  %v2970_v29 = vsel %vm2928_vm14, %v11500_v42, 0.0  ;;  %v2778_v18 = vadd.f32 %v2737_v10, %v2653_v53  ;;  %v2971_v57 = vsel %vm2929_vm15, %v11500_v42, 0.0 }
 0x328   : > { %v3054_v2 = vsel %vm3012_vm0, %v11501_v41, 0.0  ;;  %v3055_v6 = vsel %vm3013_vm1, %v11501_v41, 0.0  ;;  %vm3137_vm2 = vcmp.eq.s32.totalorder %v11502_v14, %v7443_v34  ;;  %vm3138_vm3 = vcmp.eq.s32.totalorder %v11502_v14, %v7446_v30 }
 0x329   : > { %v3095_v5 = vadd.f32 %v3054_v2, %v2970_v29  ;;  %v2815_v31 = vpack.c.bf16 %v2778_v18, %v2777_v58  ;;  %v3096_v62 = vadd.f32 %v3055_v6, %v2971_v57  ;;  %v3179_v44 = vsel %vm3137_vm2, %v11503_v33, 0.0 }
 0x32a   : > { %v3180_v20 = vsel %vm3138_vm3, %v11503_v33, 0.0  ;;  %vm3262_vm4 = vcmp.eq.s32.totalorder %v11504_v15, %v7443_v34  ;;  %vm3263_vm5 = vcmp.eq.s32.totalorder %v11504_v15, %v7446_v30  ;;  %vm3438_vm8 = vcmp.eq.s32.totalorder %v11518_v60, %v11510_v7 }
 0x32b   : > { %v3220_v53 = vadd.f32 %v3179_v44, %v3095_v5  ;;  %2853 = vmatpush.bf16.msrb.mxu3 %v2815_v31  ;;  %v3221_v55 = vadd.f32 %v3180_v20, %v3096_v62  ;;  %v3304_v10 = vsel %vm3262_vm4, %v11506_v47, 0.0  ;;  %v3305_v58 = vsel %vm3263_vm5, %v11506_v47, 0.0 }
 0x32c   : > { %vm3439_vm9 = vcmp.eq.s32.totalorder %v11518_v60, %v11511_v45  ;;  %v3480_v18 = vsel %vm3438_vm8, %v11520_v11, 0.0  ;;  %vm3522_vm10 = vcmp.eq.s32.totalorder %v11519_v4, %v11510_v7  ;;  %vm3523_vm11 = vcmp.eq.s32.totalorder %v11519_v4, %v11511_v45 }
 0x32d   : > { %v3345_v29 = vadd.f32 %v3304_v10, %v3220_v53  ;;  %v3481_v57 = vsel %vm3439_vm9, %v11520_v11, 0.0  ;;  %v3346_v2 = vadd.f32 %v3305_v58, %v3221_v55  ;;  %v3564_v6 = vsel %vm3522_vm10, %v11521_v43, 0.0 }
 0x32e   : > { %vm3647_vm12 = vcmp.eq.s32.totalorder %v11522_v35, %v11510_v7  ;;  %v3565_v5 = vsel %vm3523_vm11, %v11521_v43, 0.0  ;;  %v3605_v31 = vadd.f32 %v3564_v6, %v3480_v18  ;;  %vm3648_vm13 = vcmp.eq.s32.totalorder %v11522_v35, %v11511_v45 }
 0x32f   : > { %v3689_v62 = vsel %vm3647_vm12, %v11523_v9, 0.0  ;;  %v3367_v44 = vpack.c.bf16 %v3346_v2, %v3345_v29  ;;  %v3606_v20 = vadd.f32 %v3565_v5, %v3481_v57  ;;  %v3690_v53 = vsel %vm3648_vm13, %v11523_v9, 0.0  ;;  %v11526_v29 = vld [vmem:[#allocation89_spill] sm:$0xff] }
 0x330   : > { %vm3772_vm14 = vcmp.eq.s32.totalorder %v11524_v17, %v11510_v7  ;;  %v3730_v55 = vadd.f32 %v3689_v62, %v3605_v31  ;;  %vm3773_vm15 = vcmp.eq.s32.totalorder %v11524_v17, %v11511_v45  ;;  %vm2892_vm0 = vcmp.eq.s32.totalorder %v11497_v38, %v11493_v37 }
 0x331   : > { %v3814_v10 = vsel %vm3772_vm14, %v11525_v48, 0.0  ;;  %3415 = vmatpush.bf16.msra.mxu0 %v3367_v44  ;;  %v3731_v58 = vadd.f32 %v3690_v53, %v3606_v20  ;;  %v3815_v18 = vsel %vm3773_vm15, %v11525_v48, 0.0  ;;  %vm2893_vm1 = vcmp.eq.s32.totalorder %v11497_v38, %v11526_v29 }
 0x332   : > { %v2934_v57 = vsel %vm2892_vm0, %v11500_v42, 0.0  ;;  %v3855_v2 = vadd.f32 %v3814_v10, %v3730_v55  ;;  %v2935_v6 = vsel %vm2893_vm1, %v11500_v42, 0.0  ;;  %vm2976_vm2 = vcmp.eq.s32.totalorder %v11499_v32, %v11493_v37 }
 0x333   : > { %vm2977_vm3 = vcmp.eq.s32.totalorder %v11499_v32, %v11526_v29  ;;  %v3856_v5 = vadd.f32 %v3815_v18, %v3731_v58  ;;  %v3018_v31 = vsel %vm2976_vm2, %v11501_v41, 0.0  ;;  %vm3101_vm4 = vcmp.eq.s32.totalorder %v11502_v14, %v11493_v37 }
 0x334   : > { %v3019_v62 = vsel %vm2977_vm3, %v11501_v41, 0.0  ;;  %v3059_v44 = vadd.f32 %v3018_v31, %v2934_v57  ;;  %vm3102_vm5 = vcmp.eq.s32.totalorder %v11502_v14, %v11526_v29  ;;  %v3143_v53 = vsel %vm3101_vm4, %v11503_v33, 0.0 }
 0x335   : > { %v3060_v20 = vadd.f32 %v3019_v62, %v2935_v6  ;;  %v3890_v55 = vpack.c.bf16 %v3856_v5, %v3855_v2  ;;  %v3144_v10 = vsel %vm3102_vm5, %v11503_v33, 0.0  ;;  %vm3226_vm8 = vcmp.eq.s32.totalorder %v11504_v15, %v11493_v37 }
 0x336   : > { %vm3227_vm9 = vcmp.eq.s32.totalorder %v11504_v15, %v11526_v29  ;;  %v3184_v58 = vadd.f32 %v3143_v53, %v3059_v44  ;;  %v3268_v45 = vsel %vm3226_vm8, %v11506_v47, 0.0  ;;  %vm2358_vm10 = vcmp.eq.s32.totalorder %v11480_v59, %v11489_v24 }
 0x337   : > { %v3185_v18 = vadd.f32 %v3144_v10, %v3060_v20  ;;  %v3269_v57 = vsel %vm3227_vm9, %v11506_v47, 0.0  ;;  %3922 = vmatpush.bf16.msra.mxu2 %v3890_v55  ;;  %vm2359_vm11 = vcmp.eq.s32.totalorder %v11480_v59, %v11490_v26  ;;  %vm2442_vm12 = vcmp.eq.s32.totalorder %v11481_v25, %v11489_v24 }
 0x338   : > { %vm2443_vm13 = vcmp.eq.s32.totalorder %v11481_v25, %v11490_v26  ;;  %v3309_v2 = vadd.f32 %v3268_v45, %v3184_v58  ;;  %v2400_v5 = vsel %vm2358_vm10, %v11482_v56, 0.0  ;;  %v2401_v31 = vsel %vm2359_vm11, %v11482_v56, 0.0 }
 0x339   : > { %v3310_v6 = vadd.f32 %v3269_v57, %v3185_v18  ;;  %v2484_v62 = vsel %vm2442_vm12, %v11483_v27, 0.0  ;;  %v2485_v44 = vsel %vm2443_vm13, %v11483_v27, 0.0  ;;  %vm2567_vm14 = vcmp.eq.s32.totalorder %v11484_v8, %v11489_v24 }
 0x33a   : > { %vm2568_vm15 = vcmp.eq.s32.totalorder %v11484_v8, %v11490_v26  ;;  %v2525_v53 = vadd.f32 %v2484_v62, %v2400_v5  ;;  %v2526_v55 = vadd.f32 %v2485_v44, %v2401_v31  ;;  %v2609_v45 = vsel %vm2567_vm14, %v11485_v63, 0.0 }
 0x33b   : > { %v3349_v20 = vpack.c.bf16 %v3310_v6, %v3309_v2  ;;  %v2610_v10 = vsel %vm2568_vm15, %v11485_v63, 0.0  ;;  %vm2692_vm0 = vcmp.eq.s32.totalorder %v11486_v51, %v11489_v24  ;;  %vm2693_vm1 = vcmp.eq.s32.totalorder %v11486_v51, %v11490_v26 }
 0x33c   : > { %vm2926_vm2 = vcmp.eq.s32.totalorder %v11497_v38, %v7559_v19  ;;  %v2650_v58 = vadd.f32 %v2609_v45, %v2525_v53  ;;  %v2651_v18 = vadd.f32 %v2610_v10, %v2526_v55  ;;  %v2734_v57 = vsel %vm2692_vm0, %v11487_v49, 0.0 }
 0x33d   : > { %3391 = vmatpush.bf16.msrb.mxu1 %v3349_v20  ;;  %v2735_v2 = vsel %vm2693_vm1, %v11487_v49, 0.0  ;;  %vm2927_vm3 = vcmp.eq.s32.totalorder %v11497_v38, %v7562_v12  ;;  %v2968_v6 = vsel %vm2926_vm2, %v11500_v42, 0.0  ;;  %vm3010_vm4 = vcmp.eq.s32.totalorder %v11499_v32, %v7559_v19 }
 0x33e   : > { %vm3011_vm5 = vcmp.eq.s32.totalorder %v11499_v32, %v7562_v12  ;;  %v2775_v5 = vadd.f32 %v2734_v57, %v2650_v58  ;;  %v2776_v31 = vadd.f32 %v2735_v2, %v2651_v18  ;;  %v2969_v62 = vsel %vm2927_vm3, %v11500_v42, 0.0 }
 0x33f   : > { %v3052_v44 = vsel %vm3010_vm4, %v11501_v41, 0.0  ;;  %v3053_v20 = vsel %vm3011_vm5, %v11501_v41, 0.0  ;;  %vm3135_vm8 = vcmp.eq.s32.totalorder %v11502_v14, %v7559_v19  ;;  %vm3136_vm9 = vcmp.eq.s32.totalorder %v11502_v14, %v7562_v12 }
 0x340   : > { %v3093_v53 = vadd.f32 %v3052_v44, %v2968_v6  ;;  %v2814_v55 = vpack.c.bf16 %v2776_v31, %v2775_v5  ;;  %v3094_v45 = vadd.f32 %v3053_v20, %v2969_v62  ;;  %v3177_v10 = vsel %vm3135_vm8, %v11503_v33, 0.0 }
 0x341   : > { %v3178_v58 = vsel %vm3136_vm9, %v11503_v33, 0.0  ;;  %vm3260_vm10 = vcmp.eq.s32.totalorder %v11504_v15, %v7559_v19  ;;  %vm3261_vm11 = vcmp.eq.s32.totalorder %v11504_v15, %v7562_v12  ;;  %vm3436_vm12 = vcmp.eq.s32.totalorder %v11518_v60, %v11512_v46 }
 0x342   : > { %v3218_v18 = vadd.f32 %v3177_v10, %v3093_v53  ;;  %2854 = vmatpush.bf16.msrb.mxu3 %v2814_v55  ;;  %v3219_v57 = vadd.f32 %v3178_v58, %v3094_v45  ;;  %v3302_v2 = vsel %vm3260_vm10, %v11506_v47, 0.0  ;;  %v3303_v6 = vsel %vm3261_vm11, %v11506_v47, 0.0  ;;  %v535_v53 = vpop.f32.mrf.mxu2 }
 0x343   : > { %vm3437_vm13 = vcmp.eq.s32.totalorder %v11518_v60, %v11513_v3  ;;  %v3478_v31 = vsel %vm3436_vm12, %v11520_v11, 0.0  ;;  %vm3520_vm14 = vcmp.eq.s32.totalorder %v11519_v4, %v11512_v46  ;;  %vm3521_vm15 = vcmp.eq.s32.totalorder %v11519_v4, %v11513_v3 }
 0x344   : > { %v3343_v5 = vadd.f32 %v3302_v2, %v3218_v18  ;;  %v3479_v62 = vsel %vm3437_vm13, %v11520_v11, 0.0  ;;  %v3344_v44 = vadd.f32 %v3303_v6, %v3219_v57  ;;  %v3562_v20 = vsel %vm3520_vm14, %v11521_v43, 0.0 }
 0x345   : > { %vm3645_vm0 = vcmp.eq.s32.totalorder %v11522_v35, %v11512_v46  ;;  %v3563_v55 = vsel %vm3521_vm15, %v11521_v43, 0.0  ;;  %v3603_v45 = vadd.f32 %v3562_v20, %v3478_v31  ;;  %vm3646_vm1 = vcmp.eq.s32.totalorder %v11522_v35, %v11513_v3 }
 0x346   : > { %v3687_v10 = vsel %vm3645_vm0, %v11523_v9, 0.0  ;;  %v3366_v58 = vpack.c.bf16 %v3344_v44, %v3343_v5  ;;  %v3604_v18 = vadd.f32 %v3563_v55, %v3479_v62  ;;  %v3688_v57 = vsel %vm3646_vm1, %v11523_v9, 0.0  ;;  %v11527_v5 = vld [vmem:[#allocation92_spill] sm:$0xff] }
 0x347   : > { %vm3770_vm2 = vcmp.eq.s32.totalorder %v11524_v17, %v11512_v46  ;;  %v3728_v2 = vadd.f32 %v3687_v10, %v3603_v45  ;;  %vm3771_vm3 = vcmp.eq.s32.totalorder %v11524_v17, %v11513_v3  ;;  %v560_v7 = vpack.c.bf16 %v535_v53, %v535_v53  ;;  %v491_v53 = vpop.f32.mrf.mxu1 }
 0x348   : > { %v3812_v6 = vsel %vm3770_vm2, %v11525_v48, 0.0  ;;  %3416 = vmatpush.bf16.msra.mxu0 %v3366_v58  ;;  %v3729_v31 = vadd.f32 %v3688_v57, %v3604_v18  ;;  %v3813_v20 = vsel %vm3771_vm3, %v11525_v48, 0.0  ;;  %vm2890_vm4 = vcmp.eq.s32.totalorder %v11497_v38, %v6222_v16 }
 0x349   : > { %vm2891_vm5 = vcmp.eq.s32.totalorder %v11497_v38, %v11527_v5  ;;  %v3853_v62 = vadd.f32 %v3812_v6, %v3728_v2  ;;  %v2837_v44 = vunpack.c.l.b16 %v560_v7  ;;  %v2932_v55 = vsel %vm2890_vm4, %v11500_v42, 0.0 }
 0x34a   : > { %v2933_v45 = vsel %vm2891_vm5, %v11500_v42, 0.0  ;;  %v3854_v10 = vadd.f32 %v3813_v20, %v3729_v31  ;;  %vm2974_vm8 = vcmp.eq.s32.totalorder %v11499_v32, %v6222_v16  ;;  %vm2975_vm9 = vcmp.eq.s32.totalorder %v11499_v32, %v11527_v5 }
 0x34b   : > { %vm3099_vm10 = vcmp.eq.s32.totalorder %v11502_v14, %v6222_v16  ;;  %v2840_v58 = vpack.c.b16 %v2837_v44, %v2837_v44  ;;  %v3016_v18 = vsel %vm2974_vm8, %v11501_v41, 0.0  ;;  %v3017_v7 = vsel %vm2975_vm9, %v11501_v41, 0.0  ;;  %v11528_v44 = vld [vmem:[#allocation10_spill] sm:$0xff] }
 0x34c   : > { %vm3100_vm11 = vcmp.eq.s32.totalorder %v11502_v14, %v11527_v5  ;;  %v3889_v57 = vpack.c.bf16 %v3854_v10, %v3853_v62  ;;  %v3057_v2 = vadd.f32 %v3016_v18, %v2932_v55  ;;  %v3058_v6 = vadd.f32 %v3017_v7, %v2933_v45 }
 0x34d   : > { %v3141_v31 = vsel %vm3099_vm10, %v11503_v33, 0.0  ;;  %v3142_v20 = vsel %vm3100_vm11, %v11503_v33, 0.0  ;;  %vm3224_vm12 = vcmp.eq.s32.totalorder %v11504_v15, %v6222_v16  ;;  %vm3225_vm13 = vcmp.eq.s32.totalorder %v11504_v15, %v11527_v5  ;;  %5741 = vmatmul.msk.bf16.vlgmr.msrb.gmra.mxu0 %vm1715_vm6, %v2840_v58 }
 0x34e   : > { %v559_v3 = vpack.c.bf16 %v491_v53, %v11528_v44  ;;  %3923 = vmatpush.bf16.msra.mxu2 %v3889_v57  ;;  %v3182_v46 = vadd.f32 %v3141_v31, %v3057_v2  ;;  %v3183_v39 = vadd.f32 %v3142_v20, %v3058_v6  ;;  %v3266_v62 = vsel %vm3224_vm12, %v11506_v47, 0.0 }
 0x34f   : > { %v3267_v55 = vsel %vm3225_vm13, %v11506_v47, 0.0  ;;  %vm2356_vm14 = vcmp.eq.s32.totalorder %v11480_v59, %v11493_v37  ;;  %vm2357_vm15 = vcmp.eq.s32.totalorder %v11480_v59, %v11526_v29  ;;  %vm2440_vm0 = vcmp.eq.s32.totalorder %v11481_v25, %v11493_v37 }
 0x350   : > { %v2835_v45 = vunpack.c.l.b16 %v559_v3  ;;  %v2836_v10 = vunpack.c.h.b16 %v559_v3  ;;  %v3307_v18 = vadd.f32 %v3266_v62, %v3182_v46  ;;  %v3308_v7 = vadd.f32 %v3267_v55, %v3183_v39 }
 0x351   : > { %v2398_v53 = vsel %vm2356_vm14, %v11482_v56, 0.0  ;;  %v2399_v58 = vsel %vm2357_vm15, %v11482_v56, 0.0  ;;  %vm2441_vm1 = vcmp.eq.s32.totalorder %v11481_v25, %v11526_v29  ;;  %v2482_v6 = vsel %vm2440_vm0, %v11483_v27, 0.0 }
 0x352   : > { %v8918_v57 = vpack.c.b16 %v2835_v45, %v2835_v45  ;;  %v2839_v2 = vpack.c.b16 %v2836_v10, %v2836_v10  ;;  %v3348_v3 = vpack.c.bf16 %v3308_v7, %v3307_v18  ;;  %v2483_v31 = vsel %vm2441_vm1, %v11483_v27, 0.0 }
 0x353   : > { %vm2565_vm2 = vcmp.eq.s32.totalorder %v11484_v8, %v11493_v37  ;;  %v2523_v39 = vadd.f32 %v2482_v6, %v2398_v53  ;;  %v2524_v46 = vadd.f32 %v2483_v31, %v2399_v58  ;;  %vm2566_vm3 = vcmp.eq.s32.totalorder %v11484_v8, %v11526_v29 }
 0x354   : > { %v2607_v20 = vsel %vm2565_vm2, %v11485_v63, 0.0  ;;  %2870 = vmatmul.bf16.vlgmr.msrb.gmra.mxu2 %v2839_v2  ;;  %3392 = vmatpush.bf16.msrb.mxu1 %v3348_v3  ;;  %v2608_v44 = vsel %vm2566_vm3, %v11485_v63, 0.0  ;;  %vm2690_vm4 = vcmp.eq.s32.totalorder %v11486_v51, %v11493_v37  ;;  %vm2691_vm5 = vcmp.eq.s32.totalorder %v11486_v51, %v11526_v29 }
 0x355   : > { %vm2924_vm8 = vcmp.eq.s32.totalorder %v11497_v38, %v7661_v61  ;;  %v2648_v62 = vadd.f32 %v2607_v20, %v2523_v39  ;;  %v2649_v55 = vadd.f32 %v2608_v44, %v2524_v46  ;;  %v2732_v45 = vsel %vm2690_vm4, %v11487_v49, 0.0 }
 0x356   : > { %v2733_v10 = vsel %vm2691_vm5, %v11487_v49, 0.0  ;;  %vm2925_vm9 = vcmp.eq.s32.totalorder %v11497_v38, %v7666_v28  ;;  %v2966_v18 = vsel %vm2924_vm8, %v11500_v42, 0.0  ;;  %vm3008_vm10 = vcmp.eq.s32.totalorder %v11499_v32, %v7661_v61 }
 0x357   : > { %vm3009_vm11 = vcmp.eq.s32.totalorder %v11499_v32, %v7666_v28  ;;  %v2773_v7 = vadd.f32 %v2732_v45, %v2648_v62  ;;  %v2774_v53 = vadd.f32 %v2733_v10, %v2649_v55  ;;  %v2967_v58 = vsel %vm2925_vm9, %v11500_v42, 0.0 }
 0x358   : > { %v3050_v2 = vsel %vm3008_vm10, %v11501_v41, 0.0  ;;  %v3051_v3 = vsel %vm3009_vm11, %v11501_v41, 0.0  ;;  %vm3133_vm12 = vcmp.eq.s32.totalorder %v11502_v14, %v7661_v61  ;;  %vm3134_vm13 = vcmp.eq.s32.totalorder %v11502_v14, %v7666_v28 }
 0x359   : > { %v3091_v6 = vadd.f32 %v3050_v2, %v2966_v18  ;;  %v2813_v31 = vpack.c.bf16 %v2774_v53, %v2773_v7  ;;  %v3092_v39 = vadd.f32 %v3051_v3, %v2967_v58  ;;  %v3175_v46 = vsel %vm3133_vm12, %v11503_v33, 0.0 }
 0x35a   : > { %v3176_v20 = vsel %vm3134_vm13, %v11503_v33, 0.0  ;;  %vm3258_vm14 = vcmp.eq.s32.totalorder %v11504_v15, %v7661_v61  ;;  %vm3259_vm15 = vcmp.eq.s32.totalorder %v11504_v15, %v7666_v28  ;;  %vm3434_vm0 = vcmp.eq.s32.totalorder %v11518_v60, %v11514_v1 }
 0x35b   : > { %v3216_v44 = vadd.f32 %v3175_v46, %v3091_v6  ;;  %2855 = vmatpush.bf16.msrb.mxu3 %v2813_v31  ;;  %v3217_v62 = vadd.f32 %v3176_v20, %v3092_v39  ;;  %v3300_v55 = vsel %vm3258_vm14, %v11506_v47, 0.0  ;;  %v3301_v45 = vsel %vm3259_vm15, %v11506_v47, 0.0 }
 0x35c   : > { %vm3435_vm1 = vcmp.eq.s32.totalorder %v11518_v60, %v11515_v13  ;;  %v3476_v18 = vsel %vm3434_vm0, %v11520_v11, 0.0  ;;  %vm3518_vm2 = vcmp.eq.s32.totalorder %v11519_v4, %v11514_v1  ;;  %vm3519_vm3 = vcmp.eq.s32.totalorder %v11519_v4, %v11515_v13 }
 0x35d   : > { %v3341_v10 = vadd.f32 %v3300_v55, %v3216_v44  ;;  %v3477_v7 = vsel %vm3435_vm1, %v11520_v11, 0.0  ;;  %v3342_v53 = vadd.f32 %v3301_v45, %v3217_v62  ;;  %v3560_v58 = vsel %vm3518_vm2, %v11521_v43, 0.0  ;;  %v11529_v62 = vld [vmem:[#allocation15_spill] sm:$0xff] }
 0x35e   : > { %vm3643_vm4 = vcmp.eq.s32.totalorder %v11522_v35, %v11514_v1  ;;  %v3561_v2 = vsel %vm3519_vm3, %v11521_v43, 0.0  ;;  %v3601_v3 = vadd.f32 %v3560_v58, %v3476_v18  ;;  %vm3644_vm5 = vcmp.eq.s32.totalorder %v11522_v35, %v11515_v13 }
 0x35f   : > { %v3685_v6 = vsel %vm3643_vm4, %v11523_v9, 0.0  ;;  %v3365_v31 = vpack.c.bf16 %v3342_v53, %v3341_v10  ;;  %v3602_v39 = vadd.f32 %v3561_v2, %v3477_v7  ;;  %v3686_v46 = vsel %vm3644_vm5, %v11523_v9, 0.0  ;;  %v11530_v10 = vld [vmem:[#allocation16_spill] sm:$0xff] }
 0x360   : > { %vm3768_vm8 = vcmp.eq.s32.totalorder %v11524_v17, %v11514_v1  ;;  %v3726_v20 = vadd.f32 %v3685_v6, %v3601_v3  ;;  %vm3769_vm9 = vcmp.eq.s32.totalorder %v11524_v17, %v11515_v13  ;;  %vm3456_vm10 = vcmp.eq.s32.totalorder %v11518_v60, %v11529_v62 }
 0x361   : > { %v3810_v44 = vsel %vm3768_vm8, %v11525_v48, 0.0  ;;  %3417 = vmatpush.bf16.msra.mxu0 %v3365_v31  ;;  %v3727_v55 = vadd.f32 %v3686_v46, %v3602_v39  ;;  %v3811_v45 = vsel %vm3769_vm9, %v11525_v48, 0.0  ;;  %vm3457_vm11 = vcmp.eq.s32.totalorder %v11518_v60, %v11530_v10 }
 0x362   : > { %v3498_v18 = vsel %vm3456_vm10, %v11520_v11, 0.0  ;;  %v3851_v7 = vadd.f32 %v3810_v44, %v3726_v20  ;;  %v3499_v53 = vsel %vm3457_vm11, %v11520_v11, 0.0  ;;  %vm3540_vm12 = vcmp.eq.s32.totalorder %v11519_v4, %v11529_v62 }
 0x363   : > { %vm3541_vm13 = vcmp.eq.s32.totalorder %v11519_v4, %v11530_v10  ;;  %v3852_v58 = vadd.f32 %v3811_v45, %v3727_v55  ;;  %v3582_v2 = vsel %vm3540_vm12, %v11521_v43, 0.0  ;;  %vm3665_vm14 = vcmp.eq.s32.totalorder %v11522_v35, %v11529_v62 }
 0x364   : > { %v3583_v3 = vsel %vm3541_vm13, %v11521_v43, 0.0  ;;  %v3623_v6 = vadd.f32 %v3582_v2, %v3498_v18  ;;  %vm3666_vm15 = vcmp.eq.s32.totalorder %v11522_v35, %v11530_v10  ;;  %v3707_v39 = vsel %vm3665_vm14, %v11523_v9, 0.0 }
 0x365   : > { %v3624_v31 = vadd.f32 %v3583_v3, %v3499_v53  ;;  %v3888_v46 = vpack.c.bf16 %v3852_v58, %v3851_v7  ;;  %v3708_v20 = vsel %vm3666_vm15, %v11523_v9, 0.0  ;;  %vm3790_vm0 = vcmp.eq.s32.totalorder %v11524_v17, %v11529_v62 }
 0x366   : > { %vm3791_vm1 = vcmp.eq.s32.totalorder %v11524_v17, %v11530_v10  ;;  %v3748_v44 = vadd.f32 %v3707_v39, %v3623_v6  ;;  %v3832_v45 = vsel %vm3790_vm0, %v11525_v48, 0.0  ;;  %vm2354_vm2 = vcmp.eq.s32.totalorder %v11480_v59, %v6222_v16 }
 0x367   : > { %v3749_v55 = vadd.f32 %v3708_v20, %v3624_v31  ;;  %v3833_v18 = vsel %vm3791_vm1, %v11525_v48, 0.0  ;;  %3924 = vmatpush.bf16.msra.mxu2 %v3888_v46  ;;  %vm2355_vm3 = vcmp.eq.s32.totalorder %v11480_v59, %v11527_v5  ;;  %vm2438_vm4 = vcmp.eq.s32.totalorder %v11481_v25, %v6222_v16 }
 0x368   : > { %vm2439_vm5 = vcmp.eq.s32.totalorder %v11481_v25, %v11527_v5  ;;  %v3873_v7 = vadd.f32 %v3832_v45, %v3748_v44  ;;  %v2396_v58 = vsel %vm2354_vm2, %v11482_v56, 0.0  ;;  %v2397_v2 = vsel %vm2355_vm3, %v11482_v56, 0.0 }
 0x369   : > { %v3874_v53 = vadd.f32 %v3833_v18, %v3749_v55  ;;  %v2480_v3 = vsel %vm2438_vm4, %v11483_v27, 0.0  ;;  %v2481_v6 = vsel %vm2439_vm5, %v11483_v27, 0.0  ;;  %vm2563_vm8 = vcmp.eq.s32.totalorder %v11484_v8, %v6222_v16 }
 0x36a   : > { %vm2564_vm9 = vcmp.eq.s32.totalorder %v11484_v8, %v11527_v5  ;;  %v2521_v31 = vadd.f32 %v2480_v3, %v2396_v58  ;;  %v2522_v39 = vadd.f32 %v2481_v6, %v2397_v2  ;;  %v2605_v25 = vsel %vm2563_vm8, %v11485_v63, 0.0 }
 0x36b   : > { %v3899_v59 = vpack.c.bf16 %v3874_v53, %v3873_v7  ;;  %v2606_v46 = vsel %vm2564_vm9, %v11485_v63, 0.0  ;;  %vm2688_vm10 = vcmp.eq.s32.totalorder %v11486_v51, %v6222_v16  ;;  %vm2689_vm11 = vcmp.eq.s32.totalorder %v11486_v51, %v11527_v5 }
 0x36c   : > { %vm2922_vm12 = vcmp.eq.s32.totalorder %v11497_v38, %v7770_v0  ;;  %v2646_v56 = vadd.f32 %v2605_v25, %v2521_v31  ;;  %v2647_v27 = vadd.f32 %v2606_v46, %v2522_v39  ;;  %v2730_v8 = vsel %vm2688_vm10, %v11487_v49, 0.0 }
 0x36d   : > { %3934 = vmatpush.bf16.msra.mxu1 %v3899_v59  ;;  %v2731_v20 = vsel %vm2689_vm11, %v11487_v49, 0.0  ;;  %vm2923_vm13 = vcmp.eq.s32.totalorder %v11497_v38, %v7773_v50  ;;  %v2964_v63 = vsel %vm2922_vm12, %v11500_v42, 0.0  ;;  %vm3006_vm14 = vcmp.eq.s32.totalorder %v11499_v32, %v7770_v0 }
 0x36e   : > { %vm3007_vm15 = vcmp.eq.s32.totalorder %v11499_v32, %v7773_v50  ;;  %v2771_v51 = vadd.f32 %v2730_v8, %v2646_v56  ;;  %v2772_v44 = vadd.f32 %v2731_v20, %v2647_v27  ;;  %v2965_v55 = vsel %vm2923_vm13, %v11500_v42, 0.0 }
 0x36f   : > { %v3048_v45 = vsel %vm3006_vm14, %v11501_v41, 0.0  ;;  %v3049_v18 = vsel %vm3007_vm15, %v11501_v41, 0.0  ;;  %vm3131_vm0 = vcmp.eq.s32.totalorder %v11502_v14, %v7770_v0  ;;  %vm3132_vm1 = vcmp.eq.s32.totalorder %v11502_v14, %v7773_v50 }
 0x370   : > { %v3089_v49 = vadd.f32 %v3048_v45, %v2964_v63  ;;  %v2812_v7 = vpack.c.bf16 %v2772_v44, %v2771_v51  ;;  %v3090_v53 = vadd.f32 %v3049_v18, %v2965_v55  ;;  %v3173_v58 = vsel %vm3131_vm0, %v11503_v33, 0.0 }
 0x371   : > { %v3174_v2 = vsel %vm3132_vm1, %v11503_v33, 0.0  ;;  %vm3256_vm2 = vcmp.eq.s32.totalorder %v11504_v15, %v7770_v0  ;;  %vm3257_vm3 = vcmp.eq.s32.totalorder %v11504_v15, %v7773_v50  ;;  %vm3432_vm4 = vcmp.eq.s32.totalorder %v11518_v60, %v11516_v22 }
 0x372   : > { %v3214_v3 = vadd.f32 %v3173_v58, %v3089_v49  ;;  %2856 = vmatpush.bf16.msrb.mxu3 %v2812_v7  ;;  %v3215_v6 = vadd.f32 %v3174_v2, %v3090_v53  ;;  %v3298_v59 = vsel %vm3256_vm2, %v11506_v47, 0.0  ;;  %v3299_v31 = vsel %vm3257_vm3, %v11506_v47, 0.0  ;;  %v11531_v49 = vld [vmem:[#allocation70_spill] sm:$0xff]  ;;  %v11532_v53 = vld [vmem:[#allocation71_spill] sm:$0xff] }
 0x373   : > { %vm3433_vm5 = vcmp.eq.s32.totalorder %v11518_v60, %v11517_v40  ;;  %v3474_v25 = vsel %vm3432_vm4, %v11520_v11, 0.0  ;;  %vm3516_vm8 = vcmp.eq.s32.totalorder %v11519_v4, %v11516_v22  ;;  %vm3517_vm9 = vcmp.eq.s32.totalorder %v11519_v4, %v11517_v40 }
 0x374   : > { %v3339_v39 = vadd.f32 %v3298_v59, %v3214_v3  ;;  %v3475_v46 = vsel %vm3433_vm5, %v11520_v11, 0.0  ;;  %v3340_v56 = vadd.f32 %v3299_v31, %v3215_v6  ;;  %v3558_v27 = vsel %vm3516_vm8, %v11521_v43, 0.0 }
 0x375   : > { %vm3641_vm10 = vcmp.eq.s32.totalorder %v11522_v35, %v11516_v22  ;;  %v3559_v8 = vsel %vm3517_vm9, %v11521_v43, 0.0  ;;  %v3599_v20 = vadd.f32 %v3558_v27, %v3474_v25  ;;  %vm3642_vm11 = vcmp.eq.s32.totalorder %v11522_v35, %v11517_v40  ;;  %2857 = vmatmul.bf16.vlgmr.msrb.gmra.mxu3 %v8918_v57 }
 0x376   : > { %v3683_v63 = vsel %vm3641_vm10, %v11523_v9, 0.0  ;;  %v3364_v51 = vpack.c.bf16 %v3340_v56, %v3339_v39  ;;  %v3600_v44 = vadd.f32 %v3559_v8, %v3475_v46  ;;  %v3684_v55 = vsel %vm3642_vm11, %v11523_v9, 0.0 }
 0x377   : > { %vm3766_vm12 = vcmp.eq.s32.totalorder %v11524_v17, %v11516_v22  ;;  %v3724_v45 = vadd.f32 %v3683_v63, %v3599_v20  ;;  %vm3767_vm13 = vcmp.eq.s32.totalorder %v11524_v17, %v11517_v40  ;;  %vm3454_vm14 = vcmp.eq.s32.totalorder %v11518_v60, %v11531_v49 }
 0x378   : > { %v3808_v18 = vsel %vm3766_vm12, %v11525_v48, 0.0  ;;  %3418 = vmatpush.bf16.msra.mxu0 %v3364_v51  ;;  %v3725_v7 = vadd.f32 %v3684_v55, %v3600_v44  ;;  %v3809_v57 = vsel %vm3767_vm13, %v11525_v48, 0.0  ;;  %vm3455_vm15 = vcmp.eq.s32.totalorder %v11518_v60, %v11532_v53 }
 0x379   : > { %v3496_v58 = vsel %vm3454_vm14, %v11520_v11, 0.0  ;;  %v3849_v2 = vadd.f32 %v3808_v18, %v3724_v45  ;;  %v3497_v3 = vsel %vm3455_vm15, %v11520_v11, 0.0  ;;  %vm3538_vm0 = vcmp.eq.s32.totalorder %v11519_v4, %v11531_v49 }
 0x37a   : > { %vm3539_vm1 = vcmp.eq.s32.totalorder %v11519_v4, %v11532_v53  ;;  %v3850_v6 = vadd.f32 %v3809_v57, %v3725_v7  ;;  %v3580_v59 = vsel %vm3538_vm0, %v11521_v43, 0.0  ;;  %vm3663_vm2 = vcmp.eq.s32.totalorder %v11522_v35, %v11531_v49 }
 0x37b   : > { %v3581_v31 = vsel %vm3539_vm1, %v11521_v43, 0.0  ;;  %v3621_v39 = vadd.f32 %v3580_v59, %v3496_v58  ;;  %vm3664_vm3 = vcmp.eq.s32.totalorder %v11522_v35, %v11532_v53  ;;  %v3705_v46 = vsel %vm3663_vm2, %v11523_v9, 0.0 }
 0x37c   : > { %v3622_v25 = vadd.f32 %v3581_v31, %v3497_v3  ;;  %v3887_v56 = vpack.c.bf16 %v3850_v6, %v3849_v2  ;;  %v3706_v27 = vsel %vm3664_vm3, %v11523_v9, 0.0  ;;  %vm3788_vm4 = vcmp.eq.s32.totalorder %v11524_v17, %v11531_v49 }
 0x37d   : > { %vm3789_vm5 = vcmp.eq.s32.totalorder %v11524_v17, %v11532_v53  ;;  %v3746_v8 = vadd.f32 %v3705_v46, %v3621_v39  ;;  %v3830_v63 = vsel %vm3788_vm4, %v11525_v48, 0.0  ;;  %vm2920_vm8 = vcmp.eq.s32.totalorder %v11497_v38, %v11529_v62 }
 0x37e   : > { %v3747_v20 = vadd.f32 %v3706_v27, %v3622_v25  ;;  %v3831_v51 = vsel %vm3789_vm5, %v11525_v48, 0.0  ;;  %3925 = vmatpush.bf16.msra.mxu2 %v3887_v56  ;;  %vm2921_vm9 = vcmp.eq.s32.totalorder %v11497_v38, %v11530_v10  ;;  %vm3004_vm10 = vcmp.eq.s32.totalorder %v11499_v32, %v11529_v62 }
 0x37f   : > { %vm3005_vm11 = vcmp.eq.s32.totalorder %v11499_v32, %v11530_v10  ;;  %v3871_v44 = vadd.f32 %v3830_v63, %v3746_v8  ;;  %v2962_v45 = vsel %vm2920_vm8, %v11500_v42, 0.0  ;;  %v2963_v18 = vsel %vm2921_vm9, %v11500_v42, 0.0 }
 0x380   : > { %v3872_v55 = vadd.f32 %v3831_v51, %v3747_v20  ;;  %v3046_v7 = vsel %vm3004_vm10, %v11501_v41, 0.0  ;;  %v3047_v57 = vsel %vm3005_vm11, %v11501_v41, 0.0  ;;  %vm3129_vm12 = vcmp.eq.s32.totalorder %v11502_v14, %v11529_v62 }
 0x381   : > { %vm3130_vm13 = vcmp.eq.s32.totalorder %v11502_v14, %v11530_v10  ;;  %v3087_v2 = vadd.f32 %v3046_v7, %v2962_v45  ;;  %v3088_v3 = vadd.f32 %v3047_v57, %v2963_v18  ;;  %v3171_v6 = vsel %vm3129_vm12, %v11503_v33, 0.0 }
 0x382   : > { %v3898_v58 = vpack.c.bf16 %v3872_v55, %v3871_v44  ;;  %v3172_v59 = vsel %vm3130_vm13, %v11503_v33, 0.0  ;;  %vm3254_vm14 = vcmp.eq.s32.totalorder %v11504_v15, %v11529_v62  ;;  %vm3255_vm15 = vcmp.eq.s32.totalorder %v11504_v15, %v11530_v10 }
 0x383   : > { %vm3466_vm0 = vcmp.eq.s32.totalorder %v11518_v60, %v7364_v52  ;;  %v3212_v31 = vadd.f32 %v3171_v6, %v3087_v2  ;;  %v3213_v39 = vadd.f32 %v3172_v59, %v3088_v3  ;;  %v3296_v25 = vsel %vm3254_vm14, %v11506_v47, 0.0 }
 0x384   : > { %3935 = vmatpush.bf16.msra.mxu1 %v3898_v58  ;;  %v3297_v46 = vsel %vm3255_vm15, %v11506_v47, 0.0  ;;  %v3508_v56 = vsel %vm3466_vm0, %v11520_v11, 0.0  ;;  %vm3550_vm1 = vcmp.eq.s32.totalorder %v11519_v4, %v7364_v52  ;;  %vm3675_vm2 = vcmp.eq.s32.totalorder %v11522_v35, %v7364_v52 }
 0x385   : > { %vm3800_vm3 = vcmp.eq.s32.totalorder %v11524_v17, %v7364_v52  ;;  %v3337_v27 = vadd.f32 %v3296_v25, %v3212_v31  ;;  %v3338_v8 = vadd.f32 %v3297_v46, %v3213_v39  ;;  %v3592_v20 = vsel %vm3550_vm1, %v11521_v43, 0.0  ;;  %v11533_v46 = vld [vmem:[#allocation74_spill] sm:$0xff] }
 0x386   : > { %v3717_v63 = vsel %vm3675_vm2, %v11523_v9, 0.0  ;;  %v3633_v51 = vadd.f32 %v3592_v20, %v3508_v56  ;;  %v3842_v44 = vsel %vm3800_vm3, %v11525_v48, 0.0  ;;  %vm3430_vm4 = vcmp.eq.s32.totalorder %v11518_v60, %v11489_v24  ;;  %v11534_v20 = vld [vmem:[#allocation75_spill] sm:$0xff] }
 0x387   : > { %vm3431_vm5 = vcmp.eq.s32.totalorder %v11518_v60, %v11490_v26  ;;  %v3363_v55 = vpack.c.bf16 %v3338_v8, %v3337_v27  ;;  %v3472_v45 = vsel %vm3430_vm4, %v11520_v11, 0.0  ;;  %vm3514_vm8 = vcmp.eq.s32.totalorder %v11519_v4, %v11489_v24 }
 0x388   : > { %v3473_v18 = vsel %vm3431_vm5, %v11520_v11, 0.0  ;;  %v3758_v7 = vadd.f32 %v3717_v63, %v3633_v51  ;;  %vm3515_vm9 = vcmp.eq.s32.totalorder %v11519_v4, %v11490_v26  ;;  %v3556_v57 = vsel %vm3514_vm8, %v11521_v43, 0.0 }
 0x389   : > { %vm3639_vm10 = vcmp.eq.s32.totalorder %v11522_v35, %v11489_v24  ;;  %3398 = vmatpush.bf16.msra.mxu3 %v3363_v55  ;;  %v3557_v58 = vsel %vm3515_vm9, %v11521_v43, 0.0  ;;  %v3597_v2 = vadd.f32 %v3556_v57, %v3472_v45  ;;  %vm3640_vm11 = vcmp.eq.s32.totalorder %v11522_v35, %v11490_v26 }
 0x38a   : > { %v3681_v3 = vsel %vm3639_vm10, %v11523_v9, 0.0  ;;  %v3883_v6 = vadd.f32 %v3842_v44, %v3758_v7  ;;  %v3598_v59 = vadd.f32 %v3557_v58, %v3473_v18  ;;  %v3682_v31 = vsel %vm3640_vm11, %v11523_v9, 0.0 }
 0x38b   : > { %vm3764_vm12 = vcmp.eq.s32.totalorder %v11524_v17, %v11489_v24  ;;  %v3722_v39 = vadd.f32 %v3681_v3, %v3597_v2  ;;  %vm3765_vm13 = vcmp.eq.s32.totalorder %v11524_v17, %v11490_v26  ;;  %vm3452_vm14 = vcmp.eq.s32.totalorder %v11518_v60, %v11533_v46  ;;  %v11546_v26 = vld [vmem:[#allocation11_spill] sm:$0xff] }
 0x38c   : > { %v3806_v25 = vsel %vm3764_vm12, %v11525_v48, 0.0  ;;  %v3904_v56 = vpack.c.bf16 %v3883_v6, %v3883_v6  ;;  %v3723_v27 = vadd.f32 %v3682_v31, %v3598_v59  ;;  %v3807_v8 = vsel %vm3765_vm13, %v11525_v48, 0.0 }
 0x38d   : > { %vm3453_vm15 = vcmp.eq.s32.totalorder %v11518_v60, %v11534_v20  ;;  %v3847_v63 = vadd.f32 %v3806_v25, %v3722_v39  ;;  %v3494_v51 = vsel %vm3452_vm14, %v11520_v11, 0.0  ;;  %vm3536_vm0 = vcmp.eq.s32.totalorder %v11519_v4, %v11533_v46 }
 0x38e   : > { %v3495_v44 = vsel %vm3453_vm15, %v11520_v11, 0.0  ;;  %v3919_v55 = vsel %vm1719_vm7, %v3904_v56, 0  ;;  %v3848_v45 = vadd.f32 %v3807_v8, %v3723_v27  ;;  %vm3537_vm1 = vcmp.eq.s32.totalorder %v11519_v4, %v11534_v20 }
 0x38f   : > { %v3578_v18 = vsel %vm3536_vm0, %v11521_v43, 0.0  ;;  %3950 = vmatpush.bf16.msrb.mxu0 %v3919_v55  ;;  %v3579_v7 = vsel %vm3537_vm1, %v11521_v43, 0.0  ;;  %vm3661_vm2 = vcmp.eq.s32.totalorder %v11522_v35, %v11533_v46  ;;  %vm3662_vm3 = vcmp.eq.s32.totalorder %v11522_v35, %v11534_v20 }
 0x390   : > { %v3619_v57 = vadd.f32 %v3578_v18, %v3494_v51  ;;  %v3886_v58 = vpack.c.bf16 %v3848_v45, %v3847_v63  ;;  %v3620_v2 = vadd.f32 %v3579_v7, %v3495_v44  ;;  %v3703_v3 = vsel %vm3661_vm2, %v11523_v9, 0.0 }
 0x391   : > { %v3704_v6 = vsel %vm3662_vm3, %v11523_v9, 0.0  ;;  %vm3786_vm4 = vcmp.eq.s32.totalorder %v11524_v17, %v11533_v46  ;;  %vm3787_vm5 = vcmp.eq.s32.totalorder %v11524_v17, %v11534_v20  ;;  %vm2918_vm8 = vcmp.eq.s32.totalorder %v11497_v38, %v11531_v49 }
 0x392   : > { %v3744_v59 = vadd.f32 %v3703_v3, %v3619_v57  ;;  %3926 = vmatpush.bf16.msra.mxu2 %v3886_v58  ;;  %v3745_v31 = vadd.f32 %v3704_v6, %v3620_v2  ;;  %v3828_v39 = vsel %vm3786_vm4, %v11525_v48, 0.0  ;;  %v3829_v25 = vsel %vm3787_vm5, %v11525_v48, 0.0 }
 0x393   : > { %vm2919_vm9 = vcmp.eq.s32.totalorder %v11497_v38, %v11532_v53  ;;  %v2960_v27 = vsel %vm2918_vm8, %v11500_v42, 0.0  ;;  %vm3002_vm10 = vcmp.eq.s32.totalorder %v11499_v32, %v11531_v49  ;;  %vm3003_vm11 = vcmp.eq.s32.totalorder %v11499_v32, %v11532_v53 }
 0x394   : > { %v3869_v56 = vadd.f32 %v3828_v39, %v3744_v59  ;;  %v2961_v8 = vsel %vm2919_vm9, %v11500_v42, 0.0  ;;  %v3870_v63 = vadd.f32 %v3829_v25, %v3745_v31  ;;  %v3044_v51 = vsel %vm3002_vm10, %v11501_v41, 0.0 }
 0x395   : > { %vm3127_vm12 = vcmp.eq.s32.totalorder %v11502_v14, %v11531_v49  ;;  %v3045_v44 = vsel %vm3003_vm11, %v11501_v41, 0.0  ;;  %v3085_v55 = vadd.f32 %v3044_v51, %v2960_v27  ;;  %vm3128_vm13 = vcmp.eq.s32.totalorder %v11502_v14, %v11532_v53 }
 0x396   : > { %v3169_v45 = vsel %vm3127_vm12, %v11503_v33, 0.0  ;;  %v3897_v18 = vpack.c.bf16 %v3870_v63, %v3869_v56  ;;  %v3086_v7 = vadd.f32 %v3045_v44, %v2961_v8  ;;  %v3170_v57 = vsel %vm3128_vm13, %v11503_v33, 0.0 }
 0x397   : > { %vm3252_vm14 = vcmp.eq.s32.totalorder %v11504_v15, %v11531_v49  ;;  %v3210_v58 = vadd.f32 %v3169_v45, %v3085_v55  ;;  %vm3253_vm15 = vcmp.eq.s32.totalorder %v11504_v15, %v11532_v53  ;;  %vm3464_vm0 = vcmp.eq.s32.totalorder %v11518_v60, %v7443_v34 }
 0x398   : > { %v3294_v2 = vsel %vm3252_vm14, %v11506_v47, 0.0  ;;  %3936 = vmatpush.bf16.msra.mxu1 %v3897_v18  ;;  %v3211_v3 = vadd.f32 %v3170_v57, %v3086_v7  ;;  %v3295_v6 = vsel %vm3253_vm15, %v11506_v47, 0.0  ;;  %vm3465_vm1 = vcmp.eq.s32.totalorder %v11518_v60, %v7446_v30 }
 0x399   : > { %v3506_v59 = vsel %vm3464_vm0, %v11520_v11, 0.0  ;;  %v3335_v31 = vadd.f32 %v3294_v2, %v3210_v58  ;;  %v3507_v39 = vsel %vm3465_vm1, %v11520_v11, 0.0  ;;  %vm3548_vm2 = vcmp.eq.s32.totalorder %v11519_v4, %v7443_v34 }
 0x39a   : > { %vm3549_vm3 = vcmp.eq.s32.totalorder %v11519_v4, %v7446_v30  ;;  %v3336_v25 = vadd.f32 %v3295_v6, %v3211_v3  ;;  %v3590_v56 = vsel %vm3548_vm2, %v11521_v43, 0.0  ;;  %vm3673_vm4 = vcmp.eq.s32.totalorder %v11522_v35, %v7443_v34 }
 0x39b   : > { %v3591_v27 = vsel %vm3549_vm3, %v11521_v43, 0.0  ;;  %v3631_v8 = vadd.f32 %v3590_v56, %v3506_v59  ;;  %vm3674_vm5 = vcmp.eq.s32.totalorder %v11522_v35, %v7446_v30  ;;  %v3715_v51 = vsel %vm3673_vm4, %v11523_v9, 0.0 }
 0x39c   : > { %v3632_v63 = vadd.f32 %v3591_v27, %v3507_v39  ;;  %v3362_v44 = vpack.c.bf16 %v3336_v25, %v3335_v31  ;;  %v3716_v55 = vsel %vm3674_vm5, %v11523_v9, 0.0  ;;  %vm3798_vm8 = vcmp.eq.s32.totalorder %v11524_v17, %v7443_v34 }
 0x39d   : > { %vm3799_vm9 = vcmp.eq.s32.totalorder %v11524_v17, %v7446_v30  ;;  %v3756_v45 = vadd.f32 %v3715_v51, %v3631_v8  ;;  %v3840_v7 = vsel %vm3798_vm8, %v11525_v48, 0.0  ;;  %vm3428_vm10 = vcmp.eq.s32.totalorder %v11518_v60, %v11493_v37 }
 0x39e   : > { %v3757_v18 = vadd.f32 %v3716_v55, %v3632_v63  ;;  %v3841_v57 = vsel %vm3799_vm9, %v11525_v48, 0.0  ;;  %3399 = vmatpush.bf16.msra.mxu3 %v3362_v44  ;;  %vm3429_vm11 = vcmp.eq.s32.totalorder %v11518_v60, %v11526_v29  ;;  %vm3512_vm12 = vcmp.eq.s32.totalorder %v11519_v4, %v11493_v37  ;;  %v11535_v63 = vld [vmem:[#allocation78_spill] sm:$0xff] }
 0x39f   : > { %vm3513_vm13 = vcmp.eq.s32.totalorder %v11519_v4, %v11526_v29  ;;  %v3881_v58 = vadd.f32 %v3840_v7, %v3756_v45  ;;  %v3470_v3 = vsel %vm3428_vm10, %v11520_v11, 0.0  ;;  %v3471_v6 = vsel %vm3429_vm11, %v11520_v11, 0.0 }
 0x3a0   : > { %v3882_v2 = vadd.f32 %v3841_v57, %v3757_v18  ;;  %v3554_v59 = vsel %vm3512_vm12, %v11521_v43, 0.0  ;;  %v3555_v31 = vsel %vm3513_vm13, %v11521_v43, 0.0  ;;  %vm3637_vm14 = vcmp.eq.s32.totalorder %v11522_v35, %v11493_v37  ;;  %v11536_v18 = vld [vmem:[#allocation79_spill] sm:$0xff] }
 0x3a1   : > { %vm3638_vm15 = vcmp.eq.s32.totalorder %v11522_v35, %v11526_v29  ;;  %v3595_v25 = vadd.f32 %v3554_v59, %v3470_v3  ;;  %v3596_v56 = vadd.f32 %v3555_v31, %v3471_v6  ;;  %v3679_v27 = vsel %vm3637_vm14, %v11523_v9, 0.0 }
 0x3a2   : > { %v3903_v39 = vpack.c.bf16 %v3882_v2, %v3881_v58  ;;  %v3680_v8 = vsel %vm3638_vm15, %v11523_v9, 0.0  ;;  %vm3762_vm0 = vcmp.eq.s32.totalorder %v11524_v17, %v11493_v37  ;;  %vm3763_vm1 = vcmp.eq.s32.totalorder %v11524_v17, %v11526_v29 }
 0x3a3   : > { %vm3450_vm2 = vcmp.eq.s32.totalorder %v11518_v60, %v11535_v63  ;;  %v3720_v51 = vadd.f32 %v3679_v27, %v3595_v25  ;;  %v3721_v44 = vadd.f32 %v3680_v8, %v3596_v56  ;;  %v3804_v55 = vsel %vm3762_vm0, %v11525_v48, 0.0 }
 0x3a4   : > { %3951 = vmatpush.bf16.msrb.mxu0 %v3903_v39  ;;  %v3805_v45 = vsel %vm3763_vm1, %v11525_v48, 0.0  ;;  %vm3451_vm3 = vcmp.eq.s32.totalorder %v11518_v60, %v11536_v18  ;;  %v3492_v7 = vsel %vm3450_vm2, %v11520_v11, 0.0  ;;  %vm3534_vm4 = vcmp.eq.s32.totalorder %v11519_v4, %v11535_v63 }
 0x3a5   : > { %vm3535_vm5 = vcmp.eq.s32.totalorder %v11519_v4, %v11536_v18  ;;  %v3845_v57 = vadd.f32 %v3804_v55, %v3720_v51  ;;  %v3846_v58 = vadd.f32 %v3805_v45, %v3721_v44  ;;  %v3493_v2 = vsel %vm3451_vm3, %v11520_v11, 0.0 }
 0x3a6   : > { %v3576_v3 = vsel %vm3534_vm4, %v11521_v43, 0.0  ;;  %v3577_v6 = vsel %vm3535_vm5, %v11521_v43, 0.0  ;;  %vm3659_vm8 = vcmp.eq.s32.totalorder %v11522_v35, %v11535_v63  ;;  %vm3660_vm9 = vcmp.eq.s32.totalorder %v11522_v35, %v11536_v18 }
 0x3a7   : > { %v3617_v59 = vadd.f32 %v3576_v3, %v3492_v7  ;;  %v3885_v31 = vpack.c.bf16 %v3846_v58, %v3845_v57  ;;  %v3618_v39 = vadd.f32 %v3577_v6, %v3493_v2  ;;  %v3701_v25 = vsel %vm3659_vm8, %v11523_v9, 0.0 }
 0x3a8   : > { %v3702_v56 = vsel %vm3660_vm9, %v11523_v9, 0.0  ;;  %vm3784_vm10 = vcmp.eq.s32.totalorder %v11524_v17, %v11535_v63  ;;  %vm3785_vm11 = vcmp.eq.s32.totalorder %v11524_v17, %v11536_v18  ;;  %vm2916_vm12 = vcmp.eq.s32.totalorder %v11497_v38, %v11533_v46 }
 0x3a9   : > { %v3742_v27 = vadd.f32 %v3701_v25, %v3617_v59  ;;  %3927 = vmatpush.bf16.msra.mxu2 %v3885_v31  ;;  %v3743_v8 = vadd.f32 %v3702_v56, %v3618_v39  ;;  %v3826_v51 = vsel %vm3784_vm10, %v11525_v48, 0.0  ;;  %v3827_v44 = vsel %vm3785_vm11, %v11525_v48, 0.0 }
 0x3aa   : > { %vm2917_vm13 = vcmp.eq.s32.totalorder %v11497_v38, %v11534_v20  ;;  %v2958_v45 = vsel %vm2916_vm12, %v11500_v42, 0.0  ;;  %vm3000_vm14 = vcmp.eq.s32.totalorder %v11499_v32, %v11533_v46  ;;  %vm3001_vm15 = vcmp.eq.s32.totalorder %v11499_v32, %v11534_v20 }
 0x3ab   : > { %v3867_v55 = vadd.f32 %v3826_v51, %v3742_v27  ;;  %v2959_v7 = vsel %vm2917_vm13, %v11500_v42, 0.0  ;;  %v3868_v57 = vadd.f32 %v3827_v44, %v3743_v8  ;;  %v3042_v58 = vsel %vm3000_vm14, %v11501_v41, 0.0 }
 0x3ac   : > { %vm3125_vm0 = vcmp.eq.s32.totalorder %v11502_v14, %v11533_v46  ;;  %v3043_v2 = vsel %vm3001_vm15, %v11501_v41, 0.0  ;;  %v3083_v3 = vadd.f32 %v3042_v58, %v2958_v45  ;;  %vm3126_vm1 = vcmp.eq.s32.totalorder %v11502_v14, %v11534_v20 }
 0x3ad   : > { %v3167_v6 = vsel %vm3125_vm0, %v11503_v33, 0.0  ;;  %v3896_v59 = vpack.c.bf16 %v3868_v57, %v3867_v55  ;;  %v3084_v31 = vadd.f32 %v3043_v2, %v2959_v7  ;;  %v3168_v39 = vsel %vm3126_vm1, %v11503_v33, 0.0 }
 0x3ae   : > { %vm3250_vm2 = vcmp.eq.s32.totalorder %v11504_v15, %v11533_v46  ;;  %v3208_v25 = vadd.f32 %v3167_v6, %v3083_v3  ;;  %vm3251_vm3 = vcmp.eq.s32.totalorder %v11504_v15, %v11534_v20  ;;  %vm3462_vm4 = vcmp.eq.s32.totalorder %v11518_v60, %v7559_v19  ;;  %v538_v6 = vpop.f32.mrf.mxu2 }
 0x3af   : > { %v3292_v56 = vsel %vm3250_vm2, %v11506_v47, 0.0  ;;  %3937 = vmatpush.bf16.msra.mxu1 %v3896_v59  ;;  %v3209_v27 = vadd.f32 %v3168_v39, %v3084_v31  ;;  %v3293_v8 = vsel %vm3251_vm3, %v11506_v47, 0.0  ;;  %vm3463_vm5 = vcmp.eq.s32.totalorder %v11518_v60, %v7562_v12 }
 0x3b0   : > { %v3504_v51 = vsel %vm3462_vm4, %v11520_v11, 0.0  ;;  %v3333_v44 = vadd.f32 %v3292_v56, %v3208_v25  ;;  %v3505_v55 = vsel %vm3463_vm5, %v11520_v11, 0.0  ;;  %vm3546_vm8 = vcmp.eq.s32.totalorder %v11519_v4, %v7559_v19 }
 0x3b1   : > { %vm3547_vm9 = vcmp.eq.s32.totalorder %v11519_v4, %v7562_v12  ;;  %v3334_v45 = vadd.f32 %v3293_v8, %v3209_v27  ;;  %v3588_v7 = vsel %vm3546_vm8, %v11521_v43, 0.0  ;;  %vm3671_vm10 = vcmp.eq.s32.totalorder %v11522_v35, %v7559_v19 }
 0x3b2   : > { %v3589_v57 = vsel %vm3547_vm9, %v11521_v43, 0.0  ;;  %v3629_v58 = vadd.f32 %v3588_v7, %v3504_v51  ;;  %vm3672_vm11 = vcmp.eq.s32.totalorder %v11522_v35, %v7562_v12  ;;  %v3713_v3 = vsel %vm3671_vm10, %v11523_v9, 0.0 }
 0x3b3   : > { %v3630_v2 = vadd.f32 %v3589_v57, %v3505_v55  ;;  %v3361_v59 = vpack.c.bf16 %v3334_v45, %v3333_v44  ;;  %v3714_v31 = vsel %vm3672_vm11, %v11523_v9, 0.0  ;;  %vm3796_vm12 = vcmp.eq.s32.totalorder %v11524_v17, %v7559_v19 }
 0x3b4   : > { %vm3797_vm13 = vcmp.eq.s32.totalorder %v11524_v17, %v7562_v12  ;;  %v3754_v39 = vadd.f32 %v3713_v3, %v3629_v58  ;;  %v3838_v56 = vsel %vm3796_vm12, %v11525_v48, 0.0  ;;  %v562_v8 = vpack.c.bf16 %v538_v6, %v538_v6 }
 0x3b5   : > { %v3755_v25 = vadd.f32 %v3714_v31, %v3630_v2  ;;  %v3839_v27 = vsel %vm3797_vm13, %v11525_v48, 0.0  ;;  %3400 = vmatpush.bf16.msra.mxu3 %v3361_v59  ;;  %vm3426_vm14 = vcmp.eq.s32.totalorder %v11518_v60, %v6222_v16  ;;  %vm3427_vm15 = vcmp.eq.s32.totalorder %v11518_v60, %v11527_v5 }
 0x3b6   : > { %vm3510_vm0 = vcmp.eq.s32.totalorder %v11519_v4, %v6222_v16  ;;  %v3879_v51 = vadd.f32 %v3838_v56, %v3754_v39  ;;  %v3468_v55 = vsel %vm3426_vm14, %v11520_v11, 0.0  ;;  %v3469_v45 = vsel %vm3427_vm15, %v11520_v11, 0.0 }
 0x3b7   : > { %v3880_v44 = vadd.f32 %v3839_v27, %v3755_v25  ;;  %v3373_v7 = vunpack.c.l.b16 %v562_v8  ;;  %vm3511_vm1 = vcmp.eq.s32.totalorder %v11519_v4, %v11527_v5  ;;  %v3552_v57 = vsel %vm3510_vm0, %v11521_v43, 0.0 }
 0x3b8   : > { %vm3635_vm2 = vcmp.eq.s32.totalorder %v11522_v35, %v6222_v16  ;;  %v3553_v2 = vsel %vm3511_vm1, %v11521_v43, 0.0  ;;  %v3593_v3 = vadd.f32 %v3552_v57, %v3468_v55  ;;  %vm3636_vm3 = vcmp.eq.s32.totalorder %v11522_v35, %v11527_v5 }
 0x3b9   : > { %v3902_v58 = vpack.c.bf16 %v3880_v44, %v3879_v51  ;;  %v3376_v6 = vpack.c.b16 %v3373_v7, %v3373_v7  ;;  %v3594_v59 = vadd.f32 %v3553_v2, %v3469_v45  ;;  %v3677_v31 = vsel %vm3635_vm2, %v11523_v9, 0.0 }
 0x3ba   : > { %v3678_v39 = vsel %vm3636_vm3, %v11523_v9, 0.0  ;;  %v3718_v25 = vadd.f32 %v3677_v31, %v3593_v3  ;;  %vm3760_vm4 = vcmp.eq.s32.totalorder %v11524_v17, %v6222_v16  ;;  %vm3761_vm5 = vcmp.eq.s32.totalorder %v11524_v17, %v11527_v5  ;;  %v11542_v16 = vld [vmem:[#allocation48_spill] sm:$0xff] }
 0x3bb   : > { %3952 = vmatpush.bf16.msrb.mxu0 %v3902_v58  ;;  %vm3448_vm8 = vcmp.eq.s32.totalorder %v11518_v60, %v11478_v54  ;;  %v3719_v56 = vadd.f32 %v3678_v39, %v3594_v59  ;;  %v3802_v27 = vsel %vm3760_vm4, %v11525_v48, 0.0  ;;  %v3803_v8 = vsel %vm3761_vm5, %v11525_v48, 0.0 }
 0x3bc   : > { %vm3449_vm9 = vcmp.eq.s32.totalorder %v11518_v60, %v11507_v23  ;;  %5742 = vmatmul.msk.bf16.vlgmr.msra.gmra.mxu0 %vm1715_vm6, %v3376_v6  ;;  %v3843_v51 = vadd.f32 %v3802_v27, %v3718_v25  ;;  %v3490_v44 = vsel %vm3448_vm8, %v11520_v11, 0.0  ;;  %vm3532_vm10 = vcmp.eq.s32.totalorder %v11519_v4, %v11478_v54 }
 0x3bd   : > { %v3491_v55 = vsel %vm3449_vm9, %v11520_v11, 0.0  ;;  %v3844_v45 = vadd.f32 %v3803_v8, %v3719_v56  ;;  %vm3533_vm11 = vcmp.eq.s32.totalorder %v11519_v4, %v11507_v23  ;;  %v3574_v7 = vsel %vm3532_vm10, %v11521_v43, 0.0 }
 0x3be   : > { %vm3657_vm12 = vcmp.eq.s32.totalorder %v11522_v35, %v11478_v54  ;;  %v3575_v57 = vsel %vm3533_vm11, %v11521_v43, 0.0  ;;  %v3615_v58 = vadd.f32 %v3574_v7, %v3490_v44  ;;  %vm3658_vm13 = vcmp.eq.s32.totalorder %v11522_v35, %v11507_v23 }
 0x3bf   : > { %v3699_v2 = vsel %vm3657_vm12, %v11523_v9, 0.0  ;;  %v3884_v3 = vpack.c.bf16 %v3844_v45, %v3843_v51  ;;  %v3616_v6 = vadd.f32 %v3575_v57, %v3491_v55  ;;  %v3700_v59 = vsel %vm3658_vm13, %v11523_v9, 0.0 }
 0x3c0   : > { %vm3782_vm14 = vcmp.eq.s32.totalorder %v11524_v17, %v11478_v54  ;;  %v3740_v31 = vadd.f32 %v3699_v2, %v3615_v58  ;;  %vm3783_vm15 = vcmp.eq.s32.totalorder %v11524_v17, %v11507_v23  ;;  %vm2914_vm0 = vcmp.eq.s32.totalorder %v11497_v38, %v11535_v63 }
 0x3c1   : > { %v3824_v39 = vsel %vm3782_vm14, %v11525_v48, 0.0  ;;  %3928 = vmatpush.bf16.msra.mxu2 %v3884_v3  ;;  %v3741_v25 = vadd.f32 %v3700_v59, %v3616_v6  ;;  %v3825_v56 = vsel %vm3783_vm15, %v11525_v48, 0.0  ;;  %vm2915_vm1 = vcmp.eq.s32.totalorder %v11497_v38, %v11536_v18 }
 0x3c2   : > { %v2956_v27 = vsel %vm2914_vm0, %v11500_v42, 0.0  ;;  %v3865_v8 = vadd.f32 %v3824_v39, %v3740_v31  ;;  %v2957_v51 = vsel %vm2915_vm1, %v11500_v42, 0.0  ;;  %vm2998_vm2 = vcmp.eq.s32.totalorder %v11499_v32, %v11535_v63 }
 0x3c3   : > { %vm2999_vm3 = vcmp.eq.s32.totalorder %v11499_v32, %v11536_v18  ;;  %v3866_v44 = vadd.f32 %v3825_v56, %v3741_v25  ;;  %v3040_v55 = vsel %vm2998_vm2, %v11501_v41, 0.0  ;;  %vm3123_vm4 = vcmp.eq.s32.totalorder %v11502_v14, %v11535_v63 }
 0x3c4   : > { %v3041_v45 = vsel %vm2999_vm3, %v11501_v41, 0.0  ;;  %v3081_v7 = vadd.f32 %v3040_v55, %v2956_v27  ;;  %vm3124_vm5 = vcmp.eq.s32.totalorder %v11502_v14, %v11536_v18  ;;  %v3165_v58 = vsel %vm3123_vm4, %v11503_v33, 0.0 }
 0x3c5   : > { %v3082_v57 = vadd.f32 %v3041_v45, %v2957_v51  ;;  %v3895_v2 = vpack.c.bf16 %v3866_v44, %v3865_v8  ;;  %v3166_v3 = vsel %vm3124_vm5, %v11503_v33, 0.0  ;;  %vm3248_vm8 = vcmp.eq.s32.totalorder %v11504_v15, %v11535_v63 }
 0x3c6   : > { %vm3249_vm9 = vcmp.eq.s32.totalorder %v11504_v15, %v11536_v18  ;;  %v3206_v6 = vadd.f32 %v3165_v58, %v3081_v7  ;;  %v3290_v31 = vsel %vm3248_vm8, %v11506_v47, 0.0  ;;  %vm3460_vm10 = vcmp.eq.s32.totalorder %v11518_v60, %v7661_v61 }
 0x3c7   : > { %v3207_v59 = vadd.f32 %v3166_v3, %v3082_v57  ;;  %v3291_v39 = vsel %vm3249_vm9, %v11506_v47, 0.0  ;;  %3938 = vmatpush.bf16.msra.mxu1 %v3895_v2  ;;  %vm3461_vm11 = vcmp.eq.s32.totalorder %v11518_v60, %v7666_v28  ;;  %vm3544_vm12 = vcmp.eq.s32.totalorder %v11519_v4, %v7661_v61  ;;  %v11537_v2 = vld [vmem:[#allocation43_spill] sm:$0xff] }
 0x3c8   : > { %vm3545_vm13 = vcmp.eq.s32.totalorder %v11519_v4, %v7666_v28  ;;  %v3331_v25 = vadd.f32 %v3290_v31, %v3206_v6  ;;  %v3502_v27 = vsel %vm3460_vm10, %v11520_v11, 0.0  ;;  %v3503_v8 = vsel %vm3461_vm11, %v11520_v11, 0.0 }
 0x3c9   : > { %v3332_v56 = vadd.f32 %v3291_v39, %v3207_v59  ;;  %v3586_v51 = vsel %vm3544_vm12, %v11521_v43, 0.0  ;;  %v3587_v44 = vsel %vm3545_vm13, %v11521_v43, 0.0  ;;  %vm3669_vm14 = vcmp.eq.s32.totalorder %v11522_v35, %v7661_v61  ;;  %v11538_v39 = vld [vmem:[#allocation44_spill] sm:$0xff] }
 0x3ca   : > { %vm3670_vm15 = vcmp.eq.s32.totalorder %v11522_v35, %v7666_v28  ;;  %v3627_v45 = vadd.f32 %v3586_v51, %v3502_v27  ;;  %v3628_v7 = vadd.f32 %v3587_v44, %v3503_v8  ;;  %v3711_v57 = vsel %vm3669_vm14, %v11523_v9, 0.0  ;;  %v11540_v44 = vld [vmem:[#allocation46_spill] sm:$0xff] }
 0x3cb   : > { %v3360_v55 = vpack.c.bf16 %v3332_v56, %v3331_v25  ;;  %v3712_v58 = vsel %vm3670_vm15, %v11523_v9, 0.0  ;;  %vm3794_vm0 = vcmp.eq.s32.totalorder %v11524_v17, %v7661_v61  ;;  %vm3795_vm1 = vcmp.eq.s32.totalorder %v11524_v17, %v7666_v28  ;;  %v11539_v56 = vld [vmem:[#allocation45_spill] sm:$0xff] }
 0x3cc   : > { %vm3992_vm2 = vcmp.eq.s32.totalorder %v11537_v2, %v11529_v62  ;;  %v3752_v3 = vadd.f32 %v3711_v57, %v3627_v45  ;;  %v3753_v6 = vadd.f32 %v3712_v58, %v3628_v7  ;;  %v3836_v59 = vsel %vm3794_vm0, %v11525_v48, 0.0  ;;  %v11541_v57 = vld [vmem:[#allocation47_spill] sm:$0xff] }
 0x3cd   : > { %3401 = vmatpush.bf16.msra.mxu3 %v3360_v55  ;;  %v3837_v31 = vsel %vm3795_vm1, %v11525_v48, 0.0  ;;  %vm3993_vm3 = vcmp.eq.s32.totalorder %v11537_v2, %v11530_v10  ;;  %v4034_v25 = vsel %vm3992_vm2, %v11538_v39, 0.0  ;;  %vm4076_vm4 = vcmp.eq.s32.totalorder %v11539_v56, %v11529_v62 }
 0x3ce   : > { %vm4077_vm5 = vcmp.eq.s32.totalorder %v11539_v56, %v11530_v10  ;;  %v3877_v27 = vadd.f32 %v3836_v59, %v3752_v3  ;;  %v3878_v8 = vadd.f32 %v3837_v31, %v3753_v6  ;;  %v4035_v51 = vsel %vm3993_vm3, %v11538_v39, 0.0  ;;  %v11543_v59 = vld [vmem:[#allocation49_spill] sm:$0xff] }
 0x3cf   : > { %v4118_v55 = vsel %vm4076_vm4, %v11540_v44, 0.0  ;;  %v4119_v45 = vsel %vm4077_vm5, %v11540_v44, 0.0  ;;  %vm4201_vm8 = vcmp.eq.s32.totalorder %v11541_v57, %v11529_v62  ;;  %vm4202_vm9 = vcmp.eq.s32.totalorder %v11541_v57, %v11530_v10 }
 0x3d0   : > { %v4159_v7 = vadd.f32 %v4118_v55, %v4034_v25  ;;  %v3901_v58 = vpack.c.bf16 %v3878_v8, %v3877_v27  ;;  %v4160_v5 = vadd.f32 %v4119_v45, %v4035_v51  ;;  %v4243_v29 = vsel %vm4201_vm8, %v11542_v16, 0.0  ;;  %v11544_v25 = vld [vmem:[#allocation50_spill] sm:$0xff]  ;;  %v11545_v8 = vld [vmem:[#allocation87_spill] sm:$0xff] }
 0x3d1   : > { %v4244_v3 = vsel %vm4202_vm9, %v11542_v16, 0.0  ;;  %vm4326_vm10 = vcmp.eq.s32.totalorder %v11543_v59, %v11529_v62  ;;  %vm4327_vm11 = vcmp.eq.s32.totalorder %v11543_v59, %v11530_v10  ;;  %vm3446_vm12 = vcmp.eq.s32.totalorder %v11518_v60, %v11491_v21 }
 0x3d2   : > { %v4284_v6 = vadd.f32 %v4243_v29, %v4159_v7  ;;  %3953 = vmatpush.bf16.msrb.mxu0 %v3901_v58  ;;  %v4285_v31 = vadd.f32 %v4244_v3, %v4160_v5  ;;  %v4368_v55 = vsel %vm4326_vm10, %v11544_v25, 0.0  ;;  %v4369_v27 = vsel %vm4327_vm11, %v11544_v25, 0.0  ;;  %v494_v58 = vpop.f32.mrf.mxu1 }
 0x3d3   : > { %vm3447_vm13 = vcmp.eq.s32.totalorder %v11518_v60, %v11545_v8  ;;  %v3488_v29 = vsel %vm3446_vm12, %v11520_v11, 0.0  ;;  %vm3530_vm14 = vcmp.eq.s32.totalorder %v11519_v4, %v11491_v21  ;;  %vm3531_vm15 = vcmp.eq.s32.totalorder %v11519_v4, %v11545_v8 }
 0x3d4   : > { %v4409_v51 = vadd.f32 %v4368_v55, %v4284_v6  ;;  %v3489_v45 = vsel %vm3447_vm13, %v11520_v11, 0.0  ;;  %v4410_v7 = vadd.f32 %v4369_v27, %v4285_v31  ;;  %v3572_v5 = vsel %vm3530_vm14, %v11521_v43, 0.0 }
 0x3d5   : > { %vm3655_vm0 = vcmp.eq.s32.totalorder %v11522_v35, %v11491_v21  ;;  %v3573_v3 = vsel %vm3531_vm15, %v11521_v43, 0.0  ;;  %v3613_v6 = vadd.f32 %v3572_v5, %v3488_v29  ;;  %vm3656_vm1 = vcmp.eq.s32.totalorder %v11522_v35, %v11545_v8 }
 0x3d6   : > { %v3697_v55 = vsel %vm3655_vm0, %v11523_v9, 0.0  ;;  %v4435_v10 = vpack.c.bf16 %v4410_v7, %v4409_v51  ;;  %v3614_v62 = vadd.f32 %v3573_v3, %v3489_v45  ;;  %v3698_v31 = vsel %vm3656_vm1, %v11523_v9, 0.0 }
 0x3d7   : > { %vm3780_vm2 = vcmp.eq.s32.totalorder %v11524_v17, %v11491_v21  ;;  %v3738_v27 = vadd.f32 %v3697_v55, %v3613_v6  ;;  %vm3781_vm3 = vcmp.eq.s32.totalorder %v11524_v17, %v11545_v8  ;;  %v561_v29 = vpack.c.bf16 %v494_v58, %v11546_v26 }
 0x3d8   : > { %v3822_v37 = vsel %vm3780_vm2, %v11525_v48, 0.0  ;;  %4470 = vmatpush.bf16.msrb.mxu2 %v4435_v10  ;;  %v3739_v5 = vadd.f32 %v3698_v31, %v3614_v62  ;;  %v3823_v24 = vsel %vm3781_vm3, %v11525_v48, 0.0  ;;  %vm2912_vm4 = vcmp.eq.s32.totalorder %v11497_v38, %v11478_v54 }
 0x3d9   : > { %vm2913_vm5 = vcmp.eq.s32.totalorder %v11497_v38, %v11507_v23  ;;  %v3863_v51 = vadd.f32 %v3822_v37, %v3738_v27  ;;  %v3371_v45 = vunpack.c.l.b16 %v561_v29  ;;  %v3372_v7 = vunpack.c.h.b16 %v561_v29 }
 0x3da   : > { %v2954_v3 = vsel %vm2912_vm4, %v11500_v42, 0.0  ;;  %v3864_v6 = vadd.f32 %v3823_v24, %v3739_v5  ;;  %v2955_v55 = vsel %vm2913_vm5, %v11500_v42, 0.0  ;;  %vm2996_vm8 = vcmp.eq.s32.totalorder %v11499_v32, %v11478_v54 }
 0x3db   : > { %vm2997_vm9 = vcmp.eq.s32.totalorder %v11499_v32, %v11507_v23  ;;  %v3374_v26 = vpack.c.b16 %v3371_v45, %v3371_v45  ;;  %v9492_v62 = vpack.c.b16 %v3372_v7, %v3372_v7  ;;  %v3038_v10 = vsel %vm2996_vm8, %v11501_v41, 0.0 }
 0x3dc   : > { %v3039_v37 = vsel %vm2997_vm9, %v11501_v41, 0.0  ;;  %v3894_v58 = vpack.c.bf16 %v3864_v6, %v3863_v51  ;;  %v3079_v31 = vadd.f32 %v3038_v10, %v2954_v3  ;;  %vm3121_vm10 = vcmp.eq.s32.totalorder %v11502_v14, %v11478_v54 }
 0x3dd   : > { %v3080_v27 = vadd.f32 %v3039_v37, %v2955_v55  ;;  %vm3122_vm11 = vcmp.eq.s32.totalorder %v11502_v14, %v11507_v23  ;;  %v3163_v24 = vsel %vm3121_vm10, %v11503_v33, 0.0  ;;  %vm3246_vm12 = vcmp.eq.s32.totalorder %v11504_v15, %v11478_v54  ;;  %3393 = vmatmul.bf16.vlgmr.msrb.gmra.mxu1 %v3374_v26 }
 0x3de   : > { %vm3247_vm13 = vcmp.eq.s32.totalorder %v11504_v15, %v11507_v23  ;;  %3939 = vmatpush.bf16.msra.mxu1 %v3894_v58  ;;  %v3164_v29 = vsel %vm3122_vm11, %v11503_v33, 0.0  ;;  %v3204_v5 = vadd.f32 %v3163_v24, %v3079_v31  ;;  %v3288_v51 = vsel %vm3246_vm12, %v11506_v47, 0.0 }
 0x3df   : > { %v3289_v45 = vsel %vm3247_vm13, %v11506_v47, 0.0  ;;  %v3205_v7 = vadd.f32 %v3164_v29, %v3080_v27  ;;  %vm3458_vm14 = vcmp.eq.s32.totalorder %v11518_v60, %v7770_v0  ;;  %vm3459_vm15 = vcmp.eq.s32.totalorder %v11518_v60, %v7773_v50 }
 0x3e0   : > { %vm3542_vm0 = vcmp.eq.s32.totalorder %v11519_v4, %v7770_v0  ;;  %v3329_v3 = vadd.f32 %v3288_v51, %v3204_v5  ;;  %v3500_v6 = vsel %vm3458_vm14, %v11520_v11, 0.0  ;;  %v3501_v55 = vsel %vm3459_vm15, %v11520_v11, 0.0 }
 0x3e1   : > { %vm3543_vm1 = vcmp.eq.s32.totalorder %v11519_v4, %v7773_v50  ;;  %v3330_v26 = vadd.f32 %v3289_v45, %v3205_v7  ;;  %v3584_v10 = vsel %vm3542_vm0, %v11521_v43, 0.0  ;;  %vm3667_vm2 = vcmp.eq.s32.totalorder %v11522_v35, %v7770_v0 }
 0x3e2   : > { %v3585_v37 = vsel %vm3543_vm1, %v11521_v43, 0.0  ;;  %v3625_v58 = vadd.f32 %v3584_v10, %v3500_v6  ;;  %vm3668_vm3 = vcmp.eq.s32.totalorder %v11522_v35, %v7773_v50  ;;  %v3709_v27 = vsel %vm3667_vm2, %v11523_v9, 0.0 }
 0x3e3   : > { %v3626_v31 = vadd.f32 %v3585_v37, %v3501_v55  ;;  %v3359_v24 = vpack.c.bf16 %v3330_v26, %v3329_v3  ;;  %v3710_v29 = vsel %vm3668_vm3, %v11523_v9, 0.0  ;;  %vm3792_vm4 = vcmp.eq.s32.totalorder %v11524_v17, %v7770_v0 }
 0x3e4   : > { %vm3793_vm5 = vcmp.eq.s32.totalorder %v11524_v17, %v7773_v50  ;;  %v3750_v5 = vadd.f32 %v3709_v27, %v3625_v58  ;;  %v3834_v45 = vsel %vm3792_vm4, %v11525_v48, 0.0  ;;  %vm3990_vm8 = vcmp.eq.s32.totalorder %v11537_v2, %v11531_v49 }
 0x3e5   : > { %v3751_v51 = vadd.f32 %v3710_v29, %v3626_v31  ;;  %v3835_v7 = vsel %vm3793_vm5, %v11525_v48, 0.0  ;;  %3402 = vmatpush.bf16.msra.mxu3 %v3359_v24  ;;  %vm3991_vm9 = vcmp.eq.s32.totalorder %v11537_v2, %v11532_v53  ;;  %vm4074_vm10 = vcmp.eq.s32.totalorder %v11539_v56, %v11531_v49 }
 0x3e6   : > { %vm4075_vm11 = vcmp.eq.s32.totalorder %v11539_v56, %v11532_v53  ;;  %v3875_v3 = vadd.f32 %v3834_v45, %v3750_v5  ;;  %v4032_v55 = vsel %vm3990_vm8, %v11538_v39, 0.0  ;;  %v4033_v26 = vsel %vm3991_vm9, %v11538_v39, 0.0 }
 0x3e7   : > { %v3876_v6 = vadd.f32 %v3835_v7, %v3751_v51  ;;  %v4116_v10 = vsel %vm4074_vm10, %v11540_v44, 0.0  ;;  %v4117_v37 = vsel %vm4075_vm11, %v11540_v44, 0.0  ;;  %vm4199_vm12 = vcmp.eq.s32.totalorder %v11541_v57, %v11531_v49 }
 0x3e8   : > { %vm4200_vm13 = vcmp.eq.s32.totalorder %v11541_v57, %v11532_v53  ;;  %v4157_v31 = vadd.f32 %v4116_v10, %v4032_v55  ;;  %v4158_v27 = vadd.f32 %v4117_v37, %v4033_v26  ;;  %v4241_v24 = vsel %vm4199_vm12, %v11542_v16, 0.0 }
 0x3e9   : > { %v3900_v58 = vpack.c.bf16 %v3876_v6, %v3875_v3  ;;  %v4242_v29 = vsel %vm4200_vm13, %v11542_v16, 0.0  ;;  %vm4324_vm14 = vcmp.eq.s32.totalorder %v11543_v59, %v11531_v49  ;;  %vm4325_vm15 = vcmp.eq.s32.totalorder %v11543_v59, %v11532_v53 }
 0x3ea   : > { %vm4002_vm0 = vcmp.eq.s32.totalorder %v11537_v2, %v7364_v52  ;;  %v4282_v5 = vadd.f32 %v4241_v24, %v4157_v31  ;;  %v4283_v51 = vadd.f32 %v4242_v29, %v4158_v27  ;;  %v4366_v45 = vsel %vm4324_vm14, %v11544_v25, 0.0  ;;  %v11547_v31 = vld [vmem:[#allocation90_spill] sm:$0xff]  ;;  %v11548_v27 = vld [vmem:[#allocation91_spill] sm:$0xff] }
 0x3eb   : > { %3954 = vmatpush.bf16.msrb.mxu0 %v3900_v58  ;;  %v4367_v7 = vsel %vm4325_vm15, %v11544_v25, 0.0  ;;  %v4044_v3 = vsel %vm4002_vm0, %v11538_v39, 0.0  ;;  %vm4086_vm1 = vcmp.eq.s32.totalorder %v11539_v56, %v7364_v52  ;;  %vm4211_vm2 = vcmp.eq.s32.totalorder %v11541_v57, %v7364_v52 }
 0x3ec   : > { %vm4336_vm3 = vcmp.eq.s32.totalorder %v11543_v59, %v7364_v52  ;;  %v4407_v6 = vadd.f32 %v4366_v45, %v4282_v5  ;;  %v4408_v55 = vadd.f32 %v4367_v7, %v4283_v51  ;;  %v4128_v26 = vsel %vm4086_vm1, %v11540_v44, 0.0 }
 0x3ed   : > { %v4253_v10 = vsel %vm4211_vm2, %v11542_v16, 0.0  ;;  %v4169_v37 = vadd.f32 %v4128_v26, %v4044_v3  ;;  %v4378_v58 = vsel %vm4336_vm3, %v11544_v25, 0.0  ;;  %vm3444_vm4 = vcmp.eq.s32.totalorder %v11518_v60, %v11547_v31 }
 0x3ee   : > { %vm3445_vm5 = vcmp.eq.s32.totalorder %v11518_v60, %v11548_v27  ;;  %v4434_v24 = vpack.c.bf16 %v4408_v55, %v4407_v6  ;;  %v3486_v29 = vsel %vm3444_vm4, %v11520_v11, 0.0  ;;  %vm3528_vm8 = vcmp.eq.s32.totalorder %v11519_v4, %v11547_v31 }
 0x3ef   : > { %v3487_v53 = vsel %vm3445_vm5, %v11520_v11, 0.0  ;;  %v4294_v5 = vadd.f32 %v4253_v10, %v4169_v37  ;;  %vm3529_vm9 = vcmp.eq.s32.totalorder %v11519_v4, %v11548_v27  ;;  %v3570_v51 = vsel %vm3528_vm8, %v11521_v43, 0.0 }
 0x3f0   : > { %vm3653_vm10 = vcmp.eq.s32.totalorder %v11522_v35, %v11547_v31  ;;  %4471 = vmatpush.bf16.msrb.mxu2 %v4434_v24  ;;  %v3571_v45 = vsel %vm3529_vm9, %v11521_v43, 0.0  ;;  %v3611_v7 = vadd.f32 %v3570_v51, %v3486_v29  ;;  %vm3654_vm11 = vcmp.eq.s32.totalorder %v11522_v35, %v11548_v27 }
 0x3f1   : > { %v3695_v3 = vsel %vm3653_vm10, %v11523_v9, 0.0  ;;  %v4419_v6 = vadd.f32 %v4378_v58, %v4294_v5  ;;  %v3612_v55 = vadd.f32 %v3571_v45, %v3487_v53  ;;  %v3696_v26 = vsel %vm3654_vm11, %v11523_v9, 0.0 }
 0x3f2   : > { %vm3778_vm12 = vcmp.eq.s32.totalorder %v11524_v17, %v11547_v31  ;;  %v3736_v10 = vadd.f32 %v3695_v3, %v3611_v7  ;;  %vm3779_vm13 = vcmp.eq.s32.totalorder %v11524_v17, %v11548_v27  ;;  %vm2910_vm14 = vcmp.eq.s32.totalorder %v11497_v38, %v11491_v21 }
 0x3f3   : > { %v3820_v37 = vsel %vm3778_vm12, %v11525_v48, 0.0  ;;  %v4440_v24 = vpack.c.bf16 %v4419_v6, %v4419_v6  ;;  %v3737_v29 = vadd.f32 %v3696_v26, %v3612_v55  ;;  %v3821_v51 = vsel %vm3779_vm13, %v11525_v48, 0.0 }
 0x3f4   : > { %vm2911_vm15 = vcmp.eq.s32.totalorder %v11497_v38, %v11545_v8  ;;  %v3861_v53 = vadd.f32 %v3820_v37, %v3736_v10  ;;  %v2952_v58 = vsel %vm2910_vm14, %v11500_v42, 0.0  ;;  %vm2994_vm0 = vcmp.eq.s32.totalorder %v11499_v32, %v11491_v21 }
 0x3f5   : > { %v2953_v5 = vsel %vm2911_vm15, %v11500_v42, 0.0  ;;  %v4455_v45 = vsel %vm1719_vm7, %v4440_v24, 0  ;;  %v3862_v7 = vadd.f32 %v3821_v51, %v3737_v29  ;;  %vm2995_vm1 = vcmp.eq.s32.totalorder %v11499_v32, %v11545_v8 }
 0x3f6   : > { %v3036_v3 = vsel %vm2994_vm0, %v11501_v41, 0.0  ;;  %4486 = vmatpush.bf16.msra.mxu0 %v4455_v45  ;;  %v3037_v6 = vsel %vm2995_vm1, %v11501_v41, 0.0  ;;  %vm3119_vm2 = vcmp.eq.s32.totalorder %v11502_v14, %v11491_v21  ;;  %vm3120_vm3 = vcmp.eq.s32.totalorder %v11502_v14, %v11545_v8 }
 0x3f7   : > { %v3077_v55 = vadd.f32 %v3036_v3, %v2952_v58  ;;  %v3893_v26 = vpack.c.bf16 %v3862_v7, %v3861_v53  ;;  %v3078_v10 = vadd.f32 %v3037_v6, %v2953_v5  ;;  %v3161_v37 = vsel %vm3119_vm2, %v11503_v33, 0.0 }
 0x3f8   : > { %v3162_v24 = vsel %vm3120_vm3, %v11503_v33, 0.0  ;;  %vm3244_vm4 = vcmp.eq.s32.totalorder %v11504_v15, %v11491_v21  ;;  %vm3245_vm5 = vcmp.eq.s32.totalorder %v11504_v15, %v11545_v8  ;;  %vm3988_vm8 = vcmp.eq.s32.totalorder %v11537_v2, %v11533_v46 }
 0x3f9   : > { %v3202_v29 = vadd.f32 %v3161_v37, %v3077_v55  ;;  %3940 = vmatpush.bf16.msra.mxu1 %v3893_v26  ;;  %v3203_v51 = vadd.f32 %v3162_v24, %v3078_v10  ;;  %v3286_v58 = vsel %vm3244_vm4, %v11506_v47, 0.0  ;;  %v3287_v53 = vsel %vm3245_vm5, %v11506_v47, 0.0 }
 0x3fa   : > { %vm3989_vm9 = vcmp.eq.s32.totalorder %v11537_v2, %v11534_v20  ;;  %v4030_v45 = vsel %vm3988_vm8, %v11538_v39, 0.0  ;;  %vm4072_vm10 = vcmp.eq.s32.totalorder %v11539_v56, %v11533_v46  ;;  %vm4073_vm11 = vcmp.eq.s32.totalorder %v11539_v56, %v11534_v20 }
 0x3fb   : > { %v3327_v5 = vadd.f32 %v3286_v58, %v3202_v29  ;;  %v4031_v7 = vsel %vm3989_vm9, %v11538_v39, 0.0  ;;  %v3328_v3 = vadd.f32 %v3287_v53, %v3203_v51  ;;  %v4114_v6 = vsel %vm4072_vm10, %v11540_v44, 0.0 }
 0x3fc   : > { %vm4197_vm12 = vcmp.eq.s32.totalorder %v11541_v57, %v11533_v46  ;;  %v4115_v55 = vsel %vm4073_vm11, %v11540_v44, 0.0  ;;  %v4155_v26 = vadd.f32 %v4114_v6, %v4030_v45  ;;  %vm4198_vm13 = vcmp.eq.s32.totalorder %v11541_v57, %v11534_v20 }
 0x3fd   : > { %v4239_v10 = vsel %vm4197_vm12, %v11542_v16, 0.0  ;;  %v3358_v37 = vpack.c.bf16 %v3328_v3, %v3327_v5  ;;  %v4156_v24 = vadd.f32 %v4115_v55, %v4031_v7  ;;  %v4240_v29 = vsel %vm4198_vm13, %v11542_v16, 0.0 }
 0x3fe   : > { %vm4322_vm14 = vcmp.eq.s32.totalorder %v11543_v59, %v11533_v46  ;;  %v4280_v51 = vadd.f32 %v4239_v10, %v4155_v26  ;;  %vm4323_vm15 = vcmp.eq.s32.totalorder %v11543_v59, %v11534_v20  ;;  %vm4000_vm0 = vcmp.eq.s32.totalorder %v11537_v2, %v7443_v34 }
 0x3ff   : > { %v4364_v58 = vsel %vm4322_vm14, %v11544_v25, 0.0  ;;  %3403 = vmatpush.bf16.msra.mxu3 %v3358_v37  ;;  %v4281_v53 = vadd.f32 %v4240_v29, %v4156_v24  ;;  %v4365_v45 = vsel %vm4323_vm15, %v11544_v25, 0.0  ;;  %vm4001_vm1 = vcmp.eq.s32.totalorder %v11537_v2, %v7446_v30 }
 0x400   : > { %v4042_v5 = vsel %vm4000_vm0, %v11538_v39, 0.0  ;;  %v4405_v7 = vadd.f32 %v4364_v58, %v4280_v51  ;;  %v4043_v3 = vsel %vm4001_vm1, %v11538_v39, 0.0  ;;  %vm4084_vm2 = vcmp.eq.s32.totalorder %v11539_v56, %v7443_v34 }
 0x401   : > { %vm4085_vm3 = vcmp.eq.s32.totalorder %v11539_v56, %v7446_v30  ;;  %v4406_v6 = vadd.f32 %v4365_v45, %v4281_v53  ;;  %v4126_v55 = vsel %vm4084_vm2, %v11540_v44, 0.0  ;;  %vm4209_vm4 = vcmp.eq.s32.totalorder %v11541_v57, %v7443_v34 }
 0x402   : > { %v4127_v26 = vsel %vm4085_vm3, %v11540_v44, 0.0  ;;  %v4167_v10 = vadd.f32 %v4126_v55, %v4042_v5  ;;  %vm4210_vm5 = vcmp.eq.s32.totalorder %v11541_v57, %v7446_v30  ;;  %v4251_v24 = vsel %vm4209_vm4, %v11542_v16, 0.0  ;;  %v11550_v55 = vld [vmem:[#allocation94_spill] sm:$0xff] }
 0x403   : > { %v4168_v37 = vadd.f32 %v4127_v26, %v4043_v3  ;;  %v4433_v29 = vpack.c.bf16 %v4406_v6, %v4405_v7  ;;  %v4252_v51 = vsel %vm4210_vm5, %v11542_v16, 0.0  ;;  %vm4334_vm8 = vcmp.eq.s32.totalorder %v11543_v59, %v7443_v34  ;;  %v11549_v3 = vld [vmem:[#allocation93_spill] sm:$0xff] }
 0x404   : > { %vm4335_vm9 = vcmp.eq.s32.totalorder %v11543_v59, %v7446_v30  ;;  %v4292_v58 = vadd.f32 %v4251_v24, %v4167_v10  ;;  %v4376_v45 = vsel %vm4334_vm8, %v11544_v25, 0.0  ;;  %vm3442_vm10 = vcmp.eq.s32.totalorder %v11518_v60, %v11549_v3 }
 0x405   : > { %v4293_v53 = vadd.f32 %v4252_v51, %v4168_v37  ;;  %v4377_v5 = vsel %vm4335_vm9, %v11544_v25, 0.0  ;;  %4472 = vmatpush.bf16.msrb.mxu2 %v4433_v29  ;;  %vm3443_vm11 = vcmp.eq.s32.totalorder %v11518_v60, %v11550_v55  ;;  %vm3526_vm12 = vcmp.eq.s32.totalorder %v11519_v4, %v11549_v3 }
 0x406   : > { %vm3527_vm13 = vcmp.eq.s32.totalorder %v11519_v4, %v11550_v55  ;;  %v4417_v7 = vadd.f32 %v4376_v45, %v4292_v58  ;;  %v3484_v26 = vsel %vm3442_vm10, %v11520_v11, 0.0  ;;  %v3485_v10 = vsel %vm3443_vm11, %v11520_v11, 0.0 }
 0x407   : > { %v4418_v6 = vadd.f32 %v4377_v5, %v4293_v53  ;;  %v3568_v37 = vsel %vm3526_vm12, %v11521_v43, 0.0  ;;  %v3569_v24 = vsel %vm3527_vm13, %v11521_v43, 0.0  ;;  %vm3651_vm14 = vcmp.eq.s32.totalorder %v11522_v35, %v11549_v3 }
 0x408   : > { %vm3652_vm15 = vcmp.eq.s32.totalorder %v11522_v35, %v11550_v55  ;;  %v3609_v29 = vadd.f32 %v3568_v37, %v3484_v26  ;;  %v3610_v51 = vadd.f32 %v3569_v24, %v3485_v10  ;;  %v3693_v4 = vsel %vm3651_vm14, %v11523_v9, 0.0 }
 0x409   : > { %v4439_v60 = vpack.c.bf16 %v4418_v6, %v4417_v7  ;;  %v3694_v58 = vsel %vm3652_vm15, %v11523_v9, 0.0  ;;  %vm3776_vm0 = vcmp.eq.s32.totalorder %v11524_v17, %v11549_v3  ;;  %vm3777_vm1 = vcmp.eq.s32.totalorder %v11524_v17, %v11550_v55 }
 0x40a   : > { %vm2908_vm2 = vcmp.eq.s32.totalorder %v11497_v38, %v11547_v31  ;;  %v3734_v11 = vadd.f32 %v3693_v4, %v3609_v29  ;;  %v3735_v43 = vadd.f32 %v3694_v58, %v3610_v51  ;;  %v3818_v35 = vsel %vm3776_vm0, %v11525_v48, 0.0 }
 0x40b   : > { %4487 = vmatpush.bf16.msra.mxu0 %v4439_v60  ;;  %v3819_v53 = vsel %vm3777_vm1, %v11525_v48, 0.0  ;;  %vm2909_vm3 = vcmp.eq.s32.totalorder %v11497_v38, %v11548_v27  ;;  %v2950_v9 = vsel %vm2908_vm2, %v11500_v42, 0.0  ;;  %vm2992_vm4 = vcmp.eq.s32.totalorder %v11499_v32, %v11547_v31 }
 0x40c   : > { %vm2993_vm5 = vcmp.eq.s32.totalorder %v11499_v32, %v11548_v27  ;;  %v3859_v17 = vadd.f32 %v3818_v35, %v3734_v11  ;;  %v3860_v45 = vadd.f32 %v3819_v53, %v3735_v43  ;;  %v2951_v5 = vsel %vm2909_vm3, %v11500_v42, 0.0 }
 0x40d   : > { %v3034_v7 = vsel %vm2992_vm4, %v11501_v41, 0.0  ;;  %v3035_v6 = vsel %vm2993_vm5, %v11501_v41, 0.0  ;;  %vm3117_vm8 = vcmp.eq.s32.totalorder %v11502_v14, %v11547_v31  ;;  %vm3118_vm9 = vcmp.eq.s32.totalorder %v11502_v14, %v11548_v27 }
 0x40e   : > { %v3075_v48 = vadd.f32 %v3034_v7, %v2950_v9  ;;  %v3892_v26 = vpack.c.bf16 %v3860_v45, %v3859_v17  ;;  %v3076_v10 = vadd.f32 %v3035_v6, %v2951_v5  ;;  %v3159_v37 = vsel %vm3117_vm8, %v11503_v33, 0.0 }
 0x40f   : > { %v3160_v24 = vsel %vm3118_vm9, %v11503_v33, 0.0  ;;  %vm3242_vm10 = vcmp.eq.s32.totalorder %v11504_v15, %v11547_v31  ;;  %vm3243_vm11 = vcmp.eq.s32.totalorder %v11504_v15, %v11548_v27  ;;  %vm3986_vm12 = vcmp.eq.s32.totalorder %v11537_v2, %v11535_v63 }
 0x410   : > { %v3200_v60 = vadd.f32 %v3159_v37, %v3075_v48  ;;  %3941 = vmatpush.bf16.msra.mxu1 %v3892_v26  ;;  %v3201_v29 = vadd.f32 %v3160_v24, %v3076_v10  ;;  %v3284_v51 = vsel %vm3242_vm10, %v11506_v47, 0.0  ;;  %v3285_v4 = vsel %vm3243_vm11, %v11506_v47, 0.0  ;;  %v11551_v10 = vld [vmem:[#allocation51_spill] sm:$0xff] }
 0x411   : > { %vm3987_vm13 = vcmp.eq.s32.totalorder %v11537_v2, %v11536_v18  ;;  %v4028_v11 = vsel %vm3986_vm12, %v11538_v39, 0.0  ;;  %vm4070_vm14 = vcmp.eq.s32.totalorder %v11539_v56, %v11535_v63  ;;  %vm4071_vm15 = vcmp.eq.s32.totalorder %v11539_v56, %v11536_v18 }
 0x412   : > { %v3325_v58 = vadd.f32 %v3284_v51, %v3200_v60  ;;  %v4029_v43 = vsel %vm3987_vm13, %v11538_v39, 0.0  ;;  %v3326_v35 = vadd.f32 %v3285_v4, %v3201_v29  ;;  %v4112_v53 = vsel %vm4070_vm14, %v11540_v44, 0.0  ;;  %v11552_v60 = vld [vmem:[#allocation14_spill] sm:$0xff]  ;;  %v11553_v29 = vld [vmem:[#allocation52_spill] sm:$0xff] }
 0x413   : > { %vm4195_vm0 = vcmp.eq.s32.totalorder %v11541_v57, %v11535_v63  ;;  %v4113_v9 = vsel %vm4071_vm15, %v11540_v44, 0.0  ;;  %v4153_v17 = vadd.f32 %v4112_v53, %v4028_v11  ;;  %vm4196_vm1 = vcmp.eq.s32.totalorder %v11541_v57, %v11536_v18  ;;  %v11554_v11 = vld [vmem:[#allocation53_spill] sm:$0xff] }
 0x414   : > { %v4237_v45 = vsel %vm4195_vm0, %v11542_v16, 0.0  ;;  %v3357_v5 = vpack.c.bf16 %v3326_v35, %v3325_v58  ;;  %v4154_v7 = vadd.f32 %v4113_v9, %v4029_v43  ;;  %v4238_v6 = vsel %vm4196_vm1, %v11542_v16, 0.0  ;;  %v11555_v35 = vld [vmem:[#allocation54_spill] sm:$0xff] }
 0x415   : > { %vm4320_vm2 = vcmp.eq.s32.totalorder %v11543_v59, %v11535_v63  ;;  %v4278_v48 = vadd.f32 %v4237_v45, %v4153_v17  ;;  %vm4321_vm3 = vcmp.eq.s32.totalorder %v11543_v59, %v11536_v18  ;;  %vm4512_vm4 = vcmp.eq.s32.totalorder %v11551_v10, %v6229_v36  ;;  %v11556_v17 = vld [vmem:[#allocation55_spill] sm:$0xff]  ;;  %v11558_v18 = vld [vmem:[#allocation57_spill] sm:$0xff]  ;;  %v11559_v63 = vld [vmem:[#allocation58_spill] sm:$0xff] }
 0x416   : > { %v4362_v26 = vsel %vm4320_vm2, %v11544_v25, 0.0  ;;  %3404 = vmatpush.bf16.msra.mxu3 %v3357_v5  ;;  %v4279_v37 = vadd.f32 %v4238_v6, %v4154_v7  ;;  %v4363_v24 = vsel %vm4321_vm3, %v11544_v25, 0.0  ;;  %vm4513_vm5 = vcmp.eq.s32.totalorder %v11551_v10, %v11552_v60  ;;  %v11557_v7 = vld [vmem:[#allocation56_spill] sm:$0xff] }
 0x417   : > { %v4554_v51 = vsel %vm4512_vm4, %v11553_v29, 0.0  ;;  %v4403_v4 = vadd.f32 %v4362_v26, %v4278_v48  ;;  %v4555_v58 = vsel %vm4513_vm5, %v11553_v29, 0.0  ;;  %vm4596_vm8 = vcmp.eq.s32.totalorder %v11554_v11, %v6229_v36 }
 0x418   : > { %vm4597_vm9 = vcmp.eq.s32.totalorder %v11554_v11, %v11552_v60  ;;  %v4404_v43 = vadd.f32 %v4363_v24, %v4279_v37  ;;  %v4638_v53 = vsel %vm4596_vm8, %v11555_v35, 0.0  ;;  %vm4721_vm10 = vcmp.eq.s32.totalorder %v11556_v17, %v6229_v36 }
 0x419   : > { %v4639_v9 = vsel %vm4597_vm9, %v11555_v35, 0.0  ;;  %v4679_v45 = vadd.f32 %v4638_v53, %v4554_v51  ;;  %vm4722_vm11 = vcmp.eq.s32.totalorder %v11556_v17, %v11552_v60  ;;  %v4763_v6 = vsel %vm4721_vm10, %v11557_v7, 0.0 }
 0x41a   : > { %v4680_v5 = vadd.f32 %v4639_v9, %v4555_v58  ;;  %v4432_v48 = vpack.c.bf16 %v4404_v43, %v4403_v4  ;;  %v4764_v26 = vsel %vm4722_vm11, %v11557_v7, 0.0  ;;  %vm4846_vm12 = vcmp.eq.s32.totalorder %v11558_v18, %v6229_v36  ;;  %v497_v9 = vpop.f32.mrf.mxu1 }
 0x41b   : > { %vm4847_vm13 = vcmp.eq.s32.totalorder %v11558_v18, %v11552_v60  ;;  %v4804_v37 = vadd.f32 %v4763_v6, %v4679_v45  ;;  %v4888_v20 = vsel %vm4846_vm12, %v11559_v63, 0.0  ;;  %vm3998_vm14 = vcmp.eq.s32.totalorder %v11537_v2, %v7559_v19 }
 0x41c   : > { %v4805_v24 = vadd.f32 %v4764_v26, %v4680_v5  ;;  %v4889_v51 = vsel %vm4847_vm13, %v11559_v63, 0.0  ;;  %4473 = vmatpush.bf16.msrb.mxu2 %v4432_v48  ;;  %vm3999_vm15 = vcmp.eq.s32.totalorder %v11537_v2, %v7562_v12  ;;  %vm4082_vm0 = vcmp.eq.s32.totalorder %v11539_v56, %v7559_v19 }
 0x41d   : > { %vm4083_vm1 = vcmp.eq.s32.totalorder %v11539_v56, %v7562_v12  ;;  %v4929_v4 = vadd.f32 %v4888_v20, %v4804_v37  ;;  %v4040_v43 = vsel %vm3998_vm14, %v11538_v39, 0.0  ;;  %v4041_v53 = vsel %vm3999_vm15, %v11538_v39, 0.0  ;;  %v541_v37 = vpop.f32.mrf.mxu2 }
 0x41e   : > { %v4930_v58 = vadd.f32 %v4889_v51, %v4805_v24  ;;  %v4124_v45 = vsel %vm4082_vm0, %v11540_v44, 0.0  ;;  %v4125_v5 = vsel %vm4083_vm1, %v11540_v44, 0.0  ;;  %vm4207_vm2 = vcmp.eq.s32.totalorder %v11541_v57, %v7559_v19  ;;  %v11560_v51 = vld [vmem:[#allocation13_spill] sm:$0xff] }
 0x41f   : > { %vm4208_vm3 = vcmp.eq.s32.totalorder %v11541_v57, %v7562_v12  ;;  %v4165_v48 = vadd.f32 %v4124_v45, %v4040_v43  ;;  %v4166_v26 = vadd.f32 %v4125_v5, %v4041_v53  ;;  %v4249_v20 = vsel %vm4207_vm2, %v11542_v16, 0.0 }
 0x420   : > { %v4963_v6 = vpack.c.bf16 %v4930_v58, %v4929_v4  ;;  %v4250_v24 = vsel %vm4208_vm3, %v11542_v16, 0.0  ;;  %vm4332_vm4 = vcmp.eq.s32.totalorder %v11543_v59, %v7559_v19  ;;  %vm4333_vm5 = vcmp.eq.s32.totalorder %v11543_v59, %v7562_v12 }
 0x421   : > { %v563_v46 = vpack.c.bf16 %v497_v9, %v11560_v51  ;;  %v4290_v49 = vadd.f32 %v4249_v20, %v4165_v48  ;;  %v4291_v40 = vadd.f32 %v4250_v24, %v4166_v26  ;;  %v4374_v4 = vsel %vm4332_vm4, %v11544_v25, 0.0 }
 0x422   : > { %4993 = vmatpush.bf16.msrb.mxu1 %v4963_v6  ;;  %v4375_v58 = vsel %vm4333_vm5, %v11544_v25, 0.0  ;;  %v564_v45 = vpack.c.bf16 %v541_v37, %v541_v37  ;;  %vm2906_vm8 = vcmp.eq.s32.totalorder %v11497_v38, %v11549_v3  ;;  %vm2907_vm9 = vcmp.eq.s32.totalorder %v11497_v38, %v11550_v55 }
 0x423   : > { %v3907_v43 = vunpack.c.l.b16 %v563_v46  ;;  %v3908_v53 = vunpack.c.h.b16 %v563_v46  ;;  %v4415_v5 = vadd.f32 %v4374_v4, %v4290_v49  ;;  %v4416_v19 = vadd.f32 %v4375_v58, %v4291_v40 }
 0x424   : > { %v2948_v9 = vsel %vm2906_vm8, %v11500_v42, 0.0  ;;  %v3909_v26 = vunpack.c.l.b16 %v564_v45  ;;  %v2949_v20 = vsel %vm2907_vm9, %v11500_v42, 0.0  ;;  %vm2990_vm10 = vcmp.eq.s32.totalorder %v11499_v32, %v11549_v3 }
 0x425   : > { %v3910_v6 = vpack.c.b16 %v3907_v43, %v3907_v43  ;;  %v3911_v48 = vpack.c.b16 %v3908_v53, %v3908_v53  ;;  %v4438_v24 = vpack.c.bf16 %v4416_v19, %v4415_v5  ;;  %vm2991_vm11 = vcmp.eq.s32.totalorder %v11499_v32, %v11550_v55 }
 0x426   : > { %vm3115_vm12 = vcmp.eq.s32.totalorder %v11502_v14, %v11549_v3  ;;  %v3912_v40 = vpack.c.b16 %v3909_v26, %v3909_v26  ;;  %v3032_v38 = vsel %vm2990_vm10, %v11501_v41, 0.0  ;;  %v3033_v49 = vsel %vm2991_vm11, %v11501_v41, 0.0 }
 0x427   : > { %vm3116_vm13 = vcmp.eq.s32.totalorder %v11502_v14, %v11550_v55  ;;  %3929 = vmatmul.bf16.vlgmr.msra.gmra.mxu2 %v3910_v6  ;;  %3942 = vmatmul.bf16.vlgmr.msra.gmra.mxu1 %v3911_v48  ;;  %v3073_v19 = vadd.f32 %v3032_v38, %v2948_v9  ;;  %v3074_v42 = vadd.f32 %v3033_v49, %v2949_v20  ;;  %v3157_v46 = vsel %vm3115_vm12, %v11503_v33, 0.0  ;;  %v11562_v38 = vld [vmem:[#allocation69_spill] sm:$0xff] }
 0x428   : > { %4488 = vmatpush.bf16.msra.mxu0 %v4438_v24  ;;  %v3158_v32 = vsel %vm3116_vm13, %v11503_v33, 0.0  ;;  %vm3240_vm14 = vcmp.eq.s32.totalorder %v11504_v15, %v11549_v3  ;;  %vm3241_vm15 = vcmp.eq.s32.totalorder %v11504_v15, %v11550_v55  ;;  %vm3984_vm0 = vcmp.eq.s32.totalorder %v11537_v2, %v11478_v54 }
 0x429   : > { %vm3985_vm1 = vcmp.eq.s32.totalorder %v11537_v2, %v11507_v23  ;;  %5743 = vmatmul.msk.bf16.vlgmr.msrb.gmra.mxu0 %vm1715_vm6, %v3912_v40  ;;  %v3198_v41 = vadd.f32 %v3157_v46, %v3073_v19  ;;  %v3199_v14 = vadd.f32 %v3158_v32, %v3074_v42  ;;  %v3282_v37 = vsel %vm3240_vm14, %v11506_v47, 0.0  ;;  %v11561_v40 = vld [vmem:[#allocation68_spill] sm:$0xff] }
 0x42a   : > { %v3283_v33 = vsel %vm3241_vm15, %v11506_v47, 0.0  ;;  %v4026_v51 = vsel %vm3984_vm0, %v11538_v39, 0.0  ;;  %v4027_v4 = vsel %vm3985_vm1, %v11538_v39, 0.0  ;;  %vm4068_vm2 = vcmp.eq.s32.totalorder %v11539_v56, %v11478_v54 }
 0x42b   : > { %vm4069_vm3 = vcmp.eq.s32.totalorder %v11539_v56, %v11507_v23  ;;  %v3323_v15 = vadd.f32 %v3282_v37, %v3198_v41  ;;  %v3324_v58 = vadd.f32 %v3283_v33, %v3199_v14  ;;  %v4110_v43 = vsel %vm4068_vm2, %v11540_v44, 0.0 }
 0x42c   : > { %v4111_v53 = vsel %vm4069_vm3, %v11540_v44, 0.0  ;;  %v4151_v45 = vadd.f32 %v4110_v43, %v4026_v51  ;;  %vm4193_vm4 = vcmp.eq.s32.totalorder %v11541_v57, %v11478_v54  ;;  %vm4194_vm5 = vcmp.eq.s32.totalorder %v11541_v57, %v11507_v23 }
 0x42d   : > { %v4152_v5 = vadd.f32 %v4111_v53, %v4027_v4  ;;  %v3356_v47 = vpack.c.bf16 %v3324_v58, %v3323_v15  ;;  %v4235_v9 = vsel %vm4193_vm4, %v11542_v16, 0.0  ;;  %v4236_v6 = vsel %vm4194_vm5, %v11542_v16, 0.0 }
 0x42e   : > { %vm4318_vm8 = vcmp.eq.s32.totalorder %v11543_v59, %v11478_v54  ;;  %v4276_v48 = vadd.f32 %v4235_v9, %v4151_v45  ;;  %vm4319_vm9 = vcmp.eq.s32.totalorder %v11543_v59, %v11507_v23  ;;  %vm4510_vm10 = vcmp.eq.s32.totalorder %v11551_v10, %v11561_v40 }
 0x42f   : > { %v4277_v26 = vadd.f32 %v4236_v6, %v4152_v5  ;;  %v4360_v20 = vsel %vm4318_vm8, %v11544_v25, 0.0  ;;  %3405 = vmatpush.bf16.msra.mxu3 %v3356_v47  ;;  %v4361_v24 = vsel %vm4319_vm9, %v11544_v25, 0.0  ;;  %vm4511_vm11 = vcmp.eq.s32.totalorder %v11551_v10, %v11562_v38 }
 0x430   : > { %vm4594_vm12 = vcmp.eq.s32.totalorder %v11554_v11, %v11561_v40  ;;  %v4401_v49 = vadd.f32 %v4360_v20, %v4276_v48  ;;  %v4552_v42 = vsel %vm4510_vm10, %v11553_v29, 0.0  ;;  %v4553_v46 = vsel %vm4511_vm11, %v11553_v29, 0.0 }
 0x431   : > { %v4402_v19 = vadd.f32 %v4361_v24, %v4277_v26  ;;  %vm4595_vm13 = vcmp.eq.s32.totalorder %v11554_v11, %v11562_v38  ;;  %v4636_v32 = vsel %vm4594_vm12, %v11555_v35, 0.0  ;;  %vm4719_vm14 = vcmp.eq.s32.totalorder %v11556_v17, %v11561_v40 }
 0x432   : > { %vm4720_vm15 = vcmp.eq.s32.totalorder %v11556_v17, %v11562_v38  ;;  %v4637_v14 = vsel %vm4595_vm13, %v11555_v35, 0.0  ;;  %v4677_v37 = vadd.f32 %v4636_v32, %v4552_v42  ;;  %v4761_v33 = vsel %vm4719_vm14, %v11557_v7, 0.0  ;;  %3406 = vmatmul.bf16.vlgmr.msra.gmra.mxu3 %v9492_v62 }
 0x433   : > { %v4431_v41 = vpack.c.bf16 %v4402_v19, %v4401_v49  ;;  %v4678_v51 = vadd.f32 %v4637_v14, %v4553_v46  ;;  %v4762_v4 = vsel %vm4720_vm15, %v11557_v7, 0.0  ;;  %vm4844_vm0 = vcmp.eq.s32.totalorder %v11558_v18, %v11561_v40 }
 0x434   : > { %vm4845_vm1 = vcmp.eq.s32.totalorder %v11558_v18, %v11562_v38  ;;  %v4802_v15 = vadd.f32 %v4761_v33, %v4677_v37  ;;  %v4886_v58 = vsel %vm4844_vm0, %v11559_v63, 0.0  ;;  %vm3976_vm2 = vcmp.eq.s32.totalorder %v11537_v2, %v6229_v36 }
 0x435   : > { %4474 = vmatpush.bf16.msrb.mxu2 %v4431_v41  ;;  %v4887_v43 = vsel %vm4845_vm1, %v11559_v63, 0.0  ;;  %v4803_v53 = vadd.f32 %v4762_v4, %v4678_v51  ;;  %vm3977_vm3 = vcmp.eq.s32.totalorder %v11537_v2, %v11552_v60  ;;  %v4018_v62 = vsel %vm3976_vm2, %v11538_v39, 0.0 }
 0x436   : > { %vm4060_vm4 = vcmp.eq.s32.totalorder %v11539_v56, %v6229_v36  ;;  %v4927_v45 = vadd.f32 %v4886_v58, %v4802_v15  ;;  %v4019_v5 = vsel %vm3977_vm3, %v11538_v39, 0.0  ;;  %vm4061_vm5 = vcmp.eq.s32.totalorder %v11539_v56, %v11552_v60 }
 0x437   : > { %v4102_v47 = vsel %vm4060_vm4, %v11540_v44, 0.0  ;;  %v4928_v9 = vadd.f32 %v4887_v43, %v4803_v53  ;;  %v4103_v6 = vsel %vm4061_vm5, %v11540_v44, 0.0  ;;  %vm4185_vm8 = vcmp.eq.s32.totalorder %v11541_v57, %v6229_v36 }
 0x438   : > { %v4143_v48 = vadd.f32 %v4102_v47, %v4018_v62  ;;  %v4144_v26 = vadd.f32 %v4103_v6, %v4019_v5  ;;  %vm4186_vm9 = vcmp.eq.s32.totalorder %v11541_v57, %v11552_v60  ;;  %v4227_v20 = vsel %vm4185_vm8, %v11542_v16, 0.0 }
 0x439   : > { %vm4310_vm10 = vcmp.eq.s32.totalorder %v11543_v59, %v6229_v36  ;;  %v4962_v24 = vpack.c.bf16 %v4928_v9, %v4927_v45  ;;  %v4228_v49 = vsel %vm4186_vm9, %v11542_v16, 0.0  ;;  %vm4311_vm11 = vcmp.eq.s32.totalorder %v11543_v59, %v11552_v60 }
 0x43a   : > { %v4268_v19 = vadd.f32 %v4227_v20, %v4143_v48  ;;  %v4269_v42 = vadd.f32 %v4228_v49, %v4144_v26  ;;  %v4352_v46 = vsel %vm4310_vm10, %v11544_v25, 0.0  ;;  %v4353_v32 = vsel %vm4311_vm11, %v11544_v25, 0.0 }
 0x43b   : > { %vm3996_vm12 = vcmp.eq.s32.totalorder %v11537_v2, %v7661_v61  ;;  %4994 = vmatpush.bf16.msrb.mxu1 %v4962_v24  ;;  %vm3997_vm13 = vcmp.eq.s32.totalorder %v11537_v2, %v7666_v28  ;;  %vm4080_vm14 = vcmp.eq.s32.totalorder %v11539_v56, %v7661_v61  ;;  %vm4081_vm15 = vcmp.eq.s32.totalorder %v11539_v56, %v7666_v28 }
 0x43c   : > { %v4393_v41 = vadd.f32 %v4352_v46, %v4268_v19  ;;  %v4038_v14 = vsel %vm3996_vm12, %v11538_v39, 0.0  ;;  %v4394_v37 = vadd.f32 %v4353_v32, %v4269_v42  ;;  %v4039_v33 = vsel %vm3997_vm13, %v11538_v39, 0.0 }
 0x43d   : > { %v4122_v51 = vsel %vm4080_vm14, %v11540_v44, 0.0  ;;  %v4123_v4 = vsel %vm4081_vm15, %v11540_v44, 0.0  ;;  %vm4205_vm0 = vcmp.eq.s32.totalorder %v11541_v57, %v7661_v61  ;;  %vm4206_vm1 = vcmp.eq.s32.totalorder %v11541_v57, %v7666_v28 }
 0x43e   : > { %v4163_v15 = vadd.f32 %v4122_v51, %v4038_v14  ;;  %v4427_v58 = vpack.c.bf16 %v4394_v37, %v4393_v41  ;;  %v4164_v43 = vadd.f32 %v4123_v4, %v4039_v33  ;;  %v4247_v53 = vsel %vm4205_vm0, %v11542_v16, 0.0  ;;  %v11563_v33 = vld [vmem:[#allocation72_spill] sm:$0xff] }
 0x43f   : > { %v4248_v62 = vsel %vm4206_vm1, %v11542_v16, 0.0  ;;  %vm4330_vm2 = vcmp.eq.s32.totalorder %v11543_v59, %v7661_v61  ;;  %vm4331_vm3 = vcmp.eq.s32.totalorder %v11543_v59, %v7666_v28  ;;  %vm3982_vm4 = vcmp.eq.s32.totalorder %v11537_v2, %v11491_v21 }
 0x440   : > { %v4288_v45 = vadd.f32 %v4247_v53, %v4163_v15  ;;  %4457 = vmatpush.bf16.msrb.mxu3 %v4427_v58  ;;  %v4289_v5 = vadd.f32 %v4248_v62, %v4164_v43  ;;  %v4372_v47 = vsel %vm4330_vm2, %v11544_v25, 0.0  ;;  %v4373_v9 = vsel %vm4331_vm3, %v11544_v25, 0.0  ;;  %v11564_v15 = vld [vmem:[#allocation73_spill] sm:$0xff] }
 0x441   : > { %vm3983_vm5 = vcmp.eq.s32.totalorder %v11537_v2, %v11545_v8  ;;  %v4024_v48 = vsel %vm3982_vm4, %v11538_v39, 0.0  ;;  %vm4066_vm8 = vcmp.eq.s32.totalorder %v11539_v56, %v11491_v21  ;;  %vm4067_vm9 = vcmp.eq.s32.totalorder %v11539_v56, %v11545_v8 }
 0x442   : > { %v4413_v6 = vadd.f32 %v4372_v47, %v4288_v45  ;;  %v4025_v26 = vsel %vm3983_vm5, %v11538_v39, 0.0  ;;  %v4414_v20 = vadd.f32 %v4373_v9, %v4289_v5  ;;  %v4108_v24 = vsel %vm4066_vm8, %v11540_v44, 0.0 }
 0x443   : > { %vm4191_vm10 = vcmp.eq.s32.totalorder %v11541_v57, %v11491_v21  ;;  %v4109_v49 = vsel %vm4067_vm9, %v11540_v44, 0.0  ;;  %v4149_v19 = vadd.f32 %v4108_v24, %v4024_v48  ;;  %vm4192_vm11 = vcmp.eq.s32.totalorder %v11541_v57, %v11545_v8 }
 0x444   : > { %v4233_v42 = vsel %vm4191_vm10, %v11542_v16, 0.0  ;;  %v4437_v46 = vpack.c.bf16 %v4414_v20, %v4413_v6  ;;  %v4150_v32 = vadd.f32 %v4109_v49, %v4025_v26  ;;  %v4234_v41 = vsel %vm4192_vm11, %v11542_v16, 0.0 }
 0x445   : > { %vm4316_vm12 = vcmp.eq.s32.totalorder %v11543_v59, %v11491_v21  ;;  %v4274_v14 = vadd.f32 %v4233_v42, %v4149_v19  ;;  %vm4317_vm13 = vcmp.eq.s32.totalorder %v11543_v59, %v11545_v8  ;;  %vm4508_vm14 = vcmp.eq.s32.totalorder %v11551_v10, %v11563_v33 }
 0x446   : > { %v4358_v37 = vsel %vm4316_vm12, %v11544_v25, 0.0  ;;  %4489 = vmatpush.bf16.msra.mxu0 %v4437_v46  ;;  %v4275_v51 = vadd.f32 %v4234_v41, %v4150_v32  ;;  %v4359_v4 = vsel %vm4317_vm13, %v11544_v25, 0.0  ;;  %vm4509_vm15 = vcmp.eq.s32.totalorder %v11551_v10, %v11564_v15 }
 0x447   : > { %v4550_v58 = vsel %vm4508_vm14, %v11553_v29, 0.0  ;;  %v4399_v43 = vadd.f32 %v4358_v37, %v4274_v14  ;;  %v4551_v53 = vsel %vm4509_vm15, %v11553_v29, 0.0  ;;  %vm4592_vm0 = vcmp.eq.s32.totalorder %v11554_v11, %v11563_v33 }
 0x448   : > { %vm4593_vm1 = vcmp.eq.s32.totalorder %v11554_v11, %v11564_v15  ;;  %v4400_v62 = vadd.f32 %v4359_v4, %v4275_v51  ;;  %v4634_v45 = vsel %vm4592_vm0, %v11555_v35, 0.0  ;;  %vm4717_vm2 = vcmp.eq.s32.totalorder %v11556_v17, %v11563_v33 }
 0x449   : > { %v4635_v5 = vsel %vm4593_vm1, %v11555_v35, 0.0  ;;  %v4675_v47 = vadd.f32 %v4634_v45, %v4550_v58  ;;  %vm4718_vm3 = vcmp.eq.s32.totalorder %v11556_v17, %v11564_v15  ;;  %v4759_v6 = vsel %vm4717_vm2, %v11557_v7, 0.0 }
 0x44a   : > { %v4676_v9 = vadd.f32 %v4635_v5, %v4551_v53  ;;  %v4430_v48 = vpack.c.bf16 %v4400_v62, %v4399_v43  ;;  %v4760_v26 = vsel %vm4718_vm3, %v11557_v7, 0.0  ;;  %vm4842_vm4 = vcmp.eq.s32.totalorder %v11558_v18, %v11563_v33 }
 0x44b   : > { %vm4843_vm5 = vcmp.eq.s32.totalorder %v11558_v18, %v11564_v15  ;;  %v4800_v20 = vadd.f32 %v4759_v6, %v4675_v47  ;;  %v4884_v49 = vsel %vm4842_vm4, %v11559_v63, 0.0  ;;  %vm3974_vm8 = vcmp.eq.s32.totalorder %v11537_v2, %v11561_v40 }
 0x44c   : > { %v4801_v24 = vadd.f32 %v4760_v26, %v4676_v9  ;;  %v4885_v19 = vsel %vm4843_vm5, %v11559_v63, 0.0  ;;  %4475 = vmatpush.bf16.msrb.mxu2 %v4430_v48  ;;  %vm3975_vm9 = vcmp.eq.s32.totalorder %v11537_v2, %v11562_v38  ;;  %vm4058_vm10 = vcmp.eq.s32.totalorder %v11539_v56, %v11561_v40 }
 0x44d   : > { %vm4059_vm11 = vcmp.eq.s32.totalorder %v11539_v56, %v11562_v38  ;;  %v4925_v42 = vadd.f32 %v4884_v49, %v4800_v20  ;;  %v4016_v32 = vsel %vm3974_vm8, %v11538_v39, 0.0  ;;  %v4017_v41 = vsel %vm3975_vm9, %v11538_v39, 0.0 }
 0x44e   : > { %v4926_v46 = vadd.f32 %v4885_v19, %v4801_v24  ;;  %v4100_v14 = vsel %vm4058_vm10, %v11540_v44, 0.0  ;;  %v4101_v37 = vsel %vm4059_vm11, %v11540_v44, 0.0  ;;  %vm4183_vm12 = vcmp.eq.s32.totalorder %v11541_v57, %v11561_v40 }
 0x44f   : > { %vm4184_vm13 = vcmp.eq.s32.totalorder %v11541_v57, %v11562_v38  ;;  %v4141_v4 = vadd.f32 %v4100_v14, %v4016_v32  ;;  %v4142_v58 = vadd.f32 %v4101_v37, %v4017_v41  ;;  %v4225_v43 = vsel %vm4183_vm12, %v11542_v16, 0.0 }
 0x450   : > { %v4961_v51 = vpack.c.bf16 %v4926_v46, %v4925_v42  ;;  %v4226_v53 = vsel %vm4184_vm13, %v11542_v16, 0.0  ;;  %vm4308_vm14 = vcmp.eq.s32.totalorder %v11543_v59, %v11561_v40  ;;  %vm4309_vm15 = vcmp.eq.s32.totalorder %v11543_v59, %v11562_v38 }
 0x451   : > { %vm3994_vm0 = vcmp.eq.s32.totalorder %v11537_v2, %v7770_v0  ;;  %v4266_v62 = vadd.f32 %v4225_v43, %v4141_v4  ;;  %v4267_v45 = vadd.f32 %v4226_v53, %v4142_v58  ;;  %v4350_v5 = vsel %vm4308_vm14, %v11544_v25, 0.0 }
 0x452   : > { %4995 = vmatpush.bf16.msrb.mxu1 %v4961_v51  ;;  %v4351_v47 = vsel %vm4309_vm15, %v11544_v25, 0.0  ;;  %vm3995_vm1 = vcmp.eq.s32.totalorder %v11537_v2, %v7773_v50  ;;  %v4036_v9 = vsel %vm3994_vm0, %v11538_v39, 0.0  ;;  %vm4078_vm2 = vcmp.eq.s32.totalorder %v11539_v56, %v7770_v0 }
 0x453   : > { %vm4079_vm3 = vcmp.eq.s32.totalorder %v11539_v56, %v7773_v50  ;;  %v4391_v6 = vadd.f32 %v4350_v5, %v4266_v62  ;;  %v4392_v48 = vadd.f32 %v4351_v47, %v4267_v45  ;;  %v4037_v26 = vsel %vm3995_vm1, %v11538_v39, 0.0 }
 0x454   : > { %v4120_v20 = vsel %vm4078_vm2, %v11540_v44, 0.0  ;;  %v4121_v24 = vsel %vm4079_vm3, %v11540_v44, 0.0  ;;  %vm4203_vm4 = vcmp.eq.s32.totalorder %v11541_v57, %v7770_v0  ;;  %vm4204_vm5 = vcmp.eq.s32.totalorder %v11541_v57, %v7773_v50 }
 0x455   : > { %v4161_v49 = vadd.f32 %v4120_v20, %v4036_v9  ;;  %v4426_v19 = vpack.c.bf16 %v4392_v48, %v4391_v6  ;;  %v4162_v42 = vadd.f32 %v4121_v24, %v4037_v26  ;;  %v4245_v46 = vsel %vm4203_vm4, %v11542_v16, 0.0 }
 0x456   : > { %v4246_v32 = vsel %vm4204_vm5, %v11542_v16, 0.0  ;;  %vm4328_vm8 = vcmp.eq.s32.totalorder %v11543_v59, %v7770_v0  ;;  %vm4329_vm9 = vcmp.eq.s32.totalorder %v11543_v59, %v7773_v50  ;;  %vm4538_vm10 = vcmp.eq.s32.totalorder %v11551_v10, %v7364_v52 }
 0x457   : > { %v4286_v41 = vadd.f32 %v4245_v46, %v4161_v49  ;;  %4458 = vmatpush.bf16.msrb.mxu3 %v4426_v19  ;;  %v4287_v14 = vadd.f32 %v4246_v32, %v4162_v42  ;;  %v4370_v37 = vsel %vm4328_vm8, %v11544_v25, 0.0  ;;  %v4371_v51 = vsel %vm4329_vm9, %v11544_v25, 0.0 }
 0x458   : > { %v4580_v4 = vsel %vm4538_vm10, %v11553_v29, 0.0  ;;  %vm4622_vm11 = vcmp.eq.s32.totalorder %v11554_v11, %v7364_v52  ;;  %vm4747_vm12 = vcmp.eq.s32.totalorder %v11556_v17, %v7364_v52  ;;  %vm4872_vm13 = vcmp.eq.s32.totalorder %v11558_v18, %v7364_v52 }
 0x459   : > { %v4411_v58 = vadd.f32 %v4370_v37, %v4286_v41  ;;  %v4412_v43 = vadd.f32 %v4371_v51, %v4287_v14  ;;  %v4664_v53 = vsel %vm4622_vm11, %v11555_v35, 0.0  ;;  %v4789_v62 = vsel %vm4747_vm12, %v11557_v7, 0.0 }
 0x45a   : > { %v4914_v45 = vsel %vm4872_vm13, %v11559_v63, 0.0  ;;  %v4705_v5 = vadd.f32 %v4664_v53, %v4580_v4  ;;  %vm3980_vm14 = vcmp.eq.s32.totalorder %v11537_v2, %v11547_v31  ;;  %vm3981_vm15 = vcmp.eq.s32.totalorder %v11537_v2, %v11548_v27 }
 0x45b   : > { %vm4064_vm0 = vcmp.eq.s32.totalorder %v11539_v56, %v11547_v31  ;;  %v4436_v47 = vpack.c.bf16 %v4412_v43, %v4411_v58  ;;  %v4022_v9 = vsel %vm3980_vm14, %v11538_v39, 0.0  ;;  %v4023_v6 = vsel %vm3981_vm15, %v11538_v39, 0.0 }
 0x45c   : > { %vm4065_vm1 = vcmp.eq.s32.totalorder %v11539_v56, %v11548_v27  ;;  %v4830_v48 = vadd.f32 %v4789_v62, %v4705_v5  ;;  %v4106_v26 = vsel %vm4064_vm0, %v11540_v44, 0.0  ;;  %vm4189_vm2 = vcmp.eq.s32.totalorder %v11541_v57, %v11547_v31 }
 0x45d   : > { %v4107_v20 = vsel %vm4065_vm1, %v11540_v44, 0.0  ;;  %4490 = vmatpush.bf16.msra.mxu0 %v4436_v47  ;;  %v4147_v24 = vadd.f32 %v4106_v26, %v4022_v9  ;;  %vm4190_vm3 = vcmp.eq.s32.totalorder %v11541_v57, %v11548_v27  ;;  %v4231_v19 = vsel %vm4189_vm2, %v11542_v16, 0.0 }
 0x45e   : > { %v4148_v49 = vadd.f32 %v4107_v20, %v4023_v6  ;;  %v4955_v42 = vadd.f32 %v4914_v45, %v4830_v48  ;;  %v4232_v46 = vsel %vm4190_vm3, %v11542_v16, 0.0  ;;  %vm4314_vm4 = vcmp.eq.s32.totalorder %v11543_v59, %v11547_v31 }
 0x45f   : > { %vm4315_vm5 = vcmp.eq.s32.totalorder %v11543_v59, %v11548_v27  ;;  %v4272_v32 = vadd.f32 %v4231_v19, %v4147_v24  ;;  %v4356_v14 = vsel %vm4314_vm4, %v11544_v25, 0.0  ;;  %vm4506_vm8 = vcmp.eq.s32.totalorder %v11551_v10, %v11514_v1 }
 0x460   : > { %v4273_v41 = vadd.f32 %v4232_v46, %v4148_v49  ;;  %v4357_v37 = vsel %vm4315_vm5, %v11544_v25, 0.0  ;;  %v4976_v51 = vpack.c.bf16 %v4955_v42, %v4955_v42  ;;  %vm4507_vm9 = vcmp.eq.s32.totalorder %v11551_v10, %v11515_v13 }
 0x461   : > { %vm4590_vm10 = vcmp.eq.s32.totalorder %v11554_v11, %v11514_v1  ;;  %v4397_v4 = vadd.f32 %v4356_v14, %v4272_v32  ;;  %v4548_v43 = vsel %vm4506_vm8, %v11553_v29, 0.0  ;;  %v4549_v53 = vsel %vm4507_vm9, %v11553_v29, 0.0 }
 0x462   : > { %v4398_v58 = vadd.f32 %v4357_v37, %v4273_v41  ;;  %v4991_v62 = vsel %vm1719_vm7, %v4976_v51, 0  ;;  %vm4591_vm11 = vcmp.eq.s32.totalorder %v11554_v11, %v11515_v13  ;;  %v4632_v45 = vsel %vm4590_vm10, %v11555_v35, 0.0 }
 0x463   : > { %vm4715_vm12 = vcmp.eq.s32.totalorder %v11556_v17, %v11514_v1  ;;  %5022 = vmatpush.bf16.msrb.mxu0 %v4991_v62  ;;  %v4633_v47 = vsel %vm4591_vm11, %v11555_v35, 0.0  ;;  %v4673_v9 = vadd.f32 %v4632_v45, %v4548_v43  ;;  %vm4716_vm13 = vcmp.eq.s32.totalorder %v11556_v17, %v11515_v13 }
 0x464   : > { %v4429_v5 = vpack.c.bf16 %v4398_v58, %v4397_v4  ;;  %v4674_v6 = vadd.f32 %v4633_v47, %v4549_v53  ;;  %v4757_v48 = vsel %vm4715_vm12, %v11557_v7, 0.0  ;;  %v4758_v26 = vsel %vm4716_vm13, %v11557_v7, 0.0 }
 0x465   : > { %vm4840_vm14 = vcmp.eq.s32.totalorder %v11558_v18, %v11514_v1  ;;  %v4798_v20 = vadd.f32 %v4757_v48, %v4673_v9  ;;  %vm4841_vm15 = vcmp.eq.s32.totalorder %v11558_v18, %v11515_v13  ;;  %vm3972_vm0 = vcmp.eq.s32.totalorder %v11537_v2, %v11563_v33 }
 0x466   : > { %4476 = vmatpush.bf16.msrb.mxu2 %v4429_v5  ;;  %v4882_v24 = vsel %vm4840_vm14, %v11559_v63, 0.0  ;;  %v4799_v49 = vadd.f32 %v4758_v26, %v4674_v6  ;;  %v4883_v19 = vsel %vm4841_vm15, %v11559_v63, 0.0  ;;  %vm3973_vm1 = vcmp.eq.s32.totalorder %v11537_v2, %v11564_v15 }
 0x467   : > { %v4014_v42 = vsel %vm3972_vm0, %v11538_v39, 0.0  ;;  %v4923_v46 = vadd.f32 %v4882_v24, %v4798_v20  ;;  %v4015_v32 = vsel %vm3973_vm1, %v11538_v39, 0.0  ;;  %vm4056_vm2 = vcmp.eq.s32.totalorder %v11539_v56, %v11563_v33 }
 0x468   : > { %vm4057_vm3 = vcmp.eq.s32.totalorder %v11539_v56, %v11564_v15  ;;  %v4924_v41 = vadd.f32 %v4883_v19, %v4799_v49  ;;  %v4098_v14 = vsel %vm4056_vm2, %v11540_v44, 0.0  ;;  %vm4181_vm4 = vcmp.eq.s32.totalorder %v11541_v57, %v11563_v33 }
 0x469   : > { %v4099_v37 = vsel %vm4057_vm3, %v11540_v44, 0.0  ;;  %v4139_v51 = vadd.f32 %v4098_v14, %v4014_v42  ;;  %vm4182_vm5 = vcmp.eq.s32.totalorder %v11541_v57, %v11564_v15  ;;  %v4223_v58 = vsel %vm4181_vm4, %v11542_v16, 0.0 }
 0x46a   : > { %v4140_v4 = vadd.f32 %v4099_v37, %v4015_v32  ;;  %v4960_v43 = vpack.c.bf16 %v4924_v41, %v4923_v46  ;;  %v4224_v53 = vsel %vm4182_vm5, %v11542_v16, 0.0  ;;  %vm4306_vm8 = vcmp.eq.s32.totalorder %v11543_v59, %v11563_v33 }
 0x46b   : > { %vm4307_vm9 = vcmp.eq.s32.totalorder %v11543_v59, %v11564_v15  ;;  %v4264_v62 = vadd.f32 %v4223_v58, %v4139_v51  ;;  %v4348_v5 = vsel %vm4306_vm8, %v11544_v25, 0.0  ;;  %vm4536_vm10 = vcmp.eq.s32.totalorder %v11551_v10, %v7443_v34 }
 0x46c   : > { %v4265_v45 = vadd.f32 %v4224_v53, %v4140_v4  ;;  %v4349_v47 = vsel %vm4307_vm9, %v11544_v25, 0.0  ;;  %4996 = vmatpush.bf16.msrb.mxu1 %v4960_v43  ;;  %vm4537_vm11 = vcmp.eq.s32.totalorder %v11551_v10, %v7446_v30  ;;  %vm4620_vm12 = vcmp.eq.s32.totalorder %v11554_v11, %v7443_v34 }
 0x46d   : > { %vm4621_vm13 = vcmp.eq.s32.totalorder %v11554_v11, %v7446_v30  ;;  %v4389_v9 = vadd.f32 %v4348_v5, %v4264_v62  ;;  %v4578_v48 = vsel %vm4536_vm10, %v11553_v29, 0.0  ;;  %v4579_v26 = vsel %vm4537_vm11, %v11553_v29, 0.0 }
 0x46e   : > { %v4390_v6 = vadd.f32 %v4349_v47, %v4265_v45  ;;  %v4662_v20 = vsel %vm4620_vm12, %v11555_v35, 0.0  ;;  %v4663_v24 = vsel %vm4621_vm13, %v11555_v35, 0.0  ;;  %vm4745_vm14 = vcmp.eq.s32.totalorder %v11556_v17, %v7443_v34 }
 0x46f   : > { %vm4746_vm15 = vcmp.eq.s32.totalorder %v11556_v17, %v7446_v30  ;;  %v4703_v19 = vadd.f32 %v4662_v20, %v4578_v48  ;;  %v4704_v42 = vadd.f32 %v4663_v24, %v4579_v26  ;;  %v4787_v46 = vsel %vm4745_vm14, %v11557_v7, 0.0 }
 0x470   : > { %v4425_v49 = vpack.c.bf16 %v4390_v6, %v4389_v9  ;;  %v4788_v32 = vsel %vm4746_vm15, %v11557_v7, 0.0  ;;  %vm4870_vm0 = vcmp.eq.s32.totalorder %v11558_v18, %v7443_v34  ;;  %vm4871_vm1 = vcmp.eq.s32.totalorder %v11558_v18, %v7446_v30 }
 0x471   : > { %vm3978_vm2 = vcmp.eq.s32.totalorder %v11537_v2, %v11549_v3  ;;  %v4828_v41 = vadd.f32 %v4787_v46, %v4703_v19  ;;  %v4829_v14 = vadd.f32 %v4788_v32, %v4704_v42  ;;  %v4912_v37 = vsel %vm4870_vm0, %v11559_v63, 0.0  ;;  %v11565_v19 = vld [vmem:[#allocation81_spill] sm:$0xff] }
 0x472   : > { %4459 = vmatpush.bf16.msrb.mxu3 %v4425_v49  ;;  %v4913_v51 = vsel %vm4871_vm1, %v11559_v63, 0.0  ;;  %vm3979_vm3 = vcmp.eq.s32.totalorder %v11537_v2, %v11550_v55  ;;  %v4020_v4 = vsel %vm3978_vm2, %v11538_v39, 0.0  ;;  %vm4062_vm4 = vcmp.eq.s32.totalorder %v11539_v56, %v11549_v3 }
 0x473   : > { %vm4063_vm5 = vcmp.eq.s32.totalorder %v11539_v56, %v11550_v55  ;;  %v4953_v58 = vadd.f32 %v4912_v37, %v4828_v41  ;;  %v4954_v43 = vadd.f32 %v4913_v51, %v4829_v14  ;;  %v4021_v53 = vsel %vm3979_vm3, %v11538_v39, 0.0 }
 0x474   : > { %v4104_v62 = vsel %vm4062_vm4, %v11540_v44, 0.0  ;;  %v4105_v45 = vsel %vm4063_vm5, %v11540_v44, 0.0  ;;  %vm4187_vm8 = vcmp.eq.s32.totalorder %v11541_v57, %v11549_v3  ;;  %vm4188_vm9 = vcmp.eq.s32.totalorder %v11541_v57, %v11550_v55 }
 0x475   : > { %v4145_v5 = vadd.f32 %v4104_v62, %v4020_v4  ;;  %v4975_v47 = vpack.c.bf16 %v4954_v43, %v4953_v58  ;;  %v4146_v9 = vadd.f32 %v4105_v45, %v4021_v53  ;;  %v4229_v6 = vsel %vm4187_vm8, %v11542_v16, 0.0 }
 0x476   : > { %v4230_v48 = vsel %vm4188_vm9, %v11542_v16, 0.0  ;;  %vm4312_vm10 = vcmp.eq.s32.totalorder %v11543_v59, %v11549_v3  ;;  %vm4313_vm11 = vcmp.eq.s32.totalorder %v11543_v59, %v11550_v55  ;;  %vm4504_vm12 = vcmp.eq.s32.totalorder %v11551_v10, %v11516_v22 }
 0x477   : > { %v4270_v26 = vadd.f32 %v4229_v6, %v4145_v5  ;;  %5023 = vmatpush.bf16.msrb.mxu0 %v4975_v47  ;;  %v4271_v20 = vadd.f32 %v4230_v48, %v4146_v9  ;;  %v4354_v24 = vsel %vm4312_vm10, %v11544_v25, 0.0  ;;  %v4355_v49 = vsel %vm4313_vm11, %v11544_v25, 0.0 }
 0x478   : > { %vm4505_vm13 = vcmp.eq.s32.totalorder %v11551_v10, %v11565_v19  ;;  %v4546_v46 = vsel %vm4504_vm12, %v11553_v29, 0.0  ;;  %vm4588_vm14 = vcmp.eq.s32.totalorder %v11554_v11, %v11516_v22  ;;  %vm4589_vm15 = vcmp.eq.s32.totalorder %v11554_v11, %v11565_v19 }
 0x479   : > { %v4395_v42 = vadd.f32 %v4354_v24, %v4270_v26  ;;  %v4547_v32 = vsel %vm4505_vm13, %v11553_v29, 0.0  ;;  %v4396_v41 = vadd.f32 %v4355_v49, %v4271_v20  ;;  %v4630_v14 = vsel %vm4588_vm14, %v11555_v35, 0.0 }
 0x47a   : > { %vm4713_vm0 = vcmp.eq.s32.totalorder %v11556_v17, %v11516_v22  ;;  %v4631_v37 = vsel %vm4589_vm15, %v11555_v35, 0.0  ;;  %v4671_v51 = vadd.f32 %v4630_v14, %v4546_v46  ;;  %vm4714_vm1 = vcmp.eq.s32.totalorder %v11556_v17, %v11565_v19 }
 0x47b   : > { %v4755_v4 = vsel %vm4713_vm0, %v11557_v7, 0.0  ;;  %v4428_v58 = vpack.c.bf16 %v4396_v41, %v4395_v42  ;;  %v4672_v43 = vadd.f32 %v4631_v37, %v4547_v32  ;;  %v4756_v53 = vsel %vm4714_vm1, %v11557_v7, 0.0 }
 0x47c   : > { %vm4838_vm2 = vcmp.eq.s32.totalorder %v11558_v18, %v11516_v22  ;;  %v4796_v62 = vadd.f32 %v4755_v4, %v4671_v51  ;;  %vm4839_vm3 = vcmp.eq.s32.totalorder %v11558_v18, %v11565_v19  ;;  %vm3970_vm4 = vcmp.eq.s32.totalorder %v11537_v2, %v11514_v1 }
 0x47d   : > { %v4880_v45 = vsel %vm4838_vm2, %v11559_v63, 0.0  ;;  %4477 = vmatpush.bf16.msrb.mxu2 %v4428_v58  ;;  %v4797_v5 = vadd.f32 %v4756_v53, %v4672_v43  ;;  %v4881_v47 = vsel %vm4839_vm3, %v11559_v63, 0.0  ;;  %vm3971_vm5 = vcmp.eq.s32.totalorder %v11537_v2, %v11515_v13  ;;  %v11566_v58 = vld [vmem:[#allocation59_spill] sm:$0xff]  ;;  %v11567_v43 = vld [vmem:[#allocation61_spill] sm:$0xff] }
 0x47e   : > { %v4012_v9 = vsel %vm3970_vm4, %v11538_v39, 0.0  ;;  %v4921_v6 = vadd.f32 %v4880_v45, %v4796_v62  ;;  %v4013_v48 = vsel %vm3971_vm5, %v11538_v39, 0.0  ;;  %vm4054_vm8 = vcmp.eq.s32.totalorder %v11539_v56, %v11514_v1  ;;  %v11568_v45 = vld [vmem:[#allocation60_spill] sm:$0xff] }
 0x47f   : > { %vm4055_vm9 = vcmp.eq.s32.totalorder %v11539_v56, %v11515_v13  ;;  %v4922_v26 = vadd.f32 %v4881_v47, %v4797_v5  ;;  %v4096_v20 = vsel %vm4054_vm8, %v11540_v44, 0.0  ;;  %vm4179_vm10 = vcmp.eq.s32.totalorder %v11541_v57, %v11514_v1 }
 0x480   : > { %v4097_v24 = vsel %vm4055_vm9, %v11540_v44, 0.0  ;;  %v4137_v49 = vadd.f32 %v4096_v20, %v4012_v9  ;;  %vm4180_vm11 = vcmp.eq.s32.totalorder %v11541_v57, %v11515_v13  ;;  %v4221_v46 = vsel %vm4179_vm10, %v11542_v16, 0.0  ;;  %v11569_v9 = vld [vmem:[#allocation62_spill] sm:$0xff] }
 0x481   : > { %v4138_v42 = vadd.f32 %v4097_v24, %v4013_v48  ;;  %v4959_v32 = vpack.c.bf16 %v4922_v26, %v4921_v6  ;;  %v4222_v41 = vsel %vm4180_vm11, %v11542_v16, 0.0  ;;  %vm4304_vm12 = vcmp.eq.s32.totalorder %v11543_v59, %v11514_v1  ;;  %v11570_v26 = vld [vmem:[#allocation63_spill] sm:$0xff] }
 0x482   : > { %vm4305_vm13 = vcmp.eq.s32.totalorder %v11543_v59, %v11515_v13  ;;  %v4262_v14 = vadd.f32 %v4221_v46, %v4137_v49  ;;  %v4346_v51 = vsel %vm4304_vm12, %v11544_v25, 0.0  ;;  %vm5048_vm14 = vcmp.eq.s32.totalorder %v11566_v58, %v6229_v36 }
 0x483   : > { %v4263_v37 = vadd.f32 %v4222_v41, %v4138_v42  ;;  %v4347_v4 = vsel %vm4305_vm13, %v11544_v25, 0.0  ;;  %4997 = vmatpush.bf16.msrb.mxu1 %v4959_v32  ;;  %vm5049_vm15 = vcmp.eq.s32.totalorder %v11566_v58, %v11552_v60  ;;  %vm5132_vm0 = vcmp.eq.s32.totalorder %v11567_v43, %v6229_v36  ;;  %v11571_v42 = vld [vmem:[#allocation64_spill] sm:$0xff]  ;;  %v11572_v41 = vld [vmem:[#allocation66_spill] sm:$0xff] }
 0x484   : > { %vm5133_vm1 = vcmp.eq.s32.totalorder %v11567_v43, %v11552_v60  ;;  %v4387_v53 = vadd.f32 %v4346_v51, %v4262_v14  ;;  %v5090_v5 = vsel %vm5048_vm14, %v11568_v45, 0.0  ;;  %v5091_v47 = vsel %vm5049_vm15, %v11568_v45, 0.0  ;;  %v11573_v14 = vld [vmem:[#allocation96_spill] sm:$0xff] }
 0x485   : > { %v4388_v62 = vadd.f32 %v4347_v4, %v4263_v37  ;;  %v5174_v6 = vsel %vm5132_vm0, %v11569_v9, 0.0  ;;  %v5175_v48 = vsel %vm5133_vm1, %v11569_v9, 0.0  ;;  %vm5257_vm2 = vcmp.eq.s32.totalorder %v11570_v26, %v6229_v36  ;;  %v11574_v4 = vld [vmem:[#allocation67_spill] sm:$0xff] }
 0x486   : > { %vm5258_vm3 = vcmp.eq.s32.totalorder %v11570_v26, %v11552_v60  ;;  %v5215_v24 = vadd.f32 %v5174_v6, %v5090_v5  ;;  %v5216_v49 = vadd.f32 %v5175_v48, %v5091_v47  ;;  %v5299_v46 = vsel %vm5257_vm2, %v11571_v42, 0.0  ;;  %v544_v48 = vpop.f32.mrf.mxu2 }
 0x487   : > { %v4424_v20 = vpack.c.bf16 %v4388_v62, %v4387_v53  ;;  %v5300_v32 = vsel %vm5258_vm3, %v11571_v42, 0.0  ;;  %vm5382_vm4 = vcmp.eq.s32.totalorder %v11572_v41, %v6229_v36  ;;  %vm5383_vm5 = vcmp.eq.s32.totalorder %v11572_v41, %v11552_v60 }
 0x488   : > { %vm4534_vm8 = vcmp.eq.s32.totalorder %v11551_v10, %v11573_v14  ;;  %v5340_v37 = vadd.f32 %v5299_v46, %v5215_v24  ;;  %v5341_v51 = vadd.f32 %v5300_v32, %v5216_v49  ;;  %v5424_v53 = vsel %vm5382_vm4, %v11574_v4, 0.0 }
 0x489   : > { %4460 = vmatpush.bf16.msrb.mxu3 %v4424_v20  ;;  %v5425_v62 = vsel %vm5383_vm5, %v11574_v4, 0.0  ;;  %vm4535_vm9 = vcmp.eq.s32.totalorder %v11551_v10, %v7562_v12  ;;  %v4576_v5 = vsel %vm4534_vm8, %v11553_v29, 0.0  ;;  %vm4618_vm10 = vcmp.eq.s32.totalorder %v11554_v11, %v11573_v14 }
 0x48a   : > { %vm4619_vm11 = vcmp.eq.s32.totalorder %v11554_v11, %v7562_v12  ;;  %v5465_v36 = vadd.f32 %v5424_v53, %v5340_v37  ;;  %v5466_v60 = vadd.f32 %v5425_v62, %v5341_v51  ;;  %v4577_v47 = vsel %vm4535_vm9, %v11553_v29, 0.0 }
 0x48b   : > { %v4660_v6 = vsel %vm4618_vm10, %v11555_v35, 0.0  ;;  %v4661_v20 = vsel %vm4619_vm11, %v11555_v35, 0.0  ;;  %vm4743_vm12 = vcmp.eq.s32.totalorder %v11556_v17, %v11573_v14  ;;  %vm4744_vm13 = vcmp.eq.s32.totalorder %v11556_v17, %v7562_v12 }
 0x48c   : > { %v4701_v24 = vadd.f32 %v4660_v6, %v4576_v5  ;;  %v5499_v49 = vpack.c.bf16 %v5466_v60, %v5465_v36  ;;  %v4702_v46 = vadd.f32 %v4661_v20, %v4577_v47  ;;  %v4785_v32 = vsel %vm4743_vm12, %v11557_v7, 0.0  ;;  %v11575_v36 = vld [vmem:[#allocation84_spill] sm:$0xff]  ;;  %v11576_v20 = vld [vmem:[#allocation85_spill] sm:$0xff] }
 0x48d   : > { %v4786_v37 = vsel %vm4744_vm13, %v11557_v7, 0.0  ;;  %vm4868_vm14 = vcmp.eq.s32.totalorder %v11558_v18, %v11573_v14  ;;  %vm4869_vm15 = vcmp.eq.s32.totalorder %v11558_v18, %v7562_v12  ;;  %v566_v53 = vpack.c.bf16 %v544_v48, %v544_v48 }
 0x48e   : > { %v4826_v51 = vadd.f32 %v4785_v32, %v4701_v24  ;;  %5529 = vmatpush.bf16.msra.mxu2 %v5499_v49  ;;  %v4827_v62 = vadd.f32 %v4786_v37, %v4702_v46  ;;  %v4910_v5 = vsel %vm4868_vm14, %v11559_v63, 0.0  ;;  %v4911_v6 = vsel %vm4869_vm15, %v11559_v63, 0.0 }
 0x48f   : > { %vm4502_vm0 = vcmp.eq.s32.totalorder %v11551_v10, %v11575_v36  ;;  %v4445_v47 = vunpack.c.l.b16 %v566_v53  ;;  %vm4503_vm1 = vcmp.eq.s32.totalorder %v11551_v10, %v11576_v20  ;;  %vm4586_vm2 = vcmp.eq.s32.totalorder %v11554_v11, %v11575_v36 }
 0x490   : > { %v4951_v60 = vadd.f32 %v4910_v5, %v4826_v51  ;;  %v4544_v24 = vsel %vm4502_vm0, %v11553_v29, 0.0  ;;  %v4952_v32 = vadd.f32 %v4911_v6, %v4827_v62  ;;  %v4545_v55 = vsel %vm4503_vm1, %v11553_v29, 0.0 }
 0x491   : > { %vm4587_vm3 = vcmp.eq.s32.totalorder %v11554_v11, %v11576_v20  ;;  %v4448_v48 = vpack.c.b16 %v4445_v47, %v4445_v47  ;;  %v4628_v49 = vsel %vm4586_vm2, %v11555_v35, 0.0  ;;  %vm4711_vm4 = vcmp.eq.s32.totalorder %v11556_v17, %v11575_v36 }
 0x492   : > { %v4629_v46 = vsel %vm4587_vm3, %v11555_v35, 0.0  ;;  %v4974_v37 = vpack.c.bf16 %v4952_v32, %v4951_v60  ;;  %v4669_v51 = vadd.f32 %v4628_v49, %v4544_v24  ;;  %vm4712_vm5 = vcmp.eq.s32.totalorder %v11556_v17, %v11576_v20 }
 0x493   : > { %v4670_v53 = vadd.f32 %v4629_v46, %v4545_v55  ;;  %v4753_v62 = vsel %vm4711_vm4, %v11557_v7, 0.0  ;;  %v4754_v5 = vsel %vm4712_vm5, %v11557_v7, 0.0  ;;  %vm4836_vm8 = vcmp.eq.s32.totalorder %v11558_v18, %v11575_v36  ;;  %5744 = vmatmul.msk.bf16.vlgmr.msra.gmra.mxu0 %vm1715_vm6, %v4448_v48 }
 0x494   : > { %vm4837_vm9 = vcmp.eq.s32.totalorder %v11558_v18, %v11576_v20  ;;  %5024 = vmatpush.bf16.msrb.mxu0 %v4974_v37  ;;  %v4794_v6 = vadd.f32 %v4753_v62, %v4669_v51  ;;  %v4878_v55 = vsel %vm4836_vm8, %v11559_v63, 0.0  ;;  %vm3968_vm10 = vcmp.eq.s32.totalorder %v11537_v2, %v11516_v22 }
 0x495   : > { %v4795_v60 = vadd.f32 %v4754_v5, %v4670_v53  ;;  %v4879_v47 = vsel %vm4837_vm9, %v11559_v63, 0.0  ;;  %vm3969_vm11 = vcmp.eq.s32.totalorder %v11537_v2, %v11565_v19  ;;  %vm4052_vm12 = vcmp.eq.s32.totalorder %v11539_v56, %v11516_v22 }
 0x496   : > { %vm4053_vm13 = vcmp.eq.s32.totalorder %v11539_v56, %v11565_v19  ;;  %v4919_v24 = vadd.f32 %v4878_v55, %v4794_v6  ;;  %v4010_v48 = vsel %vm3968_vm10, %v11538_v39, 0.0  ;;  %v4011_v49 = vsel %vm3969_vm11, %v11538_v39, 0.0 }
 0x497   : > { %v4920_v32 = vadd.f32 %v4879_v47, %v4795_v60  ;;  %v4094_v46 = vsel %vm4052_vm12, %v11540_v44, 0.0  ;;  %v4095_v37 = vsel %vm4053_vm13, %v11540_v44, 0.0  ;;  %vm4177_vm14 = vcmp.eq.s32.totalorder %v11541_v57, %v11516_v22 }
 0x498   : > { %vm4178_vm15 = vcmp.eq.s32.totalorder %v11541_v57, %v11565_v19  ;;  %v4135_v53 = vadd.f32 %v4094_v46, %v4010_v48  ;;  %v4136_v62 = vadd.f32 %v4095_v37, %v4011_v49  ;;  %v4219_v5 = vsel %vm4177_vm14, %v11542_v16, 0.0 }
 0x499   : > { %v4958_v51 = vpack.c.bf16 %v4920_v32, %v4919_v24  ;;  %v4220_v6 = vsel %vm4178_vm15, %v11542_v16, 0.0  ;;  %vm4302_vm0 = vcmp.eq.s32.totalorder %v11543_v59, %v11516_v22  ;;  %vm4303_vm1 = vcmp.eq.s32.totalorder %v11543_v59, %v11565_v19 }
 0x49a   : > { %vm5046_vm2 = vcmp.eq.s32.totalorder %v11566_v58, %v11561_v40  ;;  %v4260_v60 = vadd.f32 %v4219_v5, %v4135_v53  ;;  %v4261_v55 = vadd.f32 %v4220_v6, %v4136_v62  ;;  %v4344_v47 = vsel %vm4302_vm0, %v11544_v25, 0.0 }
 0x49b   : > { %4998 = vmatpush.bf16.msrb.mxu1 %v4958_v51  ;;  %v4345_v24 = vsel %vm4303_vm1, %v11544_v25, 0.0  ;;  %vm5047_vm3 = vcmp.eq.s32.totalorder %v11566_v58, %v11562_v38  ;;  %v5088_v32 = vsel %vm5046_vm2, %v11568_v45, 0.0  ;;  %vm5130_vm4 = vcmp.eq.s32.totalorder %v11567_v43, %v11561_v40 }
 0x49c   : > { %vm5131_vm5 = vcmp.eq.s32.totalorder %v11567_v43, %v11562_v38  ;;  %v4385_v48 = vadd.f32 %v4344_v47, %v4260_v60  ;;  %v4386_v49 = vadd.f32 %v4345_v24, %v4261_v55  ;;  %v5089_v46 = vsel %vm5047_vm3, %v11568_v45, 0.0  ;;  %v11577_v47 = vld [vmem:[#allocation65_spill] sm:$0xff] }
 0x49d   : > { %v5172_v37 = vsel %vm5130_vm4, %v11569_v9, 0.0  ;;  %v5173_v51 = vsel %vm5131_vm5, %v11569_v9, 0.0  ;;  %vm5255_vm8 = vcmp.eq.s32.totalorder %v11570_v26, %v11561_v40  ;;  %vm5256_vm9 = vcmp.eq.s32.totalorder %v11570_v26, %v11562_v38 }
 0x49e   : > { %v5213_v53 = vadd.f32 %v5172_v37, %v5088_v32  ;;  %v4423_v62 = vpack.c.bf16 %v4386_v49, %v4385_v48  ;;  %v5214_v5 = vadd.f32 %v5173_v51, %v5089_v46  ;;  %v5297_v6 = vsel %vm5255_vm8, %v11571_v42, 0.0 }
 0x49f   : > { %v5298_v60 = vsel %vm5256_vm9, %v11571_v42, 0.0  ;;  %vm5380_vm10 = vcmp.eq.s32.totalorder %v11572_v41, %v11561_v40  ;;  %vm5381_vm11 = vcmp.eq.s32.totalorder %v11572_v41, %v11562_v38  ;;  %vm4532_vm12 = vcmp.eq.s32.totalorder %v11551_v10, %v7661_v61 }
 0x4a0   : > { %v5338_v55 = vadd.f32 %v5297_v6, %v5213_v53  ;;  %v11578_v24 = vunpack.c.l.b16 %v11577_v47  ;;  %4461 = vmatpush.bf16.msrb.mxu3 %v4423_v62  ;;  %v5339_v48 = vadd.f32 %v5298_v60, %v5214_v5  ;;  %v5422_v49 = vsel %vm5380_vm10, %v11574_v4, 0.0  ;;  %v500_v53 = vpop.f32.mrf.mxu1 }
 0x4a1   : > { %vm4533_vm13 = vcmp.eq.s32.totalorder %v11551_v10, %v7666_v28  ;;  %v5423_v40 = vsel %vm5381_vm11, %v11574_v4, 0.0  ;;  %v4574_v38 = vsel %vm4532_vm12, %v11553_v29, 0.0  ;;  %vm4616_vm14 = vcmp.eq.s32.totalorder %v11554_v11, %v7661_v61 }
 0x4a2   : > { %v10309_v32 = vpack.c.b16 %v11578_v24, %v11578_v24  ;;  %v5463_v46 = vadd.f32 %v5422_v49, %v5338_v55  ;;  %v5464_v37 = vadd.f32 %v5423_v40, %v5339_v48  ;;  %vm4617_vm15 = vcmp.eq.s32.totalorder %v11554_v11, %v7666_v28  ;;  %v11579_v40 = vld [vmem:[#allocation17_spill] sm:$0xff] }
 0x4a3   : > { %v4658_v51 = vsel %vm4616_vm14, %v11555_v35, 0.0  ;;  %vm4741_vm0 = vcmp.eq.s32.totalorder %v11556_v17, %v7661_v61  ;;  %v4575_v62 = vsel %vm4533_vm13, %v11553_v29, 0.0  ;;  %v4659_v5 = vsel %vm4617_vm15, %v11555_v35, 0.0 }
 0x4a4   : > { %v4699_v6 = vadd.f32 %v4658_v51, %v4574_v38  ;;  %vm4742_vm1 = vcmp.eq.s32.totalorder %v11556_v17, %v7666_v28  ;;  %v5498_v60 = vpack.c.bf16 %v5464_v37, %v5463_v46  ;;  %v4700_v55 = vadd.f32 %v4659_v5, %v4575_v62  ;;  %v11580_v46 = vld [vmem:[#allocation88_spill] sm:$0xff]  ;;  %v11581_v37 = vld [vmem:[#allocation89_spill] sm:$0xff] }
 0x4a5   : > { %v4783_v24 = vsel %vm4741_vm0, %v11557_v7, 0.0  ;;  %vm4866_vm2 = vcmp.eq.s32.totalorder %v11558_v18, %v7661_v61  ;;  %v4784_v48 = vsel %vm4742_vm1, %v11557_v7, 0.0  ;;  %vm4867_vm3 = vcmp.eq.s32.totalorder %v11558_v18, %v7666_v28 }
 0x4a6   : > { %v4824_v49 = vadd.f32 %v4783_v24, %v4699_v6  ;;  %v10334_v3 = vpack.c.bf16 %v500_v53, %v11579_v40  ;;  %5530 = vmatpush.bf16.msra.mxu2 %v5498_v60  ;;  %v4825_v38 = vadd.f32 %v4784_v48, %v4700_v55  ;;  %v4908_v51 = vsel %vm4866_vm2, %v11559_v63, 0.0 }
 0x4a7   : > { %vm4500_vm4 = vcmp.eq.s32.totalorder %v11551_v10, %v11580_v46  ;;  %vm4501_vm5 = vcmp.eq.s32.totalorder %v11551_v10, %v11581_v37  ;;  %v4909_v62 = vsel %vm4867_vm3, %v11559_v63, 0.0  ;;  %vm4584_vm8 = vcmp.eq.s32.totalorder %v11554_v11, %v11580_v46 }
 0x4a8   : > { %v4949_v5 = vadd.f32 %v4908_v51, %v4824_v49  ;;  %v4444_v24 = vunpack.c.h.b16 %v10334_v3  ;;  %v4950_v27 = vadd.f32 %v4909_v62, %v4825_v38  ;;  %v4542_v53 = vsel %vm4500_vm4, %v11553_v29, 0.0 }
 0x4a9   : > { %vm4585_vm9 = vcmp.eq.s32.totalorder %v11554_v11, %v11581_v37  ;;  %v4543_v55 = vsel %vm4501_vm5, %v11553_v29, 0.0  ;;  %v4626_v48 = vsel %vm4584_vm8, %v11555_v35, 0.0  ;;  %vm4709_vm10 = vcmp.eq.s32.totalorder %v11556_v17, %v11580_v46 }
 0x4aa   : > { %v4447_v60 = vpack.c.b16 %v4444_v24, %v4444_v24  ;;  %v4627_v49 = vsel %vm4585_vm9, %v11555_v35, 0.0  ;;  %v4973_v40 = vpack.c.bf16 %v4950_v27, %v4949_v5  ;;  %v4667_v51 = vadd.f32 %v4626_v48, %v4542_v53 }
 0x4ab   : > { %v4668_v6 = vadd.f32 %v4627_v49, %v4543_v55  ;;  %vm4710_vm11 = vcmp.eq.s32.totalorder %v11556_v17, %v11581_v37  ;;  %v4751_v38 = vsel %vm4709_vm10, %v11557_v7, 0.0  ;;  %vm4834_vm12 = vcmp.eq.s32.totalorder %v11558_v18, %v11580_v46 }
 0x4ac   : > { %vm4835_vm13 = vcmp.eq.s32.totalorder %v11558_v18, %v11581_v37  ;;  %4478 = vmatmul.bf16.vlgmr.msrb.gmra.mxu2 %v4447_v60  ;;  %5025 = vmatpush.bf16.msrb.mxu0 %v4973_v40  ;;  %v4752_v27 = vsel %vm4710_vm11, %v11557_v7, 0.0  ;;  %v4792_v62 = vadd.f32 %v4751_v38, %v4667_v51  ;;  %v4876_v5 = vsel %vm4834_vm12, %v11559_v63, 0.0 }
 0x4ad   : > { %v4877_v24 = vsel %vm4835_vm13, %v11559_v63, 0.0  ;;  %v4793_v53 = vadd.f32 %v4752_v27, %v4668_v6  ;;  %vm3966_vm14 = vcmp.eq.s32.totalorder %v11537_v2, %v11575_v36  ;;  %vm3967_vm15 = vcmp.eq.s32.totalorder %v11537_v2, %v11576_v20 }
 0x4ae   : > { %vm4050_vm0 = vcmp.eq.s32.totalorder %v11539_v56, %v11575_v36  ;;  %v4917_v55 = vadd.f32 %v4876_v5, %v4792_v62  ;;  %v4008_v60 = vsel %vm3966_vm14, %v11538_v39, 0.0  ;;  %v4009_v48 = vsel %vm3967_vm15, %v11538_v39, 0.0 }
 0x4af   : > { %vm4051_vm1 = vcmp.eq.s32.totalorder %v11539_v56, %v11576_v20  ;;  %v4918_v49 = vadd.f32 %v4877_v24, %v4793_v53  ;;  %v4092_v6 = vsel %vm4050_vm0, %v11540_v44, 0.0  ;;  %vm4175_vm2 = vcmp.eq.s32.totalorder %v11541_v57, %v11575_v36 }
 0x4b0   : > { %v4093_v40 = vsel %vm4051_vm1, %v11540_v44, 0.0  ;;  %v4133_v51 = vadd.f32 %v4092_v6, %v4008_v60  ;;  %vm4176_vm3 = vcmp.eq.s32.totalorder %v11541_v57, %v11576_v20  ;;  %v4217_v27 = vsel %vm4175_vm2, %v11542_v16, 0.0 }
 0x4b1   : > { %v4134_v38 = vadd.f32 %v4093_v40, %v4009_v48  ;;  %v4957_v62 = vpack.c.bf16 %v4918_v49, %v4917_v55  ;;  %v4218_v5 = vsel %vm4176_vm3, %v11542_v16, 0.0  ;;  %vm4300_vm4 = vcmp.eq.s32.totalorder %v11543_v59, %v11575_v36 }
 0x4b2   : > { %vm4301_vm5 = vcmp.eq.s32.totalorder %v11543_v59, %v11576_v20  ;;  %v4258_v24 = vadd.f32 %v4217_v27, %v4133_v51  ;;  %v4342_v31 = vsel %vm4300_vm4, %v11544_v25, 0.0  ;;  %vm5044_vm8 = vcmp.eq.s32.totalorder %v11566_v58, %v11563_v33 }
 0x4b3   : > { %v4259_v53 = vadd.f32 %v4218_v5, %v4134_v38  ;;  %v4343_v60 = vsel %vm4301_vm5, %v11544_v25, 0.0  ;;  %4999 = vmatpush.bf16.msrb.mxu1 %v4957_v62  ;;  %vm5045_vm9 = vcmp.eq.s32.totalorder %v11566_v58, %v11564_v15  ;;  %vm5128_vm10 = vcmp.eq.s32.totalorder %v11567_v43, %v11563_v33 }
 0x4b4   : > { %vm5129_vm11 = vcmp.eq.s32.totalorder %v11567_v43, %v11564_v15  ;;  %v4383_v55 = vadd.f32 %v4342_v31, %v4258_v24  ;;  %v5086_v49 = vsel %vm5044_vm8, %v11568_v45, 0.0  ;;  %v5087_v6 = vsel %vm5045_vm9, %v11568_v45, 0.0 }
 0x4b5   : > { %v4384_v48 = vadd.f32 %v4343_v60, %v4259_v53  ;;  %v5170_v40 = vsel %vm5128_vm10, %v11569_v9, 0.0  ;;  %v5171_v51 = vsel %vm5129_vm11, %v11569_v9, 0.0  ;;  %vm5253_vm12 = vcmp.eq.s32.totalorder %v11570_v26, %v11563_v33 }
 0x4b6   : > { %vm5254_vm13 = vcmp.eq.s32.totalorder %v11570_v26, %v11564_v15  ;;  %v5211_v27 = vadd.f32 %v5170_v40, %v5086_v49  ;;  %v5212_v62 = vadd.f32 %v5171_v51, %v5087_v6  ;;  %v5295_v31 = vsel %vm5253_vm12, %v11571_v42, 0.0 }
 0x4b7   : > { %v4422_v38 = vpack.c.bf16 %v4384_v48, %v4383_v55  ;;  %v5296_v5 = vsel %vm5254_vm13, %v11571_v42, 0.0  ;;  %vm5378_vm14 = vcmp.eq.s32.totalorder %v11572_v41, %v11563_v33  ;;  %vm5379_vm15 = vcmp.eq.s32.totalorder %v11572_v41, %v11564_v15 }
 0x4b8   : > { %vm4530_vm0 = vcmp.eq.s32.totalorder %v11551_v10, %v7770_v0  ;;  %v5336_v24 = vadd.f32 %v5295_v31, %v5211_v27  ;;  %v5337_v53 = vadd.f32 %v5296_v5, %v5212_v62  ;;  %v5420_v60 = vsel %vm5378_vm14, %v11574_v4, 0.0 }
 0x4b9   : > { %4462 = vmatpush.bf16.msrb.mxu3 %v4422_v38  ;;  %v5421_v55 = vsel %vm5379_vm15, %v11574_v4, 0.0  ;;  %vm4531_vm1 = vcmp.eq.s32.totalorder %v11551_v10, %v7773_v50  ;;  %v4572_v48 = vsel %vm4530_vm0, %v11553_v29, 0.0  ;;  %vm4614_vm2 = vcmp.eq.s32.totalorder %v11554_v11, %v7770_v0 }
 0x4ba   : > { %vm4615_vm3 = vcmp.eq.s32.totalorder %v11554_v11, %v7773_v50  ;;  %v5461_v33 = vadd.f32 %v5420_v60, %v5336_v24  ;;  %v5462_v15 = vadd.f32 %v5421_v55, %v5337_v53  ;;  %v4573_v49 = vsel %vm4531_vm1, %v11553_v29, 0.0 }
 0x4bb   : > { %v4656_v6 = vsel %vm4614_vm2, %v11555_v35, 0.0  ;;  %v4657_v40 = vsel %vm4615_vm3, %v11555_v35, 0.0  ;;  %vm4739_vm4 = vcmp.eq.s32.totalorder %v11556_v17, %v7770_v0  ;;  %vm4740_vm5 = vcmp.eq.s32.totalorder %v11556_v17, %v7773_v50 }
 0x4bc   : > { %v4697_v51 = vadd.f32 %v4656_v6, %v4572_v48  ;;  %v5497_v38 = vpack.c.bf16 %v5462_v15, %v5461_v33  ;;  %v4698_v27 = vadd.f32 %v4657_v40, %v4573_v49  ;;  %v4781_v62 = vsel %vm4739_vm4, %v11557_v7, 0.0 }
 0x4bd   : > { %v4782_v31 = vsel %vm4740_vm5, %v11557_v7, 0.0  ;;  %vm4864_vm8 = vcmp.eq.s32.totalorder %v11558_v18, %v7770_v0  ;;  %vm4865_vm9 = vcmp.eq.s32.totalorder %v11558_v18, %v7773_v50  ;;  %vm5074_vm10 = vcmp.eq.s32.totalorder %v11566_v58, %v7364_v52 }
 0x4be   : > { %v4822_v5 = vadd.f32 %v4781_v62, %v4697_v51  ;;  %5531 = vmatpush.bf16.msra.mxu2 %v5497_v38  ;;  %v4823_v24 = vadd.f32 %v4782_v31, %v4698_v27  ;;  %v4906_v53 = vsel %vm4864_vm8, %v11559_v63, 0.0  ;;  %v4907_v60 = vsel %vm4865_vm9, %v11559_v63, 0.0  ;;  %v11582_v51 = vld [vmem:[#allocation12_spill] sm:$0xff] }
 0x4bf   : > { %v5116_v55 = vsel %vm5074_vm10, %v11568_v45, 0.0  ;;  %vm5158_vm11 = vcmp.eq.s32.totalorder %v11567_v43, %v7364_v52  ;;  %vm5283_vm12 = vcmp.eq.s32.totalorder %v11570_v26, %v7364_v52  ;;  %vm5408_vm13 = vcmp.eq.s32.totalorder %v11572_v41, %v7364_v52  ;;  %v11583_v38 = vld [vmem:[#allocation92_spill] sm:$0xff] }
 0x4c0   : > { %v4947_v48 = vadd.f32 %v4906_v53, %v4822_v5  ;;  %v4948_v33 = vadd.f32 %v4907_v60, %v4823_v24  ;;  %v5200_v15 = vsel %vm5158_vm11, %v11569_v9, 0.0  ;;  %v5325_v49 = vsel %vm5283_vm12, %v11571_v42, 0.0 }
 0x4c1   : > { %v5450_v6 = vsel %vm5408_vm13, %v11574_v4, 0.0  ;;  %v5241_v40 = vadd.f32 %v5200_v15, %v5116_v55  ;;  %vm4498_vm14 = vcmp.eq.s32.totalorder %v11551_v10, %v11582_v51  ;;  %vm4499_vm15 = vcmp.eq.s32.totalorder %v11551_v10, %v11583_v38 }
 0x4c2   : > { %vm4582_vm0 = vcmp.eq.s32.totalorder %v11554_v11, %v11582_v51  ;;  %v4972_v27 = vpack.c.bf16 %v4948_v33, %v4947_v48  ;;  %v4540_v52 = vsel %vm4498_vm14, %v11553_v29, 0.0  ;;  %v4541_v62 = vsel %vm4499_vm15, %v11553_v29, 0.0 }
 0x4c3   : > { %vm4583_vm1 = vcmp.eq.s32.totalorder %v11554_v11, %v11583_v38  ;;  %v5366_v31 = vadd.f32 %v5325_v49, %v5241_v40  ;;  %v4624_v5 = vsel %vm4582_vm0, %v11555_v35, 0.0  ;;  %vm4707_vm2 = vcmp.eq.s32.totalorder %v11556_v17, %v11582_v51 }
 0x4c4   : > { %v4625_v24 = vsel %vm4583_vm1, %v11555_v35, 0.0  ;;  %5026 = vmatpush.bf16.msrb.mxu0 %v4972_v27  ;;  %v4665_v53 = vadd.f32 %v4624_v5, %v4540_v52  ;;  %vm4708_vm3 = vcmp.eq.s32.totalorder %v11556_v17, %v11583_v38  ;;  %v4749_v55 = vsel %vm4707_vm2, %v11557_v7, 0.0 }
 0x4c5   : > { %v4666_v60 = vadd.f32 %v4625_v24, %v4541_v62  ;;  %v5491_v48 = vadd.f32 %v5450_v6, %v5366_v31  ;;  %v4750_v33 = vsel %vm4708_vm3, %v11557_v7, 0.0  ;;  %vm4832_vm4 = vcmp.eq.s32.totalorder %v11558_v18, %v11582_v51 }
 0x4c6   : > { %vm4833_vm5 = vcmp.eq.s32.totalorder %v11558_v18, %v11583_v38  ;;  %v4790_v15 = vadd.f32 %v4749_v55, %v4665_v53  ;;  %v4874_v40 = vsel %vm4832_vm4, %v11559_v63, 0.0  ;;  %vm3964_vm8 = vcmp.eq.s32.totalorder %v11537_v2, %v11580_v46 }
 0x4c7   : > { %v4791_v49 = vadd.f32 %v4750_v33, %v4666_v60  ;;  %v4875_v27 = vsel %vm4833_vm5, %v11559_v63, 0.0  ;;  %v5512_v52 = vpack.c.bf16 %v5491_v48, %v5491_v48  ;;  %vm3965_vm9 = vcmp.eq.s32.totalorder %v11537_v2, %v11581_v37 }
 0x4c8   : > { %vm4048_vm10 = vcmp.eq.s32.totalorder %v11539_v56, %v11580_v46  ;;  %v4915_v6 = vadd.f32 %v4874_v40, %v4790_v15  ;;  %v4006_v31 = vsel %vm3964_vm8, %v11538_v39, 0.0  ;;  %v4007_v5 = vsel %vm3965_vm9, %v11538_v39, 0.0 }
 0x4c9   : > { %v4916_v62 = vadd.f32 %v4875_v27, %v4791_v49  ;;  %v5527_v24 = vsel %vm1719_vm7, %v5512_v52, 0  ;;  %vm4049_vm11 = vcmp.eq.s32.totalorder %v11539_v56, %v11581_v37  ;;  %v4090_v53 = vsel %vm4048_vm10, %v11540_v44, 0.0 }
 0x4ca   : > { %vm4173_vm12 = vcmp.eq.s32.totalorder %v11541_v57, %v11580_v46  ;;  %5558 = vmatpush.bf16.msra.mxu0 %v5527_v24  ;;  %v4091_v55 = vsel %vm4049_vm11, %v11540_v44, 0.0  ;;  %v4131_v48 = vadd.f32 %v4090_v53, %v4006_v31  ;;  %vm4174_vm13 = vcmp.eq.s32.totalorder %v11541_v57, %v11581_v37 }
 0x4cb   : > { %v4956_v60 = vpack.c.bf16 %v4916_v62, %v4915_v6  ;;  %v4132_v33 = vadd.f32 %v4091_v55, %v4007_v5  ;;  %v4215_v15 = vsel %vm4173_vm12, %v11542_v16, 0.0  ;;  %v4216_v49 = vsel %vm4174_vm13, %v11542_v16, 0.0 }
 0x4cc   : > { %vm4298_vm7 = vcmp.eq.s32.totalorder %v11543_v59, %v11580_v46  ;;  %v4256_v40 = vadd.f32 %v4215_v15, %v4131_v48  ;;  %vm4299_vm14 = vcmp.eq.s32.totalorder %v11543_v59, %v11581_v37  ;;  %vm5042_vm15 = vcmp.eq.s32.totalorder %v11566_v58, %v11514_v1 }
 0x4cd   : > { %5000 = vmatpush.bf16.msrb.mxu1 %v4956_v60  ;;  %v4340_v27 = vsel %vm4298_vm7, %v11544_v25, 0.0  ;;  %v4257_v52 = vadd.f32 %v4216_v49, %v4132_v33  ;;  %v4341_v6 = vsel %vm4299_vm14, %v11544_v25, 0.0  ;;  %vm5043_vm0 = vcmp.eq.s32.totalorder %v11566_v58, %v11515_v13 }
 0x4ce   : > { %v5084_v62 = vsel %vm5042_vm15, %v11568_v45, 0.0  ;;  %v4381_v31 = vadd.f32 %v4340_v27, %v4256_v40  ;;  %v5085_v5 = vsel %vm5043_vm0, %v11568_v45, 0.0  ;;  %vm5126_vm1 = vcmp.eq.s32.totalorder %v11567_v43, %v11514_v1 }
 0x4cf   : > { %vm5127_vm2 = vcmp.eq.s32.totalorder %v11567_v43, %v11515_v13  ;;  %v4382_v24 = vadd.f32 %v4341_v6, %v4257_v52  ;;  %v5168_v53 = vsel %vm5126_vm1, %v11569_v9, 0.0  ;;  %vm5251_vm3 = vcmp.eq.s32.totalorder %v11570_v26, %v11514_v1 }
 0x4d0   : > { %v5169_v60 = vsel %vm5127_vm2, %v11569_v9, 0.0  ;;  %v5209_v55 = vadd.f32 %v5168_v53, %v5084_v62  ;;  %vm5252_vm4 = vcmp.eq.s32.totalorder %v11570_v26, %v11515_v13  ;;  %v5293_v33 = vsel %vm5251_vm3, %v11571_v42, 0.0  ;;  %v11584_v62 = vld [vmem:[#allocation15_spill] sm:$0xff] }
 0x4d1   : > { %v5210_v48 = vadd.f32 %v5169_v60, %v5085_v5  ;;  %v4421_v15 = vpack.c.bf16 %v4382_v24, %v4381_v31  ;;  %v5294_v49 = vsel %vm5252_vm4, %v11571_v42, 0.0  ;;  %vm5376_vm5 = vcmp.eq.s32.totalorder %v11572_v41, %v11514_v1  ;;  %v11585_v5 = vld [vmem:[#allocation16_spill] sm:$0xff] }
 0x4d2   : > { %vm5377_vm8 = vcmp.eq.s32.totalorder %v11572_v41, %v11515_v13  ;;  %v5334_v40 = vadd.f32 %v5293_v33, %v5209_v55  ;;  %v5418_v52 = vsel %vm5376_vm5, %v11574_v4, 0.0  ;;  %vm5064_vm9 = vcmp.eq.s32.totalorder %v11566_v58, %v11584_v62 }
 0x4d3   : > { %v5335_v27 = vadd.f32 %v5294_v49, %v5210_v48  ;;  %v5419_v6 = vsel %vm5377_vm8, %v11574_v4, 0.0  ;;  %4463 = vmatpush.bf16.msrb.mxu3 %v4421_v15  ;;  %vm5065_vm10 = vcmp.eq.s32.totalorder %v11566_v58, %v11585_v5  ;;  %vm5148_vm11 = vcmp.eq.s32.totalorder %v11567_v43, %v11584_v62  ;;  %v547_v49 = vpop.f32.mrf.mxu2 }
 0x4d4   : > { %vm5149_vm12 = vcmp.eq.s32.totalorder %v11567_v43, %v11585_v5  ;;  %v5459_v1 = vadd.f32 %v5418_v52, %v5334_v40  ;;  %v5106_v31 = vsel %vm5064_vm9, %v11568_v45, 0.0  ;;  %v5107_v24 = vsel %vm5065_vm10, %v11568_v45, 0.0 }
 0x4d5   : > { %v5460_v13 = vadd.f32 %v5419_v6, %v5335_v27  ;;  %v5190_v53 = vsel %vm5148_vm11, %v11569_v9, 0.0  ;;  %v5191_v60 = vsel %vm5149_vm12, %v11569_v9, 0.0  ;;  %vm5273_vm13 = vcmp.eq.s32.totalorder %v11570_v26, %v11584_v62 }
 0x4d6   : > { %vm5274_vm7 = vcmp.eq.s32.totalorder %v11570_v26, %v11585_v5  ;;  %v5231_v48 = vadd.f32 %v5190_v53, %v5106_v31  ;;  %v5232_v33 = vadd.f32 %v5191_v60, %v5107_v24  ;;  %v5315_v15 = vsel %vm5273_vm13, %v11571_v42, 0.0 }
 0x4d7   : > { %v5496_v55 = vpack.c.bf16 %v5460_v13, %v5459_v1  ;;  %v5316_v40 = vsel %vm5274_vm7, %v11571_v42, 0.0  ;;  %vm5398_vm14 = vcmp.eq.s32.totalorder %v11572_v41, %v11584_v62  ;;  %vm5399_vm15 = vcmp.eq.s32.totalorder %v11572_v41, %v11585_v5 }
 0x4d8   : > { %v568_v27 = vpack.c.bf16 %v547_v49, %v547_v49  ;;  %v5356_v52 = vadd.f32 %v5315_v15, %v5231_v48  ;;  %v5357_v6 = vadd.f32 %v5316_v40, %v5232_v33  ;;  %v5440_v8 = vsel %vm5398_vm14, %v11574_v4, 0.0 }
 0x4d9   : > { %5532 = vmatpush.bf16.msra.mxu2 %v5496_v55  ;;  %v5441_v1 = vsel %vm5399_vm15, %v11574_v4, 0.0  ;;  %vm5072_vm0 = vcmp.eq.s32.totalorder %v11566_v58, %v7443_v34  ;;  %vm5073_vm1 = vcmp.eq.s32.totalorder %v11566_v58, %v7446_v30  ;;  %vm5156_vm2 = vcmp.eq.s32.totalorder %v11567_v43, %v7443_v34 }
 0x4da   : > { %v4981_v13 = vunpack.c.l.b16 %v568_v27  ;;  %v5481_v31 = vadd.f32 %v5440_v8, %v5356_v52  ;;  %v5482_v24 = vadd.f32 %v5441_v1, %v5357_v6  ;;  %v5114_v53 = vsel %vm5072_vm0, %v11568_v45, 0.0  ;;  %v503_v6 = vpop.f32.mrf.mxu1 }
 0x4db   : > { %v5115_v60 = vsel %vm5073_vm1, %v11568_v45, 0.0  ;;  %vm5157_vm3 = vcmp.eq.s32.totalorder %v11567_v43, %v7446_v30  ;;  %v5198_v48 = vsel %vm5156_vm2, %v11569_v9, 0.0  ;;  %vm5281_vm4 = vcmp.eq.s32.totalorder %v11570_v26, %v7443_v34 }
 0x4dc   : > { %v4984_v55 = vpack.c.b16 %v4981_v13, %v4981_v13  ;;  %v5507_v33 = vpack.c.bf16 %v5482_v24, %v5481_v31  ;;  %v5199_v15 = vsel %vm5157_vm3, %v11569_v9, 0.0  ;;  %v5239_v49 = vadd.f32 %v5198_v48, %v5114_v53 }
 0x4dd   : > { %vm5282_vm5 = vcmp.eq.s32.totalorder %v11570_v26, %v7446_v30  ;;  %v11586_v8 = vunpack.c.h.b16 %v11577_v47  ;;  %v5240_v27 = vadd.f32 %v5199_v15, %v5115_v60  ;;  %v5323_v52 = vsel %vm5281_vm4, %v11571_v42, 0.0  ;;  %v11587_v47 = vld [vmem:[#allocation18_spill] sm:$0xff] }
 0x4de   : > { %vm5406_vm8 = vcmp.eq.s32.totalorder %v11572_v41, %v7443_v34  ;;  %5745 = vmatmul.msk.bf16.vlgmr.msrb.gmra.mxu0 %vm1715_vm6, %v4984_v55  ;;  %5542 = vmatpush.bf16.msra.mxu1 %v5507_v33  ;;  %v5324_v1 = vsel %vm5282_vm5, %v11571_v42, 0.0  ;;  %v5364_v13 = vadd.f32 %v5323_v52, %v5239_v49  ;;  %vm5407_vm9 = vcmp.eq.s32.totalorder %v11572_v41, %v7446_v30 }
 0x4df   : > { %v10564_v40 = vpack.c.b16 %v11586_v8, %v11586_v8  ;;  %v10574_v31 = vpack.c.bf16 %v503_v6, %v11587_v47  ;;  %v5365_v24 = vadd.f32 %v5324_v1, %v5240_v27  ;;  %v5448_v53 = vsel %vm5406_vm8, %v11574_v4, 0.0 }
 0x4e0   : > { %vm3962_vm10 = vcmp.eq.s32.totalorder %v11537_v2, %v11582_v51  ;;  %vm3963_vm11 = vcmp.eq.s32.totalorder %v11537_v2, %v11583_v38  ;;  %v11588_v34 = vunpack.c.l.b16 %v10334_v3  ;;  %v5449_v55 = vsel %vm5407_vm9, %v11574_v4, 0.0 }
 0x4e1   : > { %v5489_v30 = vadd.f32 %v5448_v53, %v5364_v13  ;;  %v4979_v48 = vunpack.c.l.b16 %v10574_v31  ;;  %v5490_v33 = vadd.f32 %v5449_v55, %v5365_v24  ;;  %v4004_v15 = vsel %vm3962_vm10, %v11538_v39, 0.0 }
 0x4e2   : > { %v10584_v60 = vpack.c.b16 %v11588_v34, %v11588_v34  ;;  %vm4046_vm12 = vcmp.eq.s32.totalorder %v11539_v56, %v11582_v51  ;;  %vm4047_vm13 = vcmp.eq.s32.totalorder %v11539_v56, %v11583_v38  ;;  %v4005_v3 = vsel %vm3963_vm11, %v11538_v39, 0.0 }
 0x4e3   : > { %v4982_v2 = vpack.c.b16 %v4979_v48, %v4979_v48  ;;  %v4088_v49 = vsel %vm4046_vm12, %v11540_v44, 0.0  ;;  %v4089_v8 = vsel %vm4047_vm13, %v11540_v44, 0.0  ;;  %v5511_v27 = vpack.c.bf16 %v5490_v33, %v5489_v30 }
 0x4e4   : > { %v4129_v52 = vadd.f32 %v4088_v49, %v4004_v15  ;;  %v4130_v6 = vadd.f32 %v4089_v8, %v4005_v3  ;;  %vm4171_vm7 = vcmp.eq.s32.totalorder %v11541_v57, %v11582_v51  ;;  %vm4172_vm14 = vcmp.eq.s32.totalorder %v11541_v57, %v11583_v38  ;;  %v11589_v8 = vld [vmem:[#allocation70_spill] sm:$0xff] }
 0x4e5   : > { %v4213_v1 = vsel %vm4171_vm7, %v11542_v16, 0.0  ;;  %vm4296_vm15 = vcmp.eq.s32.totalorder %v11543_v59, %v11582_v51  ;;  %vm4297_vm0 = vcmp.eq.s32.totalorder %v11543_v59, %v11583_v38  ;;  %5001 = vmatmul.bf16.vlgmr.msrb.gmra.mxu1 %v4982_v2  ;;  %5559 = vmatpush.bf16.msra.mxu0 %v5511_v27  ;;  %v4214_v39 = vsel %vm4172_vm14, %v11542_v16, 0.0  ;;  %v11590_v27 = vld [vmem:[#allocation71_spill] sm:$0xff] }
 0x4e6   : > { %v4254_v56 = vadd.f32 %v4213_v1, %v4129_v52  ;;  %v4338_v44 = vsel %vm4296_vm15, %v11544_v25, 0.0  ;;  %v4339_v13 = vsel %vm4297_vm0, %v11544_v25, 0.0  ;;  %v4255_v47 = vadd.f32 %v4214_v39, %v4130_v6 }
 0x4e7   : > { %vm5040_vm1 = vcmp.eq.s32.totalorder %v11566_v58, %v11516_v22  ;;  %vm5041_vm2 = vcmp.eq.s32.totalorder %v11566_v58, %v11565_v19  ;;  %vm5124_vm3 = vcmp.eq.s32.totalorder %v11567_v43, %v11516_v22  ;;  %vm5125_vm4 = vcmp.eq.s32.totalorder %v11567_v43, %v11565_v19 }
 0x4e8   : > { %v4379_v57 = vadd.f32 %v4338_v44, %v4254_v56  ;;  %v5082_v59 = vsel %vm5040_vm1, %v11568_v45, 0.0  ;;  %v5083_v16 = vsel %vm5041_vm2, %v11568_v45, 0.0  ;;  %v4380_v24 = vadd.f32 %v4339_v13, %v4255_v47 }
 0x4e9   : > { %v5166_v25 = vsel %vm5124_vm3, %v11569_v9, 0.0  ;;  %v5167_v53 = vsel %vm5125_vm4, %v11569_v9, 0.0  ;;  %vm5249_vm5 = vcmp.eq.s32.totalorder %v11570_v26, %v11516_v22  ;;  %vm5250_vm8 = vcmp.eq.s32.totalorder %v11570_v26, %v11565_v19 }
 0x4ea   : > { %v5207_v34 = vadd.f32 %v5166_v25, %v5082_v59  ;;  %v5208_v55 = vadd.f32 %v5167_v53, %v5083_v16  ;;  %v5291_v30 = vsel %vm5249_vm5, %v11571_v42, 0.0  ;;  %v4420_v48 = vpack.c.bf16 %v4380_v24, %v4379_v57 }
 0x4eb   : > { %v5292_v33 = vsel %vm5250_vm8, %v11571_v42, 0.0  ;;  %vm5374_vm9 = vcmp.eq.s32.totalorder %v11572_v41, %v11516_v22  ;;  %vm5375_vm10 = vcmp.eq.s32.totalorder %v11572_v41, %v11565_v19  ;;  %vm5062_vm11 = vcmp.eq.s32.totalorder %v11566_v58, %v11589_v8 }
 0x4ec   : > { %v5332_v15 = vadd.f32 %v5291_v30, %v5207_v34  ;;  %v5333_v2 = vadd.f32 %v5292_v33, %v5208_v55  ;;  %v5416_v3 = vsel %vm5374_vm9, %v11574_v4, 0.0  ;;  %v5417_v49 = vsel %vm5375_vm10, %v11574_v4, 0.0  ;;  %4464 = vmatpush.bf16.msrb.mxu3 %v4420_v48 }
 0x4ed   : > { %vm5063_vm12 = vcmp.eq.s32.totalorder %v11566_v58, %v11590_v27  ;;  %vm5146_vm13 = vcmp.eq.s32.totalorder %v11567_v43, %v11589_v8  ;;  %vm5147_vm7 = vcmp.eq.s32.totalorder %v11567_v43, %v11590_v27  ;;  %v5104_v52 = vsel %vm5062_vm11, %v11568_v45, 0.0 }
 0x4ee   : > { %v5457_v22 = vadd.f32 %v5416_v3, %v5332_v15  ;;  %v5458_v19 = vadd.f32 %v5417_v49, %v5333_v2  ;;  %v5105_v6 = vsel %vm5063_vm12, %v11568_v45, 0.0  ;;  %v5188_v1 = vsel %vm5146_vm13, %v11569_v9, 0.0 }
 0x4ef   : > { %v5189_v39 = vsel %vm5147_vm7, %v11569_v9, 0.0  ;;  %vm5271_vm14 = vcmp.eq.s32.totalorder %v11570_v26, %v11589_v8  ;;  %vm5272_vm15 = vcmp.eq.s32.totalorder %v11570_v26, %v11590_v27  ;;  %v5229_v44 = vadd.f32 %v5188_v1, %v5104_v52  ;;  %4465 = vmatmul.bf16.vlgmr.msrb.gmra.mxu3 %v10584_v60 }
 0x4f0   : > { %v5495_v56 = vpack.c.bf16 %v5458_v19, %v5457_v22  ;;  %v5230_v13 = vadd.f32 %v5189_v39, %v5105_v6  ;;  %v5313_v47 = vsel %vm5271_vm14, %v11571_v42, 0.0  ;;  %v5314_v57 = vsel %vm5272_vm15, %v11571_v42, 0.0 }
 0x4f1   : > { %vm5396_vm0 = vcmp.eq.s32.totalorder %v11572_v41, %v11589_v8  ;;  %vm5397_vm1 = vcmp.eq.s32.totalorder %v11572_v41, %v11590_v27  ;;  %vm4528_vm2 = vcmp.eq.s32.totalorder %v11551_v10, %v11584_v62  ;;  %v5354_v59 = vadd.f32 %v5313_v47, %v5229_v44 }
 0x4f2   : > { %5533 = vmatpush.bf16.msra.mxu2 %v5495_v56  ;;  %v5355_v16 = vadd.f32 %v5314_v57, %v5230_v13  ;;  %v5438_v24 = vsel %vm5396_vm0, %v11574_v4, 0.0  ;;  %v5439_v25 = vsel %vm5397_vm1, %v11574_v4, 0.0  ;;  %vm4529_vm3 = vcmp.eq.s32.totalorder %v11551_v10, %v11585_v5  ;;  %v10698_v57 = vpop.f32.mrf.mxu1 }
 0x4f3   : > { %v4570_v60 = vsel %vm4528_vm2, %v11553_v29, 0.0  ;;  %vm4612_vm4 = vcmp.eq.s32.totalorder %v11554_v11, %v11584_v62  ;;  %vm4613_vm5 = vcmp.eq.s32.totalorder %v11554_v11, %v11585_v5  ;;  %v5479_v53 = vadd.f32 %v5438_v24, %v5354_v59 }
 0x4f4   : > { %v5480_v34 = vadd.f32 %v5439_v25, %v5355_v16  ;;  %v4571_v55 = vsel %vm4529_vm3, %v11553_v29, 0.0  ;;  %v4654_v30 = vsel %vm4612_vm4, %v11555_v35, 0.0  ;;  %v4655_v48 = vsel %vm4613_vm5, %v11555_v35, 0.0 }
 0x4f5   : > { %v4695_v33 = vadd.f32 %v4654_v30, %v4570_v60  ;;  %vm4737_vm8 = vcmp.eq.s32.totalorder %v11556_v17, %v11584_v62  ;;  %vm4738_vm9 = vcmp.eq.s32.totalorder %v11556_v17, %v11585_v5  ;;  %v4696_v2 = vadd.f32 %v4655_v48, %v4571_v55 }
 0x4f6   : > { %v5506_v15 = vpack.c.bf16 %v5480_v34, %v5479_v53  ;;  %v4779_v3 = vsel %vm4737_vm8, %v11557_v7, 0.0  ;;  %v4780_v49 = vsel %vm4738_vm9, %v11557_v7, 0.0  ;;  %vm4862_vm10 = vcmp.eq.s32.totalorder %v11558_v18, %v11584_v62 }
 0x4f7   : > { %v4820_v22 = vadd.f32 %v4779_v3, %v4695_v33  ;;  %vm4863_vm11 = vcmp.eq.s32.totalorder %v11558_v18, %v11585_v5  ;;  %vm5070_vm12 = vcmp.eq.s32.totalorder %v11566_v58, %v11573_v14  ;;  %v4821_v19 = vadd.f32 %v4780_v49, %v4696_v2 }
 0x4f8   : > { %5543 = vmatpush.bf16.msra.mxu1 %v5506_v15  ;;  %v4904_v52 = vsel %vm4862_vm10, %v11559_v63, 0.0  ;;  %v4905_v6 = vsel %vm4863_vm11, %v11559_v63, 0.0  ;;  %vm5071_vm13 = vcmp.eq.s32.totalorder %v11566_v58, %v7562_v12  ;;  %v5112_v39 = vsel %vm5070_vm12, %v11568_v45, 0.0 }
 0x4f9   : > { %v4945_v1 = vadd.f32 %v4904_v52, %v4820_v22  ;;  %v5113_v62 = vsel %vm5071_vm13, %v11568_v45, 0.0  ;;  %vm5154_vm7 = vcmp.eq.s32.totalorder %v11567_v43, %v11573_v14  ;;  %v4946_v5 = vadd.f32 %v4905_v6, %v4821_v19 }
 0x4fa   : > { %vm5155_vm14 = vcmp.eq.s32.totalorder %v11567_v43, %v7562_v12  ;;  %v5196_v56 = vsel %vm5154_vm7, %v11569_v9, 0.0  ;;  %vm5279_vm15 = vcmp.eq.s32.totalorder %v11570_v26, %v11573_v14  ;;  %vm5280_vm0 = vcmp.eq.s32.totalorder %v11570_v26, %v7562_v12 }
 0x4fb   : > { %v5197_v44 = vsel %vm5155_vm14, %v11569_v9, 0.0  ;;  %v5237_v13 = vadd.f32 %v5196_v56, %v5112_v39  ;;  %v5321_v47 = vsel %vm5279_vm15, %v11571_v42, 0.0  ;;  %v4971_v59 = vpack.c.bf16 %v4946_v5, %v4945_v1  ;;  %v1789_v39 = vpop.f32.mrf.mxu1  ;;  %v11592_v5 = vld [vmem:[#allocation75_spill] sm:$0xff] }
 0x4fc   : > { %v5238_v16 = vadd.f32 %v5197_v44, %v5113_v62  ;;  %v5322_v24 = vsel %vm5280_vm0, %v11571_v42, 0.0  ;;  %vm5404_vm1 = vcmp.eq.s32.totalorder %v11572_v41, %v11573_v14  ;;  %vm5405_vm2 = vcmp.eq.s32.totalorder %v11572_v41, %v7562_v12  ;;  %v11591_v62 = vld [vmem:[#allocation74_spill] sm:$0xff] }
 0x4fd   : > { %v5362_v25 = vadd.f32 %v5321_v47, %v5237_v13  ;;  %v5446_v60 = vsel %vm5404_vm1, %v11574_v4, 0.0  ;;  %vm5038_vm3 = vcmp.eq.s32.totalorder %v11566_v58, %v11575_v36  ;;  %5006 = vmatpush.bf16.msra.mxu3 %v4971_v59  ;;  %v5447_v34 = vsel %vm5405_vm2, %v11574_v4, 0.0 }
 0x4fe   : > { %v5363_v53 = vadd.f32 %v5322_v24, %v5238_v16  ;;  %vm5039_vm4 = vcmp.eq.s32.totalorder %v11566_v58, %v11576_v20  ;;  %v5080_v55 = vsel %vm5038_vm3, %v11568_v45, 0.0  ;;  %vm5122_vm5 = vcmp.eq.s32.totalorder %v11567_v43, %v11575_v36 }
 0x4ff   : > { %v5487_v30 = vadd.f32 %v5446_v60, %v5362_v25  ;;  %v5081_v14 = vsel %vm5039_vm4, %v11568_v45, 0.0  ;;  %vm5123_vm8 = vcmp.eq.s32.totalorder %v11567_v43, %v11576_v20  ;;  %v5164_v48 = vsel %vm5122_vm5, %v11569_v9, 0.0  ;;  %v550_v60 = vpop.f32.mrf.mxu2 }
 0x500   : > { %v5488_v12 = vadd.f32 %v5447_v34, %v5363_v53  ;;  %v5165_v33 = vsel %vm5123_vm8, %v11569_v9, 0.0  ;;  %vm5247_vm9 = vcmp.eq.s32.totalorder %v11570_v26, %v11575_v36  ;;  %v5205_v15 = vadd.f32 %v5164_v48, %v5080_v55 }
 0x501   : > { %v5206_v2 = vadd.f32 %v5165_v33, %v5081_v14  ;;  %vm5248_vm10 = vcmp.eq.s32.totalorder %v11570_v26, %v11576_v20  ;;  %v5289_v3 = vsel %vm5247_vm9, %v11571_v42, 0.0  ;;  %vm5372_vm11 = vcmp.eq.s32.totalorder %v11572_v41, %v11575_v36 }
 0x502   : > { %v5510_v49 = vpack.c.bf16 %v5488_v12, %v5487_v30  ;;  %v5290_v22 = vsel %vm5248_vm10, %v11571_v42, 0.0  ;;  %vm5373_vm12 = vcmp.eq.s32.totalorder %v11572_v41, %v11576_v20  ;;  %v5330_v19 = vadd.f32 %v5289_v3, %v5205_v15 }
 0x503   : > { %v5331_v52 = vadd.f32 %v5290_v22, %v5206_v2  ;;  %v5414_v6 = vsel %vm5372_vm11, %v11574_v4, 0.0  ;;  %v5415_v1 = vsel %vm5373_vm12, %v11574_v4, 0.0  ;;  %vm5060_vm13 = vcmp.eq.s32.totalorder %v11566_v58, %v11591_v62 }
 0x504   : > { %5560 = vmatpush.bf16.msra.mxu0 %v5510_v49  ;;  %vm5061_vm7 = vcmp.eq.s32.totalorder %v11566_v58, %v11592_v5  ;;  %vm5144_vm14 = vcmp.eq.s32.totalorder %v11567_v43, %v11591_v62  ;;  %vm5145_vm15 = vcmp.eq.s32.totalorder %v11567_v43, %v11592_v5  ;;  %v5455_v36 = vadd.f32 %v5414_v6, %v5330_v19 }
 0x505   : > { %v5456_v20 = vadd.f32 %v5415_v1, %v5331_v52  ;;  %v5102_v56 = vsel %vm5060_vm13, %v11568_v45, 0.0  ;;  %v5103_v44 = vsel %vm5061_vm7, %v11568_v45, 0.0  ;;  %v5186_v13 = vsel %vm5144_vm14, %v11569_v9, 0.0 }
 0x506   : > { %v5187_v47 = vsel %vm5145_vm15, %v11569_v9, 0.0  ;;  %vm5269_vm0 = vcmp.eq.s32.totalorder %v11570_v26, %v11591_v62  ;;  %vm5270_vm1 = vcmp.eq.s32.totalorder %v11570_v26, %v11592_v5  ;;  %v5227_v16 = vadd.f32 %v5186_v13, %v5102_v56 }
 0x507   : > { %v5494_v59 = vpack.c.bf16 %v5456_v20, %v5455_v36  ;;  %v5228_v24 = vadd.f32 %v5187_v47, %v5103_v44  ;;  %v5311_v25 = vsel %vm5269_vm0, %v11571_v42, 0.0  ;;  %v5312_v53 = vsel %vm5270_vm1, %v11571_v42, 0.0 }
 0x508   : > { %vm5394_vm2 = vcmp.eq.s32.totalorder %v11572_v41, %v11591_v62  ;;  %vm5395_vm3 = vcmp.eq.s32.totalorder %v11572_v41, %v11592_v5  ;;  %v570_v34 = vpack.c.bf16 %v550_v60, %v550_v60  ;;  %v5352_v55 = vadd.f32 %v5311_v25, %v5227_v16 }
 0x509   : > { %5534 = vmatpush.bf16.msra.mxu2 %v5494_v59  ;;  %v5353_v30 = vadd.f32 %v5312_v53, %v5228_v24  ;;  %v5436_v14 = vsel %vm5394_vm2, %v11574_v4, 0.0  ;;  %v5437_v12 = vsel %vm5395_vm3, %v11574_v4, 0.0  ;;  %vm4526_vm4 = vcmp.eq.s32.totalorder %v11551_v10, %v11589_v8 }
 0x50a   : > { %v10755_v48 = vunpack.c.l.b16 %v570_v34  ;;  %vm4527_vm5 = vcmp.eq.s32.totalorder %v11551_v10, %v11590_v27  ;;  %vm4610_vm8 = vcmp.eq.s32.totalorder %v11554_v11, %v11589_v8  ;;  %v5477_v33 = vadd.f32 %v5436_v14, %v5352_v55 }
 0x50b   : > { %v5478_v15 = vadd.f32 %v5437_v12, %v5353_v30  ;;  %v4568_v2 = vsel %vm4526_vm4, %v11553_v29, 0.0  ;;  %v4569_v3 = vsel %vm4527_vm5, %v11553_v29, 0.0  ;;  %vm4611_vm9 = vcmp.eq.s32.totalorder %v11554_v11, %v11590_v27 }
 0x50c   : > { %v5520_v49 = vpack.c.b16 %v10755_v48, %v10755_v48  ;;  %v4652_v22 = vsel %vm4610_vm8, %v11555_v35, 0.0  ;;  %vm4735_vm10 = vcmp.eq.s32.totalorder %v11556_v17, %v11589_v8  ;;  %v4653_v52 = vsel %vm4611_vm9, %v11555_v35, 0.0 }
 0x50d   : > { %v5505_v19 = vpack.c.bf16 %v5478_v15, %v5477_v33  ;;  %v4693_v6 = vadd.f32 %v4652_v22, %v4568_v2  ;;  %vm4736_vm11 = vcmp.eq.s32.totalorder %v11556_v17, %v11590_v27  ;;  %v4694_v1 = vadd.f32 %v4653_v52, %v4569_v3 }
 0x50e   : > { %v4777_v39 = vsel %vm4735_vm10, %v11557_v7, 0.0  ;;  %v4778_v36 = vsel %vm4736_vm11, %v11557_v7, 0.0  ;;  %vm4860_vm12 = vcmp.eq.s32.totalorder %v11558_v18, %v11589_v8  ;;  %vm4861_vm13 = vcmp.eq.s32.totalorder %v11558_v18, %v11590_v27 }
 0x50f   : > { %5544 = vmatpush.bf16.msra.mxu1 %v5505_v19  ;;  %v4818_v20 = vadd.f32 %v4777_v39, %v4693_v6  ;;  %v4902_v56 = vsel %vm4860_vm12, %v11559_v63, 0.0  ;;  %vm5068_vm7 = vcmp.eq.s32.totalorder %v11566_v58, %v7661_v61  ;;  %v4819_v44 = vadd.f32 %v4778_v36, %v4694_v1  ;;  %v11593_v36 = vld [vmem:[#allocation78_spill] sm:$0xff] }
 0x510   : > { %v4903_v13 = vsel %vm4861_vm13, %v11559_v63, 0.0  ;;  %vm5069_vm14 = vcmp.eq.s32.totalorder %v11566_v58, %v7666_v28  ;;  %v5110_v47 = vsel %vm5068_vm7, %v11568_v45, 0.0  ;;  %vm5152_vm15 = vcmp.eq.s32.totalorder %v11567_v43, %v7661_v61 }
 0x511   : > { %v4943_v59 = vadd.f32 %v4902_v56, %v4818_v20  ;;  %v5111_v8 = vsel %vm5069_vm14, %v11568_v45, 0.0  ;;  %vm5153_vm0 = vcmp.eq.s32.totalorder %v11567_v43, %v7666_v28  ;;  %v4944_v27 = vadd.f32 %v4903_v13, %v4819_v44 }
 0x512   : > { %v5194_v16 = vsel %vm5152_vm15, %v11569_v9, 0.0  ;;  %v5195_v24 = vsel %vm5153_vm0, %v11569_v9, 0.0  ;;  %vm5277_vm1 = vcmp.eq.s32.totalorder %v11570_v26, %v7661_v61  ;;  %vm5278_vm2 = vcmp.eq.s32.totalorder %v11570_v26, %v7666_v28 }
 0x513   : > { %v5235_v25 = vadd.f32 %v5194_v16, %v5110_v47  ;;  %v5236_v60 = vadd.f32 %v5195_v24, %v5111_v8  ;;  %v5319_v53 = vsel %vm5277_vm1, %v11571_v42, 0.0  ;;  %v4970_v34 = vpack.c.bf16 %v4944_v27, %v4943_v59  ;;  %v11594_v47 = vld [vmem:[#allocation79_spill] sm:$0xff] }
 0x514   : > { %v5320_v55 = vsel %vm5278_vm2, %v11571_v42, 0.0  ;;  %vm5402_vm3 = vcmp.eq.s32.totalorder %v11572_v41, %v7661_v61  ;;  %vm5403_vm4 = vcmp.eq.s32.totalorder %v11572_v41, %v7666_v28  ;;  %vm5036_vm5 = vcmp.eq.s32.totalorder %v11566_v58, %v11580_v46 }
 0x515   : > { %v5360_v30 = vadd.f32 %v5319_v53, %v5235_v25  ;;  %v5361_v14 = vadd.f32 %v5320_v55, %v5236_v60  ;;  %v5444_v12 = vsel %vm5402_vm3, %v11574_v4, 0.0  ;;  %v5445_v33 = vsel %vm5403_vm4, %v11574_v4, 0.0  ;;  %5007 = vmatpush.bf16.msra.mxu3 %v4970_v34  ;;  %v10847_v25 = vpop.f32.mrf.mxu2 }
 0x516   : > { %vm5037_vm8 = vcmp.eq.s32.totalorder %v11566_v58, %v11581_v37  ;;  %vm5120_vm9 = vcmp.eq.s32.totalorder %v11567_v43, %v11580_v46  ;;  %vm5121_vm10 = vcmp.eq.s32.totalorder %v11567_v43, %v11581_v37  ;;  %v5078_v15 = vsel %vm5036_vm5, %v11568_v45, 0.0 }
 0x517   : > { %v5485_v61 = vadd.f32 %v5444_v12, %v5360_v30  ;;  %v5486_v28 = vadd.f32 %v5445_v33, %v5361_v14  ;;  %v5079_v2 = vsel %vm5037_vm8, %v11568_v45, 0.0  ;;  %v5162_v3 = vsel %vm5120_vm9, %v11569_v9, 0.0 }
 0x518   : > { %v5163_v22 = vsel %vm5121_vm10, %v11569_v9, 0.0  ;;  %vm5245_vm11 = vcmp.eq.s32.totalorder %v11570_v26, %v11580_v46  ;;  %vm5246_vm12 = vcmp.eq.s32.totalorder %v11570_v26, %v11581_v37  ;;  %v5203_v52 = vadd.f32 %v5162_v3, %v5078_v15 }
 0x519   : > { %v5509_v19 = vpack.c.bf16 %v5486_v28, %v5485_v61  ;;  %v5204_v6 = vadd.f32 %v5163_v22, %v5079_v2  ;;  %v5287_v1 = vsel %vm5245_vm11, %v11571_v42, 0.0  ;;  %v5288_v39 = vsel %vm5246_vm12, %v11571_v42, 0.0 }
 0x51a   : > { %vm5370_vm13 = vcmp.eq.s32.totalorder %v11572_v41, %v11580_v46  ;;  %vm5371_vm7 = vcmp.eq.s32.totalorder %v11572_v41, %v11581_v37  ;;  %vm5058_vm14 = vcmp.eq.s32.totalorder %v11566_v58, %v11593_v36  ;;  %v5328_v20 = vadd.f32 %v5287_v1, %v5203_v52  ;;  %v10876_v1 = vpop.f32.mrf.mxu0 }
 0x51b   : > { %5561 = vmatpush.bf16.msra.mxu0 %v5509_v19  ;;  %v5329_v56 = vadd.f32 %v5288_v39, %v5204_v6  ;;  %v5412_v44 = vsel %vm5370_vm13, %v11574_v4, 0.0  ;;  %v5413_v13 = vsel %vm5371_vm7, %v11574_v4, 0.0  ;;  %vm5059_vm15 = vcmp.eq.s32.totalorder %v11566_v58, %v11594_v47  ;;  %v10874_v6 = vpop.f32.mrf.mxu3 }
 0x51c   : > { %v5100_v59 = vsel %vm5058_vm14, %v11568_v45, 0.0  ;;  %vm5142_vm0 = vcmp.eq.s32.totalorder %v11567_v43, %v11593_v36  ;;  %vm5143_vm1 = vcmp.eq.s32.totalorder %v11567_v43, %v11594_v47  ;;  %v5453_v46 = vadd.f32 %v5412_v44, %v5328_v20 }
 0x51d   : > { %v5454_v37 = vadd.f32 %v5413_v13, %v5329_v56  ;;  %v5101_v8 = vsel %vm5059_vm15, %v11568_v45, 0.0  ;;  %v5184_v27 = vsel %vm5142_vm0, %v11569_v9, 0.0  ;;  %v5185_v16 = vsel %vm5143_vm1, %v11569_v9, 0.0 }
 0x51e   : > { %v5225_v24 = vadd.f32 %v5184_v27, %v5100_v59  ;;  %vm5267_vm2 = vcmp.eq.s32.totalorder %v11570_v26, %v11593_v36  ;;  %vm5268_vm3 = vcmp.eq.s32.totalorder %v11570_v26, %v11594_v47  ;;  %v5226_v53 = vadd.f32 %v5185_v16, %v5101_v8  ;;  %v1802_v59 = vpop.f32.mrf.mxu2 }
 0x51f   : > { %v5493_v60 = vpack.c.bf16 %v5454_v37, %v5453_v46  ;;  %v5309_v34 = vsel %vm5267_vm2, %v11571_v42, 0.0  ;;  %v5310_v55 = vsel %vm5268_vm3, %v11571_v42, 0.0  ;;  %vm5392_vm4 = vcmp.eq.s32.totalorder %v11572_v41, %v11593_v36 }
 0x520   : > { %v5350_v30 = vadd.f32 %v5309_v34, %v5225_v24  ;;  %vm5393_vm5 = vcmp.eq.s32.totalorder %v11572_v41, %v11594_v47  ;;  %vm4524_vm8 = vcmp.eq.s32.totalorder %v11551_v10, %v11591_v62  ;;  %v5351_v14 = vadd.f32 %v5310_v55, %v5226_v53 }
 0x521   : > { %5535 = vmatpush.bf16.msra.mxu2 %v5493_v60  ;;  %v5434_v12 = vsel %vm5392_vm4, %v11574_v4, 0.0  ;;  %v5435_v33 = vsel %vm5393_vm5, %v11574_v4, 0.0  ;;  %vm4525_vm9 = vcmp.eq.s32.totalorder %v11551_v10, %v11592_v5  ;;  %v4566_v28 = vsel %vm4524_vm8, %v11553_v29, 0.0 }
 0x522   : > { %v5475_v61 = vadd.f32 %v5434_v12, %v5350_v30  ;;  %v4567_v15 = vsel %vm4525_vm9, %v11553_v29, 0.0  ;;  %vm4608_vm10 = vcmp.eq.s32.totalorder %v11554_v11, %v11591_v62  ;;  %v5476_v2 = vadd.f32 %v5435_v33, %v5351_v14 }
 0x523   : > { %vm4609_vm11 = vcmp.eq.s32.totalorder %v11554_v11, %v11592_v5  ;;  %v4650_v3 = vsel %vm4608_vm10, %v11555_v35, 0.0  ;;  %vm4733_vm12 = vcmp.eq.s32.totalorder %v11556_v17, %v11591_v62  ;;  %vm4734_vm13 = vcmp.eq.s32.totalorder %v11556_v17, %v11592_v5 }
 0x524   : > { %v4651_v22 = vsel %vm4609_vm11, %v11555_v35, 0.0  ;;  %v4691_v19 = vadd.f32 %v4650_v3, %v4566_v28  ;;  %v4775_v52 = vsel %vm4733_vm12, %v11557_v7, 0.0  ;;  %v5504_v39 = vpack.c.bf16 %v5476_v2, %v5475_v61  ;;  %v1734_v28 = vpop.f32.mrf.mxu3 }
 0x525   : > { %v4692_v20 = vadd.f32 %v4651_v22, %v4567_v15  ;;  %v4776_v56 = vsel %vm4734_vm13, %v11557_v7, 0.0  ;;  %vm4858_vm7 = vcmp.eq.s32.totalorder %v11558_v18, %v11591_v62  ;;  %vm4859_vm14 = vcmp.eq.s32.totalorder %v11558_v18, %v11592_v5  ;;  %v1747_v15 = vpop.f32.mrf.mxu0 }
 0x526   : > { %v4816_v44 = vadd.f32 %v4775_v52, %v4691_v19  ;;  %v4900_v13 = vsel %vm4858_vm7, %v11559_v63, 0.0  ;;  %vm5066_vm15 = vcmp.eq.s32.totalorder %v11566_v58, %v7770_v0  ;;  %5545 = vmatpush.bf16.msra.mxu1 %v5504_v39  ;;  %v4901_v37 = vsel %vm4859_vm14, %v11559_v63, 0.0 }
 0x527   : > { %v4817_v46 = vadd.f32 %v4776_v56, %v4692_v20  ;;  %vm5067_vm0 = vcmp.eq.s32.totalorder %v11566_v58, %v7773_v50  ;;  %v5108_v8 = vsel %vm5066_vm15, %v11568_v45, 0.0  ;;  %vm5150_vm1 = vcmp.eq.s32.totalorder %v11567_v43, %v7770_v0 }
 0x528   : > { %v4941_v62 = vadd.f32 %v4900_v13, %v4816_v44  ;;  %v5109_v27 = vsel %vm5067_vm0, %v11568_v45, 0.0  ;;  %vm5151_vm2 = vcmp.eq.s32.totalorder %v11567_v43, %v7773_v50  ;;  %v5192_v16 = vsel %vm5150_vm1, %v11569_v9, 0.0 }
 0x529   : > { %v4942_v5 = vadd.f32 %v4901_v37, %v4817_v46  ;;  %v5193_v24 = vsel %vm5151_vm2, %v11569_v9, 0.0  ;;  %vm5275_vm3 = vcmp.eq.s32.totalorder %v11570_v26, %v7770_v0  ;;  %v5233_v60 = vadd.f32 %v5192_v16, %v5108_v8 }
 0x52a   : > { %v5234_v53 = vadd.f32 %v5193_v24, %v5109_v27  ;;  %vm5276_vm4 = vcmp.eq.s32.totalorder %v11570_v26, %v7773_v50  ;;  %v5317_v34 = vsel %vm5275_vm3, %v11571_v42, 0.0  ;;  %vm5400_vm5 = vcmp.eq.s32.totalorder %v11572_v41, %v7770_v0 }
 0x52b   : > { %v4969_v55 = vpack.c.bf16 %v4942_v5, %v4941_v62  ;;  %v5318_v30 = vsel %vm5276_vm4, %v11571_v42, 0.0  ;;  %vm5401_vm8 = vcmp.eq.s32.totalorder %v11572_v41, %v7773_v50  ;;  %v5358_v14 = vadd.f32 %v5317_v34, %v5233_v60 }
 0x52c   : > { %v5359_v12 = vadd.f32 %v5318_v30, %v5234_v53  ;;  %v5442_v33 = vsel %vm5400_vm5, %v11574_v4, 0.0  ;;  %v5443_v61 = vsel %vm5401_vm8, %v11574_v4, 0.0  ;;  %vm5034_vm9 = vcmp.eq.s32.totalorder %v11566_v58, %v11582_v51 }
 0x52d   : > { %5008 = vmatpush.bf16.msra.mxu3 %v4969_v55  ;;  %vm5035_vm10 = vcmp.eq.s32.totalorder %v11566_v58, %v11583_v38  ;;  %vm5118_vm11 = vcmp.eq.s32.totalorder %v11567_v43, %v11582_v51  ;;  %vm5119_vm12 = vcmp.eq.s32.totalorder %v11567_v43, %v11583_v38  ;;  %v5483_v0 = vadd.f32 %v5442_v33, %v5358_v14 }
 0x52e   : > { %v5484_v50 = vadd.f32 %v5443_v61, %v5359_v12  ;;  %v5076_v2 = vsel %vm5034_vm9, %v11568_v45, 0.0  ;;  %v5077_v3 = vsel %vm5035_vm10, %v11568_v45, 0.0  ;;  %v5160_v22 = vsel %vm5118_vm11, %v11569_v9, 0.0 }
 0x52f   : > { %v5161_v19 = vsel %vm5119_vm12, %v11569_v9, 0.0  ;;  %vm5243_vm13 = vcmp.eq.s32.totalorder %v11570_v26, %v11582_v51  ;;  %vm5244_vm7 = vcmp.eq.s32.totalorder %v11570_v26, %v11583_v38  ;;  %v5201_v39 = vadd.f32 %v5160_v22, %v5076_v2 }
 0x530   : > { %v5508_v52 = vpack.c.bf16 %v5484_v50, %v5483_v0  ;;  %v5202_v20 = vadd.f32 %v5161_v19, %v5077_v3  ;;  %v5285_v56 = vsel %vm5243_vm13, %v11571_v42, 0.0  ;;  %v5286_v44 = vsel %vm5244_vm7, %v11571_v42, 0.0 }
 0x531   : > { %vm5368_vm14 = vcmp.eq.s32.totalorder %v11572_v41, %v11582_v51  ;;  %vm5369_vm15 = vcmp.eq.s32.totalorder %v11572_v41, %v11583_v38  ;;  %vm5056_vm0 = vcmp.eq.s32.totalorder %v11566_v58, %v11478_v54  ;;  %v5326_v13 = vadd.f32 %v5285_v56, %v5201_v39  ;;  %v11595_v56 = vld [vmem:[#allocation87_spill] sm:$0xff] }
 0x532   : > { %5562 = vmatpush.bf16.msra.mxu0 %v5508_v52  ;;  %v5327_v59 = vadd.f32 %v5286_v44, %v5202_v20  ;;  %v5410_v46 = vsel %vm5368_vm14, %v11574_v4, 0.0  ;;  %v5411_v37 = vsel %vm5369_vm15, %v11574_v4, 0.0  ;;  %vm5057_vm1 = vcmp.eq.s32.totalorder %v11566_v58, %v11507_v23 }
 0x533   : > { %v5098_v8 = vsel %vm5056_vm0, %v11568_v45, 0.0  ;;  %vm5140_vm2 = vcmp.eq.s32.totalorder %v11567_v43, %v11478_v54  ;;  %vm5141_vm3 = vcmp.eq.s32.totalorder %v11567_v43, %v11507_v23  ;;  %v5451_v51 = vadd.f32 %v5410_v46, %v5326_v13 }
 0x534   : > { %v5452_v38 = vadd.f32 %v5411_v37, %v5327_v59  ;;  %v5099_v62 = vsel %vm5057_vm1, %v11568_v45, 0.0  ;;  %v5182_v27 = vsel %vm5140_vm2, %v11569_v9, 0.0  ;;  %v5183_v5 = vsel %vm5141_vm3, %v11569_v9, 0.0 }
 0x535   : > { %v5223_v16 = vadd.f32 %v5182_v27, %v5098_v8  ;;  %vm5265_vm4 = vcmp.eq.s32.totalorder %v11570_v26, %v11478_v54  ;;  %vm5266_vm5 = vcmp.eq.s32.totalorder %v11570_v26, %v11507_v23  ;;  %5746 = vmatmul.msk.bf16.vlgmr.msra.gmra.mxu0 %vm1715_vm6, %v5520_v49  ;;  %v5224_v60 = vadd.f32 %v5183_v5, %v5099_v62 }
 0x536   : > { %v5492_v24 = vpack.c.bf16 %v5452_v38, %v5451_v51  ;;  %v5307_v53 = vsel %vm5265_vm4, %v11571_v42, 0.0  ;;  %v5308_v34 = vsel %vm5266_vm5, %v11571_v42, 0.0  ;;  %vm5390_vm8 = vcmp.eq.s32.totalorder %v11572_v41, %v11478_v54 }
 0x537   : > { %v5348_v55 = vadd.f32 %v5307_v53, %v5223_v16  ;;  %vm5391_vm9 = vcmp.eq.s32.totalorder %v11572_v41, %v11507_v23  ;;  %vm4522_vm10 = vcmp.eq.s32.totalorder %v11551_v10, %v11593_v36  ;;  %v5349_v48 = vadd.f32 %v5308_v34, %v5224_v60 }
 0x538   : > { %5536 = vmatpush.bf16.msra.mxu2 %v5492_v24  ;;  %v5432_v49 = vsel %vm5390_vm8, %v11574_v4, 0.0  ;;  %v5433_v30 = vsel %vm5391_vm9, %v11574_v4, 0.0  ;;  %vm4523_vm6 = vcmp.eq.s32.totalorder %v11551_v10, %v11594_v47  ;;  %v4564_v12 = vsel %vm4522_vm10, %v11553_v29, 0.0 }
 0x539   : > { %v5473_v14 = vadd.f32 %v5432_v49, %v5348_v55  ;;  %v4565_v33 = vsel %vm4523_vm6, %v11553_v29, 0.0  ;;  %vm4606_vm11 = vcmp.eq.s32.totalorder %v11554_v11, %v11593_v36  ;;  %v5474_v61 = vadd.f32 %v5433_v30, %v5349_v48 }
 0x53a   : > { %vm4607_vm12 = vcmp.eq.s32.totalorder %v11554_v11, %v11594_v47  ;;  %v4648_v28 = vsel %vm4606_vm11, %v11555_v35, 0.0  ;;  %vm4731_vm13 = vcmp.eq.s32.totalorder %v11556_v17, %v11593_v36  ;;  %vm4732_vm7 = vcmp.eq.s32.totalorder %v11556_v17, %v11594_v47 }
 0x53b   : > { %v4649_v15 = vsel %vm4607_vm12, %v11555_v35, 0.0  ;;  %v4689_v0 = vadd.f32 %v4648_v28, %v4564_v12  ;;  %v4773_v50 = vsel %vm4731_vm13, %v11557_v7, 0.0  ;;  %5537 = vmatmul.bf16.vlgmr.msra.gmra.mxu2 %v10309_v32  ;;  %v5503_v2 = vpack.c.bf16 %v5474_v61, %v5473_v14 }
 0x53c   : > { %v4690_v3 = vadd.f32 %v4649_v15, %v4565_v33  ;;  %v4774_v22 = vsel %vm4732_vm7, %v11557_v7, 0.0  ;;  %vm4856_vm14 = vcmp.eq.s32.totalorder %v11558_v18, %v11593_v36  ;;  %vm4857_vm15 = vcmp.eq.s32.totalorder %v11558_v18, %v11594_v47 }
 0x53d   : > { %v4814_v19 = vadd.f32 %v4773_v50, %v4689_v0  ;;  %v4898_v52 = vsel %vm4856_vm14, %v11559_v63, 0.0  ;;  %v10987_v39 = vadd.f32 %v10876_v1, %v10874_v6  ;;  %5546 = vmatpush.bf16.msra.mxu1 %v5503_v2  ;;  %v4899_v32 = vsel %vm4857_vm15, %v11559_v63, 0.0  ;;  %v11596_v0 = vld [vmem:[#allocation90_spill] sm:$0xff]  ;;  %v11597_v50 = vld [vmem:[#allocation91_spill] sm:$0xff] }
 0x53e   : > { %v4815_v20 = vadd.f32 %v4774_v22, %v4690_v3  ;;  %vm5054_vm0 = vcmp.eq.s32.totalorder %v11566_v58, %v11491_v21  ;;  %vm5055_vm1 = vcmp.eq.s32.totalorder %v11566_v58, %v11595_v56  ;;  %vm5138_vm2 = vcmp.eq.s32.totalorder %v11567_v43, %v11491_v21 }
 0x53f   : > { %v4939_v36 = vadd.f32 %v4898_v52, %v4814_v19  ;;  %v5096_v44 = vsel %vm5054_vm0, %v11568_v45, 0.0  ;;  %v5097_v47 = vsel %vm5055_vm1, %v11568_v45, 0.0  ;;  %vm5139_vm3 = vcmp.eq.s32.totalorder %v11567_v43, %v11595_v56  ;;  %v11054_v52 = vpop.f32.mrf.mxu3 }
 0x540   : > { %v4940_v6 = vadd.f32 %v4899_v32, %v4815_v20  ;;  %v5180_v1 = vsel %vm5138_vm2, %v11569_v9, 0.0  ;;  %vm5263_vm4 = vcmp.eq.s32.totalorder %v11570_v26, %v11491_v21  ;;  %v5181_v13 = vsel %vm5139_vm3, %v11569_v9, 0.0 }
 0x541   : > { %v5221_v59 = vadd.f32 %v5180_v1, %v5096_v44  ;;  %vm5264_vm5 = vcmp.eq.s32.totalorder %v11570_v26, %v11595_v56  ;;  %v5305_v46 = vsel %vm5263_vm4, %v11571_v42, 0.0  ;;  %v5222_v8 = vadd.f32 %v5181_v13, %v5097_v47 }
 0x542   : > { %v4968_v37 = vpack.c.bf16 %v4940_v6, %v4939_v36  ;;  %v5306_v51 = vsel %vm5264_vm5, %v11571_v42, 0.0  ;;  %vm5388_vm8 = vcmp.eq.s32.totalorder %v11572_v41, %v11491_v21  ;;  %vm5389_vm9 = vcmp.eq.s32.totalorder %v11572_v41, %v11595_v56 }
 0x543   : > { %v5346_v38 = vadd.f32 %v5305_v46, %v5221_v59  ;;  %v5430_v62 = vsel %vm5388_vm8, %v11574_v4, 0.0  ;;  %vm4520_vm10 = vcmp.eq.s32.totalorder %v11551_v10, %v11478_v54  ;;  %v5347_v27 = vadd.f32 %v5306_v51, %v5222_v8  ;;  %v11066_v46 = vpop.f32.mrf.mxu0  ;;  %v11077_v51 = vpop.f32.mrf.mxu2 }
 0x544   : > { %5009 = vmatpush.bf16.msra.mxu3 %v4968_v37  ;;  %v5431_v5 = vsel %vm5389_vm9, %v11574_v4, 0.0  ;;  %vm4521_vm6 = vcmp.eq.s32.totalorder %v11551_v10, %v11507_v23  ;;  %v4562_v16 = vsel %vm4520_vm10, %v11553_v29, 0.0  ;;  %vm4604_vm11 = vcmp.eq.s32.totalorder %v11554_v11, %v11478_v54  ;;  %v11068_v37 = vpop.f32.mrf.mxu1 }
 0x545   : > { %v5471_v24 = vadd.f32 %v5430_v62, %v5346_v38  ;;  %v4563_v60 = vsel %vm4521_vm6, %v11553_v29, 0.0  ;;  %vm4605_vm12 = vcmp.eq.s32.totalorder %v11554_v11, %v11507_v23  ;;  %v5472_v53 = vadd.f32 %v5431_v5, %v5347_v27 }
 0x546   : > { %v4646_v34 = vsel %vm4604_vm11, %v11555_v35, 0.0  ;;  %v4647_v55 = vsel %vm4605_vm12, %v11555_v35, 0.0  ;;  %vm4729_vm13 = vcmp.eq.s32.totalorder %v11556_v17, %v11478_v54  ;;  %vm4730_vm7 = vcmp.eq.s32.totalorder %v11556_v17, %v11507_v23 }
 0x547   : > { %v4687_v48 = vadd.f32 %v4646_v34, %v4562_v16  ;;  %v4688_v49 = vadd.f32 %v4647_v55, %v4563_v60  ;;  %v4771_v30 = vsel %vm4729_vm13, %v11557_v7, 0.0  ;;  %v5502_v14 = vpack.c.bf16 %v5472_v53, %v5471_v24 }
 0x548   : > { %v4772_v12 = vsel %vm4730_vm7, %v11557_v7, 0.0  ;;  %vm4854_vm14 = vcmp.eq.s32.totalorder %v11558_v18, %v11478_v54  ;;  %vm4855_vm15 = vcmp.eq.s32.totalorder %v11558_v18, %v11507_v23  ;;  %vm5052_vm0 = vcmp.eq.s32.totalorder %v11566_v58, %v11596_v0 }
 0x549   : > { %v4812_v33 = vadd.f32 %v4771_v30, %v4687_v48  ;;  %v4813_v61 = vadd.f32 %v4772_v12, %v4688_v49  ;;  %v4896_v28 = vsel %vm4854_vm14, %v11559_v63, 0.0  ;;  %v4897_v15 = vsel %vm4855_vm15, %v11559_v63, 0.0  ;;  %5547 = vmatpush.bf16.msra.mxu1 %v5502_v14  ;;  %v11598_v49 = vld [vmem:[#allocation93_spill] sm:$0xff]  ;;  %v1760_v30 = vpop.f32.mrf.mxu3 }
 0x54a   : > { %vm5053_vm1 = vcmp.eq.s32.totalorder %v11566_v58, %v11597_v50  ;;  %vm5136_vm2 = vcmp.eq.s32.totalorder %v11567_v43, %v11596_v0  ;;  %vm5137_vm3 = vcmp.eq.s32.totalorder %v11567_v43, %v11597_v50  ;;  %v5094_v2 = vsel %vm5052_vm0, %v11568_v45, 0.0 }
 0x54b   : > { %v4937_v54 = vadd.f32 %v4896_v28, %v4812_v33  ;;  %v4938_v23 = vadd.f32 %v4897_v15, %v4813_v61  ;;  %v5095_v3 = vsel %vm5053_vm1, %v11568_v45, 0.0  ;;  %v5178_v22 = vsel %vm5136_vm2, %v11569_v9, 0.0  ;;  %v11599_v61 = vld [vmem:[#allocation94_spill] sm:$0xff] }
 0x54c   : > { %v5179_v19 = vsel %vm5137_vm3, %v11569_v9, 0.0  ;;  %vm5261_vm4 = vcmp.eq.s32.totalorder %v11570_v26, %v11596_v0  ;;  %vm5262_vm5 = vcmp.eq.s32.totalorder %v11570_v26, %v11597_v50  ;;  %v5219_v32 = vadd.f32 %v5178_v22, %v5094_v2  ;;  %v2337_v2 = vpop.f32.mrf.mxu1  ;;  %v2350_v22 = vpop.f32.mrf.mxu2 }
 0x54d   : > { %v4967_v20 = vpack.c.bf16 %v4938_v23, %v4937_v54  ;;  %v5220_v36 = vadd.f32 %v5179_v19, %v5095_v3  ;;  %v5303_v44 = vsel %vm5261_vm4, %v11571_v42, 0.0  ;;  %v5304_v47 = vsel %vm5262_vm5, %v11571_v42, 0.0  ;;  %v2324_v23 = vpop.f32.mrf.mxu0 }
 0x54e   : > { %vm5386_vm8 = vcmp.eq.s32.totalorder %v11572_v41, %v11596_v0  ;;  %vm5387_vm9 = vcmp.eq.s32.totalorder %v11572_v41, %v11597_v50  ;;  %vm4518_vm10 = vcmp.eq.s32.totalorder %v11551_v10, %v11491_v21  ;;  %v5344_v6 = vadd.f32 %v5303_v44, %v5219_v32 }
 0x54f   : > { %5010 = vmatpush.bf16.msra.mxu3 %v4967_v20  ;;  %v5345_v1 = vadd.f32 %v5304_v47, %v5220_v36  ;;  %v5428_v13 = vsel %vm5386_vm8, %v11574_v4, 0.0  ;;  %v5429_v59 = vsel %vm5387_vm9, %v11574_v4, 0.0  ;;  %vm4519_vm6 = vcmp.eq.s32.totalorder %v11551_v10, %v11595_v56 }
 0x550   : > { %v4560_v8 = vsel %vm4518_vm10, %v11553_v29, 0.0  ;;  %vm4602_vm11 = vcmp.eq.s32.totalorder %v11554_v11, %v11491_v21  ;;  %vm4603_vm12 = vcmp.eq.s32.totalorder %v11554_v11, %v11595_v56  ;;  %v5469_v38 = vadd.f32 %v5428_v13, %v5344_v6 }
 0x551   : > { %v5470_v62 = vadd.f32 %v5429_v59, %v5345_v1  ;;  %v4561_v27 = vsel %vm4519_vm6, %v11553_v29, 0.0  ;;  %v4644_v5 = vsel %vm4602_vm11, %v11555_v35, 0.0  ;;  %v4645_v16 = vsel %vm4603_vm12, %v11555_v35, 0.0 }
 0x552   : > { %v4685_v24 = vadd.f32 %v4644_v5, %v4560_v8  ;;  %vm4727_vm13 = vcmp.eq.s32.totalorder %v11556_v17, %v11491_v21  ;;  %vm4728_vm7 = vcmp.eq.s32.totalorder %v11556_v17, %v11595_v56  ;;  %v4686_v53 = vadd.f32 %v4645_v16, %v4561_v27 }
 0x553   : > { %v5501_v60 = vpack.c.bf16 %v5470_v62, %v5469_v38  ;;  %v4769_v34 = vsel %vm4727_vm13, %v11557_v7, 0.0  ;;  %v4770_v55 = vsel %vm4728_vm7, %v11557_v7, 0.0  ;;  %vm4852_vm14 = vcmp.eq.s32.totalorder %v11558_v18, %v11491_v21 }
 0x554   : > { %v4810_v48 = vadd.f32 %v4769_v34, %v4685_v24  ;;  %vm4853_vm15 = vcmp.eq.s32.totalorder %v11558_v18, %v11595_v56  ;;  %vm5050_vm0 = vcmp.eq.s32.totalorder %v11566_v58, %v11598_v49  ;;  %v4811_v14 = vadd.f32 %v4770_v55, %v4686_v53  ;;  %v11140_v5 = vpop.f32.mrf.mxu1  ;;  %v2871_v34 = vpop.f32.mrf.mxu2 }
 0x555   : > { %5548 = vmatpush.bf16.msra.mxu1 %v5501_v60  ;;  %v4894_v12 = vsel %vm4852_vm14, %v11559_v63, 0.0  ;;  %v4895_v33 = vsel %vm4853_vm15, %v11559_v63, 0.0  ;;  %vm5051_vm1 = vcmp.eq.s32.totalorder %v11566_v58, %v11599_v61  ;;  %v5092_v15 = vsel %vm5050_vm0, %v11568_v45, 0.0  ;;  %v2884_v27 = vpop.f32.mrf.mxu0 }
 0x556   : > { %v4935_v28 = vadd.f32 %v4894_v12, %v4810_v48  ;;  %v5093_v21 = vsel %vm5051_vm1, %v11568_v45, 0.0  ;;  %vm5134_vm2 = vcmp.eq.s32.totalorder %v11567_v43, %v11598_v49  ;;  %v4936_v56 = vadd.f32 %v4895_v33, %v4811_v14 }
 0x557   : > { %vm5135_vm3 = vcmp.eq.s32.totalorder %v11567_v43, %v11599_v61  ;;  %v5176_v54 = vsel %vm5134_vm2, %v11569_v9, 0.0  ;;  %vm5259_vm4 = vcmp.eq.s32.totalorder %v11570_v26, %v11598_v49  ;;  %vm5260_vm5 = vcmp.eq.s32.totalorder %v11570_v26, %v11599_v61 }
 0x558   : > { %v5177_v58 = vsel %vm5135_vm3, %v11569_v9, 0.0  ;;  %v5217_v3 = vadd.f32 %v5176_v54, %v5092_v15  ;;  %v5301_v45 = vsel %vm5259_vm4, %v11571_v42, 0.0  ;;  %v4966_v19 = vpack.c.bf16 %v4936_v56, %v4935_v28 }
 0x559   : > { %v5218_v20 = vadd.f32 %v5177_v58, %v5093_v21  ;;  %v5302_v43 = vsel %vm5260_vm5, %v11571_v42, 0.0  ;;  %vm5384_vm8 = vcmp.eq.s32.totalorder %v11572_v41, %v11598_v49  ;;  %vm5385_vm9 = vcmp.eq.s32.totalorder %v11572_v41, %v11599_v61  ;;  %v1813_v41 = vpop.f32.mrf.mxu3 }
 0x55a   : > { %v5342_v32 = vadd.f32 %v5301_v45, %v5217_v3  ;;  %v5426_v9 = vsel %vm5384_vm8, %v11574_v4, 0.0  ;;  %vm4516_vm10 = vcmp.eq.s32.totalorder %v11551_v10, %v11596_v0  ;;  %5011 = vmatpush.bf16.msra.mxu3 %v4966_v19  ;;  %v5427_v36 = vsel %vm5385_vm9, %v11574_v4, 0.0 }
 0x55b   : > { %v5343_v26 = vadd.f32 %v5302_v43, %v5218_v20  ;;  %vm4517_vm6 = vcmp.eq.s32.totalorder %v11551_v10, %v11597_v50  ;;  %v4558_v42 = vsel %vm4516_vm10, %v11553_v29, 0.0  ;;  %vm4600_vm11 = vcmp.eq.s32.totalorder %v11554_v11, %v11596_v0 }
 0x55c   : > { %v5467_v44 = vadd.f32 %v5426_v9, %v5342_v32  ;;  %v4559_v47 = vsel %vm4517_vm6, %v11553_v29, 0.0  ;;  %vm4601_vm12 = vcmp.eq.s32.totalorder %v11554_v11, %v11597_v50  ;;  %v4642_v1 = vsel %vm4600_vm11, %v11555_v35, 0.0 }
 0x55d   : > { %v5468_v6 = vadd.f32 %v5427_v36, %v5343_v26  ;;  %v4643_v4 = vsel %vm4601_vm12, %v11555_v35, 0.0  ;;  %vm4725_vm13 = vcmp.eq.s32.totalorder %v11556_v17, %v11596_v0  ;;  %v4683_v13 = vadd.f32 %v4642_v1, %v4558_v42  ;;  %v2886_v54 = vpop.f32.mrf.mxu0 }
 0x55e   : > { %v4684_v59 = vadd.f32 %v4643_v4, %v4559_v47  ;;  %vm4726_vm7 = vcmp.eq.s32.totalorder %v11556_v17, %v11597_v50  ;;  %v4767_v8 = vsel %vm4725_vm13, %v11557_v7, 0.0  ;;  %vm4850_vm14 = vcmp.eq.s32.totalorder %v11558_v18, %v11596_v0 }
 0x55f   : > { %v5500_v38 = vpack.c.bf16 %v5468_v6, %v5467_v44  ;;  %v4768_v62 = vsel %vm4726_vm7, %v11557_v7, 0.0  ;;  %vm4851_vm15 = vcmp.eq.s32.totalorder %v11558_v18, %v11597_v50  ;;  %v4808_v16 = vadd.f32 %v4767_v8, %v4683_v13 }
 0x560   : > { %v4809_v24 = vadd.f32 %v4768_v62, %v4684_v59  ;;  %v4892_v60 = vsel %vm4850_vm14, %v11559_v63, 0.0  ;;  %v4893_v53 = vsel %vm4851_vm15, %v11559_v63, 0.0  ;;  %vm4514_vm0 = vcmp.eq.s32.totalorder %v11551_v10, %v11598_v49 }
 0x561   : > { %5549 = vmatpush.bf16.msra.mxu1 %v5500_v38  ;;  %vm4515_vm1 = vcmp.eq.s32.totalorder %v11551_v10, %v11599_v61  ;;  %vm4598_vm2 = vcmp.eq.s32.totalorder %v11554_v11, %v11598_v49  ;;  %vm4599_vm3 = vcmp.eq.s32.totalorder %v11554_v11, %v11599_v61  ;;  %v4933_v0 = vadd.f32 %v4892_v60, %v4808_v16  ;;  %v1815_v28 = vpop.f32.mrf.mxu3 }
 0x562   : > { %v4934_v50 = vadd.f32 %v4893_v53, %v4809_v24  ;;  %v4556_v55 = vsel %vm4514_vm0, %v11553_v29, 0.0  ;;  %v4557_v48 = vsel %vm4515_vm1, %v11553_v29, 0.0  ;;  %v4640_v30 = vsel %vm4598_vm2, %v11555_v35, 0.0 }
 0x563   : > { %v4641_v14 = vsel %vm4599_vm3, %v11555_v35, 0.0  ;;  %vm4723_vm4 = vcmp.eq.s32.totalorder %v11556_v17, %v11598_v49  ;;  %vm4724_vm5 = vcmp.eq.s32.totalorder %v11556_v17, %v11599_v61  ;;  %v4681_v11 = vadd.f32 %v4640_v30, %v4556_v55 }
 0x564   : > { %v4965_v10 = vpack.c.bf16 %v4934_v50, %v4933_v0  ;;  %5550 = vmatmul.bf16.vlgmr.msra.gmra.mxu1 %v10564_v40  ;;  %v4682_v12 = vadd.f32 %v4641_v14, %v4557_v48  ;;  %v4765_v33 = vsel %vm4723_vm4, %v11557_v7, 0.0  ;;  %v4766_v29 = vsel %vm4724_vm5, %v11557_v7, 0.0 }
 0x565   : > { %vm4848_vm8 = vcmp.eq.s32.totalorder %v11558_v18, %v11598_v49  ;;  %vm4849_vm9 = vcmp.eq.s32.totalorder %v11558_v18, %v11599_v61  ;;  %v1759_v35 = vadd.f32 %v11054_v52, %v10987_v39  ;;  %v4806_v17 = vadd.f32 %v4765_v33, %v4681_v11  ;;  %v3396_v49 = vpop.f32.mrf.mxu1  ;;  %v2873_v18 = vpop.f32.mrf.mxu2 }
 0x566   : > { %5012 = vmatpush.bf16.msra.mxu3 %v4965_v10  ;;  %v4807_v15 = vadd.f32 %v4766_v29, %v4682_v12  ;;  %v4890_v40 = vsel %vm4848_vm8, %v11559_v63, 0.0  ;;  %v4891_v21 = vsel %vm4849_vm9, %v11559_v63, 0.0  ;;  %v2336_v7 = vadd.f32 %v11068_v37, %v11066_v46  ;;  %v3420_v37 = vpop.f32.mrf.mxu0 }
 0x567   : > { %v1788_v56 = vadd.f32 %v10698_v57, %v1759_v35  ;;  %v4931_v23 = vadd.f32 %v4890_v40, %v4806_v17  ;;  %v4980_v61 = vunpack.c.h.b16 %v10574_v31 }
 0x568   : > { %v4932_v2 = vadd.f32 %v4891_v21, %v4807_v15  ;;  %v2349_v52 = vadd.f32 %v11077_v51, %v2336_v7 }
 0x569   : > { %v1801_v39 = vadd.f32 %v10847_v25, %v1788_v56  ;;  %v2858_v63 = vpop.f32.mrf.mxu3  ;;  %v4983_v45 = vpack.c.b16 %v4980_v61, %v4980_v61 }
 0x56a   : > { %v4964_v58 = vpack.c.bf16 %v4932_v2, %v4931_v23  ;;  %v2872_v22 = vadd.f32 %v2871_v34, %v2858_v63 }
 0x56b   : > { %v1814_v3 = vadd.f32 %v1813_v41, %v1801_v39 }
 0x56c   : > { %5013 = vmatpush.bf16.msra.mxu3 %v4964_v58  ;;  %v2885_v46 = vadd.f32 %v2884_v27, %v2872_v22 }
 0x56d   : > { %v2352_v57 = vadd.f32 %v2349_v52, %v1814_v3  ;;  %v3943_v19 = vpop.f32.mrf.mxu1  ;;  %v3930_v20 = vpop.f32.mrf.mxu2 }
 0x56e   : > { %v3944_v32 = vadd.f32 %v3943_v19, %v3930_v20  ;;  %v3422_v31 = vpop.f32.mrf.mxu0 }
 0x56f   : > { %5014 = vmatmul.bf16.vlgmr.msra.gmra.mxu3 %v4983_v45  ;;  %v2888_v43 = vadd.f32 %v2885_v46, %v2352_v57 }
 0x571   : > { %v2860_v9 = vpop.f32.mrf.mxu3 }
 0x575   : > { %v3945_v26 = vpop.f32.mrf.mxu1  ;;  %v3932_v25 = vpop.f32.mrf.mxu2 }
 0x576   : > { %v3956_v44 = vpop.f32.mrf.mxu0 }
 0x577   : > { %v3957_v41 = vadd.f32 %v3956_v44, %v3944_v32 }
 0x579   : > { %v3407_v36 = vpop.f32.mrf.mxu3 }
 0x57a   : > { %v3408_v51 = vadd.f32 %v3407_v36, %v11140_v5 }
 0x57c   : > { %v3421_v42 = vadd.f32 %v3420_v37, %v3408_v51 }
 0x57d   : > { %v5002_v47 = vpop.f32.mrf.mxu1  ;;  %v4479_v6 = vpop.f32.mrf.mxu2 }
 0x57e   : > { %v3424_v1 = vadd.f32 %v3421_v42, %v2888_v43  ;;  %v3958_v59 = vpop.f32.mrf.mxu0 }
 0x580   : > { %v3960_v4 = vadd.f32 %v3957_v41, %v3424_v1 }
 0x581   : > { %v3409_v13 = vpop.f32.mrf.mxu3 }
 0x585   : > { %v5004_v8 = vpop.f32.mrf.mxu1  ;;  %v4481_v38 = vpop.f32.mrf.mxu2 }
 0x586   : > { %v4492_v16 = vpop.f32.mrf.mxu0 }
 0x589   : > { %v4466_v62 = vpop.f32.mrf.mxu3 }
 0x58a   : > { %v4480_v27 = vadd.f32 %v4479_v6, %v4466_v62 }
 0x58c   : > { %v4493_v24 = vadd.f32 %v4492_v16, %v4480_v27 }
 0x58e   : > { %v4496_v60 = vadd.f32 %v4493_v24, %v3960_v4  ;;  %v4494_v53 = vpop.f32.mrf.mxu0 }
 0x591   : > { %v4468_v5 = vpop.f32.mrf.mxu3 }
 0x596   : > { %v5028_v34 = vpop.f32.mrf.mxu0 }
 0x59e   : > { %v5030_v0 = vpop.f32.mrf.mxu0 }
 0x5b2   : > { %v5564_v55 = vpop.f32.mrf.mxu0 }
 0x5ba   : > { %v5566_v30 = vpop.f32.mrf.mxu0 }
 0x5be   : > { %v5538_v50 = vpop.f32.mrf.mxu2 }
 0x5c6   : > { %v5540_v48 = vpop.f32.mrf.mxu2 }
 0x5e1   : > { %v5551_v14 = vpop.f32.mrf.mxu1 }
 0x5e2   : > { %v5552_v12 = vadd.f32 %v5551_v14, %v5538_v50 }
 0x5e4   : > { %v5565_v29 = vadd.f32 %v5564_v55, %v5552_v12 }
 0x5e9   : > { %v5553_v10 = vpop.f32.mrf.mxu1 }
 0x5f2   : > { %v5015_v11 = vpop.f32.mrf.mxu3 }
 0x5f3   : > { %v5016_v33 = vadd.f32 %v5015_v11, %v5002_v47 }
 0x5f5   : > { %v5029_v28 = vadd.f32 %v5028_v34, %v5016_v33 }
 0x5f7   : > { %v5032_v35 = vadd.f32 %v5029_v28, %v4496_v60 }
 0x5f9   : > { %v5568_v17 = vadd.f32 %v5565_v29, %v5032_v35 }
 0x5fa   : > { %v5017_v15 = vpop.f32.mrf.mxu3 }
 0x5fb   : > { %5569 = vst [vmem:[%s369_s8] sm:$0xff] %v5568_v17 }
 0x5fc   : > { %5894 = shalt.err (!%p5891_p12)
}
 0x5fd   : > { %5780 = dma.vmem_to_hbm [thread:$0]  (%p6098_p11), %s5586_s10, 128, %s5588_s6, %s5571_s23  }
 0x5fe PF: > { %p5786_p0 = scmp.ge.s32.totalorder %s5977_s27, 2  ;;  %s5599_s30 = sand.u32 1, %s5941_s18  }
 0x5ff   : > { %s5600_s28 = scalar_lea.sflag [#allocation5], %s5599_s30 }
 0x600   : > { %p5783_p1 = pnand %p5786_p0, %p6105_p13 }
 0x602   : > { %p5784_p2 = pneg %p5783_p1 }
 0x604   : > { %5936 = dma.done.wait (%p5784_p2), %s5600_s28, 128  }
 0x605   : > { %5938 = vsyncadd (%p5784_p2), %s5600_s28, 4294967168  ;;  %s18_s27 = sadd.s32 1, %s5977_s27   ;;  %s11600_s15 = sld [smem:[#allocation7_spill]] }
 0x606   : > { %p15_p3 = scmp.ge.s32.totalorder %s18_s27, 6   ;;  %s11601_s12 = sld [smem:[#allocation8_spill]] }
 0x607   : > { %s11602_s18 = smov %s5953_s21  ;;  %s11603_s19 = smov %s5949_s20 }
 0x608   : > { %s11604_s20 = smov %s6085_s11  ;;  %s11605_s21 = smov %s5957_s22 }
 0x609   : > { %s11606_s22 = smov %s6103_s16  ;;  %s11607_s23 = smov %s5969_s25 }
 0x60a   : > { %s11608_s24 = smov %s5973_s26  ;;  %17 = sbr.rel (!%p15_p3) target bundleno = 8 (0x8), region = 167 }
 0x60b   : > { %s11609_s25 = smov %s11600_s15 }
 0x60c   : > { %s11610_s26 = smov %s11601_s12 }
 0x60f   :  { %5606 = vsyncpa [#allocation5], 1 }
 0x610   :  { %5608 = vsyncpa [#allocation5 + $0x1], 1 }

</bundles_post_ra>
